<compile_context>
chip_gen: v7x
topology: tpu7x:2x2x1
jax: 0.10.0
libtpu: 0.0.40
codegen_flags: <defaults>
</compile_context>

<pallas_src>
import functools

import jax
import jax.numpy as jnp
from jax.experimental import pallas as pl
from jax.experimental.pallas import tpu as pltpu


# -----------------------------------------------------------------------------
# Kernel: grid = (batch_tiles, point_chunks).  Encoder runs per point chunk and
# vmax-accumulates into a VMEM scratch; decoder runs on the last chunk.
# -----------------------------------------------------------------------------
def _pointnet_kernel(
    x_ref,                                   # (B_TILE, N_CHUNK, 3)  NWC block
    w1_ref, t1_ref,                          # conv1 (+bn1 folded)
    w2_ref, t2_ref,                          # conv2 (+bn2 folded)
    w3_ref, t3_ref,                          # conv3 (+bn3 folded)
    f1w_ref, t4_ref,                         # fc1   (+bn4 folded)
    f2w_ref, t5_ref,                         # fc2   (+bn5 folded)
    f3w_ref, t6_ref,                         # fc3   (+bn6 folded)
    f4w_ref, f4b_ref,                        # fc4
    out_ref,                                 # (B_TILE, 3*N)  -- resident over point axis
    gmax_ref,                                # (B_TILE, 1024) f32 running-max scratch
):
    p = pl.program_id(1)
    bt, nc, c_in = x_ref.shape

    @pl.when(p == 0)
    def _init():
        gmax_ref[...] = jnp.full(gmax_ref.shape, -jnp.inf, gmax_ref.dtype)

    # --- Encoder over this point chunk: (bt*nc, 3) -> (bt*nc, 1024).
    x = x_ref[...].reshape(bt * nc, c_in)                     # (BT*NC, 3) f32

    # conv1 + bn1 + relu; fuse downcast of the next matmul operand.
    h = jnp.dot(x.astype(w1_ref.dtype), w1_ref[...],
                preferred_element_type=jnp.float32)
    h = jnp.maximum(h + t1_ref[...], 0.0).astype(w2_ref.dtype)   # (BT*NC, 64) bf16

    # conv2 + bn2 + relu.
    h = jnp.dot(h, w2_ref[...], preferred_element_type=jnp.float32)
    h = jnp.maximum(h + t2_ref[...], 0.0).astype(w3_ref.dtype)   # (BT*NC, 128) bf16

    # conv3 WITHOUT bias/relu: hoisted past the max-pool (exact, ReLU monotone).
    s = jnp.dot(h, w3_ref[...], preferred_element_type=jnp.float32)  # (BT*NC, 1024) f32

    # --- Fused global max-pool over the point axis (torch.max(x, 2)).
    chunk_max = jnp.max(s.reshape(bt, nc, -1), axis=1)           # (BT, 1024)
    gmax_ref[...] = jnp.maximum(gmax_ref[...], chunk_max)

    # --- Decoder MLP, only on the last point chunk of this batch tile.
    @pl.when(p == pl.num_programs(1) - 1)
    def _decode():
        def lin_relu(g, w_ref, t_ref):
            y = jnp.dot(g.astype(w_ref.dtype), w_ref[...],
                        preferred_element_type=jnp.float32)
            return jnp.maximum(y + t_ref[...], 0.0)

        # Hoisted conv3 bias + ReLU applied to the pooled features.
        g = jnp.maximum(gmax_ref[...] + t3_ref[...], 0.0)        # (BT, 1024)
        g = lin_relu(g, f1w_ref, t4_ref)                          # (BT, 512)
        g = lin_relu(g, f2w_ref, t5_ref)                          # (BT, 256)
        g = lin_relu(g, f3w_ref, t6_ref)                          # (BT, 512)
        out = jnp.dot(g.astype(f4w_ref.dtype), f4w_ref[...],
                      preferred_element_type=jnp.float32)
        out_ref[...] = (out + f4b_ref[...]).astype(out_ref.dtype)  # (BT, 3*N)


# -----------------------------------------------------------------------------
# Wrapper
# -----------------------------------------------------------------------------
def _param_spec(shape):
    nd = len(shape)
    # Grid-invariant parameter block (same block every grid step).
    return pl.BlockSpec(shape, lambda b, p, _nd=nd: (0,) * _nd)


@functools.partial(jax.jit, static_argnames=("num_points", "b_tile", "n_chunk"))
def pointnet_autoencoder(x_nchw, params, *, num_points, b_tile=8, n_chunk=None):
    """x_nchw: (B, 3, N) float32 -> (B, 3, N) float32."""
    B, C, N = x_nchw.shape
    assert C == 3 and N == num_points
    b_tile = min(b_tile, B)
    assert B % b_tile == 0, "batch must be a multiple of the batch tile"
    if n_chunk is None:
        n_chunk = min(256, N)
    assert N % n_chunk == 0 and (n_chunk % 8 == 0 or n_chunk == N)

    # NCW -> NWC in the wrapper (tiny; removes the in-kernel XLU transpose).
    x_nwc = jnp.transpose(x_nchw, (0, 2, 1))                    # (B, N, 3)

    ordered = [
        params["w1"], params["t1"],
        params["w2"], params["t2"],
        params["w3"], params["t3"],
        params["f1w"], params["t4"],
        params["f2w"], params["t5"],
        params["f3w"], params["t6"],
        params["f4w"], params["f4b"],
    ]

    in_specs = [pl.BlockSpec((b_tile, n_chunk, 3), lambda b, p: (b, p, 0))]
    in_specs += [_param_spec(w.shape) for w in ordered]

    # Advisory cost estimate (cheap; helps XLA overlap the surrounding graph).
    enc_flops = 2 * B * N * (3 * 64 + 64 * 128 + 128 * 1024)
    dec_flops = 2 * B * (1024 * 512 + 512 * 256 + 256 * 512 + 512 * 3 * N)
    param_bytes = sum(int(w.size) * w.dtype.itemsize for w in ordered)
    cost = pl.CostEstimate(
        flops=int(enc_flops + dec_flops),
        transcendentals=0,
        bytes_accessed=int(x_nchw.size * 4 + B * 3 * N * 4 + param_bytes),
    )

    out = pl.pallas_call(
        _pointnet_kernel,
        out_shape=jax.ShapeDtypeStruct((B, 3 * N), jnp.float32),
        grid_spec=pltpu.PrefetchScalarGridSpec(
            num_scalar_prefetch=0,
            grid=(B // b_tile, N // n_chunk),
            in_specs=in_specs,
            out_specs=pl.BlockSpec((b_tile, 3 * N), lambda b, p: (b, 0)),
            scratch_shapes=[pltpu.VMEM((b_tile, 1024), jnp.float32)],
        ),
        compiler_params=pltpu.CompilerParams(
            dimension_semantics=("parallel", "arbitrary"),
            vmem_limit_bytes=32 * 1024 * 1024,
        ),
        cost_estimate=cost,
    )(x_nwc, *ordered)

    return out.reshape(B, 3, N)


# -----------------------------------------------------------------------------
# Deterministic parameter construction (mirrors the torch module's shapes),
# with conv/fc bias and eval-mode BN folded into (weight, shift) pairs.
# -----------------------------------------------------------------------------
def make_params(key, num_points):
    eps = 1e-5

    def nxt():
        nonlocal key
        key, sub = jax.random.split(key)
        return sub

    def dense(cin, cout):
        # weight stored as (in, out) (torch Conv1d/Linear weights transposed)
        w = jax.random.normal(nxt(), (cin, cout), jnp.float32) * 0.05
        b = jax.random.normal(nxt(), (cout,), jnp.float32) * 0.05
        return w, b

    def bn(c):
        gamma = 1.0 + 0.1 * jax.random.normal(nxt(), (c,), jnp.float32)
        beta = 0.1 * jax.random.normal(nxt(), (c,), jnp.float32)
        mean = 0.1 * jax.random.normal(nxt(), (c,), jnp.float32)
        var = 1.0 + 0.1 * jax.random.uniform(nxt(), (c,), jnp.float32)
        scale = gamma / jnp.sqrt(var + eps)
        shift = beta - mean * scale
        return scale, shift

    def folded(cin, cout):
        w, b = dense(cin, cout)
        s, t = bn(cout)
        wf = (w * s[None, :]).astype(jnp.bfloat16)               # fold BN scale into W
        tf = (b * s + t).reshape(1, cout).astype(jnp.float32)    # bias*scale + shift
        return wf, tf

    p = {}
    p["w1"], p["t1"] = folded(3, 64)
    p["w2"], p["t2"] = folded(64, 128)
    p["w3"], p["t3"] = folded(128, 1024)
    p["f1w"], p["t4"] = folded(1024, 512)
    p["f2w"], p["t5"] = folded(512, 256)
    p["f3w"], p["t6"] = folded(256, 512)
    w4, b4 = dense(512, 3 * num_points)
    p["f4w"] = w4.astype(jnp.bfloat16)
    p["f4b"] = b4.reshape(1, 3 * num_points)
    return p


# -----------------------------------------------------------------------------
# Pure-JAX reference (same bf16-operand / f32-accumulate math, but with the
# straightforward bias+relu BEFORE the max-pool -> also validates the hoist).
# -----------------------------------------------------------------------------
def reference_forward(x_nchw, p):
    B, _, N = x_nchw.shape
    x = jnp.transpose(x_nchw, (0, 2, 1)).reshape(B * N, 3)

    def layer(h, w, t):
        y = jnp.dot(h.astype(w.dtype), w, preferred_element_type=jnp.float32)
        return jnp.maximum(y + t, 0.0)

    h = layer(x, p["w1"], p["t1"])
    h = layer(h, p["w2"], p["t2"])
    h = layer(h, p["w3"], p["t3"])                             # bias+relu pre-pool
    g = jnp.max(h.reshape(B, N, -1), axis=1)                   # (B, 1024)
    g = layer(g, p["f1w"], p["t4"])
    g = layer(g, p["f2w"], p["t5"])
    g = layer(g, p["f3w"], p["t6"])
    out = jnp.dot(g.astype(p["f4w"].dtype), p["f4w"],
                  preferred_element_type=jnp.float32) + p["f4b"]
    return out.reshape(B, 3, N)


if __name__ == "__main__":
    B = 16            # 2 parallel batch steps of B_TILE=8 -> both v7x TCs get work
    NUM_POINTS = 256  # small, MXU/VPU-friendly instance of the module
    B_TILE = 8
    N_CHUNK = 128     # 2 point chunks -> exercises the fused max-pool accumulation

    key = jax.random.PRNGKey(0)
    key, xkey, pkey = jax.random.split(key, 3)

    x = jax.random.normal(xkey, (B, 3, NUM_POINTS), jnp.float32)  # NCW like torch
    params = make_params(pkey, NUM_POINTS)

    y = pointnet_autoencoder(x, params, num_points=NUM_POINTS,
                             b_tile=B_TILE, n_chunk=N_CHUNK)
    y = jax.block_until_ready(y)

    y_ref = jax.block_until_ready(reference_forward(x, params))
    assert y.shape == (B, 3, NUM_POINTS), y.shape
    max_err = float(jnp.max(jnp.abs(y - y_ref)))
    assert jnp.allclose(y, y_ref, rtol=1e-2, atol=1e-2), max_err

    print("KERNEL_OK")
</pallas_src>

<mosaic_0001>
module attributes {stable_mosaic.version = 11 : i64} {
  func.func @_pointnet_kernel(%arg0: i32, %arg1: i32, %arg2: memref<8x128x3xf32, #tpu.memory_space<vmem>>, %arg3: memref<3x64xbf16, #tpu.memory_space<vmem>>, %arg4: memref<1x64xf32, #tpu.memory_space<vmem>>, %arg5: memref<64x128xbf16, #tpu.memory_space<vmem>>, %arg6: memref<1x128xf32, #tpu.memory_space<vmem>>, %arg7: memref<128x1024xbf16, #tpu.memory_space<vmem>>, %arg8: memref<1x1024xf32, #tpu.memory_space<vmem>>, %arg9: memref<1024x512xbf16, #tpu.memory_space<vmem>>, %arg10: memref<1x512xf32, #tpu.memory_space<vmem>>, %arg11: memref<512x256xbf16, #tpu.memory_space<vmem>>, %arg12: memref<1x256xf32, #tpu.memory_space<vmem>>, %arg13: memref<256x512xbf16, #tpu.memory_space<vmem>>, %arg14: memref<1x512xf32, #tpu.memory_space<vmem>>, %arg15: memref<512x768xbf16, #tpu.memory_space<vmem>>, %arg16: memref<1x768xf32, #tpu.memory_space<vmem>>, %arg17: memref<8x768xf32, #tpu.memory_space<vmem>>, %arg18: memref<8x1024xf32, #tpu.memory_space<vmem>>) attributes {dimension_semantics = [#tpu.dimension_semantics<parallel>, #tpu.dimension_semantics<arbitrary>], iteration_bounds = array<i64: 2, 2>, scalar_prefetch = 0 : i64, scratch_operands = 1 : i64, tpu.core_type = #tpu.core_type<tc>, window_params = [{transform_indices = @transform_0, window_bounds = array<i64: 8, 128, 3>}, {pipeline_mode = #tpu.pipeline_mode<synchronous>, transform_indices = @transform_1, window_bounds = array<i64: 3, 64>}, {pipeline_mode = #tpu.pipeline_mode<synchronous>, transform_indices = @transform_2, window_bounds = array<i64: 1, 64>}, {pipeline_mode = #tpu.pipeline_mode<synchronous>, transform_indices = @transform_3, window_bounds = array<i64: 64, 128>}, {pipeline_mode = #tpu.pipeline_mode<synchronous>, transform_indices = @transform_4, window_bounds = array<i64: 1, 128>}, {pipeline_mode = #tpu.pipeline_mode<synchronous>, transform_indices = @transform_5, window_bounds = array<i64: 128, 1024>}, {pipeline_mode = #tpu.pipeline_mode<synchronous>, transform_indices = @transform_6, window_bounds = array<i64: 1, 1024>}, {pipeline_mode = #tpu.pipeline_mode<synchronous>, transform_indices = @transform_7, window_bounds = array<i64: 1024, 512>}, {pipeline_mode = #tpu.pipeline_mode<synchronous>, transform_indices = @transform_8, window_bounds = array<i64: 1, 512>}, {pipeline_mode = #tpu.pipeline_mode<synchronous>, transform_indices = @transform_9, window_bounds = array<i64: 512, 256>}, {pipeline_mode = #tpu.pipeline_mode<synchronous>, transform_indices = @transform_10, window_bounds = array<i64: 1, 256>}, {pipeline_mode = #tpu.pipeline_mode<synchronous>, transform_indices = @transform_11, window_bounds = array<i64: 256, 512>}, {pipeline_mode = #tpu.pipeline_mode<synchronous>, transform_indices = @transform_12, window_bounds = array<i64: 1, 512>}, {pipeline_mode = #tpu.pipeline_mode<synchronous>, transform_indices = @transform_13, window_bounds = array<i64: 512, 768>}, {pipeline_mode = #tpu.pipeline_mode<synchronous>, transform_indices = @transform_14, window_bounds = array<i64: 1, 768>}, {transform_indices = @transform_15, window_bounds = array<i64: 8, 768>}]} {
    %c0_i32 = arith.constant 0 : i32
    %0 = arith.cmpi eq, %arg1, %c0_i32 : i32
    %1 = arith.extui %0 : i1 to i32
    %c0_i32_0 = arith.constant 0 : i32
    %2 = arith.cmpi ne, %1, %c0_i32_0 : i32
    scf.if %2 {
      %cst_23 = arith.constant 0xFF800000 : f32
      %32 = vector.broadcast %cst_23 : f32 to vector<8x1024xf32>
      %c0_24 = arith.constant 0 : index
      %c0_25 = arith.constant 0 : index
      %33 = vector.load %arg18[%c0_24, %c0_25] : memref<8x1024xf32, #tpu.memory_space<vmem>>, vector<8x1024xf32>
      tpu.vector_store %arg18[%c0_24, %c0_25], %32 {strides = array<i32>} : memref<8x1024xf32, #tpu.memory_space<vmem>>, vector<8x1024xf32>,
    } else {
    }
    %c0 = arith.constant 0 : index
    %c0_1 = arith.constant 0 : index
    %c0_2 = arith.constant 0 : index
    %3 = vector.load %arg2[%c0, %c0_1, %c0_2] : memref<8x128x3xf32, #tpu.memory_space<vmem>>, vector<8x128x3xf32>
    %4 = vector.shape_cast %3 : vector<8x128x3xf32> to vector<1024x3xf32>
    %5 = arith.truncf %4 : vector<1024x3xf32> to vector<1024x3xbf16>
    %c0_3 = arith.constant 0 : index
    %c0_4 = arith.constant 0 : index
    %6 = vector.load %arg3[%c0_3, %c0_4] : memref<3x64xbf16, #tpu.memory_space<vmem>>, vector<3x64xbf16>
    %cst = arith.constant dense<0.000000e+00> : vector<1024x64xf32>
    %7 = tpu.matmul %5, %6, %cst {dimension_numbers = #tpu.dot_dimension_numbers<[1], [0], [0], [1], [0, 0, 1, 1], [], []>} : vector<1024x3xbf16>, vector<3x64xbf16>, vector<1024x64xf32> -> vector<1024x64xf32>
    %c0_5 = arith.constant 0 : index
    %c0_6 = arith.constant 0 : index
    %8 = vector.load %arg4[%c0_5, %c0_6] : memref<1x64xf32, #tpu.memory_space<vmem>>, vector<1x64xf32>
    %9 = vector.broadcast %8 : vector<1x64xf32> to vector<1024x64xf32>
    %10 = arith.addf %7, %9 : vector<1024x64xf32>
    %cst_7 = arith.constant 0.000000e+00 : f32
    %11 = vector.broadcast %cst_7 : f32 to vector<1024x64xf32>
    %12 = arith.maximumf %10, %11 : vector<1024x64xf32>
    %13 = arith.truncf %12 : vector<1024x64xf32> to vector<1024x64xbf16>
    %c0_8 = arith.constant 0 : index
    %c0_9 = arith.constant 0 : index
    %14 = vector.load %arg5[%c0_8, %c0_9] : memref<64x128xbf16, #tpu.memory_space<vmem>>, vector<64x128xbf16>
    %cst_10 = arith.constant dense<0.000000e+00> : vector<1024x128xf32>
    %15 = tpu.matmul %13, %14, %cst_10 {dimension_numbers = #tpu.dot_dimension_numbers<[1], [0], [0], [1], [0, 0, 1, 1], [], []>} : vector<1024x64xbf16>, vector<64x128xbf16>, vector<1024x128xf32> -> vector<1024x128xf32>
    %c0_11 = arith.constant 0 : index
    %c0_12 = arith.constant 0 : index
    %16 = vector.load %arg6[%c0_11, %c0_12] : memref<1x128xf32, #tpu.memory_space<vmem>>, vector<1x128xf32>
    %17 = vector.broadcast %16 : vector<1x128xf32> to vector<1024x128xf32>
    %18 = arith.addf %15, %17 : vector<1024x128xf32>
    %cst_13 = arith.constant 0.000000e+00 : f32
    %19 = vector.broadcast %cst_13 : f32 to vector<1024x128xf32>
    %20 = arith.maximumf %18, %19 : vector<1024x128xf32>
    %21 = arith.truncf %20 : vector<1024x128xf32> to vector<1024x128xbf16>
    %c0_14 = arith.constant 0 : index
    %c0_15 = arith.constant 0 : index
    %22 = vector.load %arg7[%c0_14, %c0_15] : memref<128x1024xbf16, #tpu.memory_space<vmem>>, vector<128x1024xbf16>
    %cst_16 = arith.constant dense<0.000000e+00> : vector<1024x1024xf32>
    %23 = tpu.matmul %21, %22, %cst_16 {dimension_numbers = #tpu.dot_dimension_numbers<[1], [0], [0], [1], [0, 0, 1, 1], [], []>} : vector<1024x128xbf16>, vector<128x1024xbf16>, vector<1024x1024xf32> -> vector<1024x1024xf32>
    %24 = vector.shape_cast %23 : vector<1024x1024xf32> to vector<8x128x1024xf32>
    %cst_17 = arith.constant dense<0xFF800000> : vector<8x1024xf32>
    %25 = vector.multi_reduction <maximumf>, %24, %cst_17 [1] : vector<8x128x1024xf32> to vector<8x1024xf32>
    %c0_18 = arith.constant 0 : index
    %c0_19 = arith.constant 0 : index
    %26 = vector.load %arg18[%c0_18, %c0_19] : memref<8x1024xf32, #tpu.memory_space<vmem>>, vector<8x1024xf32>
    %27 = arith.maximumf %26, %25 : vector<8x1024xf32>
    %c0_20 = arith.constant 0 : index
    %c0_21 = arith.constant 0 : index
    %28 = vector.load %arg18[%c0_20, %c0_21] : memref<8x1024xf32, #tpu.memory_space<vmem>>, vector<8x1024xf32>
    tpu.vector_store %arg18[%c0_20, %c0_21], %27 {strides = array<i32>} : memref<8x1024xf32, #tpu.memory_space<vmem>>, vector<8x1024xf32>,
    %c1_i32 = arith.constant 1 : i32
    %29 = arith.cmpi eq, %arg1, %c1_i32 : i32
    %30 = arith.extui %29 : i1 to i32
    %c0_i32_22 = arith.constant 0 : i32
    %31 = arith.cmpi ne, %30, %c0_i32_22 : i32
    scf.if %31 {
      %c0_23 = arith.constant 0 : index
      %c0_24 = arith.constant 0 : index
      %32 = vector.load %arg18[%c0_23, %c0_24] : memref<8x1024xf32, #tpu.memory_space<vmem>>, vector<8x1024xf32>
      %c0_25 = arith.constant 0 : index
      %c0_26 = arith.constant 0 : index
      %33 = vector.load %arg8[%c0_25, %c0_26] : memref<1x1024xf32, #tpu.memory_space<vmem>>, vector<1x1024xf32>
      %34 = vector.broadcast %33 : vector<1x1024xf32> to vector<8x1024xf32>
      %35 = arith.addf %32, %34 : vector<8x1024xf32>
      %cst_27 = arith.constant 0.000000e+00 : f32
      %36 = vector.broadcast %cst_27 : f32 to vector<8x1024xf32>
      %37 = arith.maximumf %35, %36 : vector<8x1024xf32>
      %38 = arith.truncf %37 : vector<8x1024xf32> to vector<8x1024xbf16>
      %c0_28 = arith.constant 0 : index
      %c0_29 = arith.constant 0 : index
      %39 = vector.load %arg9[%c0_28, %c0_29] : memref<1024x512xbf16, #tpu.memory_space<vmem>>, vector<1024x512xbf16>
      %cst_30 = arith.constant dense<0.000000e+00> : vector<8x512xf32>
      %40 = tpu.matmul %38, %39, %cst_30 {dimension_numbers = #tpu.dot_dimension_numbers<[1], [0], [0], [1], [0, 0, 1, 1], [], []>} : vector<8x1024xbf16>, vector<1024x512xbf16>, vector<8x512xf32> -> vector<8x512xf32>
      %c0_31 = arith.constant 0 : index
      %c0_32 = arith.constant 0 : index
      %41 = vector.load %arg10[%c0_31, %c0_32] : memref<1x512xf32, #tpu.memory_space<vmem>>, vector<1x512xf32>
      %42 = vector.broadcast %41 : vector<1x512xf32> to vector<8x512xf32>
      %43 = arith.addf %40, %42 : vector<8x512xf32>
      %cst_33 = arith.constant 0.000000e+00 : f32
      %44 = vector.broadcast %cst_33 : f32 to vector<8x512xf32>
      %45 = arith.maximumf %43, %44 : vector<8x512xf32>
      %46 = arith.truncf %45 : vector<8x512xf32> to vector<8x512xbf16>
      %c0_34 = arith.constant 0 : index
      %c0_35 = arith.constant 0 : index
      %47 = vector.load %arg11[%c0_34, %c0_35] : memref<512x256xbf16, #tpu.memory_space<vmem>>, vector<512x256xbf16>
      %cst_36 = arith.constant dense<0.000000e+00> : vector<8x256xf32>
      %48 = tpu.matmul %46, %47, %cst_36 {dimension_numbers = #tpu.dot_dimension_numbers<[1], [0], [0], [1], [0, 0, 1, 1], [], []>} : vector<8x512xbf16>, vector<512x256xbf16>, vector<8x256xf32> -> vector<8x256xf32>
      %c0_37 = arith.constant 0 : index
      %c0_38 = arith.constant 0 : index
      %49 = vector.load %arg12[%c0_37, %c0_38] : memref<1x256xf32, #tpu.memory_space<vmem>>, vector<1x256xf32>
      %50 = vector.broadcast %49 : vector<1x256xf32> to vector<8x256xf32>
      %51 = arith.addf %48, %50 : vector<8x256xf32>
      %cst_39 = arith.constant 0.000000e+00 : f32
      %52 = vector.broadcast %cst_39 : f32 to vector<8x256xf32>
      %53 = arith.maximumf %51, %52 : vector<8x256xf32>
      %54 = arith.truncf %53 : vector<8x256xf32> to vector<8x256xbf16>
      %c0_40 = arith.constant 0 : index
      %c0_41 = arith.constant 0 : index
      %55 = vector.load %arg13[%c0_40, %c0_41] : memref<256x512xbf16, #tpu.memory_space<vmem>>, vector<256x512xbf16>
      %cst_42 = arith.constant dense<0.000000e+00> : vector<8x512xf32>
      %56 = tpu.matmul %54, %55, %cst_42 {dimension_numbers = #tpu.dot_dimension_numbers<[1], [0], [0], [1], [0, 0, 1, 1], [], []>} : vector<8x256xbf16>, vector<256x512xbf16>, vector<8x512xf32> -> vector<8x512xf32>
      %c0_43 = arith.constant 0 : index
      %c0_44 = arith.constant 0 : index
      %57 = vector.load %arg14[%c0_43, %c0_44] : memref<1x512xf32, #tpu.memory_space<vmem>>, vector<1x512xf32>
      %58 = vector.broadcast %57 : vector<1x512xf32> to vector<8x512xf32>
      %59 = arith.addf %56, %58 : vector<8x512xf32>
      %cst_45 = arith.constant 0.000000e+00 : f32
      %60 = vector.broadcast %cst_45 : f32 to vector<8x512xf32>
      %61 = arith.maximumf %59, %60 : vector<8x512xf32>
      %62 = arith.truncf %61 : vector<8x512xf32> to vector<8x512xbf16>
      %c0_46 = arith.constant 0 : index
      %c0_47 = arith.constant 0 : index
      %63 = vector.load %arg15[%c0_46, %c0_47] : memref<512x768xbf16, #tpu.memory_space<vmem>>, vector<512x768xbf16>
      %cst_48 = arith.constant dense<0.000000e+00> : vector<8x768xf32>
      %64 = tpu.matmul %62, %63, %cst_48 {dimension_numbers = #tpu.dot_dimension_numbers<[1], [0], [0], [1], [0, 0, 1, 1], [], []>} : vector<8x512xbf16>, vector<512x768xbf16>, vector<8x768xf32> -> vector<8x768xf32>
      %c0_49 = arith.constant 0 : index
      %c0_50 = arith.constant 0 : index
      %65 = vector.load %arg16[%c0_49, %c0_50] : memref<1x768xf32, #tpu.memory_space<vmem>>, vector<1x768xf32>
      %66 = vector.broadcast %65 : vector<1x768xf32> to vector<8x768xf32>
      %67 = arith.addf %64, %66 : vector<8x768xf32>
      %c0_51 = arith.constant 0 : index
      %c0_52 = arith.constant 0 : index
      %68 = vector.load %arg17[%c0_51, %c0_52] : memref<8x768xf32, #tpu.memory_space<vmem>>, vector<8x768xf32>
      tpu.vector_store %arg17[%c0_51, %c0_52], %67 {strides = array<i32>} : memref<8x768xf32, #tpu.memory_space<vmem>>, vector<8x768xf32>,
    } else {
    }
    return
  }
  func.func @transform_0(%arg0: i32, %arg1: i32) -> (i32, i32, i32) {
    %c0_i32 = arith.constant 0 : i32
    %c0_i32_0 = arith.constant 0 : i32
    return %arg0, %arg1, %c0_i32 : i32, i32, i32
  }
  func.func @transform_1(%arg0: i32, %arg1: i32) -> (i32, i32) {
    %c0_i32 = arith.constant 0 : i32
    %c0_i32_0 = arith.constant 0 : i32
    %c0_i32_1 = arith.constant 0 : i32
    return %c0_i32, %c0_i32_0 : i32, i32
  }
  func.func @transform_2(%arg0: i32, %arg1: i32) -> (i32, i32) {
    %c0_i32 = arith.constant 0 : i32
    %c0_i32_0 = arith.constant 0 : i32
    %c0_i32_1 = arith.constant 0 : i32
    return %c0_i32, %c0_i32_0 : i32, i32
  }
  func.func @transform_3(%arg0: i32, %arg1: i32) -> (i32, i32) {
    %c0_i32 = arith.constant 0 : i32
    %c0_i32_0 = arith.constant 0 : i32
    %c0_i32_1 = arith.constant 0 : i32
    return %c0_i32, %c0_i32_0 : i32, i32
  }
  func.func @transform_4(%arg0: i32, %arg1: i32) -> (i32, i32) {
    %c0_i32 = arith.constant 0 : i32
    %c0_i32_0 = arith.constant 0 : i32
    %c0_i32_1 = arith.constant 0 : i32
    return %c0_i32, %c0_i32_0 : i32, i32
  }
  func.func @transform_5(%arg0: i32, %arg1: i32) -> (i32, i32) {
    %c0_i32 = arith.constant 0 : i32
    %c0_i32_0 = arith.constant 0 : i32
    %c0_i32_1 = arith.constant 0 : i32
    return %c0_i32, %c0_i32_0 : i32, i32
  }
  func.func @transform_6(%arg0: i32, %arg1: i32) -> (i32, i32) {
    %c0_i32 = arith.constant 0 : i32
    %c0_i32_0 = arith.constant 0 : i32
    %c0_i32_1 = arith.constant 0 : i32
    return %c0_i32, %c0_i32_0 : i32, i32
  }
  func.func @transform_7(%arg0: i32, %arg1: i32) -> (i32, i32) {
    %c0_i32 = arith.constant 0 : i32
    %c0_i32_0 = arith.constant 0 : i32
    %c0_i32_1 = arith.constant 0 : i32
    return %c0_i32, %c0_i32_0 : i32, i32
  }
  func.func @transform_8(%arg0: i32, %arg1: i32) -> (i32, i32) {
    %c0_i32 = arith.constant 0 : i32
    %c0_i32_0 = arith.constant 0 : i32
    %c0_i32_1 = arith.constant 0 : i32
    return %c0_i32, %c0_i32_0 : i32, i32
  }
  func.func @transform_9(%arg0: i32, %arg1: i32) -> (i32, i32) {
    %c0_i32 = arith.constant 0 : i32
    %c0_i32_0 = arith.constant 0 : i32
    %c0_i32_1 = arith.constant 0 : i32
    return %c0_i32, %c0_i32_0 : i32, i32
  }
  func.func @transform_10(%arg0: i32, %arg1: i32) -> (i32, i32) {
    %c0_i32 = arith.constant 0 : i32
    %c0_i32_0 = arith.constant 0 : i32
    %c0_i32_1 = arith.constant 0 : i32
    return %c0_i32, %c0_i32_0 : i32, i32
  }
  func.func @transform_11(%arg0: i32, %arg1: i32) -> (i32, i32) {
    %c0_i32 = arith.constant 0 : i32
    %c0_i32_0 = arith.constant 0 : i32
    %c0_i32_1 = arith.constant 0 : i32
    return %c0_i32, %c0_i32_0 : i32, i32
  }
  func.func @transform_12(%arg0: i32, %arg1: i32) -> (i32, i32) {
    %c0_i32 = arith.constant 0 : i32
    %c0_i32_0 = arith.constant 0 : i32
    %c0_i32_1 = arith.constant 0 : i32
    return %c0_i32, %c0_i32_0 : i32, i32
  }
  func.func @transform_13(%arg0: i32, %arg1: i32) -> (i32, i32) {
    %c0_i32 = arith.constant 0 : i32
    %c0_i32_0 = arith.constant 0 : i32
    %c0_i32_1 = arith.constant 0 : i32
    return %c0_i32, %c0_i32_0 : i32, i32
  }
  func.func @transform_14(%arg0: i32, %arg1: i32) -> (i32, i32) {
    %c0_i32 = arith.constant 0 : i32
    %c0_i32_0 = arith.constant 0 : i32
    %c0_i32_1 = arith.constant 0 : i32
    return %c0_i32, %c0_i32_0 : i32, i32
  }
  func.func @transform_15(%arg0: i32, %arg1: i32) -> (i32, i32) {
    %c0_i32 = arith.constant 0 : i32
    %c0_i32_0 = arith.constant 0 : i32
    return %arg0, %c0_i32 : i32, i32
  }
}

</mosaic_0001>

<bundles_post_ra>
// kernel: pointnet_autoencoder.1
= control target key start
LH: loop header
LB: loop body
LE: loop exit
PB: predicated region body
PF: predicated region fallthrough
CT: control target
= control target key end

     0   :  { %s18240_s0 = inlined_call_operand.vmem [shape: f32[16,256,3], index: 0, kind: input, shape index: {}]   ;;  %s18241_s1 = inlined_call_operand.vmem [shape: bf16[3,64], index: 1, kind: input, shape index: {}]   ;;  %s18242_s2 = inlined_call_operand.vmem [shape: f32[1,64], index: 2, kind: input, shape index: {}]   ;;  %s18243_s3 = inlined_call_operand.vmem [shape: bf16[64,128], index: 3, kind: input, shape index: {}]   ;;  %s18244_s4 = inlined_call_operand.vmem [shape: f32[1,128], index: 4, kind: input, shape index: {}]   ;;  %s18245_s5 = inlined_call_operand.vmem [shape: bf16[128,1024], index: 5, kind: input, shape index: {}]   ;;  %s18246_s6 = inlined_call_operand.vmem [shape: f32[1,1024], index: 6, kind: input, shape index: {}]   ;;  %s18247_s7 = inlined_call_operand.vmem [shape: bf16[1024,512], index: 7, kind: input, shape index: {}]   ;;  %s18248_s8 = inlined_call_operand.vmem [shape: f32[1,512], index: 8, kind: input, shape index: {}]   ;;  %s18249_s9 = inlined_call_operand.hbm [shape: bf16[512,256], index: 9, kind: input, shape index: {}]   ;;  %s18250_s10 = inlined_call_operand.vmem [shape: f32[1,256], index: 10, kind: input, shape index: {}]   ;;  %s18251_s11 = inlined_call_operand.hbm [shape: bf16[256,512], index: 11, kind: input, shape index: {}]   ;;  %s18252_s12 = inlined_call_operand.vmem [shape: f32[1,512], index: 12, kind: input, shape index: {}]   ;;  %s18253_s13 = inlined_call_operand.vmem [shape: bf16[512,768], index: 13, kind: input, shape index: {}]   ;;  %s18254_s14 = inlined_call_operand.vmem [shape: f32[1,768], index: 14, kind: input, shape index: {}]   ;;  %s18255_s15 = inlined_call_operand.vmem [shape: f32[16,768], index: 15, kind: output, shape index: {}]  }
   0x1   :  { %18332 = sst [smem:[#allocation45_spill]] %s18242_s2 }
   0x2   :  { %18333 = sst [smem:[#allocation46_spill]] %s18244_s4 }
   0x3   :  { %18334 = sst [smem:[#allocation47_spill]] %s18245_s5 }
   0x4   :  { %18335 = sst [smem:[#allocation48_spill]] %s18246_s6 }
   0x5   :  { %18336 = sst [smem:[#allocation49_spill]] %s18247_s7 }
   0x6   :  { %18337 = sst [smem:[#allocation50_spill]] %s18248_s8 }
   0x7   :  { %18338 = sst [smem:[#allocation51_spill]] %s18250_s10 }
   0x8   :  { %18339 = sst [smem:[#allocation52_spill]] %s18252_s12 }
   0x9   :  { %18340 = sst [smem:[#allocation53_spill]] %s18253_s13 }
   0xa   :  { %18341 = sst [smem:[#allocation54_spill]] %s18254_s14 }
   0xb   :  { %20 = vsyncpa [#allocation5], 0 }
   0xc   :  { %21 = vsyncpa [#allocation7], 0  ;;  %s14677_s18 = smov 0   ;;  %s14679_s19 = smov 0  }
   0xd   :  { %s14681_s20 = smov 0   ;;  %s14683_s21 = smov 0  }
   0xe   :  { %s14685_s22 = smov 0   ;;  %s14687_s23 = smov 0  }
   0xf   :  { %s14689_s24 = smov 0  }
  0x10 LB: > { %s12269_s25 = sadd.s32 4294967295, %s14586_s24   ;;  %s36_s26 = sadd.s32 1, %s14578_s22  ;;  %s14586_s24 = sphi %s14689_s24, %s27_s24   ;;  %s14582_s23 = sphi %s14687_s23, %s18437_s23   ;;  %s14578_s22 = sphi %s14685_s22, %s18436_s22   ;;  %s14574_s21 = sphi %s14683_s21, %s18435_s21   ;;  %s14570_s20 = sphi %s14681_s20, %s18434_s20   ;;  %s14566_s19 = sphi %s14679_s19, %s18433_s19   ;;  %s14562_s18 = sphi %s14677_s18, %s18432_s18  }
  0x11   : > { %p37_p0 = scmp.ge.s32.totalorder %s36_s26, 2  ;;  %s39_s27 = sadd.s32 1, %s14582_s23 }
  0x12   : > { %s48_s28 = sadd.s32 1, %s14566_s19  ;;  %p55_p1 = scmp.ne.s32.totalorder %s14566_s19, %s14562_s18 }
  0x13   : > { %s18439_s26 = smov (%p37_p0, %s36_s26), 0  ;;  %s18441_s27 = smov (!%p37_p0, %s39_s27), %s14582_s23 }
  0x14   : > { %18342 = sst [smem:[#allocation10_spill]] %s18439_s26  ;;  %s44_s29 = ssub.s32 %s14578_s22, %s18439_s26 }
  0x15   : > { %p56_p2 = scmp.eq.s32.totalorder %s14586_s24, 0  ;;  %p41_p3 = scmp.ge.s32.totalorder %s18441_s27, 2 }
  0x16   : > { %p12271_p4 = scmp.ge.s32.totalorder %s14586_s24, 1  ;;  %p392_p6 = scmp.lt.s32.totalorder %s14586_s24, 5 }
  0x17   : > { %p14725_p5 = por %p56_p2, %p55_p1  ;;  %s18443_s27 = smov (%p41_p3, %s18441_s27), 0 }
  0x18   : > { %18344 = sst [smem:[#allocation11_spill]] %s18443_s27  ;;  %p14732_p7 = pnand %p12271_p4, %p392_p6 }
  0x19   : > { %s18343_s30 = scalar_select %p14725_p5, 1, 0 }
  0x1a   : > { %s18345_s16 = scalar_select %p14732_p7, 1, 0 }
  0x1b   : > { %s43_s17 = ssub.s32 %s14582_s23, %s18443_s27  ;;  %p14738_p8 = scmp.eq.s32.totalorder %s12269_s25, 0 }
  0x1c   : > { %s45_s14 = sor.u32 %s44_s29, %s43_s17  ;;  %p13522_p9 = pneg %p14732_p7 }
  0x1d   : > { %s18346_s26 = scalar_select %p14738_p8, 1, 0 }
  0x1e   : > { %p46_p10 = scmp.eq.s32.totalorder %s45_s14, 0  ;;  %s14588_s12 = smov [#allocation4]  }
  0x1f   : > { %s428_s10 = sshll.u32 %s14588_s12, 4  ;;  %p14746_p11 = pnand %p14738_p8, %p13522_p9  ;;  %s429_s10 = int_to_ptr.vmem [resolvable:$true] %s428_s10 }
  0x20   : > { %s14751_s8 = scalar_select %p46_p10, %s14566_s19, %s48_s28  }
  0x21   : > { %s14468_s6 = scalar_lea.hbm %s18249_s9, 8192  ;;  %p14470_p13 = pneg %p14746_p11 }
  0x22   : > { %18348 = sst [smem:[#allocation12_spill]] %s14751_s8  ;;  %p14469_p12 = scmp.ne.s32.totalorder %s18249_s9, %s14468_s6 }
  0x23   : > { %p14475_p2 = scmp.lt.u32.totalorder %s14468_s6, %s18249_s9 }
  0x24   : > { %p14471_p0 = pnand %p14470_p13, %p14469_p12 }
  0x26   : > { %p14472_p1 = pneg %p14471_p0 }
  0x28   : > { %p14477_p3 = pnand %p14475_p2, %p14472_p1 }
  0x2a   : > { %14480 = shalt.err (!%p14477_p3)
}
  0x2b   : > { %s14481_s28 = scalar_lea.vmem %s429_s10, 8192  ;;  %p14489_p10 = scmp.lt.s32.totalorder %s429_s10, %s429_s10 }
  0x2c   : > { %p14482_p4 = scmp.ne.s32.totalorder %s429_s10, %s14481_s28  ;;  %p14490_p8 = scmp.lt.s32.totalorder %s14481_s28, %s14481_s28 }
  0x2e   : > { %p14484_p6 = pnand %p14482_p4, %p14470_p13  ;;  %p14491_p7 = por %p14490_p8, %p14489_p10 }
  0x30   : > { %p14485_p9 = pneg %p14484_p6 }
  0x32   : > { %p14492_p5 = pnand %p14491_p7, %p14485_p9 }
  0x34   : > { %14495 = shalt.err (!%p14492_p5)
}
  0x35   : > { %s14589_s27 = smov 128   ;;  %s14590_s25 = smov 8  }
  0x36   : > { %13525 = dma.hbm_to_vmem [thread:$0]  (!%p14746_p11), %s18249_s9, 8192, %s429_s10, [#allocation5], %s14589_s27, %s14589_s27, %s14590_s25  }
  0x37   : > { %s14591_s17 = smov [#allocation6]   ;;  %s14496_s7 = scalar_lea.hbm %s18251_s11, 8192 }
  0x38   : > { %s444_s12 = sshll.u32 %s14591_s17, 4  ;;  %p14497_p5 = scmp.ne.s32.totalorder %s18251_s11, %s14496_s7  ;;  %s445_s12 = int_to_ptr.vmem [resolvable:$true] %s444_s12 }
  0x39   : > { %p14503_p12 = scmp.lt.u32.totalorder %s14496_s7, %s18251_s11 }
  0x3a   : > { %p14499_p7 = pnand %p14497_p5, %p14470_p13 }
  0x3c   : > { %p14500_p8 = pneg %p14499_p7 }
  0x3e   : > { %p14505_p0 = pnand %p14503_p12, %p14500_p8 }
  0x40   : > { %14508 = shalt.err (!%p14505_p0)
}
  0x41   : > { %s14509_s10 = scalar_lea.vmem %s445_s12, 8192  ;;  %p14517_p4 = scmp.lt.s32.totalorder %s445_s12, %s445_s12 }
  0x42   : > { %p14510_p1 = scmp.ne.s32.totalorder %s445_s12, %s14509_s10  ;;  %p14518_p6 = scmp.lt.s32.totalorder %s14509_s10, %s14509_s10 }
  0x44   : > { %p14512_p2 = pnand %p14510_p1, %p14470_p13  ;;  %p14519_p9 = por %p14518_p6, %p14517_p4 }
  0x46   : > { %p14513_p3 = pneg %p14512_p2 }
  0x48   : > { %p14520_p10 = pnand %p14519_p9, %p14513_p3 }
  0x4a   : > { %14523 = shalt.err (!%p14520_p10)
}
  0x4b   : > { %s14592_s4 = smov 256   ;;  %s14593_s8 = smov 16  }
  0x4c   : > { %13528 = dma.hbm_to_vmem [thread:$0]  (!%p14746_p11), %s18251_s11, 8192, %s445_s12, [#allocation7], %s14592_s4, %s14592_s4, %s14593_s8  }
  0x4d   : > { %p12274_p5 = scmp.ge.s32.totalorder %s14586_s24, 4 }
  0x4e   : > { %p18349_p7 = scmp.ne.s32.totalorder (!%p12274_p5), %s18343_s30, 0 }
  0x4f   : > { %463 = sbr.rel (%p12274_p5) target bundleno = 157 (0x9d), region = 72 }
  0x56   : > { %466 = sbr.rel (!%p18349_p7) target bundleno = 157 (0x9d), region = 76  ;;  %s468_s7 = sand.u32 (%p18349_p7), 1, %s14566_s19  }
  0x57   : > { %s12277_s27 = sshll.u32 (%p18349_p7), %s14578_s22, 4  ;;  %s12275_s25 = sshll.u32 (%p18349_p7), %s468_s7, 10 }
  0x58   : > { %s13063_s6 = sshll.u32 (%p18349_p7), %s14582_s23, 8  ;;  %s14809_s30 = scalar_lea.vmem (%p18349_p7), [#allocation3], %s12275_s25 }
  0x59   : > { %s474_s29 = sadd.s32 (%p18349_p7), %s13063_s6, %s12277_s27 }
  0x5a   : > { %s12279_s17 = sshll.u32 (%p18349_p7), %s474_s29, 3 }
  0x5b   : > { %s14804_s28 = scalar_lea.vmem (%p18349_p7), %s18240_s0, %s12279_s17 }
  0x5c   : > { %v758_v0 = vld [vmem:[%s14804_s28] sm:$0xff] (%p18349_p7)  ;;  %v760_v1 = vld [vmem:[%s14804_s28 + $0x8] sm:$0xff] (%p18349_p7)  ;;  %v762_v2 = vld [vmem:[%s14804_s28 + $0x10] sm:$0xff] (%p18349_p7) }
  0x5d   : > { %759 = vst [vmem:[%s14809_s30] sm:$0xff] %v758_v0  ;;  %761 = vst [vmem:[%s14809_s30 + $0x8] sm:$0xff] %v760_v1  ;;  %v764_v3 = vld [vmem:[%s14804_s28 + $0x18] sm:$0xff]  ;;  %v766_v4 = vld [vmem:[%s14804_s28 + $0x20] sm:$0xff] }
  0x5e   : > { %763 = vst [vmem:[%s14809_s30 + $0x10] sm:$0xff] %v762_v2  ;;  %v768_v5 = vld [vmem:[%s14804_s28 + $0x28] sm:$0xff]  ;;  %765 = vst [vmem:[%s14809_s30 + $0x18] sm:$0xff] %v764_v3  ;;  %v770_v6 = vld [vmem:[%s14804_s28 + $0x30] sm:$0xff] }
  0x5f   : > { %767 = vst [vmem:[%s14809_s30 + $0x20] sm:$0xff] %v766_v4  ;;  %769 = vst [vmem:[%s14809_s30 + $0x28] sm:$0xff] %v768_v5  ;;  %v772_v7 = vld [vmem:[%s14804_s28 + $0x38] sm:$0xff]  ;;  %v774_v8 = vld [vmem:[%s14804_s28 + $0x40] sm:$0xff] }
  0x60   : > { %771 = vst [vmem:[%s14809_s30 + $0x30] sm:$0xff] %v770_v6  ;;  %773 = vst [vmem:[%s14809_s30 + $0x38] sm:$0xff] %v772_v7  ;;  %v776_v9 = vld [vmem:[%s14804_s28 + $0x48] sm:$0xff]  ;;  %v778_v10 = vld [vmem:[%s14804_s28 + $0x50] sm:$0xff] }
  0x61   : > { %775 = vst [vmem:[%s14809_s30 + $0x40] sm:$0xff] %v774_v8  ;;  %v780_v11 = vld [vmem:[%s14804_s28 + $0x58] sm:$0xff]  ;;  %777 = vst [vmem:[%s14809_s30 + $0x48] sm:$0xff] %v776_v9  ;;  %v782_v12 = vld [vmem:[%s14804_s28 + $0x60] sm:$0xff] }
  0x62   : > { %779 = vst [vmem:[%s14809_s30 + $0x50] sm:$0xff] %v778_v10  ;;  %781 = vst [vmem:[%s14809_s30 + $0x58] sm:$0xff] %v780_v11  ;;  %v784_v13 = vld [vmem:[%s14804_s28 + $0x68] sm:$0xff]  ;;  %v786_v14 = vld [vmem:[%s14804_s28 + $0x70] sm:$0xff] }
  0x63   : > { %783 = vst [vmem:[%s14809_s30 + $0x60] sm:$0xff] %v782_v12  ;;  %785 = vst [vmem:[%s14809_s30 + $0x68] sm:$0xff] %v784_v13  ;;  %v788_v15 = vld [vmem:[%s14804_s28 + $0x78] sm:$0xff]  ;;  %v790_v16 = vld [vmem:[%s14804_s28 + $0x100] sm:$0xff] }
  0x64   : > { %787 = vst [vmem:[%s14809_s30 + $0x70] sm:$0xff] %v786_v14  ;;  %v792_v17 = vld [vmem:[%s14804_s28 + $0x108] sm:$0xff]  ;;  %789 = vst [vmem:[%s14809_s30 + $0x78] sm:$0xff] %v788_v15  ;;  %v794_v18 = vld [vmem:[%s14804_s28 + $0x110] sm:$0xff] }
  0x65   : > { %791 = vst [vmem:[%s14809_s30 + $0x80] sm:$0xff] %v790_v16  ;;  %793 = vst [vmem:[%s14809_s30 + $0x88] sm:$0xff] %v792_v17  ;;  %v796_v19 = vld [vmem:[%s14804_s28 + $0x118] sm:$0xff]  ;;  %v798_v20 = vld [vmem:[%s14804_s28 + $0x120] sm:$0xff] }
  0x66   : > { %795 = vst [vmem:[%s14809_s30 + $0x90] sm:$0xff] %v794_v18  ;;  %797 = vst [vmem:[%s14809_s30 + $0x98] sm:$0xff] %v796_v19  ;;  %v800_v21 = vld [vmem:[%s14804_s28 + $0x128] sm:$0xff]  ;;  %v802_v22 = vld [vmem:[%s14804_s28 + $0x130] sm:$0xff] }
  0x67   : > { %799 = vst [vmem:[%s14809_s30 + $0xa0] sm:$0xff] %v798_v20  ;;  %v804_v23 = vld [vmem:[%s14804_s28 + $0x138] sm:$0xff]  ;;  %801 = vst [vmem:[%s14809_s30 + $0xa8] sm:$0xff] %v800_v21  ;;  %v806_v24 = vld [vmem:[%s14804_s28 + $0x140] sm:$0xff] }
  0x68   : > { %803 = vst [vmem:[%s14809_s30 + $0xb0] sm:$0xff] %v802_v22  ;;  %805 = vst [vmem:[%s14809_s30 + $0xb8] sm:$0xff] %v804_v23  ;;  %v808_v25 = vld [vmem:[%s14804_s28 + $0x148] sm:$0xff]  ;;  %v810_v26 = vld [vmem:[%s14804_s28 + $0x150] sm:$0xff] }
  0x69   : > { %807 = vst [vmem:[%s14809_s30 + $0xc0] sm:$0xff] %v806_v24  ;;  %809 = vst [vmem:[%s14809_s30 + $0xc8] sm:$0xff] %v808_v25  ;;  %v812_v27 = vld [vmem:[%s14804_s28 + $0x158] sm:$0xff]  ;;  %v814_v28 = vld [vmem:[%s14804_s28 + $0x160] sm:$0xff] }
  0x6a   : > { %811 = vst [vmem:[%s14809_s30 + $0xd0] sm:$0xff] %v810_v26  ;;  %v816_v29 = vld [vmem:[%s14804_s28 + $0x168] sm:$0xff]  ;;  %813 = vst [vmem:[%s14809_s30 + $0xd8] sm:$0xff] %v812_v27  ;;  %v818_v30 = vld [vmem:[%s14804_s28 + $0x170] sm:$0xff] }
  0x6b   : > { %815 = vst [vmem:[%s14809_s30 + $0xe0] sm:$0xff] %v814_v28  ;;  %817 = vst [vmem:[%s14809_s30 + $0xe8] sm:$0xff] %v816_v29  ;;  %v820_v31 = vld [vmem:[%s14804_s28 + $0x178] sm:$0xff]  ;;  %v822_v32 = vld [vmem:[%s14804_s28 + $0x200] sm:$0xff] }
  0x6c   : > { %819 = vst [vmem:[%s14809_s30 + $0xf0] sm:$0xff] %v818_v30  ;;  %821 = vst [vmem:[%s14809_s30 + $0xf8] sm:$0xff] %v820_v31  ;;  %v824_v33 = vld [vmem:[%s14804_s28 + $0x208] sm:$0xff]  ;;  %v826_v34 = vld [vmem:[%s14804_s28 + $0x210] sm:$0xff] }
  0x6d   : > { %823 = vst [vmem:[%s14809_s30 + $0x100] sm:$0xff] %v822_v32  ;;  %v828_v35 = vld [vmem:[%s14804_s28 + $0x218] sm:$0xff]  ;;  %825 = vst [vmem:[%s14809_s30 + $0x108] sm:$0xff] %v824_v33  ;;  %v830_v36 = vld [vmem:[%s14804_s28 + $0x220] sm:$0xff] }
  0x6e   : > { %827 = vst [vmem:[%s14809_s30 + $0x110] sm:$0xff] %v826_v34  ;;  %829 = vst [vmem:[%s14809_s30 + $0x118] sm:$0xff] %v828_v35  ;;  %v832_v37 = vld [vmem:[%s14804_s28 + $0x228] sm:$0xff]  ;;  %v834_v38 = vld [vmem:[%s14804_s28 + $0x230] sm:$0xff] }
  0x6f   : > { %831 = vst [vmem:[%s14809_s30 + $0x120] sm:$0xff] %v830_v36  ;;  %833 = vst [vmem:[%s14809_s30 + $0x128] sm:$0xff] %v832_v37  ;;  %v836_v39 = vld [vmem:[%s14804_s28 + $0x238] sm:$0xff]  ;;  %v838_v40 = vld [vmem:[%s14804_s28 + $0x240] sm:$0xff] }
  0x70   : > { %835 = vst [vmem:[%s14809_s30 + $0x130] sm:$0xff] %v834_v38  ;;  %v840_v41 = vld [vmem:[%s14804_s28 + $0x248] sm:$0xff]  ;;  %837 = vst [vmem:[%s14809_s30 + $0x138] sm:$0xff] %v836_v39  ;;  %v842_v42 = vld [vmem:[%s14804_s28 + $0x250] sm:$0xff] }
  0x71   : > { %839 = vst [vmem:[%s14809_s30 + $0x140] sm:$0xff] %v838_v40  ;;  %841 = vst [vmem:[%s14809_s30 + $0x148] sm:$0xff] %v840_v41  ;;  %v844_v43 = vld [vmem:[%s14804_s28 + $0x258] sm:$0xff]  ;;  %v846_v44 = vld [vmem:[%s14804_s28 + $0x260] sm:$0xff] }
  0x72   : > { %843 = vst [vmem:[%s14809_s30 + $0x150] sm:$0xff] %v842_v42  ;;  %845 = vst [vmem:[%s14809_s30 + $0x158] sm:$0xff] %v844_v43  ;;  %v848_v45 = vld [vmem:[%s14804_s28 + $0x268] sm:$0xff]  ;;  %v850_v46 = vld [vmem:[%s14804_s28 + $0x270] sm:$0xff] }
  0x73   : > { %847 = vst [vmem:[%s14809_s30 + $0x160] sm:$0xff] %v846_v44  ;;  %v852_v47 = vld [vmem:[%s14804_s28 + $0x278] sm:$0xff]  ;;  %849 = vst [vmem:[%s14809_s30 + $0x168] sm:$0xff] %v848_v45  ;;  %v854_v48 = vld [vmem:[%s14804_s28 + $0x300] sm:$0xff] }
  0x74   : > { %851 = vst [vmem:[%s14809_s30 + $0x170] sm:$0xff] %v850_v46  ;;  %853 = vst [vmem:[%s14809_s30 + $0x178] sm:$0xff] %v852_v47  ;;  %v856_v49 = vld [vmem:[%s14804_s28 + $0x308] sm:$0xff]  ;;  %v858_v50 = vld [vmem:[%s14804_s28 + $0x310] sm:$0xff] }
  0x75   : > { %855 = vst [vmem:[%s14809_s30 + $0x180] sm:$0xff] %v854_v48  ;;  %857 = vst [vmem:[%s14809_s30 + $0x188] sm:$0xff] %v856_v49  ;;  %v860_v51 = vld [vmem:[%s14804_s28 + $0x318] sm:$0xff]  ;;  %v862_v52 = vld [vmem:[%s14804_s28 + $0x320] sm:$0xff] }
  0x76   : > { %859 = vst [vmem:[%s14809_s30 + $0x190] sm:$0xff] %v858_v50  ;;  %v864_v53 = vld [vmem:[%s14804_s28 + $0x328] sm:$0xff]  ;;  %861 = vst [vmem:[%s14809_s30 + $0x198] sm:$0xff] %v860_v51  ;;  %v866_v54 = vld [vmem:[%s14804_s28 + $0x330] sm:$0xff] }
  0x77   : > { %863 = vst [vmem:[%s14809_s30 + $0x1a0] sm:$0xff] %v862_v52  ;;  %865 = vst [vmem:[%s14809_s30 + $0x1a8] sm:$0xff] %v864_v53  ;;  %v868_v55 = vld [vmem:[%s14804_s28 + $0x338] sm:$0xff]  ;;  %v870_v56 = vld [vmem:[%s14804_s28 + $0x340] sm:$0xff] }
  0x78   : > { %867 = vst [vmem:[%s14809_s30 + $0x1b0] sm:$0xff] %v866_v54  ;;  %869 = vst [vmem:[%s14809_s30 + $0x1b8] sm:$0xff] %v868_v55  ;;  %v872_v57 = vld [vmem:[%s14804_s28 + $0x348] sm:$0xff]  ;;  %v874_v58 = vld [vmem:[%s14804_s28 + $0x350] sm:$0xff] }
  0x79   : > { %871 = vst [vmem:[%s14809_s30 + $0x1c0] sm:$0xff] %v870_v56  ;;  %v876_v59 = vld [vmem:[%s14804_s28 + $0x358] sm:$0xff]  ;;  %873 = vst [vmem:[%s14809_s30 + $0x1c8] sm:$0xff] %v872_v57  ;;  %v878_v60 = vld [vmem:[%s14804_s28 + $0x360] sm:$0xff] }
  0x7a   : > { %875 = vst [vmem:[%s14809_s30 + $0x1d0] sm:$0xff] %v874_v58  ;;  %877 = vst [vmem:[%s14809_s30 + $0x1d8] sm:$0xff] %v876_v59  ;;  %v880_v61 = vld [vmem:[%s14804_s28 + $0x368] sm:$0xff]  ;;  %v882_v62 = vld [vmem:[%s14804_s28 + $0x370] sm:$0xff] }
  0x7b   : > { %879 = vst [vmem:[%s14809_s30 + $0x1e0] sm:$0xff] %v878_v60  ;;  %881 = vst [vmem:[%s14809_s30 + $0x1e8] sm:$0xff] %v880_v61  ;;  %v884_v63 = vld [vmem:[%s14804_s28 + $0x378] sm:$0xff]  ;;  %v886_v0 = vld [vmem:[%s14804_s28 + $0x400] sm:$0xff] }
  0x7c   : > { %883 = vst [vmem:[%s14809_s30 + $0x1f0] sm:$0xff] %v882_v62  ;;  %v888_v1 = vld [vmem:[%s14804_s28 + $0x408] sm:$0xff]  ;;  %885 = vst [vmem:[%s14809_s30 + $0x1f8] sm:$0xff] %v884_v63  ;;  %v890_v2 = vld [vmem:[%s14804_s28 + $0x410] sm:$0xff] }
  0x7d   : > { %887 = vst [vmem:[%s14809_s30 + $0x200] sm:$0xff] %v886_v0  ;;  %889 = vst [vmem:[%s14809_s30 + $0x208] sm:$0xff] %v888_v1  ;;  %v892_v3 = vld [vmem:[%s14804_s28 + $0x418] sm:$0xff]  ;;  %v894_v4 = vld [vmem:[%s14804_s28 + $0x420] sm:$0xff] }
  0x7e   : > { %891 = vst [vmem:[%s14809_s30 + $0x210] sm:$0xff] %v890_v2  ;;  %893 = vst [vmem:[%s14809_s30 + $0x218] sm:$0xff] %v892_v3  ;;  %v896_v5 = vld [vmem:[%s14804_s28 + $0x428] sm:$0xff]  ;;  %v898_v6 = vld [vmem:[%s14804_s28 + $0x430] sm:$0xff] }
  0x7f   : > { %895 = vst [vmem:[%s14809_s30 + $0x220] sm:$0xff] %v894_v4  ;;  %v900_v7 = vld [vmem:[%s14804_s28 + $0x438] sm:$0xff]  ;;  %897 = vst [vmem:[%s14809_s30 + $0x228] sm:$0xff] %v896_v5  ;;  %v902_v8 = vld [vmem:[%s14804_s28 + $0x440] sm:$0xff] }
  0x80   : > { %899 = vst [vmem:[%s14809_s30 + $0x230] sm:$0xff] %v898_v6  ;;  %901 = vst [vmem:[%s14809_s30 + $0x238] sm:$0xff] %v900_v7  ;;  %v904_v9 = vld [vmem:[%s14804_s28 + $0x448] sm:$0xff]  ;;  %v906_v10 = vld [vmem:[%s14804_s28 + $0x450] sm:$0xff] }
  0x81   : > { %903 = vst [vmem:[%s14809_s30 + $0x240] sm:$0xff] %v902_v8  ;;  %905 = vst [vmem:[%s14809_s30 + $0x248] sm:$0xff] %v904_v9  ;;  %v908_v11 = vld [vmem:[%s14804_s28 + $0x458] sm:$0xff]  ;;  %v910_v12 = vld [vmem:[%s14804_s28 + $0x460] sm:$0xff] }
  0x82   : > { %907 = vst [vmem:[%s14809_s30 + $0x250] sm:$0xff] %v906_v10  ;;  %v912_v13 = vld [vmem:[%s14804_s28 + $0x468] sm:$0xff]  ;;  %909 = vst [vmem:[%s14809_s30 + $0x258] sm:$0xff] %v908_v11  ;;  %v914_v14 = vld [vmem:[%s14804_s28 + $0x470] sm:$0xff] }
  0x83   : > { %911 = vst [vmem:[%s14809_s30 + $0x260] sm:$0xff] %v910_v12  ;;  %913 = vst [vmem:[%s14809_s30 + $0x268] sm:$0xff] %v912_v13  ;;  %v916_v15 = vld [vmem:[%s14804_s28 + $0x478] sm:$0xff]  ;;  %v918_v16 = vld [vmem:[%s14804_s28 + $0x500] sm:$0xff] }
  0x84   : > { %915 = vst [vmem:[%s14809_s30 + $0x270] sm:$0xff] %v914_v14  ;;  %917 = vst [vmem:[%s14809_s30 + $0x278] sm:$0xff] %v916_v15  ;;  %v920_v17 = vld [vmem:[%s14804_s28 + $0x508] sm:$0xff]  ;;  %v922_v18 = vld [vmem:[%s14804_s28 + $0x510] sm:$0xff] }
  0x85   : > { %919 = vst [vmem:[%s14809_s30 + $0x280] sm:$0xff] %v918_v16  ;;  %v924_v19 = vld [vmem:[%s14804_s28 + $0x518] sm:$0xff]  ;;  %921 = vst [vmem:[%s14809_s30 + $0x288] sm:$0xff] %v920_v17  ;;  %v926_v20 = vld [vmem:[%s14804_s28 + $0x520] sm:$0xff] }
  0x86   : > { %923 = vst [vmem:[%s14809_s30 + $0x290] sm:$0xff] %v922_v18  ;;  %925 = vst [vmem:[%s14809_s30 + $0x298] sm:$0xff] %v924_v19  ;;  %v928_v21 = vld [vmem:[%s14804_s28 + $0x528] sm:$0xff]  ;;  %v930_v22 = vld [vmem:[%s14804_s28 + $0x530] sm:$0xff] }
  0x87   : > { %927 = vst [vmem:[%s14809_s30 + $0x2a0] sm:$0xff] %v926_v20  ;;  %929 = vst [vmem:[%s14809_s30 + $0x2a8] sm:$0xff] %v928_v21  ;;  %v932_v23 = vld [vmem:[%s14804_s28 + $0x538] sm:$0xff]  ;;  %v934_v24 = vld [vmem:[%s14804_s28 + $0x540] sm:$0xff] }
  0x88   : > { %931 = vst [vmem:[%s14809_s30 + $0x2b0] sm:$0xff] %v930_v22  ;;  %v936_v25 = vld [vmem:[%s14804_s28 + $0x548] sm:$0xff]  ;;  %933 = vst [vmem:[%s14809_s30 + $0x2b8] sm:$0xff] %v932_v23  ;;  %v938_v26 = vld [vmem:[%s14804_s28 + $0x550] sm:$0xff] }
  0x89   : > { %935 = vst [vmem:[%s14809_s30 + $0x2c0] sm:$0xff] %v934_v24  ;;  %937 = vst [vmem:[%s14809_s30 + $0x2c8] sm:$0xff] %v936_v25  ;;  %v940_v27 = vld [vmem:[%s14804_s28 + $0x558] sm:$0xff]  ;;  %v942_v28 = vld [vmem:[%s14804_s28 + $0x560] sm:$0xff] }
  0x8a   : > { %939 = vst [vmem:[%s14809_s30 + $0x2d0] sm:$0xff] %v938_v26  ;;  %941 = vst [vmem:[%s14809_s30 + $0x2d8] sm:$0xff] %v940_v27  ;;  %v944_v29 = vld [vmem:[%s14804_s28 + $0x568] sm:$0xff]  ;;  %v946_v30 = vld [vmem:[%s14804_s28 + $0x570] sm:$0xff] }
  0x8b   : > { %943 = vst [vmem:[%s14809_s30 + $0x2e0] sm:$0xff] %v942_v28  ;;  %v948_v31 = vld [vmem:[%s14804_s28 + $0x578] sm:$0xff]  ;;  %945 = vst [vmem:[%s14809_s30 + $0x2e8] sm:$0xff] %v944_v29  ;;  %v950_v32 = vld [vmem:[%s14804_s28 + $0x600] sm:$0xff] }
  0x8c   : > { %947 = vst [vmem:[%s14809_s30 + $0x2f0] sm:$0xff] %v946_v30  ;;  %949 = vst [vmem:[%s14809_s30 + $0x2f8] sm:$0xff] %v948_v31  ;;  %v952_v33 = vld [vmem:[%s14804_s28 + $0x608] sm:$0xff]  ;;  %v954_v34 = vld [vmem:[%s14804_s28 + $0x610] sm:$0xff] }
  0x8d   : > { %951 = vst [vmem:[%s14809_s30 + $0x300] sm:$0xff] %v950_v32  ;;  %953 = vst [vmem:[%s14809_s30 + $0x308] sm:$0xff] %v952_v33  ;;  %v956_v35 = vld [vmem:[%s14804_s28 + $0x618] sm:$0xff]  ;;  %v958_v36 = vld [vmem:[%s14804_s28 + $0x620] sm:$0xff] }
  0x8e   : > { %955 = vst [vmem:[%s14809_s30 + $0x310] sm:$0xff] %v954_v34  ;;  %v960_v37 = vld [vmem:[%s14804_s28 + $0x628] sm:$0xff]  ;;  %957 = vst [vmem:[%s14809_s30 + $0x318] sm:$0xff] %v956_v35  ;;  %v962_v38 = vld [vmem:[%s14804_s28 + $0x630] sm:$0xff] }
  0x8f   : > { %959 = vst [vmem:[%s14809_s30 + $0x320] sm:$0xff] %v958_v36  ;;  %961 = vst [vmem:[%s14809_s30 + $0x328] sm:$0xff] %v960_v37  ;;  %v964_v39 = vld [vmem:[%s14804_s28 + $0x638] sm:$0xff]  ;;  %v966_v40 = vld [vmem:[%s14804_s28 + $0x640] sm:$0xff] }
  0x90   : > { %963 = vst [vmem:[%s14809_s30 + $0x330] sm:$0xff] %v962_v38  ;;  %965 = vst [vmem:[%s14809_s30 + $0x338] sm:$0xff] %v964_v39  ;;  %v968_v41 = vld [vmem:[%s14804_s28 + $0x648] sm:$0xff]  ;;  %v970_v42 = vld [vmem:[%s14804_s28 + $0x650] sm:$0xff] }
  0x91   : > { %967 = vst [vmem:[%s14809_s30 + $0x340] sm:$0xff] %v966_v40  ;;  %v972_v43 = vld [vmem:[%s14804_s28 + $0x658] sm:$0xff]  ;;  %969 = vst [vmem:[%s14809_s30 + $0x348] sm:$0xff] %v968_v41  ;;  %v974_v44 = vld [vmem:[%s14804_s28 + $0x660] sm:$0xff] }
  0x92   : > { %971 = vst [vmem:[%s14809_s30 + $0x350] sm:$0xff] %v970_v42  ;;  %973 = vst [vmem:[%s14809_s30 + $0x358] sm:$0xff] %v972_v43  ;;  %v976_v45 = vld [vmem:[%s14804_s28 + $0x668] sm:$0xff]  ;;  %v978_v46 = vld [vmem:[%s14804_s28 + $0x670] sm:$0xff] }
  0x93   : > { %975 = vst [vmem:[%s14809_s30 + $0x360] sm:$0xff] %v974_v44  ;;  %977 = vst [vmem:[%s14809_s30 + $0x368] sm:$0xff] %v976_v45  ;;  %v980_v47 = vld [vmem:[%s14804_s28 + $0x678] sm:$0xff]  ;;  %v982_v48 = vld [vmem:[%s14804_s28 + $0x700] sm:$0xff] }
  0x94   : > { %979 = vst [vmem:[%s14809_s30 + $0x370] sm:$0xff] %v978_v46  ;;  %v984_v49 = vld [vmem:[%s14804_s28 + $0x708] sm:$0xff]  ;;  %981 = vst [vmem:[%s14809_s30 + $0x378] sm:$0xff] %v980_v47  ;;  %v986_v50 = vld [vmem:[%s14804_s28 + $0x710] sm:$0xff] }
  0x95   : > { %983 = vst [vmem:[%s14809_s30 + $0x380] sm:$0xff] %v982_v48  ;;  %985 = vst [vmem:[%s14809_s30 + $0x388] sm:$0xff] %v984_v49  ;;  %v988_v51 = vld [vmem:[%s14804_s28 + $0x718] sm:$0xff]  ;;  %v990_v52 = vld [vmem:[%s14804_s28 + $0x720] sm:$0xff] }
  0x96   : > { %987 = vst [vmem:[%s14809_s30 + $0x390] sm:$0xff] %v986_v50  ;;  %989 = vst [vmem:[%s14809_s30 + $0x398] sm:$0xff] %v988_v51  ;;  %v992_v53 = vld [vmem:[%s14804_s28 + $0x728] sm:$0xff]  ;;  %v994_v54 = vld [vmem:[%s14804_s28 + $0x730] sm:$0xff] }
  0x97   : > { %991 = vst [vmem:[%s14809_s30 + $0x3a0] sm:$0xff] %v990_v52  ;;  %v996_v55 = vld [vmem:[%s14804_s28 + $0x738] sm:$0xff]  ;;  %993 = vst [vmem:[%s14809_s30 + $0x3a8] sm:$0xff] %v992_v53  ;;  %v998_v56 = vld [vmem:[%s14804_s28 + $0x740] sm:$0xff] }
  0x98   : > { %995 = vst [vmem:[%s14809_s30 + $0x3b0] sm:$0xff] %v994_v54  ;;  %997 = vst [vmem:[%s14809_s30 + $0x3b8] sm:$0xff] %v996_v55  ;;  %v1000_v57 = vld [vmem:[%s14804_s28 + $0x748] sm:$0xff]  ;;  %v1002_v58 = vld [vmem:[%s14804_s28 + $0x750] sm:$0xff] }
  0x99   : > { %999 = vst [vmem:[%s14809_s30 + $0x3c0] sm:$0xff] %v998_v56  ;;  %1001 = vst [vmem:[%s14809_s30 + $0x3c8] sm:$0xff] %v1000_v57  ;;  %v1004_v59 = vld [vmem:[%s14804_s28 + $0x758] sm:$0xff]  ;;  %v1006_v60 = vld [vmem:[%s14804_s28 + $0x760] sm:$0xff] }
  0x9a   : > { %1003 = vst [vmem:[%s14809_s30 + $0x3d0] sm:$0xff] %v1002_v58  ;;  %v1008_v61 = vld [vmem:[%s14804_s28 + $0x768] sm:$0xff]  ;;  %1005 = vst [vmem:[%s14809_s30 + $0x3d8] sm:$0xff] %v1004_v59  ;;  %v1010_v62 = vld [vmem:[%s14804_s28 + $0x770] sm:$0xff] }
  0x9b   : > { %1007 = vst [vmem:[%s14809_s30 + $0x3e0] sm:$0xff] %v1006_v60  ;;  %1009 = vst [vmem:[%s14809_s30 + $0x3e8] sm:$0xff] %v1008_v61  ;;  %v1012_v63 = vld [vmem:[%s14804_s28 + $0x778] sm:$0xff] }
  0x9c   : > { %1011 = vst [vmem:[%s14809_s30 + $0x3f0] sm:$0xff] %v1010_v62  ;;  %1013 = vst [vmem:[%s14809_s30 + $0x3f8] sm:$0xff] %v1012_v63 }
  0x9d PF: > { %p18350_p11 = scmp.ne.s32.totalorder %s18345_s16, 0 }
  0x9f   : > { %1022 = sbr.rel (%p18350_p11) target bundleno = 3300 (0xce4), region = 114 }
  0xa6   : > { %s1025_s12 = sand.u32 1, %s14562_s18   ;;  %p18351_p13 = scmp.ne.s32.totalorder %s18346_s26, 0 }
  0xa7   : > { %s12281_s10 = sshll.u32 %s1025_s12, 10 }
  0xa8   : > { %s15067_s4 = scalar_lea.vmem [#allocation3], %s12281_s10 }
  0xa9   : > { %14553 = dma.done.wait (%p18351_p13), [#allocation5], 8192  }
  0xaa   : > { %14555 = vsyncadd (%p18351_p13), [#allocation5], 4294959104 }
  0xab   : > { %14557 = dma.done.wait (%p18351_p13), [#allocation7], 8192  }
  0xac   : > { %14559 = vsyncadd (%p18351_p13), [#allocation7], 4294959104  ;;  %p1082_p8 = scmp.lt.s32.totalorder %s14574_s21, 1  ;;  %p12285_p12 = scmp.ne.s32.totalorder %s14570_s20, 0 }
  0xad   : > { %v14594_v0 = vmov (!%p12285_p12), -inf  }
  0xae   : > { %s18445_s21 = smov (!%p1082_p8, %s14574_s21), 1  ;;  %1091 = sbr.rel (%p12285_p12) target bundleno = 181 (0xb5), region = 130 }
  0xaf   : > { %s13513_s16 = smul.u32 48, %s18445_s21  ;;  %1092 = vst [vmem:[#allocation2] sm:$0xff] (!%p12285_p12), %v14594_v0  ;;  %1093 = vst [vmem:[#allocation2 + $0x8] sm:$0xff] (!%p12285_p12), %v14594_v0 }
  0xb0   : > { %1094 = vst [vmem:[#allocation2 + $0x10] sm:$0xff] (!%p12285_p12), %v14594_v0  ;;  %1095 = vst [vmem:[#allocation2 + $0x18] sm:$0xff] (!%p12285_p12), %v14594_v0 }
  0xb1   : > { %s15082_s2 = scalar_lea.vmem %s18255_s15, %s13513_s16  ;;  %1096 = vst [vmem:[#allocation2 + $0x20] sm:$0xff] (!%p12285_p12), %v14594_v0  ;;  %1097 = vst [vmem:[#allocation2 + $0x28] sm:$0xff] (!%p12285_p12), %v14594_v0 }
  0xb2   : > { %1098 = vst [vmem:[#allocation2 + $0x30] sm:$0xff] (!%p12285_p12), %v14594_v0  ;;  %1099 = vst [vmem:[#allocation2 + $0x38] sm:$0xff] (!%p12285_p12), %v14594_v0 }
  0xb5 PF: > { %v1292_v1 = vld [vmem:[%s18241_s1] sm:$0x3]  ;;  %vm1493_vm0 = vcmask 1040384   ;;  %vm1494_vm1 = vcmask 1041408   ;;  %v14595_v3 = vmov 65535   ;;  %v1101_v5 = vld [vmem:[%s15067_s4 + $0x8] sm:$0xff] }
  0xb6   : > { %v1100_v2 = vld [vmem:[%s15067_s4] sm:$0xff]  ;;  %v1495_v4 = vsel %vm1493_vm0, 4294967295, %v14595_v3  ;;  %vm1300_vm2 = vcmask 23552   ;;  %v1102_v8 = vld [vmem:[%s15067_s4 + $0x10] sm:$0xff]  ;;  %v1103_v9 = vld [vmem:[%s15067_s4 + $0x18] sm:$0xff]  ;;  %s18352_s30 = sld [smem:[#allocation47_spill]] }
  0xb7   : > { %v1496_v6 = vsel %vm1494_vm1, %v1495_v4, 0  ;;  %v1228_v7 = vpack.c.bf16 %v1101_v5, %v1100_v2  ;;  %v1104_v11 = vld [vmem:[%s15067_s4 + $0x20] sm:$0xff]  ;;  %v1105_v12 = vld [vmem:[%s15067_s4 + $0x28] sm:$0xff]  ;;  %v1229_v13 = vpack.c.bf16 %v1103_v9, %v1102_v8  ;;  %v1106_v15 = vld [vmem:[%s15067_s4 + $0x30] sm:$0xff]  ;;  %s18353_s18 = sld [smem:[#allocation45_spill]]  ;;  %vm2276_vm3 = vcmask 523264  }
  0xb8   : > { %v1498_v10 = vand.u32 %v1496_v6, %v1292_v1  ;;  %v1230_v14 = vpack.c.bf16 %v1105_v12, %v1104_v11  ;;  %v1107_v16 = vld [vmem:[%s15067_s4 + $0x38] sm:$0xff]  ;;  %v1108_v17 = vld [vmem:[%s15067_s4 + $0x40] sm:$0xff]  ;;  %v1109_v18 = vld [vmem:[%s15067_s4 + $0x48] sm:$0xff]  ;;  %s18355_s25 = sld [smem:[#allocation46_spill]]  ;;  %vm7698_vm4 = vcmask 1041409   ;;  %vm7700_vm5 = vcmask 1042434  }
  0xb9   : > { %13199 = vmatprep.mubr.msk.bf16.mxu0 %vm1300_vm2, %v1228_v7  ;;  %v1231_v19 = vpack.c.bf16 %v1107_v16, %v1106_v15  ;;  %v1232_v20 = vpack.c.bf16 %v1109_v18, %v1108_v17  ;;  %v1110_v21 = vld [vmem:[%s15067_s4 + $0x50] sm:$0xff]  ;;  %v1111_v22 = vld [vmem:[%s15067_s4 + $0x58] sm:$0xff]  ;;  %v1112_v23 = vld [vmem:[%s15067_s4 + $0x60] sm:$0xff]  ;;  %vm7702_vm6 = vcmask 1043459   ;;  %vm7704_vm7 = vcmask 1044484   ;;  %p12484_p0 = scmp.ne.s32.totalorder %s14570_s20, 1 }
  0xba   : > { %13197 = vmatprep.subr.bf16.mxu0 %v1498_v10  ;;  %v1113_v24 = vld [vmem:[%s15067_s4 + $0x68] sm:$0xff]  ;;  %v1233_v25 = vpack.c.bf16 %v1111_v22, %v1110_v21  ;;  %v1114_v27 = vld [vmem:[%s15067_s4 + $0x70] sm:$0xff]  ;;  %v1115_v28 = vld [vmem:[%s15067_s4 + $0x78] sm:$0xff]  ;;  %vm7706_vm8 = vcmask 1045509   ;;  %vm7708_vm9 = vcmask 1046534   ;;  %vm7710_vm10 = vcmask 1047559  }
  0xbb   : > { %13198 = vmatpush3.bf16.msra.mxu0 %v1498_v10  ;;  %v1234_v26 = vpack.c.bf16 %v1113_v24, %v1112_v23  ;;  %v1116_v29 = vld [vmem:[%s15067_s4 + $0x80] sm:$0xff]  ;;  %v1117_v30 = vld [vmem:[%s15067_s4 + $0x88] sm:$0xff]  ;;  %v1235_v31 = vpack.c.bf16 %v1115_v28, %v1114_v27  ;;  %v1118_v33 = vld [vmem:[%s15067_s4 + $0x90] sm:$0xff]  ;;  %s18421_s5 = sld [smem:[#allocation49_spill]] (!%p12484_p0)  ;;  %s18422_s7 = sld [smem:[#allocation48_spill]] (!%p12484_p0) }
  0xbc   : > { %v1236_v32 = vpack.c.bf16 %v1117_v30, %v1116_v29  ;;  %v1119_v34 = vld [vmem:[%s15067_s4 + $0x98] sm:$0xff]  ;;  %v1120_v35 = vld [vmem:[%s15067_s4 + $0xa0] sm:$0xff]  ;;  %v1121_v36 = vld [vmem:[%s15067_s4 + $0xa8] sm:$0xff]  ;;  %s18423_s6 = sld [smem:[#allocation50_spill]] (!%p12484_p0)  ;;  %s18424_s20 = sld [smem:[#allocation53_spill]] (!%p12484_p0) }
  0xbd   : > { %v1237_v37 = vpack.c.bf16 %v1119_v34, %v1118_v33  ;;  %v1238_v38 = vpack.c.bf16 %v1121_v36, %v1120_v35  ;;  %v1122_v39 = vld [vmem:[%s15067_s4 + $0xb0] sm:$0xff]  ;;  %v1123_v40 = vld [vmem:[%s15067_s4 + $0xb8] sm:$0xff]  ;;  %v1124_v41 = vld [vmem:[%s15067_s4 + $0xc0] sm:$0xff]  ;;  %s18354_s8 = smov %s18353_s18  ;;  %s18426_s21 = sld [smem:[#allocation51_spill]] (!%p12484_p0) }
  0xbe   : > { %13200 = vmatmul.mubr.msk.bf16.vlgmr.msra.gmra.mrb[0].mxu0 %vm1300_vm2, %v1229_v13  ;;  %v1125_v42 = vld [vmem:[%s15067_s4 + $0xc8] sm:$0xff]  ;;  %v1239_v43 = vpack.c.bf16 %v1123_v40, %v1122_v39  ;;  %v1126_v45 = vld [vmem:[%s15067_s4 + $0xd0] sm:$0xff]  ;;  %v1127_v46 = vld [vmem:[%s15067_s4 + $0xd8] sm:$0xff]  ;;  %s18427_s14 = sld [smem:[#allocation52_spill]] (!%p12484_p0) }
  0xbf   : > { %13203 = vmatprep.mubr.msk.bf16.mxu0 %vm1300_vm2, %v1230_v14  ;;  %v1240_v44 = vpack.c.bf16 %v1125_v42, %v1124_v41  ;;  %v1128_v47 = vld [vmem:[%s15067_s4 + $0xe0] sm:$0xff]  ;;  %v1129_v48 = vld [vmem:[%s15067_s4 + $0xe8] sm:$0xff]  ;;  %v1241_v49 = vpack.c.bf16 %v1127_v46, %v1126_v45  ;;  %v1130_v51 = vld [vmem:[%s15067_s4 + $0xf0] sm:$0xff] }
  0xc0   : > { %v1242_v50 = vpack.c.bf16 %v1129_v48, %v1128_v47  ;;  %v1131_v52 = vld [vmem:[%s15067_s4 + $0xf8] sm:$0xff]  ;;  %v1132_v53 = vld [vmem:[%s15067_s4 + $0x100] sm:$0xff]  ;;  %v1133_v54 = vld [vmem:[%s15067_s4 + $0x108] sm:$0xff] }
  0xc1   : > { %v1243_v55 = vpack.c.bf16 %v1131_v52, %v1130_v51  ;;  %v1244_v56 = vpack.c.bf16 %v1133_v54, %v1132_v53  ;;  %v1134_v57 = vld [vmem:[%s15067_s4 + $0x110] sm:$0xff]  ;;  %v1135_v58 = vld [vmem:[%s15067_s4 + $0x118] sm:$0xff]  ;;  %v1136_v59 = vld [vmem:[%s15067_s4 + $0x120] sm:$0xff] }
  0xc2   : > { %v1137_v60 = vld [vmem:[%s15067_s4 + $0x128] sm:$0xff]  ;;  %v1245_v61 = vpack.c.bf16 %v1135_v58, %v1134_v57  ;;  %v1138_v63 = vld [vmem:[%s15067_s4 + $0x130] sm:$0xff]  ;;  %v1139_v0 = vld [vmem:[%s15067_s4 + $0x138] sm:$0xff]  ;;  %s18425_s13 = smov (!%p12484_p0), %s18424_s20 }
  0xc3   : > { %v1246_v62 = vpack.c.bf16 %v1137_v60, %v1136_v59  ;;  %v1140_v1 = vld [vmem:[%s15067_s4 + $0x140] sm:$0xff]  ;;  %v1141_v2 = vld [vmem:[%s15067_s4 + $0x148] sm:$0xff]  ;;  %v1247_v3 = vpack.c.bf16 %v1139_v0, %v1138_v63  ;;  %v1142_v6 = vld [vmem:[%s15067_s4 + $0x150] sm:$0xff] }
  0xc4   : > { %v1248_v4 = vpack.c.bf16 %v1141_v2, %v1140_v1  ;;  %v13598_v5 = vld [vmem:[%s18243_s3] sm:$0xff]   ;;  %v1143_v7 = vld [vmem:[%s15067_s4 + $0x158] sm:$0xff]  ;;  %v1145_v9 = vld [vmem:[%s15067_s4 + $0x168] sm:$0xff] }
  0xc5   : > { %v1144_v8 = vld [vmem:[%s15067_s4 + $0x160] sm:$0xff]  ;;  %13327 = vmatprep.subr.bf16.mxu1 %v13598_v5  ;;  %v1249_v10 = vpack.c.bf16 %v1143_v7, %v1142_v6  ;;  %v13599_v12 = vld [vmem:[%s18243_s3 + $0x8] sm:$0xff]   ;;  %v1146_v13 = vld [vmem:[%s15067_s4 + $0x170] sm:$0xff] }
  0xc6   : > { %13204 = vmatmul.mubr.msk.bf16.gmra.mrb[4].mxu0 %vm1300_vm2, %v1231_v19  ;;  %13328 = vmatpush3.bf16.msra.mxu1 %v13598_v5  ;;  %v1250_v11 = vpack.c.bf16 %v1145_v9, %v1144_v8  ;;  %v1147_v14 = vld [vmem:[%s15067_s4 + $0x178] sm:$0xff]  ;;  %v1148_v15 = vld [vmem:[%s15067_s4 + $0x180] sm:$0xff]  ;;  %v1149_v16 = vld [vmem:[%s15067_s4 + $0x188] sm:$0xff] }
  0xc7   : > { %13207 = vmatprep.mubr.msk.bf16.mxu0 %vm1300_vm2, %v1232_v20  ;;  %13329 = vmatprep.subr.bf16.mxu1 %v13599_v12  ;;  %v1251_v17 = vpack.c.bf16 %v1147_v14, %v1146_v13  ;;  %v13600_v18 = vld [vmem:[%s18243_s3 + $0x10] sm:$0xff]   ;;  %v1252_v19 = vpack.c.bf16 %v1149_v16, %v1148_v15  ;;  %v13601_v20 = vld [vmem:[%s18243_s3 + $0x18] sm:$0xff]   ;;  %v1152_v23 = vld [vmem:[%s15067_s4 + $0x1a0] sm:$0xff] }
  0xc8   : > { %v1150_v21 = vld [vmem:[%s15067_s4 + $0x190] sm:$0xff]  ;;  %v1151_v22 = vld [vmem:[%s15067_s4 + $0x198] sm:$0xff]  ;;  %v1153_v24 = vld [vmem:[%s15067_s4 + $0x1a8] sm:$0xff] }
  0xc9   : > { %v1154_v27 = vld [vmem:[%s15067_s4 + $0x1b0] sm:$0xff]  ;;  %v1155_v28 = vld [vmem:[%s15067_s4 + $0x1b8] sm:$0xff]  ;;  %v1156_v29 = vld [vmem:[%s15067_s4 + $0x1c0] sm:$0xff] }
  0xca   : > { %13330 = vmatpush3.bf16.msra.mxu1 %v13599_v12  ;;  %v1157_v30 = vld [vmem:[%s15067_s4 + $0x1c8] sm:$0xff]  ;;  %v1158_v41 = vld [vmem:[%s15067_s4 + $0x1d0] sm:$0xff]  ;;  %v1159_v42 = vld [vmem:[%s15067_s4 + $0x1d8] sm:$0xff] }
  0xcb   : > { %13331 = vmatprep.subr.bf16.mxu1 %v13600_v18  ;;  %v15194_v33 = vld [vmem:[%s18352_s30 + $0x8] sm:$0xff]  ;;  %v1256_v40 = vpack.c.bf16 %v1157_v30, %v1156_v29  ;;  %v1257_v45 = vpack.c.bf16 %v1159_v42, %v1158_v41  ;;  %v1162_v47 = vld [vmem:[%s15067_s4 + $0x1f0] sm:$0xff]  ;;  %v1163_v48 = vld [vmem:[%s15067_s4 + $0x1f8] sm:$0xff] }
  0xcc   : > { %v15199_v36 = vld [vmem:[%s18352_s30 + $0x28] sm:$0xff]  ;;  %v1259_v51 = vpack.c.bf16 %v1163_v48, %v1162_v47  ;;  %v1166_v53 = vld [vmem:[%s15067_s4 + $0x210] sm:$0xff]  ;;  %v1167_v54 = vld [vmem:[%s15067_s4 + $0x218] sm:$0xff] }
  0xcd   : > { %v12423_v39 = vcombine.high %v15194_v33, %v15199_v36  ;;  %v1261_v57 = vpack.c.bf16 %v1167_v54, %v1166_v53  ;;  %v1170_v59 = vld [vmem:[%s15067_s4 + $0x230] sm:$0xff]  ;;  %v1171_v60 = vld [vmem:[%s15067_s4 + $0x238] sm:$0xff]  ;;  %v3214_v63 = vld [vmem:[%s18352_s30 + $0x40] sm:$0xff] }
  0xce   : > { %13208 = vmatmul.mubr.msk.bf16.gmra.mrb[8].mxu0 %vm1300_vm2, %v1233_v25  ;;  %13332 = vmatpush3.bf16.msra.mxu1 %v13600_v18  ;;  %v1253_v25 = vpack.c.bf16 %v1151_v22, %v1150_v21  ;;  %v3218_v0 = vld [vmem:[%s18352_s30 + $0x60] sm:$0xff]  ;;  %v1174_v5 = vld [vmem:[%s15067_s4 + $0x250] sm:$0xff]  ;;  %v1175_v6 = vld [vmem:[%s15067_s4 + $0x258] sm:$0xff] }
  0xcf   : > { %13211 = vmatprep.mubr.msk.bf16.mxu0 %vm1300_vm2, %v1234_v26  ;;  %13333 = vmatprep.subr.bf16.mxu1 %v13601_v20  ;;  %v1254_v26 = vpack.c.bf16 %v1153_v24, %v1152_v23  ;;  %v12428_v1 = vcombine.low %v3214_v63, %v3218_v0  ;;  %v12429_v2 = vcombine.high %v3214_v63, %v3218_v0  ;;  %v1176_v7 = vld [vmem:[%s15067_s4 + $0x260] sm:$0xff]  ;;  %v1177_v8 = vld [vmem:[%s15067_s4 + $0x268] sm:$0xff]  ;;  %v1179_v12 = vld [vmem:[%s15067_s4 + $0x278] sm:$0xff] }
  0xd0   : > { %v1265_v9 = vpack.c.bf16 %v1175_v6, %v1174_v5  ;;  %v1180_v13 = vld [vmem:[%s15067_s4 + $0x280] sm:$0xff]  ;;  %v1181_v14 = vld [vmem:[%s15067_s4 + $0x288] sm:$0xff]  ;;  %v1183_v18 = vld [vmem:[%s15067_s4 + $0x298] sm:$0xff] }
  0xd1   : > { %v1268_v16 = vpack.c.bf16 %v1181_v14, %v1180_v13  ;;  %v1186_v23 = vld [vmem:[%s15067_s4 + $0x2b0] sm:$0xff]  ;;  %v1187_v24 = vld [vmem:[%s15067_s4 + $0x2b8] sm:$0xff]  ;;  %v15305_v6 = vld [vmem:[%s18353_s18] ss:$0 sm:$0xff] }
  0xd2   : > { %13334 = vmatpush3.bf16.msra.mxu1 %v13601_v20  ;;  %v1185_v20 = vld [vmem:[%s15067_s4 + $0x2a8] sm:$0xff]  ;;  %v1194_v42 = vld [vmem:[%s15067_s4 + $0x2f0] sm:$0xff] }
  0xd3   : > { %4263 = vmatprep.subr.bf16.mxu1 %v12423_v39  ;;  %v1193_v39 = vld [vmem:[%s15067_s4 + $0x2e8] sm:$0xff]  ;;  %v1198_v48 = vld [vmem:[%s15067_s4 + $0x310] sm:$0xff] }
  0xd4   : > { %v1202_v54 = vld [vmem:[%s15067_s4 + $0x330] sm:$0xff] }
  0xd5   : > { %v1206_v0 = vld [vmem:[%s15067_s4 + $0x350] sm:$0xff] }
  0xd6   : > { %13212 = vmatmul.mubr.msk.bf16.gmra.mrb[12].mxu0 %vm1300_vm2, %v1235_v31  ;;  %v3206_v31 = vld [vmem:[%s18352_s30] sm:$0xff] }
  0xd7   : > { %13215 = vmatprep.mubr.msk.bf16.mxu0 %vm1300_vm2, %v1236_v32  ;;  %v3210_v32 = vld [vmem:[%s18352_s30 + $0x20] sm:$0xff] }
  0xd8   : > { %v12420_v34 = vcombine.low %v3206_v31, %v3210_v32  ;;  %v12421_v35 = vcombine.high %v3206_v31, %v3210_v32  ;;  %v1271_v31 = vpack.c.bf16 %v1187_v24, %v1186_v23  ;;  %v1214_v23 = vld [vmem:[%s15067_s4 + $0x390] sm:$0xff] }
  0xda   : > { %3590 = vmatprep.subr.bf16.mxu0 %v12421_v35  ;;  %v1191_v35 = vld [vmem:[%s15067_s4 + $0x2d8] sm:$0xff] }
  0xdb   : > { %3591 = vmatpush1.bf16.msra.mxu0 %v12420_v34  ;;  %v1190_v34 = vld [vmem:[%s15067_s4 + $0x2d0] sm:$0xff] }
  0xdc   : > { %3592 = vmatprep.subr.bf16.mxu0 %v12429_v2  ;;  %v1208_v2 = vld [vmem:[%s15067_s4 + $0x360] sm:$0xff] }
  0xde   : > { %13216 = vmatmul.mubr.msk.bf16.gmra.mrb[16].mxu0 %vm1300_vm2, %v1237_v37  ;;  %v1255_v37 = vpack.c.bf16 %v1155_v28, %v1154_v27  ;;  %v3222_v27 = vld [vmem:[%s18352_s30 + $0x80] sm:$0xff] }
  0xdf   : > { %13219 = vmatprep.mubr.msk.bf16.mxu0 %vm1300_vm2, %v1238_v38  ;;  %v12422_v38 = vcombine.low %v15194_v33, %v15199_v36  ;;  %3593 = vmatpush1.bf16.msra.mxu0 %v12428_v1  ;;  %v3226_v28 = vld [vmem:[%s18352_s30 + $0xa0] sm:$0xff]  ;;  %v1207_v1 = vld [vmem:[%s15067_s4 + $0x358] sm:$0xff]  ;;  %v3231_v33 = vld [vmem:[%s18352_s30 + $0xc8] sm:$0xff] }
  0xe0   : > { %v12436_v29 = vcombine.low %v3222_v27, %v3226_v28  ;;  %v12437_v30 = vcombine.high %v3222_v27, %v3226_v28  ;;  %v3215_v27 = vld [vmem:[%s18352_s30 + $0x48] sm:$0xff] }
  0xe1   : > { %v3219_v28 = vld [vmem:[%s18352_s30 + $0x68] sm:$0xff] }
  0xe2   : > { %3594 = vmatprep.subr.bf16.mxu0 %v12437_v30  ;;  %v1216_v30 = vld [vmem:[%s15067_s4 + $0x3a0] sm:$0xff]  ;;  %v3235_v36 = vld [vmem:[%s18352_s30 + $0xe8] sm:$0xff] }
  0xe3   : > { %3595 = vmatpush1.bf16.msra.mxu0 %v12436_v29 }
  0xe6   : > { %13220 = vmatmul.mubr.msk.bf16.gmra.mrb[20].mxu0 %vm1300_vm2, %v1239_v43  ;;  %v1160_v43 = vld [vmem:[%s15067_s4 + $0x1e0] sm:$0xff] }
  0xe7   : > { %13223 = vmatprep.mubr.msk.bf16.mxu0 %vm1300_vm2, %v1240_v44  ;;  %v1161_v44 = vld [vmem:[%s15067_s4 + $0x1e8] sm:$0xff] }
  0xe8   : > { %v1258_v46 = vpack.c.bf16 %v1161_v44, %v1160_v43  ;;  %v1195_v43 = vld [vmem:[%s15067_s4 + $0x2f8] sm:$0xff]  ;;  %v1196_v44 = vld [vmem:[%s15067_s4 + $0x300] sm:$0xff] }
  0xee   : > { %13224 = vmatmul.mubr.msk.bf16.gmra.mrb[24].mxu0 %vm1300_vm2, %v1241_v49  ;;  %v1164_v49 = vld [vmem:[%s15067_s4 + $0x200] sm:$0xff] }
  0xef   : > { %13227 = vmatprep.mubr.msk.bf16.mxu0 %vm1300_vm2, %v1242_v50  ;;  %v1165_v50 = vld [vmem:[%s15067_s4 + $0x208] sm:$0xff] }
  0xf0   : > { %v1260_v52 = vpack.c.bf16 %v1165_v50, %v1164_v49  ;;  %v1199_v49 = vld [vmem:[%s15067_s4 + $0x318] sm:$0xff]  ;;  %v1200_v50 = vld [vmem:[%s15067_s4 + $0x320] sm:$0xff] }
  0xf6   : > { %13228 = vmatmul.mubr.msk.bf16.gmra.mrb[28].mxu0 %vm1300_vm2, %v1243_v55  ;;  %v1168_v55 = vld [vmem:[%s15067_s4 + $0x220] sm:$0xff] }
  0xf7   : > { %13231 = vmatprep.mubr.msk.bf16.mxu0 %vm1300_vm2, %v1244_v56  ;;  %v1169_v56 = vld [vmem:[%s15067_s4 + $0x228] sm:$0xff] }
  0xf8   : > { %v1262_v58 = vpack.c.bf16 %v1169_v56, %v1168_v55  ;;  %v1203_v55 = vld [vmem:[%s15067_s4 + $0x338] sm:$0xff]  ;;  %v1204_v56 = vld [vmem:[%s15067_s4 + $0x340] sm:$0xff] }
  0xfe   : > { %13232 = vmatmul.mubr.msk.bf16.gmra.mrb[32].mxu0 %vm1300_vm2, %v1245_v61  ;;  %v1172_v61 = vld [vmem:[%s15067_s4 + $0x240] sm:$0xff] }
  0xff   : > { %13235 = vmatprep.mubr.msk.bf16.mxu0 %vm1300_vm2, %v1246_v62  ;;  %v1173_v62 = vld [vmem:[%s15067_s4 + $0x248] sm:$0xff] }
 0x106   : > { %13236 = vmatmul.mubr.msk.bf16.gmra.mrb[36].mxu0 %vm1300_vm2, %v1247_v3  ;;  %v1263_v3 = vpack.c.bf16 %v1171_v60, %v1170_v59  ;;  %v3234_v59 = vld [vmem:[%s18352_s30 + $0xe0] sm:$0xff] }
 0x107   : > { %13239 = vmatprep.mubr.msk.bf16.mxu0 %vm1300_vm2, %v1248_v4  ;;  %v1264_v4 = vpack.c.bf16 %v1173_v62, %v1172_v61  ;;  %v1279_v62 = vpack.c.bf16 %v1203_v55, %v1202_v54 }
 0x10e   : > { %13240 = vmatmul.mubr.msk.bf16.gmra.mrb[40].mxu0 %vm1300_vm2, %v1249_v10  ;;  %v1266_v10 = vpack.c.bf16 %v1177_v8, %v1176_v7  ;;  %v1210_v7 = vld [vmem:[%s15067_s4 + $0x370] sm:$0xff]  ;;  %v1211_v8 = vld [vmem:[%s15067_s4 + $0x378] sm:$0xff] }
 0x10f   : > { %13243 = vmatprep.mubr.msk.bf16.mxu0 %vm1300_vm2, %v1250_v11  ;;  %v1178_v11 = vld [vmem:[%s15067_s4 + $0x270] sm:$0xff]  ;;  %v1283_v14 = vpack.c.bf16 %v1211_v8, %v1210_v7 }
 0x110   : > { %v1267_v15 = vpack.c.bf16 %v1179_v12, %v1178_v11 }
 0x116   : > { %13244 = vmatmul.mubr.msk.bf16.gmra.mrb[44].mxu0 %vm1300_vm2, %v1251_v17  ;;  %v1182_v17 = vld [vmem:[%s15067_s4 + $0x290] sm:$0xff] }
 0x117   : > { %13247 = vmatprep.mubr.msk.bf16.mxu0 %vm1300_vm2, %v1252_v19  ;;  %v1184_v19 = vld [vmem:[%s15067_s4 + $0x2a0] sm:$0xff]  ;;  %v1269_v21 = vpack.c.bf16 %v1183_v18, %v1182_v17 }
 0x118   : > { %v1270_v22 = vpack.c.bf16 %v1185_v20, %v1184_v19 }
 0x11e   : > { %13248 = vmatmul.mubr.msk.bf16.gmra.mrb[48].mxu0 %vm1300_vm2, %v1253_v25  ;;  %v1188_v25 = vld [vmem:[%s15067_s4 + $0x2c0] sm:$0xff] }
 0x11f   : > { %13251 = vmatprep.mubr.msk.bf16.mxu0 %vm1300_vm2, %v1254_v26  ;;  %v1189_v26 = vld [vmem:[%s15067_s4 + $0x2c8] sm:$0xff] }
 0x120   : > { %v1272_v32 = vpack.c.bf16 %v1189_v26, %v1188_v25  ;;  %v1215_v26 = vld [vmem:[%s15067_s4 + $0x398] sm:$0xff] }
 0x126   : > { %13252 = vmatmul.mubr.msk.bf16.gmra.mrb[52].mxu0 %vm1300_vm2, %v1255_v37  ;;  %v1192_v37 = vld [vmem:[%s15067_s4 + $0x2e0] sm:$0xff] }
 0x127   : > { %13255 = vmatprep.mubr.msk.bf16.mxu0 %vm1300_vm2, %v1256_v40  ;;  %v1273_v40 = vpack.c.bf16 %v1191_v35, %v1190_v34  ;;  %v1274_v41 = vpack.c.bf16 %v1193_v39, %v1192_v37  ;;  %v1285_v39 = vpack.c.bf16 %v1215_v26, %v1214_v23 }
 0x12e   : > { %13256 = vmatmul.mubr.msk.bf16.gmra.mrb[56].mxu0 %vm1300_vm2, %v1257_v45  ;;  %v1197_v45 = vld [vmem:[%s15067_s4 + $0x308] sm:$0xff] }
 0x12f   : > { %13259 = vmatprep.mubr.msk.bf16.mxu0 %vm1300_vm2, %v1258_v46  ;;  %v1275_v46 = vpack.c.bf16 %v1195_v43, %v1194_v42  ;;  %v1276_v47 = vpack.c.bf16 %v1197_v45, %v1196_v44  ;;  %v3223_v44 = vld [vmem:[%s18352_s30 + $0x88] sm:$0xff] }
 0x130   : > { %v3227_v45 = vld [vmem:[%s18352_s30 + $0xa8] sm:$0xff] }
 0x131   : > { %v12439_v54 = vcombine.high %v3223_v44, %v3227_v45 }
 0x136   : > { %13260 = vmatmul.mubr.msk.bf16.gmra.mrb[60].mxu0 %vm1300_vm2, %v1259_v51  ;;  %v1201_v51 = vld [vmem:[%s15067_s4 + $0x328] sm:$0xff] }
 0x137   : > { %13263 = vmatprep.mubr.msk.bf16.mxu0 %vm1300_vm2, %v1260_v52  ;;  %v1277_v52 = vpack.c.bf16 %v1199_v49, %v1198_v48  ;;  %v1278_v53 = vpack.c.bf16 %v1201_v51, %v1200_v50  ;;  %v12430_v49 = vcombine.low %v3215_v27, %v3219_v28 }
 0x13e   : > { %13264 = vmatmul.mubr.msk.bf16.gmra.mrb[64].mxu0 %vm1300_vm2, %v1261_v57  ;;  %v1205_v57 = vld [vmem:[%s15067_s4 + $0x348] sm:$0xff] }
 0x13f   : > { %13267 = vmatprep.mubr.msk.bf16.mxu0 %vm1300_vm2, %v1262_v58  ;;  %v3230_v58 = vld [vmem:[%s18352_s30 + $0xc0] sm:$0xff]  ;;  %v1280_v63 = vpack.c.bf16 %v1205_v57, %v1204_v56 }
 0x140   : > { %v12444_v60 = vcombine.low %v3230_v58, %v3234_v59  ;;  %v12445_v61 = vcombine.high %v3230_v58, %v3234_v59  ;;  %v1220_v57 = vld [vmem:[%s15067_s4 + $0x3c0] sm:$0xff]  ;;  %v1221_v58 = vld [vmem:[%s15067_s4 + $0x3c8] sm:$0xff] }
 0x141   : > { %v3238_v59 = vld [vmem:[%s18352_s30 + $0x100] sm:$0xff] }
 0x142   : > { %3596 = vmatprep.subr.bf16.mxu0 %v12445_v61 }
 0x143   : > { %3597 = vmatpush1.bf16.msra.mxu0 %v12444_v60  ;;  %v3242_v60 = vld [vmem:[%s18352_s30 + $0x120] sm:$0xff] }
 0x146   : > { %13268 = vmatmul.mubr.msk.bf16.gmra.mrb[68].mxu0 %vm1300_vm2, %v1263_v3  ;;  %v1209_v3 = vld [vmem:[%s15067_s4 + $0x368] sm:$0xff] }
 0x147   : > { %13271 = vmatprep.mubr.msk.bf16.mxu0 %vm1300_vm2, %v1264_v4  ;;  %v1281_v4 = vpack.c.bf16 %v1207_v1, %v1206_v0  ;;  %v1282_v5 = vpack.c.bf16 %v1209_v3, %v1208_v2  ;;  %v12452_v0 = vcombine.low %v3238_v59, %v3242_v60  ;;  %v12453_v1 = vcombine.high %v3238_v59, %v3242_v60 }
 0x149   : > { %3598 = vmatprep.subr.bf16.mxu0 %v12453_v1 }
 0x14a   : > { %3599 = vmatpush1.bf16.msra.mxu0 %v12452_v0 }
 0x14e   : > { %13272 = vmatmul.mubr.msk.bf16.gmra.mrb[72].mxu0 %vm1300_vm2, %v1265_v9  ;;  %v1212_v9 = vld [vmem:[%s15067_s4 + $0x380] sm:$0xff] }
 0x14f   : > { %13275 = vmatprep.mubr.msk.bf16.mxu0 %vm1300_vm2, %v1266_v10  ;;  %v1213_v10 = vld [vmem:[%s15067_s4 + $0x388] sm:$0xff] }
 0x150   : > { %v1284_v17 = vpack.c.bf16 %v1213_v10, %v1212_v9  ;;  %v1288_v9 = vpack.c.bf16 %v1221_v58, %v1220_v57  ;;  %v3239_v10 = vld [vmem:[%s18352_s30 + $0x108] sm:$0xff] }
 0x156   : > { %13276 = vmatmul.mubr.msk.bf16.gmra.mrb[76].mxu0 %vm1300_vm2, %v1267_v15 }
 0x157   : > { %13279 = vmatprep.mubr.msk.bf16.mxu0 %vm1300_vm2, %v1268_v16 }
 0x15e   : > { %13280 = vmatmul.mubr.msk.bf16.gmra.mrb[80].mxu0 %vm1300_vm2, %v1269_v21 }
 0x15f   : > { %13283 = vmatprep.mubr.msk.bf16.mxu0 %vm1300_vm2, %v1270_v22 }
 0x166   : > { %13284 = vmatmul.mubr.msk.bf16.gmra.mrb[84].mxu0 %vm1300_vm2, %v1271_v31  ;;  %v1217_v31 = vld [vmem:[%s15067_s4 + $0x3a8] sm:$0xff] }
 0x167   : > { %13287 = vmatprep.mubr.msk.bf16.mxu0 %vm1300_vm2, %v1272_v32  ;;  %v1286_v43 = vpack.c.bf16 %v1217_v31, %v1216_v30 }
 0x16e   : > { %13288 = vmatmul.mubr.msk.bf16.gmra.mrb[88].mxu0 %vm1300_vm2, %v1273_v40  ;;  %v12431_v40 = vcombine.high %v3215_v27, %v3219_v28 }
 0x16f   : > { %13291 = vmatprep.mubr.msk.bf16.mxu0 %vm1300_vm2, %v1274_v41 }
 0x176   : > { %13292 = vmatmul.mubr.msk.bf16.gmra.mrb[92].mxu0 %vm1300_vm2, %v1275_v46 }
 0x177   : > { %13295 = vmatprep.mubr.msk.bf16.mxu0 %vm1300_vm2, %v1276_v47 }
 0x17e   : > { %13296 = vmatmul.mubr.msk.bf16.gmra.mrb[96].mxu0 %vm1300_vm2, %v1277_v52  ;;  %v1218_v52 = vld [vmem:[%s15067_s4 + $0x3b0] sm:$0xff] }
 0x17f   : > { %13299 = vmatprep.mubr.msk.bf16.mxu0 %vm1300_vm2, %v1278_v53  ;;  %v1219_v53 = vld [vmem:[%s15067_s4 + $0x3b8] sm:$0xff] }
 0x186   : > { %13300 = vmatmul.mubr.msk.bf16.gmra.mrb[100].mxu0 %vm1300_vm2, %v1279_v62 }
 0x187   : > { %13303 = vmatprep.mubr.msk.bf16.mxu0 %vm1300_vm2, %v1280_v63  ;;  %v12438_v63 = vcombine.low %v3223_v44, %v3227_v45  ;;  %v1226_v45 = vld [vmem:[%s15067_s4 + $0x3f0] sm:$0xff] }
 0x18e   : > { %13304 = vmatmul.mubr.msk.bf16.gmra.mrb[104].mxu0 %vm1300_vm2, %v1281_v4  ;;  %v1287_v4 = vpack.c.bf16 %v1219_v53, %v1218_v52 }
 0x18f   : > { %13307 = vmatprep.mubr.msk.bf16.mxu0 %vm1300_vm2, %v1282_v5  ;;  %v12447_v5 = vcombine.high %v3231_v33, %v3235_v36 }
 0x191   : > { %v13201_v11 = vpop.f32.mrb[0].mxu0 }
 0x192   : > { %v1543_v12 = vadd.f32 %v13201_v11, %v15305_v6  ;;  %v1534_v13 = vpop.f32.mrb[1].mxu0  ;;  %v3243_v11 = vld [vmem:[%s18352_s30 + $0x128] sm:$0xff] }
 0x193   : > { %v1535_v15 = vadd.f32 %v15305_v6, %v1534_v13  ;;  %v13202_v16 = vpop.f32.mrb[2].mxu0  ;;  %v12454_v28 = vcombine.low %v3239_v10, %v3243_v11 }
 0x194   : > { %v1546_v18 = vadd.f32 %v13202_v16, %v15305_v6  ;;  %v1537_v19 = vpop.f32.mrb[3].mxu0  ;;  %v2047_v21 = vmax.f32 %v1543_v12, 0.0 }
 0x195   : > { %v1538_v20 = vadd.f32 %v15305_v6, %v1537_v19  ;;  %v2045_v24 = vmax.f32 %v1535_v15, 0.0  ;;  %v12446_v15 = vcombine.low %v3231_v33, %v3235_v36 }
 0x196   : > { %v2048_v22 = vmax.f32 %v1546_v18, 0.0  ;;  %13308 = vmatmul.mubr.msk.bf16.gmra.mrb[108].mxu0 %vm1300_vm2, %v1283_v14  ;;  %v12455_v18 = vcombine.high %v3239_v10, %v3243_v11  ;;  %v3246_v11 = vld [vmem:[%s18352_s30 + $0x140] sm:$0xff] }
 0x197   : > { %v2046_v25 = vmax.f32 %v1538_v20, 0.0  ;;  %13311 = vmatprep.mubr.msk.bf16.mxu0 %vm1300_vm2, %v1284_v17 }
 0x198   : > { %v2174_v29 = vpack.c.bf16 %v2048_v22, %v2047_v21  ;;  %v1222_v21 = vld [vmem:[%s15067_s4 + $0x3d0] sm:$0xff]  ;;  %v1223_v22 = vld [vmem:[%s15067_s4 + $0x3d8] sm:$0xff] }
 0x199   : > { %v13205_v32 = vpop.f32.mrb[4].mxu0  ;;  %v2173_v34 = vpack.c.bf16 %v2046_v25, %v2045_v24  ;;  %v1224_v24 = vld [vmem:[%s15067_s4 + $0x3e0] sm:$0xff]  ;;  %v1225_v25 = vld [vmem:[%s15067_s4 + $0x3e8] sm:$0xff]  ;;  %v1289_v31 = vpack.c.bf16 %v1223_v22, %v1222_v21 }
 0x19a   : > { %v1559_v35 = vadd.f32 %v13205_v32, %v15305_v6  ;;  %v1550_v37 = vpop.f32.mrb[5].mxu0 }
 0x19b   : > { %v1551_v41 = vadd.f32 %v15305_v6, %v1550_v37  ;;  %v13206_v42 = vpop.f32.mrb[6].mxu0  ;;  %13335 = vmatprep.mubr.msk.bf16.mxu1 %vm2276_vm3, %v2173_v34 }
 0x19c   : > { %v1562_v46 = vadd.f32 %v13206_v42, %v15305_v6  ;;  %v1553_v47 = vpop.f32.mrb[7].mxu0  ;;  %13336 = vmatmul.mubr.msk.bf16.vlgmr.msra.gmra.mrb[0].mxu1 %vm2276_vm3, %v2174_v29  ;;  %v2051_v50 = vmax.f32 %v1559_v35, 0.0  ;;  %v1290_v35 = vpack.c.bf16 %v1225_v25, %v1224_v24 }
 0x19d   : > { %v1554_v48 = vadd.f32 %v15305_v6, %v1553_v47  ;;  %4264 = vmatpush1.bf16.msra.mxu1 %v12422_v38  ;;  %v2049_v55 = vmax.f32 %v1551_v41, 0.0 }
 0x19e   : > { %v2052_v51 = vmax.f32 %v1562_v46, 0.0  ;;  %13312 = vmatmul.mubr.msk.bf16.gmra.mrb[112].mxu0 %vm1300_vm2, %v1285_v39  ;;  %4265 = vmatprep.subr.bf16.mxu1 %v12431_v40  ;;  %v1227_v46 = vld [vmem:[%s15067_s4 + $0x3f8] sm:$0xff] }
 0x19f   : > { %v2050_v56 = vmax.f32 %v1554_v48, 0.0  ;;  %13315 = vmatprep.mubr.msk.bf16.mxu0 %vm1300_vm2, %v1286_v43  ;;  %v1291_v52 = vpack.c.bf16 %v1227_v46, %v1226_v45 }
 0x1a0   : > { %v2176_v38 = vpack.c.bf16 %v2052_v51, %v2051_v50 }
 0x1a1   : > { %v2175_v61 = vpack.c.bf16 %v2050_v56, %v2049_v55  ;;  %v13209_v62 = vpop.f32.mrb[8].mxu0  ;;  %4266 = vmatpush1.bf16.msra.mxu1 %v12430_v49 }
 0x1a2   : > { %v1575_v2 = vadd.f32 %v13209_v62, %v15305_v6  ;;  %v1566_v3 = vpop.f32.mrb[9].mxu0  ;;  %4267 = vmatprep.subr.bf16.mxu1 %v12439_v54 }
 0x1a3   : > { %v1567_v7 = vadd.f32 %v15305_v6, %v1566_v3  ;;  %v13210_v8 = vpop.f32.mrb[10].mxu0  ;;  %13339 = vmatprep.mubr.msk.bf16.mxu1 %vm2276_vm3, %v2175_v61 }
 0x1a4   : > { %v1578_v12 = vadd.f32 %v13210_v8, %v15305_v6  ;;  %v1569_v13 = vpop.f32.mrb[11].mxu0  ;;  %13340 = vmatmul.mubr.msk.bf16.gmra.mrb[4].mxu1 %vm2276_vm3, %v2176_v38  ;;  %v2055_v16 = vmax.f32 %v1575_v2, 0.0 }
 0x1a5   : > { %v1570_v14 = vadd.f32 %v15305_v6, %v1569_v13  ;;  %4268 = vmatpush1.bf16.msra.mxu1 %v12438_v63  ;;  %v2053_v19 = vmax.f32 %v1567_v7, 0.0  ;;  %v3247_v13 = vld [vmem:[%s18352_s30 + $0x148] sm:$0xff] }
 0x1a6   : > { %v2056_v17 = vmax.f32 %v1578_v12, 0.0  ;;  %13316 = vmatmul.mubr.msk.bf16.gmra.mrb[116].mxu0 %vm1300_vm2, %v1287_v4  ;;  %4269 = vmatprep.subr.bf16.mxu1 %v12447_v5  ;;  %v3250_v12 = vld [vmem:[%s18352_s30 + $0x160] sm:$0xff] }
 0x1a7   : > { %v2054_v20 = vmax.f32 %v1570_v14, 0.0  ;;  %13319 = vmatprep.mubr.msk.bf16.mxu0 %vm1300_vm2, %v1288_v9 }
 0x1a8   : > { %v2178_v23 = vpack.c.bf16 %v2056_v17, %v2055_v16  ;;  %v12460_v16 = vcombine.low %v3246_v11, %v3250_v12  ;;  %v12461_v17 = vcombine.high %v3246_v11, %v3250_v12  ;;  %v3254_v12 = vld [vmem:[%s18352_s30 + $0x180] sm:$0xff] }
 0x1a9   : > { %v2177_v26 = vpack.c.bf16 %v2054_v20, %v2053_v19  ;;  %v13213_v27 = vpop.f32.mrb[12].mxu0  ;;  %4270 = vmatpush1.bf16.msra.mxu1 %v12446_v15 }
 0x1aa   : > { %v1591_v29 = vadd.f32 %v13213_v27, %v15305_v6  ;;  %v1582_v30 = vpop.f32.mrb[13].mxu0  ;;  %4271 = vmatprep.subr.bf16.mxu1 %v12455_v18  ;;  %v3251_v18 = vld [vmem:[%s18352_s30 + $0x168] sm:$0xff]  ;;  %3600 = vmatprep.subr.bf16.mxu0 %v12461_v17 }
 0x1ab   : > { %v1583_v32 = vadd.f32 %v15305_v6, %v1582_v30  ;;  %v13214_v34 = vpop.f32.mrb[14].mxu0  ;;  %13343 = vmatprep.mubr.msk.bf16.mxu1 %vm2276_vm3, %v2177_v26  ;;  %v12462_v21 = vcombine.low %v3247_v13, %v3251_v18  ;;  %v12463_v22 = vcombine.high %v3247_v13, %v3251_v18  ;;  %3601 = vmatpush1.bf16.msra.mxu0 %v12460_v16  ;;  %v3258_v13 = vld [vmem:[%s18352_s30 + $0x1a0] sm:$0xff] }
 0x1ac   : > { %v1594_v37 = vadd.f32 %v13214_v34, %v15305_v6  ;;  %v1585_v39 = vpop.f32.mrb[15].mxu0  ;;  %13344 = vmatmul.mubr.msk.bf16.gmra.mrb[8].mxu1 %vm2276_vm3, %v2178_v23  ;;  %v2059_v41 = vmax.f32 %v1591_v29, 0.0  ;;  %v12468_v17 = vcombine.low %v3254_v12, %v3258_v13  ;;  %v12469_v18 = vcombine.high %v3254_v12, %v3258_v13 }
 0x1ad   : > { %v1586_v40 = vadd.f32 %v15305_v6, %v1585_v39  ;;  %4272 = vmatpush1.bf16.msra.mxu1 %v12454_v28  ;;  %v2057_v43 = vmax.f32 %v1583_v32, 0.0 }
 0x1ae   : > { %v2060_v42 = vmax.f32 %v1594_v37, 0.0  ;;  %13320 = vmatmul.mubr.msk.bf16.gmra.mrb[120].mxu0 %vm1300_vm2, %v1289_v31  ;;  %4273 = vmatprep.subr.bf16.mxu1 %v12463_v22 }
 0x1af   : > { %v2058_v44 = vmax.f32 %v1586_v40, 0.0  ;;  %13323 = vmatprep.mubr.msk.bf16.mxu0 %vm1300_vm2, %v1290_v35  ;;  %3602 = vmatprep.subr.bf16.mxu0 %v12469_v18  ;;  %v3263_v18 = vld [vmem:[%s18352_s30 + $0x1c8] sm:$0xff] }
 0x1b0   : > { %v2180_v47 = vpack.c.bf16 %v2060_v42, %v2059_v41  ;;  %3603 = vmatpush1.bf16.msra.mxu0 %v12468_v17 }
 0x1b1   : > { %v2179_v48 = vpack.c.bf16 %v2058_v44, %v2057_v43  ;;  %v13217_v49 = vpop.f32.mrb[16].mxu0  ;;  %4274 = vmatpush1.bf16.msra.mxu1 %v12462_v21 }
 0x1b2   : > { %v1607_v50 = vadd.f32 %v13217_v49, %v15305_v6  ;;  %v1598_v51 = vpop.f32.mrb[17].mxu0 }
 0x1b3   : > { %v1599_v53 = vadd.f32 %v15305_v6, %v1598_v51  ;;  %v13218_v54 = vpop.f32.mrb[18].mxu0  ;;  %13347 = vmatprep.mubr.msk.bf16.mxu1 %vm2276_vm3, %v2179_v48 }
 0x1b4   : > { %v1610_v55 = vadd.f32 %v13218_v54, %v15305_v6  ;;  %v1601_v56 = vpop.f32.mrb[19].mxu0  ;;  %13348 = vmatmul.mubr.msk.bf16.gmra.mrb[12].mxu1 %vm2276_vm3, %v2180_v47  ;;  %v2063_v33 = vmax.f32 %v1607_v50, 0.0 }
 0x1b5   : > { %v1602_v57 = vadd.f32 %v15305_v6, %v1601_v56  ;;  %v2061_v38 = vmax.f32 %v1599_v53, 0.0 }
 0x1b6   : > { %v2064_v36 = vmax.f32 %v1610_v55, 0.0  ;;  %13324 = vmatmul.mubr.msk.bf16.gmra.mrb[124].mxu0 %vm1300_vm2, %v1291_v52 }
 0x1b7   : > { %v2062_v58 = vmax.f32 %v1602_v57, 0.0 }
 0x1b8   : > { %v2182_v59 = vpack.c.bf16 %v2064_v36, %v2063_v33 }
 0x1b9   : > { %v2181_v60 = vpack.c.bf16 %v2062_v58, %v2061_v38  ;;  %v13221_v61 = vpop.f32.mrb[20].mxu0 }
 0x1ba   : > { %v1623_v62 = vadd.f32 %v13221_v61, %v15305_v6  ;;  %v1614_v63 = vpop.f32.mrb[21].mxu0 }
 0x1bb   : > { %v1615_v0 = vadd.f32 %v15305_v6, %v1614_v63  ;;  %v13222_v1 = vpop.f32.mrb[22].mxu0  ;;  %13351 = vmatprep.mubr.msk.bf16.mxu1 %vm2276_vm3, %v2181_v60 }
 0x1bc   : > { %v1626_v2 = vadd.f32 %v13222_v1, %v15305_v6  ;;  %v1617_v3 = vpop.f32.mrb[23].mxu0  ;;  %13352 = vmatmul.mubr.msk.bf16.gmra.mrb[16].mxu1 %vm2276_vm3, %v2182_v59  ;;  %v2067_v5 = vmax.f32 %v1623_v62, 0.0 }
 0x1bd   : > { %v1618_v4 = vadd.f32 %v15305_v6, %v1617_v3  ;;  %v2065_v8 = vmax.f32 %v1615_v0, 0.0 }
 0x1be   : > { %v2068_v7 = vmax.f32 %v1626_v2, 0.0 }
 0x1bf   : > { %v2066_v9 = vmax.f32 %v1618_v4, 0.0 }
 0x1c0   : > { %v2184_v10 = vpack.c.bf16 %v2068_v7, %v2067_v5 }
 0x1c1   : > { %v2183_v14 = vpack.c.bf16 %v2066_v9, %v2065_v8  ;;  %v13225_v15 = vpop.f32.mrb[24].mxu0 }
 0x1c2   : > { %v1639_v19 = vadd.f32 %v13225_v15, %v15305_v6  ;;  %v1630_v20 = vpop.f32.mrb[25].mxu0 }
 0x1c3   : > { %v1631_v23 = vadd.f32 %v15305_v6, %v1630_v20  ;;  %v13226_v24 = vpop.f32.mrb[26].mxu0  ;;  %13355 = vmatprep.mubr.msk.bf16.mxu1 %vm2276_vm3, %v2183_v14  ;;  %v3255_v14 = vld [vmem:[%s18352_s30 + $0x188] sm:$0xff] }
 0x1c4   : > { %v1642_v25 = vadd.f32 %v13226_v24, %v15305_v6  ;;  %v1633_v26 = vpop.f32.mrb[27].mxu0  ;;  %13356 = vmatmul.mubr.msk.bf16.gmra.mrb[20].mxu1 %vm2276_vm3, %v2184_v10  ;;  %v2071_v28 = vmax.f32 %v1639_v19, 0.0  ;;  %v3259_v19 = vld [vmem:[%s18352_s30 + $0x1a8] sm:$0xff] }
 0x1c5   : > { %v1634_v27 = vadd.f32 %v15305_v6, %v1633_v26  ;;  %v2069_v30 = vmax.f32 %v1631_v23, 0.0  ;;  %v12470_v22 = vcombine.low %v3255_v14, %v3259_v19  ;;  %v12471_v23 = vcombine.high %v3255_v14, %v3259_v19  ;;  %v3267_v19 = vld [vmem:[%s18352_s30 + $0x1e8] sm:$0xff] }
 0x1c6   : > { %v2072_v29 = vmax.f32 %v1642_v25, 0.0 }
 0x1c7   : > { %v2070_v31 = vmax.f32 %v1634_v27, 0.0  ;;  %4275 = vmatprep.subr.bf16.mxu1 %v12471_v23  ;;  %v12479_v23 = vcombine.high %v3263_v18, %v3267_v19 }
 0x1c8   : > { %v2186_v32 = vpack.c.bf16 %v2072_v29, %v2071_v28  ;;  %4276 = vmatpush1.bf16.msra.mxu1 %v12470_v22  ;;  %v12478_v22 = vcombine.low %v3263_v18, %v3267_v19 }
 0x1c9   : > { %v2185_v34 = vpack.c.bf16 %v2070_v31, %v2069_v30  ;;  %v13229_v35 = vpop.f32.mrb[28].mxu0  ;;  %4277 = vmatprep.subr.bf16.mxu1 %v12479_v23 }
 0x1ca   : > { %v1655_v37 = vadd.f32 %v13229_v35, %v15305_v6  ;;  %v1646_v39 = vpop.f32.mrb[29].mxu0 }
 0x1cb   : > { %v1647_v40 = vadd.f32 %v15305_v6, %v1646_v39  ;;  %v13230_v41 = vpop.f32.mrb[30].mxu0  ;;  %13359 = vmatprep.mubr.msk.bf16.mxu1 %vm2276_vm3, %v2185_v34 }
 0x1cc   : > { %v1658_v42 = vadd.f32 %v13230_v41, %v15305_v6  ;;  %v1649_v43 = vpop.f32.mrb[31].mxu0  ;;  %13360 = vmatmul.mubr.msk.bf16.gmra.mrb[24].mxu1 %vm2276_vm3, %v2186_v32  ;;  %v2075_v45 = vmax.f32 %v1655_v37, 0.0 }
 0x1cd   : > { %v1650_v44 = vadd.f32 %v15305_v6, %v1649_v43  ;;  %v2073_v47 = vmax.f32 %v1647_v40, 0.0  ;;  %4278 = vmatpush1.bf16.msra.mxu1 %v12478_v22 }
 0x1ce   : > { %v2076_v46 = vmax.f32 %v1658_v42, 0.0 }
 0x1cf   : > { %v2074_v48 = vmax.f32 %v1650_v44, 0.0 }
 0x1d0   : > { %v2188_v49 = vpack.c.bf16 %v2076_v46, %v2075_v45 }
 0x1d1   : > { %v2187_v50 = vpack.c.bf16 %v2074_v48, %v2073_v47  ;;  %v13233_v51 = vpop.f32.mrb[32].mxu0 }
 0x1d2   : > { %v1671_v52 = vadd.f32 %v13233_v51, %v15305_v6  ;;  %v1662_v53 = vpop.f32.mrb[33].mxu0 }
 0x1d3   : > { %v1663_v54 = vadd.f32 %v15305_v6, %v1662_v53  ;;  %v13234_v55 = vpop.f32.mrb[34].mxu0  ;;  %13363 = vmatprep.mubr.msk.bf16.mxu1 %vm2276_vm3, %v2187_v50 }
 0x1d4   : > { %v1674_v56 = vadd.f32 %v13234_v55, %v15305_v6  ;;  %v1665_v57 = vpop.f32.mrb[35].mxu0  ;;  %13364 = vmatmul.mubr.msk.bf16.gmra.mrb[28].mxu1 %vm2276_vm3, %v2188_v49  ;;  %v2079_v36 = vmax.f32 %v1671_v52, 0.0  ;;  %v3262_v55 = vld [vmem:[%s18352_s30 + $0x1c0] sm:$0xff] }
 0x1d5   : > { %v1666_v33 = vadd.f32 %v15305_v6, %v1665_v57  ;;  %v2077_v58 = vmax.f32 %v1663_v54, 0.0 }
 0x1d6   : > { %v2080_v38 = vmax.f32 %v1674_v56, 0.0  ;;  %v3266_v56 = vld [vmem:[%s18352_s30 + $0x1e0] sm:$0xff] }
 0x1d7   : > { %v2078_v59 = vmax.f32 %v1666_v33, 0.0 }
 0x1d8   : > { %v2190_v60 = vpack.c.bf16 %v2080_v38, %v2079_v36  ;;  %v12477_v36 = vcombine.high %v3262_v55, %v3266_v56 }
 0x1d9   : > { %v2189_v61 = vpack.c.bf16 %v2078_v59, %v2077_v58  ;;  %v13237_v62 = vpop.f32.mrb[36].mxu0  ;;  %v12476_v59 = vcombine.low %v3262_v55, %v3266_v56 }
 0x1da   : > { %v1687_v63 = vadd.f32 %v13237_v62, %v15305_v6  ;;  %v1678_v0 = vpop.f32.mrb[37].mxu0  ;;  %3604 = vmatprep.subr.bf16.mxu0 %v12477_v36 }
 0x1db   : > { %v1679_v1 = vadd.f32 %v15305_v6, %v1678_v0  ;;  %v13238_v2 = vpop.f32.mrb[38].mxu0  ;;  %13367 = vmatprep.mubr.msk.bf16.mxu1 %vm2276_vm3, %v2189_v61  ;;  %3605 = vmatpush1.bf16.msra.mxu0 %v12476_v59 }
 0x1dc   : > { %v1690_v3 = vadd.f32 %v13238_v2, %v15305_v6  ;;  %v1681_v4 = vpop.f32.mrb[39].mxu0  ;;  %13368 = vmatmul.mubr.msk.bf16.gmra.mrb[32].mxu1 %vm2276_vm3, %v2190_v60  ;;  %v2083_v7 = vmax.f32 %v1687_v63, 0.0  ;;  %v18304_v2 = vmov 0  }
 0x1dd   : > { %v1682_v5 = vadd.f32 %v15305_v6, %v1681_v4  ;;  %v2081_v9 = vmax.f32 %v1679_v1, 0.0  ;;  %3622 = vmatprep.mubr.bf16.mxu0 %v18304_v2 }
 0x1de   : > { %v2084_v8 = vmax.f32 %v1690_v3, 0.0 }
 0x1df   : > { %v2082_v10 = vmax.f32 %v1682_v5, 0.0 }
 0x1e0   : > { %v2192_v11 = vpack.c.bf16 %v2084_v8, %v2083_v7 }
 0x1e1   : > { %v2191_v15 = vpack.c.bf16 %v2082_v10, %v2081_v9  ;;  %v13241_v16 = vpop.f32.mrb[40].mxu0 }
 0x1e2   : > { %v1703_v20 = vadd.f32 %v13241_v16, %v15305_v6  ;;  %v1694_v21 = vpop.f32.mrb[41].mxu0 }
 0x1e3   : > { %v1695_v24 = vadd.f32 %v15305_v6, %v1694_v21  ;;  %v13242_v25 = vpop.f32.mrb[42].mxu0  ;;  %13371 = vmatprep.mubr.msk.bf16.mxu1 %vm2276_vm3, %v2191_v15 }
 0x1e4   : > { %v1706_v26 = vadd.f32 %v13242_v25, %v15305_v6  ;;  %v1697_v27 = vpop.f32.mrb[43].mxu0  ;;  %13372 = vmatmul.mubr.msk.bf16.gmra.mrb[36].mxu1 %vm2276_vm3, %v2192_v11  ;;  %v2087_v29 = vmax.f32 %v1703_v20, 0.0 }
 0x1e5   : > { %v1698_v28 = vadd.f32 %v15305_v6, %v1697_v27  ;;  %v2085_v31 = vmax.f32 %v1695_v24, 0.0 }
 0x1e6   : > { %v2088_v30 = vmax.f32 %v1706_v26, 0.0 }
 0x1e7   : > { %v2086_v32 = vmax.f32 %v1698_v28, 0.0 }
 0x1e8   : > { %v2194_v34 = vpack.c.bf16 %v2088_v30, %v2087_v29 }
 0x1e9   : > { %v2193_v35 = vpack.c.bf16 %v2086_v32, %v2085_v31  ;;  %v13245_v37 = vpop.f32.mrb[44].mxu0 }
 0x1ea   : > { %v1719_v39 = vadd.f32 %v13245_v37, %v15305_v6  ;;  %v1710_v40 = vpop.f32.mrb[45].mxu0 }
 0x1eb   : > { %v1711_v41 = vadd.f32 %v15305_v6, %v1710_v40  ;;  %v13246_v42 = vpop.f32.mrb[46].mxu0  ;;  %13375 = vmatprep.mubr.msk.bf16.mxu1 %vm2276_vm3, %v2193_v35 }
 0x1ec   : > { %v1722_v43 = vadd.f32 %v13246_v42, %v15305_v6  ;;  %v1713_v44 = vpop.f32.mrb[47].mxu0  ;;  %13376 = vmatmul.mubr.msk.bf16.gmra.mrb[40].mxu1 %vm2276_vm3, %v2194_v34  ;;  %v2091_v46 = vmax.f32 %v1719_v39, 0.0 }
 0x1ed   : > { %v1714_v45 = vadd.f32 %v15305_v6, %v1713_v44  ;;  %v2089_v48 = vmax.f32 %v1711_v41, 0.0 }
 0x1ee   : > { %v2092_v47 = vmax.f32 %v1722_v43, 0.0 }
 0x1ef   : > { %v2090_v49 = vmax.f32 %v1714_v45, 0.0 }
 0x1f0   : > { %v2196_v50 = vpack.c.bf16 %v2092_v47, %v2091_v46 }
 0x1f1   : > { %v2195_v51 = vpack.c.bf16 %v2090_v49, %v2089_v48  ;;  %v13249_v52 = vpop.f32.mrb[48].mxu0 }
 0x1f2   : > { %v1735_v53 = vadd.f32 %v13249_v52, %v15305_v6  ;;  %v1726_v54 = vpop.f32.mrb[49].mxu0 }
 0x1f3   : > { %v1727_v57 = vadd.f32 %v15305_v6, %v1726_v54  ;;  %v13250_v33 = vpop.f32.mrb[50].mxu0  ;;  %13379 = vmatprep.mubr.msk.bf16.mxu1 %vm2276_vm3, %v2195_v51 }
 0x1f4   : > { %v1738_v38 = vadd.f32 %v13250_v33, %v15305_v6  ;;  %v1729_v58 = vpop.f32.mrb[51].mxu0  ;;  %13380 = vmatmul.mubr.msk.bf16.gmra.mrb[44].mxu1 %vm2276_vm3, %v2196_v50  ;;  %v2095_v61 = vmax.f32 %v1735_v53, 0.0 }
 0x1f5   : > { %v1730_v60 = vadd.f32 %v15305_v6, %v1729_v58  ;;  %v2093_v63 = vmax.f32 %v1727_v57, 0.0 }
 0x1f6   : > { %v2096_v62 = vmax.f32 %v1738_v38, 0.0 }
 0x1f7   : > { %v2094_v0 = vmax.f32 %v1730_v60, 0.0 }
 0x1f8   : > { %v2198_v1 = vpack.c.bf16 %v2096_v62, %v2095_v61 }
 0x1f9   : > { %v2197_v3 = vpack.c.bf16 %v2094_v0, %v2093_v63  ;;  %v13253_v4 = vpop.f32.mrb[52].mxu0 }
 0x1fa   : > { %v1751_v5 = vadd.f32 %v13253_v4, %v15305_v6  ;;  %v1742_v7 = vpop.f32.mrb[53].mxu0 }
 0x1fb   : > { %v1743_v8 = vadd.f32 %v15305_v6, %v1742_v7  ;;  %v13254_v9 = vpop.f32.mrb[54].mxu0  ;;  %13383 = vmatprep.mubr.msk.bf16.mxu1 %vm2276_vm3, %v2197_v3 }
 0x1fc   : > { %v1754_v10 = vadd.f32 %v13254_v9, %v15305_v6  ;;  %v1745_v11 = vpop.f32.mrb[55].mxu0  ;;  %13384 = vmatmul.mubr.msk.bf16.gmra.mrb[48].mxu1 %vm2276_vm3, %v2198_v1  ;;  %v2099_v13 = vmax.f32 %v1751_v5, 0.0 }
 0x1fd   : > { %v1746_v12 = vadd.f32 %v15305_v6, %v1745_v11  ;;  %v2097_v15 = vmax.f32 %v1743_v8, 0.0 }
 0x1fe   : > { %v2100_v14 = vmax.f32 %v1754_v10, 0.0 }
 0x1ff   : > { %v2098_v16 = vmax.f32 %v1746_v12, 0.0 }
 0x200   : > { %v2200_v17 = vpack.c.bf16 %v2100_v14, %v2099_v13 }
 0x201   : > { %v2199_v20 = vpack.c.bf16 %v2098_v16, %v2097_v15  ;;  %v13257_v21 = vpop.f32.mrb[56].mxu0  ;;  %v15514_v15 = vld [vmem:[%s18352_s30 + $0x10] sm:$0xff] }
 0x202   : > { %v1767_v24 = vadd.f32 %v13257_v21, %v15305_v6  ;;  %v1758_v25 = vpop.f32.mrb[57].mxu0  ;;  %v15519_v16 = vld [vmem:[%s18352_s30 + $0x30] sm:$0xff]  ;;  %v15533_v21 = vld [vmem:[%s18352_s30 + $0x38] sm:$0xff] }
 0x203   : > { %v1759_v26 = vadd.f32 %v15305_v6, %v1758_v25  ;;  %v13258_v27 = vpop.f32.mrb[58].mxu0  ;;  %13387 = vmatprep.mubr.msk.bf16.mxu1 %vm2276_vm3, %v2199_v20  ;;  %v12424_v19 = vcombine.low %v15514_v15, %v15519_v16  ;;  %v12425_v20 = vcombine.high %v15514_v15, %v15519_v16 }
 0x204   : > { %v1770_v28 = vadd.f32 %v13258_v27, %v15305_v6  ;;  %v1761_v29 = vpop.f32.mrb[59].mxu0  ;;  %13388 = vmatmul.mubr.msk.bf16.gmra.mrb[52].mxu1 %vm2276_vm3, %v2200_v17  ;;  %v2103_v31 = vmax.f32 %v1767_v24, 0.0  ;;  %v15524_v17 = vld [vmem:[%s18352_s30 + $0x18] sm:$0xff] }
 0x205   : > { %v1762_v30 = vadd.f32 %v15305_v6, %v1761_v29  ;;  %v2101_v34 = vmax.f32 %v1759_v26, 0.0  ;;  %v12426_v24 = vcombine.low %v15524_v17, %v15533_v21  ;;  %v12427_v25 = vcombine.high %v15524_v17, %v15533_v21  ;;  %4936 = vmatprep.subr.bf16.mxu0 %v12425_v20  ;;  %v3225_v17 = vld [vmem:[%s18352_s30 + $0x98] sm:$0xff] }
 0x206   : > { %v2104_v32 = vmax.f32 %v1770_v28, 0.0 }
 0x207   : > { %v2102_v35 = vmax.f32 %v1762_v30, 0.0  ;;  %5609 = vmatprep.subr.bf16.mxu1 %v12427_v25 }
 0x208   : > { %v2202_v37 = vpack.c.bf16 %v2104_v32, %v2103_v31 }
 0x209   : > { %v2201_v39 = vpack.c.bf16 %v2102_v35, %v2101_v34  ;;  %v13261_v40 = vpop.f32.mrb[60].mxu0 }
 0x20a   : > { %v1783_v41 = vadd.f32 %v13261_v40, %v15305_v6  ;;  %v1774_v42 = vpop.f32.mrb[61].mxu0 }
 0x20b   : > { %v1775_v43 = vadd.f32 %v15305_v6, %v1774_v42  ;;  %v13262_v44 = vpop.f32.mrb[62].mxu0  ;;  %13391 = vmatprep.mubr.msk.bf16.mxu1 %vm2276_vm3, %v2201_v39 }
 0x20c   : > { %v1786_v45 = vadd.f32 %v13262_v44, %v15305_v6  ;;  %v1777_v46 = vpop.f32.mrb[63].mxu0  ;;  %13392 = vmatmul.mubr.msk.bf16.gmra.mrb[56].mxu1 %vm2276_vm3, %v2202_v37  ;;  %v2107_v48 = vmax.f32 %v1783_v41, 0.0 }
 0x20d   : > { %v1778_v47 = vadd.f32 %v15305_v6, %v1777_v46  ;;  %v2105_v50 = vmax.f32 %v1775_v43, 0.0 }
 0x20e   : > { %v2108_v49 = vmax.f32 %v1786_v45, 0.0 }
 0x20f   : > { %v2106_v51 = vmax.f32 %v1778_v47, 0.0 }
 0x210   : > { %v2204_v52 = vpack.c.bf16 %v2108_v49, %v2107_v48 }
 0x211   : > { %v2203_v53 = vpack.c.bf16 %v2106_v51, %v2105_v50  ;;  %v13265_v54 = vpop.f32.mrb[64].mxu0 }
 0x212   : > { %v1799_v55 = vadd.f32 %v13265_v54, %v15305_v6  ;;  %v1790_v56 = vpop.f32.mrb[65].mxu0 }
 0x213   : > { %v1791_v57 = vadd.f32 %v15305_v6, %v1790_v56  ;;  %v13266_v33 = vpop.f32.mrb[66].mxu0  ;;  %13395 = vmatprep.mubr.msk.bf16.mxu1 %vm2276_vm3, %v2203_v53 }
 0x214   : > { %v1802_v36 = vadd.f32 %v13266_v33, %v15305_v6  ;;  %v1793_v38 = vpop.f32.mrb[67].mxu0  ;;  %13396 = vmatmul.mubr.msk.bf16.gmra.mrb[60].mxu1 %vm2276_vm3, %v2204_v52  ;;  %v2111_v59 = vmax.f32 %v1799_v55, 0.0 }
 0x215   : > { %v1794_v58 = vadd.f32 %v15305_v6, %v1793_v38  ;;  %v2109_v61 = vmax.f32 %v1791_v57, 0.0 }
 0x216   : > { %v2112_v60 = vmax.f32 %v1802_v36, 0.0 }
 0x217   : > { %v2110_v62 = vmax.f32 %v1794_v58, 0.0 }
 0x218   : > { %v2206_v63 = vpack.c.bf16 %v2112_v60, %v2111_v59 }
 0x219   : > { %v2205_v0 = vpack.c.bf16 %v2110_v62, %v2109_v61  ;;  %v13269_v1 = vpop.f32.mrb[68].mxu0 }
 0x21a   : > { %v1815_v3 = vadd.f32 %v13269_v1, %v15305_v6  ;;  %v1806_v4 = vpop.f32.mrb[69].mxu0 }
 0x21b   : > { %v1807_v5 = vadd.f32 %v15305_v6, %v1806_v4  ;;  %v13270_v7 = vpop.f32.mrb[70].mxu0  ;;  %13399 = vmatprep.mubr.msk.bf16.mxu1 %vm2276_vm3, %v2205_v0 }
 0x21c   : > { %v1818_v8 = vadd.f32 %v13270_v7, %v15305_v6  ;;  %v1809_v9 = vpop.f32.mrb[71].mxu0  ;;  %13400 = vmatmul.mubr.msk.bf16.gmra.mrb[64].mxu1 %vm2276_vm3, %v2206_v63  ;;  %v2115_v11 = vmax.f32 %v1815_v3, 0.0 }
 0x21d   : > { %v1810_v10 = vadd.f32 %v15305_v6, %v1809_v9  ;;  %v2113_v13 = vmax.f32 %v1807_v5, 0.0 }
 0x21e   : > { %v2116_v12 = vmax.f32 %v1818_v8, 0.0 }
 0x21f   : > { %v2114_v14 = vmax.f32 %v1810_v10, 0.0 }
 0x220   : > { %v2208_v18 = vpack.c.bf16 %v2116_v12, %v2115_v11 }
 0x221   : > { %v2207_v22 = vpack.c.bf16 %v2114_v14, %v2113_v13  ;;  %v13273_v23 = vpop.f32.mrb[72].mxu0 }
 0x222   : > { %v1831_v26 = vadd.f32 %v13273_v23, %v15305_v6  ;;  %v1822_v27 = vpop.f32.mrb[73].mxu0 }
 0x223   : > { %v1823_v28 = vadd.f32 %v15305_v6, %v1822_v27  ;;  %v13274_v29 = vpop.f32.mrb[74].mxu0  ;;  %13403 = vmatprep.mubr.msk.bf16.mxu1 %vm2276_vm3, %v2207_v22 }
 0x224   : > { %v1834_v30 = vadd.f32 %v13274_v29, %v15305_v6  ;;  %v1825_v31 = vpop.f32.mrb[75].mxu0  ;;  %13404 = vmatmul.mubr.msk.bf16.gmra.mrb[68].mxu1 %vm2276_vm3, %v2208_v18  ;;  %v2119_v34 = vmax.f32 %v1831_v26, 0.0 }
 0x225   : > { %v1826_v32 = vadd.f32 %v15305_v6, %v1825_v31  ;;  %v2117_v37 = vmax.f32 %v1823_v28, 0.0 }
 0x226   : > { %v2120_v35 = vmax.f32 %v1834_v30, 0.0 }
 0x227   : > { %v2118_v39 = vmax.f32 %v1826_v32, 0.0 }
 0x228   : > { %v2210_v40 = vpack.c.bf16 %v2120_v35, %v2119_v34 }
 0x229   : > { %v2209_v41 = vpack.c.bf16 %v2118_v39, %v2117_v37  ;;  %v13277_v42 = vpop.f32.mrb[76].mxu0 }
 0x22a   : > { %v1847_v43 = vadd.f32 %v13277_v42, %v15305_v6  ;;  %v1838_v44 = vpop.f32.mrb[77].mxu0 }
 0x22b   : > { %v1839_v45 = vadd.f32 %v15305_v6, %v1838_v44  ;;  %v13278_v46 = vpop.f32.mrb[78].mxu0  ;;  %13407 = vmatprep.mubr.msk.bf16.mxu1 %vm2276_vm3, %v2209_v41 }
 0x22c   : > { %v1850_v47 = vadd.f32 %v13278_v46, %v15305_v6  ;;  %v1841_v48 = vpop.f32.mrb[79].mxu0  ;;  %13408 = vmatmul.mubr.msk.bf16.gmra.mrb[72].mxu1 %vm2276_vm3, %v2210_v40  ;;  %v2123_v50 = vmax.f32 %v1847_v43, 0.0 }
 0x22d   : > { %v1842_v49 = vadd.f32 %v15305_v6, %v1841_v48  ;;  %v2121_v52 = vmax.f32 %v1839_v45, 0.0 }
 0x22e   : > { %v2124_v51 = vmax.f32 %v1850_v47, 0.0 }
 0x22f   : > { %v2122_v53 = vmax.f32 %v1842_v49, 0.0 }
 0x230   : > { %v2212_v54 = vpack.c.bf16 %v2124_v51, %v2123_v50 }
 0x231   : > { %v2211_v55 = vpack.c.bf16 %v2122_v53, %v2121_v52  ;;  %v13281_v56 = vpop.f32.mrb[80].mxu0 }
 0x232   : > { %v1863_v57 = vadd.f32 %v13281_v56, %v15305_v6  ;;  %v1854_v33 = vpop.f32.mrb[81].mxu0 }
 0x233   : > { %v1855_v36 = vadd.f32 %v15305_v6, %v1854_v33  ;;  %v13282_v38 = vpop.f32.mrb[82].mxu0  ;;  %13411 = vmatprep.mubr.msk.bf16.mxu1 %vm2276_vm3, %v2211_v55 }
 0x234   : > { %v1866_v58 = vadd.f32 %v13282_v38, %v15305_v6  ;;  %v1857_v59 = vpop.f32.mrb[83].mxu0  ;;  %13412 = vmatmul.mubr.msk.bf16.gmra.mrb[76].mxu1 %vm2276_vm3, %v2212_v54  ;;  %v2127_v61 = vmax.f32 %v1863_v57, 0.0 }
 0x235   : > { %v1858_v60 = vadd.f32 %v15305_v6, %v1857_v59  ;;  %v2125_v63 = vmax.f32 %v1855_v36, 0.0 }
 0x236   : > { %v2128_v62 = vmax.f32 %v1866_v58, 0.0 }
 0x237   : > { %v2126_v0 = vmax.f32 %v1858_v60, 0.0 }
 0x238   : > { %v2214_v1 = vpack.c.bf16 %v2128_v62, %v2127_v61 }
 0x239   : > { %v2213_v3 = vpack.c.bf16 %v2126_v0, %v2125_v63  ;;  %v13285_v4 = vpop.f32.mrb[84].mxu0 }
 0x23a   : > { %v1879_v5 = vadd.f32 %v13285_v4, %v15305_v6  ;;  %v1870_v7 = vpop.f32.mrb[85].mxu0 }
 0x23b   : > { %v1871_v8 = vadd.f32 %v15305_v6, %v1870_v7  ;;  %v13286_v9 = vpop.f32.mrb[86].mxu0  ;;  %13415 = vmatprep.mubr.msk.bf16.mxu1 %vm2276_vm3, %v2213_v3 }
 0x23c   : > { %v1882_v10 = vadd.f32 %v13286_v9, %v15305_v6  ;;  %v1873_v11 = vpop.f32.mrb[87].mxu0  ;;  %13416 = vmatmul.mubr.msk.bf16.gmra.mrb[80].mxu1 %vm2276_vm3, %v2214_v1  ;;  %v2131_v13 = vmax.f32 %v1879_v5, 0.0  ;;  %v15584_v5 = vld [vmem:[%s18354_s8] ss:$0 sm:$0xff] }
 0x23d   : > { %v1874_v12 = vadd.f32 %v15305_v6, %v1873_v11  ;;  %v2129_v18 = vmax.f32 %v1871_v8, 0.0 }
 0x23e   : > { %v2132_v14 = vmax.f32 %v1882_v10, 0.0 }
 0x23f   : > { %v2130_v20 = vmax.f32 %v1874_v12, 0.0 }
 0x240   : > { %v2216_v22 = vpack.c.bf16 %v2132_v14, %v2131_v13 }
 0x241   : > { %v2215_v23 = vpack.c.bf16 %v2130_v20, %v2129_v18  ;;  %v13289_v25 = vpop.f32.mrb[88].mxu0 }
 0x242   : > { %v1895_v26 = vadd.f32 %v13289_v25, %v15305_v6  ;;  %v1886_v27 = vpop.f32.mrb[89].mxu0 }
 0x243   : > { %v1887_v28 = vadd.f32 %v15305_v6, %v1886_v27  ;;  %v13290_v29 = vpop.f32.mrb[90].mxu0  ;;  %13419 = vmatprep.mubr.msk.bf16.mxu1 %vm2276_vm3, %v2215_v23 }
 0x244   : > { %v1898_v30 = vadd.f32 %v13290_v29, %v15305_v6  ;;  %v1889_v31 = vpop.f32.mrb[91].mxu0  ;;  %13420 = vmatmul.mubr.msk.bf16.gmra.mrb[84].mxu1 %vm2276_vm3, %v2216_v22  ;;  %v2135_v34 = vmax.f32 %v1895_v26, 0.0 }
 0x245   : > { %v1890_v32 = vadd.f32 %v15305_v6, %v1889_v31  ;;  %v2133_v37 = vmax.f32 %v1887_v28, 0.0 }
 0x246   : > { %v2136_v35 = vmax.f32 %v1898_v30, 0.0 }
 0x247   : > { %v2134_v39 = vmax.f32 %v1890_v32, 0.0 }
 0x248   : > { %v2218_v40 = vpack.c.bf16 %v2136_v35, %v2135_v34 }
 0x249   : > { %v2217_v41 = vpack.c.bf16 %v2134_v39, %v2133_v37  ;;  %v13293_v42 = vpop.f32.mrb[92].mxu0 }
 0x24a   : > { %v1911_v43 = vadd.f32 %v13293_v42, %v15305_v6  ;;  %v1902_v44 = vpop.f32.mrb[93].mxu0 }
 0x24b   : > { %v1903_v45 = vadd.f32 %v15305_v6, %v1902_v44  ;;  %v13294_v46 = vpop.f32.mrb[94].mxu0  ;;  %13423 = vmatprep.mubr.msk.bf16.mxu1 %vm2276_vm3, %v2217_v41 }
 0x24c   : > { %v1914_v47 = vadd.f32 %v13294_v46, %v15305_v6  ;;  %v1905_v48 = vpop.f32.mrb[95].mxu0  ;;  %13424 = vmatmul.mubr.msk.bf16.gmra.mrb[88].mxu1 %vm2276_vm3, %v2218_v40  ;;  %v2139_v50 = vmax.f32 %v1911_v43, 0.0 }
 0x24d   : > { %v1906_v49 = vadd.f32 %v15305_v6, %v1905_v48  ;;  %v2137_v52 = vmax.f32 %v1903_v45, 0.0 }
 0x24e   : > { %v2140_v51 = vmax.f32 %v1914_v47, 0.0 }
 0x24f   : > { %v2138_v53 = vmax.f32 %v1906_v49, 0.0 }
 0x250   : > { %v2220_v54 = vpack.c.bf16 %v2140_v51, %v2139_v50  ;;  %v15607_v50 = vld [vmem:[%s18355_s25] ss:$0 sm:$0xff] }
 0x251   : > { %v2219_v55 = vpack.c.bf16 %v2138_v53, %v2137_v52  ;;  %v13297_v56 = vpop.f32.mrb[96].mxu0 }
 0x252   : > { %v1927_v57 = vadd.f32 %v13297_v56, %v15305_v6  ;;  %v1918_v33 = vpop.f32.mrb[97].mxu0 }
 0x253   : > { %v1919_v36 = vadd.f32 %v15305_v6, %v1918_v33  ;;  %v13298_v38 = vpop.f32.mrb[98].mxu0  ;;  %13427 = vmatprep.mubr.msk.bf16.mxu1 %vm2276_vm3, %v2219_v55 }
 0x254   : > { %v1930_v58 = vadd.f32 %v13298_v38, %v15305_v6  ;;  %v1921_v59 = vpop.f32.mrb[99].mxu0  ;;  %13428 = vmatmul.mubr.msk.bf16.gmra.mrb[92].mxu1 %vm2276_vm3, %v2220_v54  ;;  %v2143_v61 = vmax.f32 %v1927_v57, 0.0 }
 0x255   : > { %v1922_v60 = vadd.f32 %v15305_v6, %v1921_v59  ;;  %v2141_v63 = vmax.f32 %v1919_v36, 0.0 }
 0x256   : > { %v2144_v62 = vmax.f32 %v1930_v58, 0.0 }
 0x257   : > { %v2142_v0 = vmax.f32 %v1922_v60, 0.0 }
 0x258   : > { %v2222_v1 = vpack.c.bf16 %v2144_v62, %v2143_v61 }
 0x259   : > { %v2221_v3 = vpack.c.bf16 %v2142_v0, %v2141_v63  ;;  %v13301_v4 = vpop.f32.mrb[100].mxu0 }
 0x25a   : > { %v1943_v7 = vadd.f32 %v15584_v5, %v13301_v4  ;;  %v1934_v8 = vpop.f32.mrb[101].mxu0 }
 0x25b   : > { %v1935_v9 = vadd.f32 %v15584_v5, %v1934_v8  ;;  %v13302_v10 = vpop.f32.mrb[102].mxu0  ;;  %13431 = vmatprep.mubr.msk.bf16.mxu1 %vm2276_vm3, %v2221_v3 }
 0x25c   : > { %v1946_v6 = vadd.f32 %v15584_v5, %v13302_v10  ;;  %v1937_v11 = vpop.f32.mrb[103].mxu0  ;;  %13432 = vmatmul.mubr.msk.bf16.gmra.mrb[96].mxu1 %vm2276_vm3, %v2222_v1  ;;  %v2147_v13 = vmax.f32 %v1943_v7, 0.0  ;;  %v3216_v10 = vld [vmem:[%s18352_s30 + $0x50] sm:$0xff] }
 0x25d   : > { %v1938_v12 = vadd.f32 %v15584_v5, %v1937_v11  ;;  %v2145_v18 = vmax.f32 %v1935_v9, 0.0 }
 0x25e   : > { %v2148_v14 = vmax.f32 %v1946_v6, 0.0  ;;  %v3220_v6 = vld [vmem:[%s18352_s30 + $0x70] sm:$0xff] }
 0x25f   : > { %v2146_v20 = vmax.f32 %v1938_v12, 0.0 }
 0x260   : > { %v2224_v22 = vpack.c.bf16 %v2148_v14, %v2147_v13 }
 0x261   : > { %v2223_v23 = vpack.c.bf16 %v2146_v20, %v2145_v18  ;;  %v13305_v25 = vpop.f32.mrb[104].mxu0 }
 0x262   : > { %v1959_v26 = vadd.f32 %v15584_v5, %v13305_v25  ;;  %v1950_v27 = vpop.f32.mrb[105].mxu0 }
 0x263   : > { %v1951_v28 = vadd.f32 %v15584_v5, %v1950_v27  ;;  %v13306_v29 = vpop.f32.mrb[106].mxu0  ;;  %13435 = vmatprep.mubr.msk.bf16.mxu1 %vm2276_vm3, %v2223_v23  ;;  %v12433_v27 = vcombine.high %v3216_v10, %v3220_v6 }
 0x264   : > { %v1962_v30 = vadd.f32 %v15584_v5, %v13306_v29  ;;  %v1953_v31 = vpop.f32.mrb[107].mxu0  ;;  %13436 = vmatmul.mubr.msk.bf16.gmra.mrb[100].mxu1 %vm2276_vm3, %v2224_v22  ;;  %v2151_v34 = vmax.f32 %v1959_v26, 0.0 }
 0x265   : > { %v1954_v32 = vadd.f32 %v15584_v5, %v1953_v31  ;;  %v2149_v37 = vmax.f32 %v1951_v28, 0.0 }
 0x266   : > { %v2152_v35 = vmax.f32 %v1962_v30, 0.0 }
 0x267   : > { %v2150_v39 = vmax.f32 %v1954_v32, 0.0 }
 0x268   : > { %v2226_v40 = vpack.c.bf16 %v2152_v35, %v2151_v34 }
 0x269   : > { %v2225_v41 = vpack.c.bf16 %v2150_v39, %v2149_v37  ;;  %v13309_v42 = vpop.f32.mrb[108].mxu0 }
 0x26a   : > { %v1975_v43 = vadd.f32 %v15584_v5, %v13309_v42  ;;  %v1966_v44 = vpop.f32.mrb[109].mxu0  ;;  %v12432_v42 = vcombine.low %v3216_v10, %v3220_v6 }
 0x26b   : > { %v1967_v45 = vadd.f32 %v15584_v5, %v1966_v44  ;;  %v13310_v46 = vpop.f32.mrb[110].mxu0  ;;  %13439 = vmatprep.mubr.msk.bf16.mxu1 %vm2276_vm3, %v2225_v41 }
 0x26c   : > { %v1978_v47 = vadd.f32 %v15584_v5, %v13310_v46  ;;  %v1969_v48 = vpop.f32.mrb[111].mxu0  ;;  %13440 = vmatmul.mubr.msk.bf16.gmra.mrb[104].mxu1 %vm2276_vm3, %v2226_v40  ;;  %v2155_v51 = vmax.f32 %v1975_v43, 0.0 }
 0x26d   : > { %v1970_v49 = vadd.f32 %v15584_v5, %v1969_v48  ;;  %v2153_v53 = vmax.f32 %v1967_v45, 0.0 }
 0x26e   : > { %v2156_v52 = vmax.f32 %v1978_v47, 0.0 }
 0x26f   : > { %v2154_v54 = vmax.f32 %v1970_v49, 0.0  ;;  %v13337_v55 = vpop.f32.mrb[0].mxu1 }
 0x270   : > { %v2228_v56 = vpack.c.bf16 %v2156_v52, %v2155_v51  ;;  %v2512_v57 = vadd.f32 %v13337_v55, %v15607_v50  ;;  %v2503_v33 = vpop.f32.mrb[1].mxu1 }
 0x271   : > { %v2227_v36 = vpack.c.bf16 %v2154_v54, %v2153_v53  ;;  %v2504_v38 = vadd.f32 %v15607_v50, %v2503_v33  ;;  %v13313_v58 = vpop.f32.mrb[112].mxu0  ;;  %v13338_v59 = vpop.f32.mrb[2].mxu1 }
 0x272   : > { %v1991_v60 = vadd.f32 %v15584_v5, %v13313_v58  ;;  %v2515_v61 = vadd.f32 %v13338_v59, %v15607_v50  ;;  %v1982_v62 = vpop.f32.mrb[113].mxu0  ;;  %v2506_v63 = vpop.f32.mrb[3].mxu1  ;;  %v3016_v4 = vmax.f32 %v2512_v57, 0.0 }
 0x273   : > { %v1983_v0 = vadd.f32 %v15584_v5, %v1982_v62  ;;  %v2507_v1 = vadd.f32 %v15607_v50, %v2506_v63  ;;  %v13314_v3 = vpop.f32.mrb[114].mxu0  ;;  %13443 = vmatprep.mubr.msk.bf16.mxu1 %vm2276_vm3, %v2227_v36  ;;  %v3014_v11 = vmax.f32 %v2504_v38, 0.0 }
 0x274   : > { %v3017_v7 = vmax.f32 %v2515_v61, 0.0  ;;  %v1994_v8 = vadd.f32 %v15584_v5, %v13314_v3  ;;  %v1985_v9 = vpop.f32.mrb[115].mxu0  ;;  %13444 = vmatmul.mubr.msk.bf16.gmra.mrb[108].mxu1 %vm2276_vm3, %v2228_v56  ;;  %v2159_v14 = vmax.f32 %v1991_v60, 0.0 }
 0x275   : > { %v3015_v12 = vmax.f32 %v2507_v1, 0.0  ;;  %v1986_v13 = vadd.f32 %v15584_v5, %v1985_v9  ;;  %v2157_v22 = vmax.f32 %v1983_v0, 0.0 }
 0x276   : > { %v15625_v18 = vpack.c.bf16 %v3017_v7, %v3016_v4  ;;  %v2160_v20 = vmax.f32 %v1994_v8, 0.0 }
 0x277   : > { %v15627_v23 = vpack.c.bf16 %v3015_v12, %v3014_v11  ;;  %v2158_v25 = vmax.f32 %v1986_v13, 0.0  ;;  %v13341_v26 = vpop.f32.mrb[4].mxu1 }
 0x278   : > { %v2230_v28 = vpack.c.bf16 %v2160_v20, %v2159_v14  ;;  %v2528_v29 = vadd.f32 %v13341_v26, %v15607_v50  ;;  %v2519_v30 = vpop.f32.mrb[5].mxu1 }
 0x279   : > { %v2229_v31 = vpack.c.bf16 %v2158_v25, %v2157_v22  ;;  %v2520_v32 = vadd.f32 %v15607_v50, %v2519_v30  ;;  %v13317_v34 = vpop.f32.mrb[116].mxu0  ;;  %v13342_v35 = vpop.f32.mrb[6].mxu1  ;;  %3623 = vmatmul.mubr.bf16.vlgmr.msra.gmra.mrb[128].mxu0 %v15627_v23 }
 0x27a   : > { %v2007_v37 = vadd.f32 %v15584_v5, %v13317_v34  ;;  %v2531_v39 = vadd.f32 %v13342_v35, %v15607_v50  ;;  %v1998_v40 = vpop.f32.mrb[117].mxu0  ;;  %v2522_v41 = vpop.f32.mrb[7].mxu1  ;;  %3632 = vmatprep.mubr.bf16.mxu0 %v18304_v2  ;;  %4937 = vmatpush1.bf16.msra.mxu0 %v12424_v19  ;;  %v3020_v46 = vmax.f32 %v2528_v29, 0.0 }
 0x27b   : > { %v1999_v43 = vadd.f32 %v15584_v5, %v1998_v40  ;;  %v2523_v44 = vadd.f32 %v15607_v50, %v2522_v41  ;;  %v13318_v45 = vpop.f32.mrb[118].mxu0  ;;  %13447 = vmatprep.mubr.msk.bf16.mxu1 %vm2276_vm3, %v2229_v31  ;;  %4938 = vmatprep.subr.bf16.mxu0 %v12433_v27  ;;  %v3018_v51 = vmax.f32 %v2520_v32, 0.0 }
 0x27c   : > { %v3021_v47 = vmax.f32 %v2531_v39, 0.0  ;;  %v2010_v48 = vadd.f32 %v15584_v5, %v13318_v45  ;;  %v2001_v49 = vpop.f32.mrb[119].mxu0  ;;  %13448 = vmatmul.mubr.msk.bf16.gmra.mrb[112].mxu1 %vm2276_vm3, %v2230_v28  ;;  %v2163_v16 = vmax.f32 %v2007_v37, 0.0 }
 0x27d   : > { %v3019_v52 = vmax.f32 %v2523_v44, 0.0  ;;  %v2002_v15 = vadd.f32 %v15584_v5, %v2001_v49  ;;  %v2161_v54 = vmax.f32 %v1999_v43, 0.0 }
 0x27e   : > { %v15644_v19 = vpack.c.bf16 %v3021_v47, %v3020_v46  ;;  %v2164_v53 = vmax.f32 %v2010_v48, 0.0  ;;  %4939 = vmatpush1.bf16.msra.mxu0 %v12432_v42 }
 0x27f   : > { %v15646_v55 = vpack.c.bf16 %v3019_v52, %v3018_v51  ;;  %v2162_v56 = vmax.f32 %v2002_v15, 0.0  ;;  %v13345_v57 = vpop.f32.mrb[8].mxu1 }
 0x280   : > { %v2232_v33 = vpack.c.bf16 %v2164_v53, %v2163_v16  ;;  %v2544_v36 = vadd.f32 %v13345_v57, %v15607_v50  ;;  %v2535_v38 = vpop.f32.mrb[9].mxu1 }
 0x281   : > { %v2231_v58 = vpack.c.bf16 %v2162_v56, %v2161_v54  ;;  %v2536_v59 = vadd.f32 %v15607_v50, %v2535_v38  ;;  %v13321_v60 = vpop.f32.mrb[120].mxu0  ;;  %v13346_v61 = vpop.f32.mrb[10].mxu1  ;;  %3633 = vmatmul.mubr.bf16.gmra.mrb[132].mxu0 %v15625_v18 }
 0x282   : > { %v2023_v62 = vadd.f32 %v15584_v5, %v13321_v60  ;;  %v2547_v63 = vadd.f32 %v13346_v61, %v15607_v50  ;;  %v2014_v0 = vpop.f32.mrb[121].mxu0  ;;  %v2538_v1 = vpop.f32.mrb[11].mxu1  ;;  %3642 = vmatprep.mubr.bf16.mxu0 %v18304_v2  ;;  %v3024_v8 = vmax.f32 %v2544_v36, 0.0 }
 0x283   : > { %v2015_v3 = vadd.f32 %v15584_v5, %v2014_v0  ;;  %v2539_v4 = vadd.f32 %v15607_v50, %v2538_v1  ;;  %v13322_v7 = vpop.f32.mrb[122].mxu0  ;;  %13451 = vmatprep.mubr.msk.bf16.mxu1 %vm2276_vm3, %v2231_v58  ;;  %v3022_v11 = vmax.f32 %v2536_v59, 0.0 }
 0x284   : > { %v3025_v9 = vmax.f32 %v2547_v63, 0.0  ;;  %v2026_v10 = vadd.f32 %v15584_v5, %v13322_v7  ;;  %v2017_v6 = vpop.f32.mrb[123].mxu0  ;;  %13452 = vmatmul.mubr.msk.bf16.gmra.mrb[116].mxu1 %vm2276_vm3, %v2232_v33  ;;  %v2167_v14 = vmax.f32 %v2023_v62, 0.0 }
 0x285   : > { %v3023_v12 = vmax.f32 %v2539_v4, 0.0  ;;  %v2018_v13 = vadd.f32 %v15584_v5, %v2017_v6  ;;  %v2165_v25 = vmax.f32 %v2015_v3, 0.0  ;;  %v3217_v6 = vld [vmem:[%s18352_s30 + $0x58] sm:$0xff] }
 0x286   : > { %v15660_v20 = vpack.c.bf16 %v3025_v9, %v3024_v8  ;;  %v2168_v22 = vmax.f32 %v2026_v10, 0.0 }
 0x287   : > { %v15662_v26 = vpack.c.bf16 %v3023_v12, %v3022_v11  ;;  %v2166_v27 = vmax.f32 %v2018_v13, 0.0  ;;  %v13349_v28 = vpop.f32.mrb[12].mxu1  ;;  %v3221_v11 = vld [vmem:[%s18352_s30 + $0x78] sm:$0xff] }
 0x288   : > { %v2234_v29 = vpack.c.bf16 %v2168_v22, %v2167_v14  ;;  %v2560_v30 = vadd.f32 %v13349_v28, %v15607_v50  ;;  %v2551_v31 = vpop.f32.mrb[13].mxu1  ;;  %v12435_v28 = vcombine.high %v3217_v6, %v3221_v11 }
 0x289   : > { %v2233_v32 = vpack.c.bf16 %v2166_v27, %v2165_v25  ;;  %v2552_v34 = vadd.f32 %v15607_v50, %v2551_v31  ;;  %v13325_v35 = vpop.f32.mrb[124].mxu0  ;;  %v13350_v37 = vpop.f32.mrb[14].mxu1  ;;  %3643 = vmatmul.mubr.bf16.gmra.mrb[136].mxu0 %v15646_v55 }
 0x28a   : > { %v2039_v39 = vadd.f32 %v15584_v5, %v13325_v35  ;;  %v2563_v40 = vadd.f32 %v13350_v37, %v15607_v50  ;;  %v2030_v41 = vpop.f32.mrb[125].mxu0  ;;  %v2554_v42 = vpop.f32.mrb[15].mxu1  ;;  %3652 = vmatprep.mubr.bf16.mxu0 %v18304_v2  ;;  %v3028_v46 = vmax.f32 %v2560_v30, 0.0  ;;  %v12434_v35 = vcombine.low %v3217_v6, %v3221_v11 }
 0x28b   : > { %v2031_v43 = vadd.f32 %v15584_v5, %v2030_v41  ;;  %v2555_v44 = vadd.f32 %v15607_v50, %v2554_v42  ;;  %v13326_v45 = vpop.f32.mrb[126].mxu0  ;;  %13455 = vmatprep.mubr.msk.bf16.mxu1 %vm2276_vm3, %v2233_v32  ;;  %v3026_v51 = vmax.f32 %v2552_v34, 0.0  ;;  %v3224_v41 = vld [vmem:[%s18352_s30 + $0x90] sm:$0xff] }
 0x28c   : > { %v3029_v47 = vmax.f32 %v2563_v40, 0.0  ;;  %v2042_v48 = vadd.f32 %v15584_v5, %v13326_v45  ;;  %v2033_v49 = vpop.f32.mrb[127].mxu0  ;;  %13456 = vmatmul.mubr.msk.bf16.gmra.mrb[120].mxu1 %vm2276_vm3, %v2234_v29  ;;  %v2171_v16 = vmax.f32 %v2039_v39, 0.0  ;;  %v3228_v42 = vld [vmem:[%s18352_s30 + $0xb0] sm:$0xff]  ;;  %v3229_v45 = vld [vmem:[%s18352_s30 + $0xb8] sm:$0xff] }
 0x28d   : > { %v3027_v52 = vmax.f32 %v2555_v44, 0.0  ;;  %v2034_v15 = vadd.f32 %v15584_v5, %v2033_v49  ;;  %v2169_v56 = vmax.f32 %v2031_v43, 0.0  ;;  %v12440_v43 = vcombine.low %v3224_v41, %v3228_v42 }
 0x28e   : > { %v15676_v53 = vpack.c.bf16 %v3029_v47, %v3028_v46  ;;  %v2172_v54 = vmax.f32 %v2042_v48, 0.0  ;;  %v12441_v44 = vcombine.high %v3224_v41, %v3228_v42  ;;  %v12442_v48 = vcombine.low %v3225_v17, %v3229_v45 }
 0x28f   : > { %v15678_v57 = vpack.c.bf16 %v3027_v52, %v3026_v51  ;;  %v2170_v33 = vmax.f32 %v2034_v15, 0.0  ;;  %v13353_v36 = vpop.f32.mrb[16].mxu1  ;;  %v12443_v49 = vcombine.high %v3225_v17, %v3229_v45 }
 0x290   : > { %18356 = vst [vmem:[#allocation13_spill] sm:$0xff] %v15676_v53  ;;  %v2236_v38 = vpack.c.bf16 %v2172_v54, %v2171_v16  ;;  %v2576_v58 = vadd.f32 %v13353_v36, %v15607_v50  ;;  %v2567_v59 = vpop.f32.mrb[17].mxu1  ;;  %4940 = vmatprep.subr.bf16.mxu0 %v12441_v44 }
 0x291   : > { %18357 = vst [vmem:[#allocation14_spill] sm:$0xff] %v15678_v57  ;;  %v2235_v60 = vpack.c.bf16 %v2170_v33, %v2169_v56  ;;  %v2568_v61 = vadd.f32 %v15607_v50, %v2567_v59  ;;  %v13354_v62 = vpop.f32.mrb[18].mxu1  ;;  %3653 = vmatmul.mubr.bf16.gmra.mrb[140].mxu0 %v15644_v19 }
 0x292   : > { %v2579_v5 = vadd.f32 %v13354_v62, %v15607_v50  ;;  %v2570_v63 = vpop.f32.mrb[19].mxu1  ;;  %3662 = vmatprep.mubr.bf16.mxu0 %v18304_v2  ;;  %v3032_v1 = vmax.f32 %v2576_v58, 0.0  ;;  %4941 = vmatpush1.bf16.msra.mxu0 %v12440_v43 }
 0x293   : > { %v2571_v0 = vadd.f32 %v15607_v50, %v2570_v63  ;;  %13459 = vmatprep.mubr.msk.bf16.mxu1 %vm2276_vm3, %v2235_v60  ;;  %v3030_v4 = vmax.f32 %v2568_v61, 0.0 }
 0x294   : > { %v3033_v3 = vmax.f32 %v2579_v5, 0.0  ;;  %13460 = vmatmul.mubr.msk.bf16.gmra.mrb[124].mxu1 %vm2276_vm3, %v2236_v38 }
 0x295   : > { %v3031_v7 = vmax.f32 %v2571_v0, 0.0  ;;  %4295 = vmatprep.mubr.bf16.mxu1 %v18304_v2 }
 0x296   : > { %v15689_v8 = vpack.c.bf16 %v3033_v3, %v3032_v1 }
 0x297   : > { %v15691_v9 = vpack.c.bf16 %v3031_v7, %v3030_v4  ;;  %v13357_v10 = vpop.f32.mrb[20].mxu1 }
 0x298   : > { %18358 = vst [vmem:[#allocation15_spill] sm:$0xff] %v15689_v8  ;;  %v2592_v12 = vadd.f32 %v13357_v10, %v15607_v50  ;;  %v2583_v13 = vpop.f32.mrb[21].mxu1 }
 0x299   : > { %18359 = vst [vmem:[#allocation16_spill] sm:$0xff] %v15691_v9  ;;  %v2584_v14 = vadd.f32 %v15607_v50, %v2583_v13  ;;  %v13358_v22 = vpop.f32.mrb[22].mxu1  ;;  %3663 = vmatmul.mubr.bf16.gmra.mrb[144].mxu0 %v15662_v26 }
 0x29a   : > { %v2595_v25 = vadd.f32 %v13358_v22, %v15607_v50  ;;  %v2586_v27 = vpop.f32.mrb[23].mxu1  ;;  %3672 = vmatprep.mubr.bf16.mxu0 %v18304_v2  ;;  %v3036_v30 = vmax.f32 %v2592_v12, 0.0 }
 0x29b   : > { %v2587_v29 = vadd.f32 %v15607_v50, %v2586_v27  ;;  %v3034_v32 = vmax.f32 %v2584_v14, 0.0 }
 0x29c   : > { %v3037_v31 = vmax.f32 %v2595_v25, 0.0  ;;  %4296 = vmatmul.mubr.bf16.vlgmr.msra.gmra.mrb[128].mxu1 %v15627_v23 }
 0x29d   : > { %v3035_v34 = vmax.f32 %v2587_v29, 0.0  ;;  %5610 = vmatpush1.bf16.msra.mxu1 %v12426_v24  ;;  %4305 = vmatprep.mubr.bf16.mxu1 %v18304_v2 }
 0x29e   : > { %v15710_v37 = vpack.c.bf16 %v3037_v31, %v3036_v30  ;;  %5611 = vmatprep.subr.bf16.mxu1 %v12435_v28 }
 0x29f   : > { %v15712_v39 = vpack.c.bf16 %v3035_v34, %v3034_v32  ;;  %v13361_v40 = vpop.f32.mrb[24].mxu1 }
 0x2a0   : > { %18360 = vst [vmem:[#allocation17_spill] sm:$0xff] %v15710_v37  ;;  %v2608_v21 = vadd.f32 %v13361_v40, %v15607_v50  ;;  %v2599_v24 = vpop.f32.mrb[25].mxu1 }
 0x2a1   : > { %18361 = vst [vmem:[#allocation18_spill] sm:$0xff] %v15712_v39  ;;  %v2600_v46 = vadd.f32 %v15607_v50, %v2599_v24  ;;  %v13362_v47 = vpop.f32.mrb[26].mxu1  ;;  %3673 = vmatmul.mubr.bf16.gmra.mrb[148].mxu0 %v15660_v20  ;;  %5612 = vmatpush1.bf16.msra.mxu1 %v12434_v35 }
 0x2a2   : > { %v2611_v51 = vadd.f32 %v13362_v47, %v15607_v50  ;;  %v2602_v52 = vpop.f32.mrb[27].mxu1  ;;  %3682 = vmatprep.mubr.bf16.mxu0 %v18304_v2  ;;  %5613 = vmatprep.subr.bf16.mxu1 %v12443_v49  ;;  %v3040_v16 = vmax.f32 %v2608_v21, 0.0 }
 0x2a3   : > { %v2603_v15 = vadd.f32 %v15607_v50, %v2602_v52  ;;  %v3038_v56 = vmax.f32 %v2600_v46, 0.0 }
 0x2a4   : > { %v3041_v54 = vmax.f32 %v2611_v51, 0.0  ;;  %4306 = vmatmul.mubr.bf16.gmra.mrb[132].mxu1 %v15625_v18 }
 0x2a5   : > { %v3039_v33 = vmax.f32 %v2603_v15, 0.0  ;;  %4315 = vmatprep.mubr.bf16.mxu1 %v18304_v2  ;;  %5614 = vmatpush1.bf16.msra.mxu1 %v12442_v48 }
 0x2a6   : > { %v15734_v36 = vpack.c.bf16 %v3041_v54, %v3040_v16 }
 0x2a7   : > { %v15736_v38 = vpack.c.bf16 %v3039_v33, %v3038_v56  ;;  %v13365_v58 = vpop.f32.mrb[28].mxu1 }
 0x2a8   : > { %18362 = vst [vmem:[#allocation19_spill] sm:$0xff] %v15734_v36  ;;  %v2624_v59 = vadd.f32 %v13365_v58, %v15607_v50  ;;  %v2615_v60 = vpop.f32.mrb[29].mxu1 }
 0x2a9   : > { %18363 = vst [vmem:[#allocation20_spill] sm:$0xff] %v15736_v38  ;;  %v2616_v61 = vadd.f32 %v15607_v50, %v2615_v60  ;;  %v13366_v62 = vpop.f32.mrb[30].mxu1  ;;  %3683 = vmatmul.mubr.bf16.gmra.mrb[152].mxu0 %v15678_v57 }
 0x2aa   : > { %v2627_v5 = vadd.f32 %v13366_v62, %v15607_v50  ;;  %v2618_v63 = vpop.f32.mrb[31].mxu1  ;;  %3692 = vmatprep.mubr.bf16.mxu0 %v18304_v2  ;;  %v3044_v1 = vmax.f32 %v2624_v59, 0.0 }
 0x2ab   : > { %v2619_v0 = vadd.f32 %v15607_v50, %v2618_v63  ;;  %v3042_v4 = vmax.f32 %v2616_v61, 0.0 }
 0x2ac   : > { %v3045_v3 = vmax.f32 %v2627_v5, 0.0  ;;  %4316 = vmatmul.mubr.bf16.gmra.mrb[136].mxu1 %v15646_v55 }
 0x2ad   : > { %v3043_v7 = vmax.f32 %v2619_v0, 0.0  ;;  %4325 = vmatprep.mubr.bf16.mxu1 %v18304_v2 }
 0x2ae   : > { %v15746_v10 = vpack.c.bf16 %v3045_v3, %v3044_v1 }
 0x2af   : > { %v15748_v6 = vpack.c.bf16 %v3043_v7, %v3042_v4  ;;  %v13369_v11 = vpop.f32.mrb[32].mxu1 }
 0x2b0   : > { %18364 = vst [vmem:[#allocation21_spill] sm:$0xff] %v15746_v10  ;;  %v2640_v12 = vadd.f32 %v13369_v11, %v15607_v50  ;;  %v2631_v13 = vpop.f32.mrb[33].mxu1 }
 0x2b1   : > { %18365 = vst [vmem:[#allocation22_spill] sm:$0xff] %v15748_v6  ;;  %v2632_v14 = vadd.f32 %v15607_v50, %v2631_v13  ;;  %v13370_v22 = vpop.f32.mrb[34].mxu1  ;;  %3693 = vmatmul.mubr.bf16.gmra.mrb[156].mxu0 %v15676_v53 }
 0x2b2   : > { %v2643_v25 = vadd.f32 %v13370_v22, %v15607_v50  ;;  %v2634_v27 = vpop.f32.mrb[35].mxu1  ;;  %3702 = vmatprep.mubr.bf16.mxu0 %v18304_v2  ;;  %v3048_v29 = vmax.f32 %v2640_v12, 0.0 }
 0x2b3   : > { %v2635_v28 = vadd.f32 %v15607_v50, %v2634_v27  ;;  %v3046_v31 = vmax.f32 %v2632_v14, 0.0 }
 0x2b4   : > { %v3049_v30 = vmax.f32 %v2643_v25, 0.0  ;;  %4326 = vmatmul.mubr.bf16.gmra.mrb[140].mxu1 %v15644_v19 }
 0x2b5   : > { %v3047_v32 = vmax.f32 %v2635_v28, 0.0  ;;  %4335 = vmatprep.mubr.bf16.mxu1 %v18304_v2 }
 0x2b6   : > { %v15758_v34 = vpack.c.bf16 %v3049_v30, %v3048_v29 }
 0x2b7   : > { %v15760_v35 = vpack.c.bf16 %v3047_v32, %v3046_v31  ;;  %v13373_v40 = vpop.f32.mrb[36].mxu1 }
 0x2b8   : > { %18366 = vst [vmem:[#allocation23_spill] sm:$0xff] %v15758_v34  ;;  %v2656_v41 = vadd.f32 %v13373_v40, %v15607_v50  ;;  %v2647_v42 = vpop.f32.mrb[37].mxu1 }
 0x2b9   : > { %18367 = vst [vmem:[#allocation24_spill] sm:$0xff] %v15760_v35  ;;  %v2648_v17 = vadd.f32 %v15607_v50, %v2647_v42  ;;  %v13374_v21 = vpop.f32.mrb[38].mxu1  ;;  %3703 = vmatmul.mubr.bf16.gmra.mrb[160].mxu0 %v15691_v9 }
 0x2ba   : > { %v2659_v24 = vadd.f32 %v13374_v21, %v15607_v50  ;;  %v2650_v43 = vpop.f32.mrb[39].mxu1  ;;  %3712 = vmatprep.mubr.bf16.mxu0 %v18304_v2  ;;  %v3052_v45 = vmax.f32 %v2656_v41, 0.0 }
 0x2bb   : > { %v2651_v44 = vadd.f32 %v15607_v50, %v2650_v43  ;;  %v3050_v47 = vmax.f32 %v2648_v17, 0.0 }
 0x2bc   : > { %v3053_v46 = vmax.f32 %v2659_v24, 0.0  ;;  %4336 = vmatmul.mubr.bf16.gmra.mrb[144].mxu1 %v15662_v26 }
 0x2bd   : > { %v3051_v48 = vmax.f32 %v2651_v44, 0.0  ;;  %4345 = vmatprep.mubr.bf16.mxu1 %v18304_v2 }
 0x2be   : > { %v15770_v49 = vpack.c.bf16 %v3053_v46, %v3052_v45 }
 0x2bf   : > { %v15772_v51 = vpack.c.bf16 %v3051_v48, %v3050_v47  ;;  %v13377_v52 = vpop.f32.mrb[40].mxu1 }
 0x2c0   : > { %18368 = vst [vmem:[#allocation25_spill] sm:$0xff] %v15770_v49  ;;  %v2672_v15 = vadd.f32 %v13377_v52, %v15607_v50  ;;  %v2663_v16 = vpop.f32.mrb[41].mxu1 }
 0x2c1   : > { %18369 = vst [vmem:[#allocation26_spill] sm:$0xff] %v15772_v51  ;;  %v2664_v54 = vadd.f32 %v15607_v50, %v2663_v16  ;;  %v13378_v56 = vpop.f32.mrb[42].mxu1  ;;  %3713 = vmatmul.mubr.bf16.gmra.mrb[164].mxu0 %v15689_v8 }
 0x2c2   : > { %v2675_v33 = vadd.f32 %v13378_v56, %v15607_v50  ;;  %v2666_v58 = vpop.f32.mrb[43].mxu1  ;;  %3722 = vmatprep.mubr.bf16.mxu0 %v18304_v2  ;;  %v3056_v60 = vmax.f32 %v2672_v15, 0.0 }
 0x2c3   : > { %v2667_v59 = vadd.f32 %v15607_v50, %v2666_v58  ;;  %v3054_v62 = vmax.f32 %v2664_v54, 0.0 }
 0x2c4   : > { %v3057_v61 = vmax.f32 %v2675_v33, 0.0  ;;  %4346 = vmatmul.mubr.bf16.gmra.mrb[148].mxu1 %v15660_v20 }
 0x2c5   : > { %v3055_v5 = vmax.f32 %v2667_v59, 0.0  ;;  %4355 = vmatprep.mubr.bf16.mxu1 %v18304_v2 }
 0x2c6   : > { %v15782_v63 = vpack.c.bf16 %v3057_v61, %v3056_v60 }
 0x2c7   : > { %v15784_v0 = vpack.c.bf16 %v3055_v5, %v3054_v62  ;;  %v13381_v1 = vpop.f32.mrb[44].mxu1 }
 0x2c8   : > { %18370 = vst [vmem:[#allocation27_spill] sm:$0xff] %v15782_v63  ;;  %v2688_v3 = vadd.f32 %v13381_v1, %v15607_v50  ;;  %v2679_v4 = vpop.f32.mrb[45].mxu1 }
 0x2c9   : > { %18371 = vst [vmem:[#allocation28_spill] sm:$0xff] %v15784_v0  ;;  %v2680_v7 = vadd.f32 %v15607_v50, %v2679_v4  ;;  %v13382_v11 = vpop.f32.mrb[46].mxu1  ;;  %3723 = vmatmul.mubr.bf16.gmra.mrb[168].mxu0 %v15712_v39 }
 0x2ca   : > { %v2691_v12 = vadd.f32 %v13382_v11, %v15607_v50  ;;  %v2682_v13 = vpop.f32.mrb[47].mxu1  ;;  %3732 = vmatprep.mubr.bf16.mxu0 %v18304_v2  ;;  %v3060_v22 = vmax.f32 %v2688_v3, 0.0  ;;  %v3236_v11 = vld [vmem:[%s18352_s30 + $0xf0] sm:$0xff] }
 0x2cb   : > { %v2683_v14 = vadd.f32 %v15607_v50, %v2682_v13  ;;  %v3058_v27 = vmax.f32 %v2680_v7, 0.0  ;;  %v3232_v7 = vld [vmem:[%s18352_s30 + $0xd0] sm:$0xff] }
 0x2cc   : > { %v3061_v25 = vmax.f32 %v2691_v12, 0.0  ;;  %4356 = vmatmul.mubr.bf16.gmra.mrb[152].mxu1 %v15678_v57  ;;  %v3233_v12 = vld [vmem:[%s18352_s30 + $0xd8] sm:$0xff] }
 0x2cd   : > { %v3059_v28 = vmax.f32 %v2683_v14, 0.0  ;;  %4365 = vmatprep.mubr.bf16.mxu1 %v18304_v2 }
 0x2ce   : > { %v15794_v29 = vpack.c.bf16 %v3061_v25, %v3060_v22  ;;  %v12448_v22 = vcombine.low %v3232_v7, %v3236_v11  ;;  %v12449_v25 = vcombine.high %v3232_v7, %v3236_v11 }
 0x2cf   : > { %v15796_v30 = vpack.c.bf16 %v3059_v28, %v3058_v27  ;;  %v13385_v31 = vpop.f32.mrb[48].mxu1  ;;  %v3237_v27 = vld [vmem:[%s18352_s30 + $0xf8] sm:$0xff] }
 0x2d0   : > { %18372 = vst [vmem:[#allocation29_spill] sm:$0xff] %v15794_v29  ;;  %v2704_v32 = vadd.f32 %v13385_v31, %v15607_v50  ;;  %v2695_v40 = vpop.f32.mrb[49].mxu1  ;;  %4942 = vmatprep.subr.bf16.mxu0 %v12449_v25 }
 0x2d1   : > { %18373 = vst [vmem:[#allocation30_spill] sm:$0xff] %v15796_v30  ;;  %v2696_v41 = vadd.f32 %v15607_v50, %v2695_v40  ;;  %v13386_v42 = vpop.f32.mrb[50].mxu1  ;;  %3733 = vmatmul.mubr.bf16.gmra.mrb[172].mxu0 %v15710_v37  ;;  %v12451_v40 = vcombine.high %v3233_v12, %v3237_v27 }
 0x2d2   : > { %v2707_v17 = vadd.f32 %v13386_v42, %v15607_v50  ;;  %v2698_v21 = vpop.f32.mrb[51].mxu1  ;;  %3742 = vmatprep.mubr.bf16.mxu0 %v18304_v2  ;;  %v3064_v43 = vmax.f32 %v2704_v32, 0.0  ;;  %v12450_v32 = vcombine.low %v3233_v12, %v3237_v27  ;;  %4943 = vmatpush1.bf16.msra.mxu0 %v12448_v22 }
 0x2d3   : > { %v2699_v24 = vadd.f32 %v15607_v50, %v2698_v21  ;;  %v3062_v45 = vmax.f32 %v2696_v41, 0.0  ;;  %5615 = vmatprep.subr.bf16.mxu1 %v12451_v40 }
 0x2d4   : > { %v3065_v44 = vmax.f32 %v2707_v17, 0.0  ;;  %4366 = vmatmul.mubr.bf16.gmra.mrb[156].mxu1 %v15676_v53 }
 0x2d5   : > { %v3063_v46 = vmax.f32 %v2699_v24, 0.0  ;;  %4375 = vmatprep.mubr.bf16.mxu1 %v18304_v2  ;;  %5616 = vmatpush1.bf16.msra.mxu1 %v12450_v32 }
 0x2d6   : > { %v15806_v47 = vpack.c.bf16 %v3065_v44, %v3064_v43 }
 0x2d7   : > { %v15808_v48 = vpack.c.bf16 %v3063_v46, %v3062_v45  ;;  %v13389_v52 = vpop.f32.mrb[52].mxu1 }
 0x2d8   : > { %18374 = vst [vmem:[#allocation31_spill] sm:$0xff] %v15806_v47  ;;  %v2720_v15 = vadd.f32 %v13389_v52, %v15607_v50  ;;  %v2711_v16 = vpop.f32.mrb[53].mxu1 }
 0x2d9   : > { %18375 = vst [vmem:[#allocation32_spill] sm:$0xff] %v15808_v48  ;;  %v2712_v54 = vadd.f32 %v15607_v50, %v2711_v16  ;;  %v13390_v56 = vpop.f32.mrb[54].mxu1  ;;  %3743 = vmatmul.mubr.bf16.gmra.mrb[176].mxu0 %v15736_v38 }
 0x2da   : > { %v2723_v33 = vadd.f32 %v13390_v56, %v15607_v50  ;;  %v2714_v58 = vpop.f32.mrb[55].mxu1  ;;  %3752 = vmatprep.mubr.bf16.mxu0 %v18304_v2  ;;  %v3068_v60 = vmax.f32 %v2720_v15, 0.0 }
 0x2db   : > { %v2715_v59 = vadd.f32 %v15607_v50, %v2714_v58  ;;  %v3066_v62 = vmax.f32 %v2712_v54, 0.0 }
 0x2dc   : > { %v3069_v61 = vmax.f32 %v2723_v33, 0.0  ;;  %4376 = vmatmul.mubr.bf16.gmra.mrb[160].mxu1 %v15691_v9 }
 0x2dd   : > { %v3067_v5 = vmax.f32 %v2715_v59, 0.0  ;;  %4385 = vmatprep.mubr.bf16.mxu1 %v18304_v2 }
 0x2de   : > { %v15818_v1 = vpack.c.bf16 %v3069_v61, %v3068_v60 }
 0x2df   : > { %v15820_v3 = vpack.c.bf16 %v3067_v5, %v3066_v62  ;;  %v13393_v4 = vpop.f32.mrb[56].mxu1 }
 0x2e0   : > { %18376 = vst [vmem:[#allocation33_spill] sm:$0xff] %v15818_v1  ;;  %v2736_v13 = vadd.f32 %v13393_v4, %v15607_v50  ;;  %v2727_v14 = vpop.f32.mrb[57].mxu1 }
 0x2e1   : > { %v2728_v28 = vadd.f32 %v15607_v50, %v2727_v14  ;;  %v13394_v31 = vpop.f32.mrb[58].mxu1  ;;  %3753 = vmatmul.mubr.bf16.gmra.mrb[180].mxu0 %v15734_v36 }
 0x2e2   : > { %v2739_v41 = vadd.f32 %v13394_v31, %v15607_v50  ;;  %v2730_v42 = vpop.f32.mrb[59].mxu1  ;;  %3762 = vmatprep.mubr.bf16.mxu0 %v18304_v2  ;;  %v3072_v21 = vmax.f32 %v2736_v13, 0.0 }
 0x2e3   : > { %v2731_v17 = vadd.f32 %v15607_v50, %v2730_v42  ;;  %v3070_v43 = vmax.f32 %v2728_v28, 0.0 }
 0x2e4   : > { %v3073_v24 = vmax.f32 %v2739_v41, 0.0  ;;  %4386 = vmatmul.mubr.bf16.gmra.mrb[164].mxu1 %v15689_v8 }
 0x2e5   : > { %v3071_v44 = vmax.f32 %v2731_v17, 0.0  ;;  %4395 = vmatprep.mubr.bf16.mxu1 %v18304_v2 }
 0x2e6   : > { %v15842_v45 = vpack.c.bf16 %v3073_v24, %v3072_v21 }
 0x2e7   : > { %v15844_v46 = vpack.c.bf16 %v3071_v44, %v3070_v43  ;;  %v13397_v52 = vpop.f32.mrb[60].mxu1 }
 0x2e8   : > { %18377 = vst [vmem:[#allocation34_spill] sm:$0xff] %v15842_v45  ;;  %v2752_v15 = vadd.f32 %v13397_v52, %v15607_v50  ;;  %v2743_v16 = vpop.f32.mrb[61].mxu1 }
 0x2e9   : > { %18378 = vst [vmem:[#allocation35_spill] sm:$0xff] %v15844_v46  ;;  %v2744_v54 = vadd.f32 %v15607_v50, %v2743_v16  ;;  %v13398_v56 = vpop.f32.mrb[62].mxu1  ;;  %3763 = vmatmul.mubr.bf16.gmra.mrb[184].mxu0 %v15748_v6 }
 0x2ea   : > { %v2755_v33 = vadd.f32 %v13398_v56, %v15607_v50  ;;  %v2746_v58 = vpop.f32.mrb[63].mxu1  ;;  %3772 = vmatprep.mubr.bf16.mxu0 %v18304_v2  ;;  %v3076_v60 = vmax.f32 %v2752_v15, 0.0 }
 0x2eb   : > { %v2747_v59 = vadd.f32 %v15607_v50, %v2746_v58  ;;  %v3074_v62 = vmax.f32 %v2744_v54, 0.0 }
 0x2ec   : > { %v3077_v61 = vmax.f32 %v2755_v33, 0.0  ;;  %4396 = vmatmul.mubr.bf16.gmra.mrb[168].mxu1 %v15712_v39 }
 0x2ed   : > { %v3075_v5 = vmax.f32 %v2747_v59, 0.0  ;;  %4405 = vmatprep.mubr.bf16.mxu1 %v18304_v2 }
 0x2ee   : > { %v15854_v4 = vpack.c.bf16 %v3077_v61, %v3076_v60 }
 0x2ef   : > { %v15856_v7 = vpack.c.bf16 %v3075_v5, %v3074_v62  ;;  %v13401_v11 = vpop.f32.mrb[64].mxu1 }
 0x2f0   : > { %18379 = vst [vmem:[#allocation36_spill] sm:$0xff] %v15854_v4  ;;  %v2768_v12 = vadd.f32 %v13401_v11, %v15607_v50  ;;  %v2759_v13 = vpop.f32.mrb[65].mxu1 }
 0x2f1   : > { %18380 = vst [vmem:[#allocation37_spill] sm:$0xff] %v15856_v7  ;;  %v2760_v14 = vadd.f32 %v15607_v50, %v2759_v13  ;;  %v13402_v22 = vpop.f32.mrb[66].mxu1  ;;  %3773 = vmatmul.mubr.bf16.gmra.mrb[188].mxu0 %v15746_v10 }
 0x2f2   : > { %v2771_v25 = vadd.f32 %v13402_v22, %v15607_v50  ;;  %v2762_v27 = vpop.f32.mrb[67].mxu1  ;;  %3782 = vmatprep.mubr.bf16.mxu0 %v18304_v2  ;;  %v3080_v31 = vmax.f32 %v2768_v12, 0.0 }
 0x2f3   : > { %v2763_v28 = vadd.f32 %v15607_v50, %v2762_v27  ;;  %v3078_v40 = vmax.f32 %v2760_v14, 0.0 }
 0x2f4   : > { %v3081_v32 = vmax.f32 %v2771_v25, 0.0  ;;  %4406 = vmatmul.mubr.bf16.gmra.mrb[172].mxu1 %v15710_v37 }
 0x2f5   : > { %v3079_v41 = vmax.f32 %v2763_v28, 0.0  ;;  %4415 = vmatprep.mubr.bf16.mxu1 %v18304_v2 }
 0x2f6   : > { %v15866_v42 = vpack.c.bf16 %v3081_v32, %v3080_v31 }
 0x2f7   : > { %v15868_v17 = vpack.c.bf16 %v3079_v41, %v3078_v40  ;;  %v13405_v21 = vpop.f32.mrb[68].mxu1 }
 0x2f8   : > { %v2784_v24 = vadd.f32 %v13405_v21, %v15607_v50  ;;  %v2775_v43 = vpop.f32.mrb[69].mxu1 }
 0x2f9   : > { %18381 = vst [vmem:[#allocation38_spill] sm:$0xff] %v15868_v17  ;;  %v2776_v44 = vadd.f32 %v15607_v50, %v2775_v43  ;;  %v13406_v52 = vpop.f32.mrb[70].mxu1  ;;  %3783 = vmatmul.mubr.bf16.gmra.mrb[192].mxu0 %v15760_v35 }
 0x2fa   : > { %v2787_v15 = vadd.f32 %v13406_v52, %v15607_v50  ;;  %v2778_v16 = vpop.f32.mrb[71].mxu1  ;;  %3792 = vmatprep.mubr.bf16.mxu0 %v18304_v2  ;;  %v3084_v56 = vmax.f32 %v2784_v24, 0.0 }
 0x2fb   : > { %v2779_v54 = vadd.f32 %v15607_v50, %v2778_v16  ;;  %v3082_v58 = vmax.f32 %v2776_v44, 0.0 }
 0x2fc   : > { %v3085_v33 = vmax.f32 %v2787_v15, 0.0  ;;  %4416 = vmatmul.mubr.bf16.gmra.mrb[176].mxu1 %v15736_v38 }
 0x2fd   : > { %v3083_v59 = vmax.f32 %v2779_v54, 0.0  ;;  %4425 = vmatprep.mubr.bf16.mxu1 %v18304_v2 }
 0x2fe   : > { %v15878_v60 = vpack.c.bf16 %v3085_v33, %v3084_v56 }
 0x2ff   : > { %v15880_v61 = vpack.c.bf16 %v3083_v59, %v3082_v58  ;;  %v13409_v62 = vpop.f32.mrb[72].mxu1 }
 0x300   : > { %18382 = vst [vmem:[#allocation39_spill] sm:$0xff] %v15878_v60  ;;  %v2800_v5 = vadd.f32 %v13409_v62, %v15607_v50  ;;  %v2791_v11 = vpop.f32.mrb[73].mxu1 }
 0x301   : > { %18383 = vst [vmem:[#allocation40_spill] sm:$0xff] %v15880_v61  ;;  %v2792_v12 = vadd.f32 %v15607_v50, %v2791_v11  ;;  %v13410_v13 = vpop.f32.mrb[74].mxu1  ;;  %3793 = vmatmul.mubr.bf16.gmra.mrb[196].mxu0 %v15758_v34 }
 0x302   : > { %v2803_v14 = vadd.f32 %v13410_v13, %v15607_v50  ;;  %v2794_v22 = vpop.f32.mrb[75].mxu1  ;;  %3802 = vmatprep.mubr.bf16.mxu0 %v18304_v2  ;;  %v3088_v27 = vmax.f32 %v2800_v5, 0.0 }
 0x303   : > { %v2795_v25 = vadd.f32 %v15607_v50, %v2794_v22  ;;  %v3086_v31 = vmax.f32 %v2792_v12, 0.0 }
 0x304   : > { %v3089_v28 = vmax.f32 %v2803_v14, 0.0  ;;  %4426 = vmatmul.mubr.bf16.gmra.mrb[180].mxu1 %v15734_v36 }
 0x305   : > { %v3087_v32 = vmax.f32 %v2795_v25, 0.0  ;;  %4435 = vmatprep.mubr.bf16.mxu1 %v18304_v2 }
 0x306   : > { %v15890_v40 = vpack.c.bf16 %v3089_v28, %v3088_v27 }
 0x307   : > { %v15892_v41 = vpack.c.bf16 %v3087_v32, %v3086_v31  ;;  %v13413_v21 = vpop.f32.mrb[76].mxu1 }
 0x308   : > { %18384 = vst [vmem:[#allocation41_spill] sm:$0xff] %v15890_v40  ;;  %v2816_v24 = vadd.f32 %v13413_v21, %v15607_v50  ;;  %v2807_v43 = vpop.f32.mrb[77].mxu1 }
 0x309   : > { %18385 = vst [vmem:[#allocation42_spill] sm:$0xff] %v15892_v41  ;;  %v2808_v44 = vadd.f32 %v15607_v50, %v2807_v43  ;;  %v13414_v52 = vpop.f32.mrb[78].mxu1  ;;  %3803 = vmatmul.mubr.bf16.gmra.mrb[200].mxu0 %v15772_v51 }
 0x30a   : > { %v2819_v15 = vadd.f32 %v13414_v52, %v15607_v50  ;;  %v2810_v16 = vpop.f32.mrb[79].mxu1  ;;  %3812 = vmatprep.mubr.bf16.mxu0 %v18304_v2  ;;  %v3092_v56 = vmax.f32 %v2816_v24, 0.0 }
 0x30b   : > { %v2811_v54 = vadd.f32 %v15607_v50, %v2810_v16  ;;  %v3090_v58 = vmax.f32 %v2808_v44, 0.0 }
 0x30c   : > { %v3093_v33 = vmax.f32 %v2819_v15, 0.0  ;;  %4436 = vmatmul.mubr.bf16.gmra.mrb[184].mxu1 %v15748_v6 }
 0x30d   : > { %v3091_v59 = vmax.f32 %v2811_v54, 0.0  ;;  %4445 = vmatprep.mubr.bf16.mxu1 %v18304_v2 }
 0x30e   : > { %v15902_v62 = vpack.c.bf16 %v3093_v33, %v3092_v56 }
 0x30f   : > { %v15904_v5 = vpack.c.bf16 %v3091_v59, %v3090_v58  ;;  %v13417_v11 = vpop.f32.mrb[80].mxu1 }
 0x310   : > { %v2832_v12 = vadd.f32 %v13417_v11, %v15607_v50  ;;  %v2823_v13 = vpop.f32.mrb[81].mxu1  ;;  %v3240_v11 = vld [vmem:[%s18352_s30 + $0x110] sm:$0xff] }
 0x311   : > { %18386 = vst [vmem:[#allocation43_spill] sm:$0xff] %v15904_v5  ;;  %v2824_v14 = vadd.f32 %v15607_v50, %v2823_v13  ;;  %v13418_v22 = vpop.f32.mrb[82].mxu1  ;;  %3813 = vmatmul.mubr.bf16.gmra.mrb[204].mxu0 %v15770_v49  ;;  %v3241_v13 = vld [vmem:[%s18352_s30 + $0x118] sm:$0xff] }
 0x312   : > { %v2835_v25 = vadd.f32 %v13418_v22, %v15607_v50  ;;  %v2826_v27 = vpop.f32.mrb[83].mxu1  ;;  %3822 = vmatprep.mubr.bf16.mxu0 %v18304_v2  ;;  %v3096_v31 = vmax.f32 %v2832_v12, 0.0  ;;  %v3244_v12 = vld [vmem:[%s18352_s30 + $0x130] sm:$0xff] }
 0x313   : > { %v2827_v28 = vadd.f32 %v15607_v50, %v2826_v27  ;;  %v3094_v21 = vmax.f32 %v2824_v14, 0.0  ;;  %v12457_v27 = vcombine.high %v3240_v11, %v3244_v12 }
 0x314   : > { %v3097_v32 = vmax.f32 %v2835_v25, 0.0  ;;  %4446 = vmatmul.mubr.bf16.gmra.mrb[188].mxu1 %v15746_v10  ;;  %v12456_v25 = vcombine.low %v3240_v11, %v3244_v12 }
 0x315   : > { %v3095_v24 = vmax.f32 %v2827_v28, 0.0  ;;  %4455 = vmatprep.mubr.bf16.mxu1 %v18304_v2  ;;  %v3245_v28 = vld [vmem:[%s18352_s30 + $0x138] sm:$0xff]  ;;  %4944 = vmatprep.subr.bf16.mxu0 %v12457_v27 }
 0x316   : > { %v15914_v43 = vpack.c.bf16 %v3097_v32, %v3096_v31  ;;  %4945 = vmatpush1.bf16.msra.mxu0 %v12456_v25 }
 0x317   : > { %v15916_v44 = vpack.c.bf16 %v3095_v24, %v3094_v21  ;;  %v13421_v52 = vpop.f32.mrb[84].mxu1  ;;  %v12458_v21 = vcombine.low %v3241_v13, %v3245_v28  ;;  %v12459_v24 = vcombine.high %v3241_v13, %v3245_v28 }
 0x318   : > { %v2848_v15 = vadd.f32 %v13421_v52, %v15607_v50  ;;  %v2839_v16 = vpop.f32.mrb[85].mxu1 }
 0x319   : > { %v2840_v54 = vadd.f32 %v15607_v50, %v2839_v16  ;;  %v13422_v56 = vpop.f32.mrb[86].mxu1  ;;  %3823 = vmatmul.mubr.bf16.gmra.mrb[208].mxu0 %v15784_v0  ;;  %5617 = vmatprep.subr.bf16.mxu1 %v12459_v24 }
 0x31a   : > { %v2851_v33 = vadd.f32 %v13422_v56, %v15607_v50  ;;  %v2842_v58 = vpop.f32.mrb[87].mxu1  ;;  %3832 = vmatprep.mubr.bf16.mxu0 %v18304_v2  ;;  %v3100_v14 = vmax.f32 %v2848_v15, 0.0  ;;  %5618 = vmatpush1.bf16.msra.mxu1 %v12458_v21 }
 0x31b   : > { %v2843_v59 = vadd.f32 %v15607_v50, %v2842_v58  ;;  %v3098_v31 = vmax.f32 %v2840_v54, 0.0 }
 0x31c   : > { %v3101_v22 = vmax.f32 %v2851_v33, 0.0  ;;  %4456 = vmatmul.mubr.bf16.gmra.mrb[192].mxu1 %v15760_v35 }
 0x31d   : > { %v3099_v32 = vmax.f32 %v2843_v59, 0.0  ;;  %4465 = vmatprep.mubr.bf16.mxu1 %v18304_v2  ;;  %v15948_v59 = vld [vmem:[%s18355_s25] ss:$0 sm:$0xff] }
 0x31e   : > { %v15938_v52 = vpack.c.bf16 %v3101_v22, %v3100_v14 }
 0x31f   : > { %v15940_v16 = vpack.c.bf16 %v3099_v32, %v3098_v31  ;;  %v13425_v15 = vpop.f32.mrb[88].mxu1 }
 0x320   : > { %v2864_v56 = vadd.f32 %v13425_v15, %v15607_v50  ;;  %v2855_v33 = vpop.f32.mrb[89].mxu1 }
 0x321   : > { %18387 = vst [vmem:[#allocation44_spill] sm:$0xff] %v15940_v16  ;;  %v2856_v58 = vadd.f32 %v15607_v50, %v2855_v33  ;;  %v13426_v54 = vpop.f32.mrb[90].mxu1  ;;  %3833 = vmatmul.mubr.bf16.gmra.mrb[212].mxu0 %v15782_v63 }
 0x322   : > { %v2867_v11 = vadd.f32 %v15948_v59, %v13426_v54  ;;  %v2858_v12 = vpop.f32.mrb[91].mxu1  ;;  %3842 = vmatprep.mubr.bf16.mxu0 %v18304_v2  ;;  %v3104_v14 = vmax.f32 %v2864_v56, 0.0 }
 0x323   : > { %v2859_v13 = vadd.f32 %v15948_v59, %v2858_v12  ;;  %v3102_v50 = vmax.f32 %v2856_v58, 0.0 }
 0x324   : > { %v3105_v22 = vmax.f32 %v2867_v11, 0.0  ;;  %4466 = vmatmul.mubr.bf16.gmra.mrb[196].mxu1 %v15758_v34 }
 0x325   : > { %v3103_v25 = vmax.f32 %v2859_v13, 0.0  ;;  %4475 = vmatprep.mubr.bf16.mxu1 %v18304_v2 }
 0x326   : > { %v15955_v27 = vpack.c.bf16 %v3105_v22, %v3104_v14 }
 0x327   : > { %v15957_v28 = vpack.c.bf16 %v3103_v25, %v3102_v50  ;;  %v13429_v31 = vpop.f32.mrb[92].mxu1 }
 0x328   : > { %v2880_v32 = vadd.f32 %v15948_v59, %v13429_v31  ;;  %v2871_v21 = vpop.f32.mrb[93].mxu1 }
 0x329   : > { %v2872_v24 = vadd.f32 %v15948_v59, %v2871_v21  ;;  %v13430_v15 = vpop.f32.mrb[94].mxu1  ;;  %3843 = vmatmul.mubr.bf16.gmra.mrb[216].mxu0 %v15796_v30 }
 0x32a   : > { %v2883_v56 = vadd.f32 %v15948_v59, %v13430_v15  ;;  %v2874_v33 = vpop.f32.mrb[95].mxu1  ;;  %3852 = vmatprep.mubr.bf16.mxu0 %v18304_v2  ;;  %v3108_v54 = vmax.f32 %v2880_v32, 0.0 }
 0x32b   : > { %v2875_v58 = vadd.f32 %v15948_v59, %v2874_v33  ;;  %v3106_v12 = vmax.f32 %v2872_v24, 0.0 }
 0x32c   : > { %v3109_v11 = vmax.f32 %v2883_v56, 0.0  ;;  %4476 = vmatmul.mubr.bf16.gmra.mrb[200].mxu1 %v15772_v51 }
 0x32d   : > { %v3107_v13 = vmax.f32 %v2875_v58, 0.0  ;;  %4485 = vmatprep.mubr.bf16.mxu1 %v18304_v2 }
 0x32e   : > { %v15967_v14 = vpack.c.bf16 %v3109_v11, %v3108_v54 }
 0x32f   : > { %v15969_v22 = vpack.c.bf16 %v3107_v13, %v3106_v12  ;;  %v13433_v50 = vpop.f32.mrb[96].mxu1 }
 0x330   : > { %v2896_v25 = vadd.f32 %v15948_v59, %v13433_v50  ;;  %v2887_v31 = vpop.f32.mrb[97].mxu1 }
 0x331   : > { %v2888_v21 = vadd.f32 %v15948_v59, %v2887_v31  ;;  %v13434_v15 = vpop.f32.mrb[98].mxu1  ;;  %3853 = vmatmul.mubr.bf16.gmra.mrb[220].mxu0 %v15794_v29 }
 0x332   : > { %v2899_v32 = vadd.f32 %v15948_v59, %v13434_v15  ;;  %v2890_v56 = vpop.f32.mrb[99].mxu1  ;;  %3862 = vmatprep.mubr.bf16.mxu0 %v18304_v2  ;;  %v3112_v33 = vmax.f32 %v2896_v25, 0.0 }
 0x333   : > { %v2891_v24 = vadd.f32 %v15948_v59, %v2890_v56  ;;  %v3110_v54 = vmax.f32 %v2888_v21, 0.0 }
 0x334   : > { %v3113_v58 = vmax.f32 %v2899_v32, 0.0  ;;  %4486 = vmatmul.mubr.bf16.gmra.mrb[204].mxu1 %v15770_v49 }
 0x335   : > { %v3111_v11 = vmax.f32 %v2891_v24, 0.0  ;;  %4495 = vmatprep.mubr.bf16.mxu1 %v18304_v2 }
 0x336   : > { %v15979_v12 = vpack.c.bf16 %v3113_v58, %v3112_v33 }
 0x337   : > { %v15981_v13 = vpack.c.bf16 %v3111_v11, %v3110_v54  ;;  %v13437_v50 = vpop.f32.mrb[100].mxu1 }
 0x338   : > { %v2912_v31 = vadd.f32 %v15948_v59, %v13437_v50  ;;  %v2903_v15 = vpop.f32.mrb[101].mxu1 }
 0x339   : > { %v2904_v51 = vadd.f32 %v15948_v59, %v2903_v15  ;;  %v13438_v34 = vpop.f32.mrb[102].mxu1  ;;  %3863 = vmatmul.mubr.bf16.gmra.mrb[224].mxu0 %v15808_v48 }
 0x33a   : > { %v2915_v25 = vadd.f32 %v15948_v59, %v13438_v34  ;;  %v2906_v32 = vpop.f32.mrb[103].mxu1  ;;  %3872 = vmatprep.mubr.bf16.mxu0 %v18304_v2  ;;  %v3116_v56 = vmax.f32 %v2912_v31, 0.0 }
 0x33b   : > { %v2907_v21 = vadd.f32 %v15948_v59, %v2906_v32  ;;  %v3114_v33 = vmax.f32 %v2904_v51, 0.0 }
 0x33c   : > { %v3117_v24 = vmax.f32 %v2915_v25, 0.0  ;;  %4496 = vmatmul.mubr.bf16.gmra.mrb[208].mxu1 %v15784_v0 }
 0x33d   : > { %v3115_v58 = vmax.f32 %v2907_v21, 0.0  ;;  %4505 = vmatprep.mubr.bf16.mxu1 %v18304_v2 }
 0x33e   : > { %v15991_v54 = vpack.c.bf16 %v3117_v24, %v3116_v56 }
 0x33f   : > { %v15993_v11 = vpack.c.bf16 %v3115_v58, %v3114_v33  ;;  %v13441_v50 = vpop.f32.mrb[104].mxu1 }
 0x340   : > { %v2928_v34 = vadd.f32 %v15948_v59, %v13441_v50  ;;  %v2919_v15 = vpop.f32.mrb[105].mxu1 }
 0x341   : > { %v2920_v49 = vadd.f32 %v15948_v59, %v2919_v15  ;;  %v13442_v35 = vpop.f32.mrb[106].mxu1  ;;  %3873 = vmatmul.mubr.bf16.gmra.mrb[228].mxu0 %v15806_v47 }
 0x342   : > { %v2931_v31 = vadd.f32 %v15948_v59, %v13442_v35  ;;  %v2922_v25 = vpop.f32.mrb[107].mxu1  ;;  %3882 = vmatprep.mubr.bf16.mxu0 %v18304_v2  ;;  %v3120_v32 = vmax.f32 %v2928_v34, 0.0 }
 0x343   : > { %v2923_v51 = vadd.f32 %v15948_v59, %v2922_v25  ;;  %v3118_v56 = vmax.f32 %v2920_v49, 0.0 }
 0x344   : > { %v3121_v21 = vmax.f32 %v2931_v31, 0.0  ;;  %4506 = vmatmul.mubr.bf16.gmra.mrb[212].mxu1 %v15782_v63 }
 0x345   : > { %v3119_v24 = vmax.f32 %v2923_v51, 0.0  ;;  %4515 = vmatprep.mubr.bf16.mxu1 %v18304_v2 }
 0x346   : > { %v16003_v33 = vpack.c.bf16 %v3121_v21, %v3120_v32 }
 0x347   : > { %v16005_v58 = vpack.c.bf16 %v3119_v24, %v3118_v56  ;;  %v13445_v50 = vpop.f32.mrb[108].mxu1 }
 0x348   : > { %v2944_v35 = vadd.f32 %v15948_v59, %v13445_v50  ;;  %v2935_v15 = vpop.f32.mrb[109].mxu1 }
 0x349   : > { %v2936_v0 = vadd.f32 %v15948_v59, %v2935_v15  ;;  %v13446_v10 = vpop.f32.mrb[110].mxu1  ;;  %3883 = vmatmul.mubr.bf16.gmra.mrb[232].mxu0 %v15820_v3 }
 0x34a   : > { %v2947_v34 = vadd.f32 %v15948_v59, %v13446_v10  ;;  %v2938_v31 = vpop.f32.mrb[111].mxu1  ;;  %3892 = vmatprep.mubr.bf16.mxu0 %v18304_v2  ;;  %v3124_v25 = vmax.f32 %v2944_v35, 0.0 }
 0x34b   : > { %v2939_v49 = vadd.f32 %v15948_v59, %v2938_v31  ;;  %v3122_v21 = vmax.f32 %v2936_v0, 0.0 }
 0x34c   : > { %v3125_v51 = vmax.f32 %v2947_v34, 0.0  ;;  %v3624_v32 = vpop.f32.mrb[128].mxu0  ;;  %4516 = vmatmul.mubr.bf16.gmra.mrb[216].mxu1 %v15796_v30 }
 0x34d   : > { %v3123_v56 = vmax.f32 %v2939_v49, 0.0  ;;  %v3626_v24 = vpop.f32.mrb[129].mxu0  ;;  %4525 = vmatprep.mubr.bf16.mxu1 %v18304_v2 }
 0x34e   : > { %v16015_v50 = vpack.c.bf16 %v3125_v51, %v3124_v25  ;;  %v3628_v15 = vpop.f32.mrb[130].mxu0 }
 0x34f   : > { %v16017_v63 = vpack.c.bf16 %v3123_v56, %v3122_v21  ;;  %v6282_v10 = vmax.f32 %v3624_v32, %v3628_v15  ;;  %v13449_v6 = vpop.f32.mrb[112].mxu1  ;;  %v3630_v36 = vpop.f32.mrb[131].mxu0 }
 0x350   : > { %v2960_v31 = vadd.f32 %v15948_v59, %v13449_v6  ;;  %v6303_v35 = vmax.f32 %v3626_v24, %v3630_v36  ;;  %v2951_v34 = vpop.f32.mrb[113].mxu1 }
 0x351   : > { %v2952_v38 = vadd.f32 %v15948_v59, %v2951_v34  ;;  %v13450_v30 = vpop.f32.mrb[114].mxu1  ;;  %3893 = vmatmul.mubr.bf16.gmra.mrb[236].mxu0 %v15818_v1 }
 0x352   : > { %v2963_v0 = vadd.f32 %v15948_v59, %v13450_v30  ;;  %v2954_v49 = vpop.f32.mrb[115].mxu1  ;;  %3902 = vmatprep.mubr.bf16.mxu0 %v18304_v2  ;;  %v3128_v51 = vmax.f32 %v2960_v31, 0.0 }
 0x353   : > { %v2955_v25 = vadd.f32 %v15948_v59, %v2954_v49  ;;  %v3126_v6 = vmax.f32 %v2952_v38, 0.0 }
 0x354   : > { %v3129_v32 = vmax.f32 %v2963_v0, 0.0  ;;  %v3634_v21 = vpop.f32.mrb[132].mxu0  ;;  %4526 = vmatmul.mubr.bf16.gmra.mrb[220].mxu1 %v15794_v29 }
 0x355   : > { %v3127_v36 = vmax.f32 %v2955_v25, 0.0  ;;  %v6283_v56 = vmax.f32 %v6282_v10, %v3634_v21  ;;  %v3636_v24 = vpop.f32.mrb[133].mxu0  ;;  %4535 = vmatprep.mubr.bf16.mxu1 %v18304_v2  ;;  %v3248_v21 = vld [vmem:[%s18352_s30 + $0x150] sm:$0xff] }
 0x356   : > { %v16027_v15 = vpack.c.bf16 %v3129_v32, %v3128_v51  ;;  %v6304_v34 = vmax.f32 %v6303_v35, %v3636_v24  ;;  %v3638_v30 = vpop.f32.mrb[134].mxu0 }
 0x357   : > { %v16029_v37 = vpack.c.bf16 %v3127_v36, %v3126_v6  ;;  %v6284_v39 = vmax.f32 %v6283_v56, %v3638_v30  ;;  %v13453_v8 = vpop.f32.mrb[116].mxu1  ;;  %v3640_v49 = vpop.f32.mrb[135].mxu0  ;;  %v3253_v30 = vld [vmem:[%s18352_s30 + $0x178] sm:$0xff] }
 0x358   : > { %v2976_v31 = vadd.f32 %v15948_v59, %v13453_v8  ;;  %v6305_v0 = vmax.f32 %v6304_v34, %v3640_v49  ;;  %v2967_v9 = vpop.f32.mrb[117].mxu1  ;;  %v3252_v8 = vld [vmem:[%s18352_s30 + $0x170] sm:$0xff] }
 0x359   : > { %v2968_v38 = vadd.f32 %v15948_v59, %v2967_v9  ;;  %v13454_v25 = vpop.f32.mrb[118].mxu1  ;;  %3903 = vmatmul.mubr.bf16.gmra.mrb[240].mxu0 %v15844_v46  ;;  %v3249_v9 = vld [vmem:[%s18352_s30 + $0x158] sm:$0xff]  ;;  %v12464_v24 = vcombine.low %v3248_v21, %v3252_v8  ;;  %v12465_v34 = vcombine.high %v3248_v21, %v3252_v8 }
 0x35a   : > { %v2979_v10 = vadd.f32 %v15948_v59, %v13454_v25  ;;  %v2970_v51 = vpop.f32.mrb[119].mxu1  ;;  %3912 = vmatprep.mubr.bf16.mxu0 %v18304_v2  ;;  %v3132_v35 = vmax.f32 %v2976_v31, 0.0  ;;  %v12467_v29 = vcombine.high %v3249_v9, %v3253_v30 }
 0x35b   : > { %v2971_v32 = vadd.f32 %v15948_v59, %v2970_v51  ;;  %v3130_v6 = vmax.f32 %v2968_v38, 0.0  ;;  %v12466_v51 = vcombine.low %v3249_v9, %v3253_v30  ;;  %4946 = vmatprep.subr.bf16.mxu0 %v12465_v34 }
 0x35c   : > { %v3133_v36 = vmax.f32 %v2979_v10, 0.0  ;;  %v3644_v56 = vpop.f32.mrb[136].mxu0  ;;  %4536 = vmatmul.mubr.bf16.gmra.mrb[224].mxu1 %v15808_v48  ;;  %5619 = vmatprep.subr.bf16.mxu1 %v12467_v29 }
 0x35d   : > { %v3131_v49 = vmax.f32 %v2971_v32, 0.0  ;;  %v6285_v31 = vmax.f32 %v6284_v39, %v3644_v56  ;;  %v3646_v25 = vpop.f32.mrb[137].mxu0  ;;  %4545 = vmatprep.mubr.bf16.mxu1 %v18304_v2  ;;  %4947 = vmatpush1.bf16.msra.mxu0 %v12464_v24 }
 0x35e   : > { %v16051_v53 = vpack.c.bf16 %v3133_v36, %v3132_v35  ;;  %v6306_v38 = vmax.f32 %v6305_v0, %v3646_v25  ;;  %v3648_v10 = vpop.f32.mrb[138].mxu0  ;;  %5620 = vmatpush1.bf16.msra.mxu1 %v12466_v51 }
 0x35f   : > { %v16053_v57 = vpack.c.bf16 %v3131_v49, %v3130_v6  ;;  %v6286_v48 = vmax.f32 %v6285_v31, %v3648_v10  ;;  %v13457_v21 = vpop.f32.mrb[120].mxu1  ;;  %v3650_v8 = vpop.f32.mrb[139].mxu0  ;;  %v18388_v6 = vmov 0  }
 0x360   : > { %v2992_v32 = vadd.f32 %v15948_v59, %v13457_v21  ;;  %v6307_v39 = vmax.f32 %v6306_v38, %v3650_v8  ;;  %v2983_v56 = vpop.f32.mrb[121].mxu1 }
 0x361   : > { %v2984_v2 = vadd.f32 %v15948_v59, %v2983_v56  ;;  %v13458_v9 = vpop.f32.mrb[122].mxu1  ;;  %3913 = vmatmul.mubr.bf16.gmra.mrb[244].mxu0 %v15842_v45 }
 0x362   : > { %v2995_v0 = vadd.f32 %v15948_v59, %v13458_v9  ;;  %v2986_v35 = vpop.f32.mrb[123].mxu1  ;;  %3922 = vmatprep.mubr.bf16.mxu0 %v18388_v6  ;;  %v3136_v34 = vmax.f32 %v2992_v32, 0.0 }
 0x363   : > { %v2987_v36 = vadd.f32 %v15948_v59, %v2986_v35  ;;  %v3134_v30 = vmax.f32 %v2984_v2, 0.0 }
 0x364   : > { %v3137_v29 = vmax.f32 %v2995_v0, 0.0  ;;  %v3654_v24 = vpop.f32.mrb[140].mxu0  ;;  %4546 = vmatmul.mubr.bf16.gmra.mrb[228].mxu1 %v15806_v47 }
 0x365   : > { %v3135_v49 = vmax.f32 %v2987_v36, 0.0  ;;  %v6287_v31 = vmax.f32 %v6286_v48, %v3654_v24  ;;  %v3656_v25 = vpop.f32.mrb[141].mxu0  ;;  %4555 = vmatprep.mubr.bf16.mxu1 %v18388_v6 }
 0x366   : > { %v16063_v51 = vpack.c.bf16 %v3137_v29, %v3136_v34  ;;  %v6308_v38 = vmax.f32 %v6307_v39, %v3656_v25  ;;  %v3658_v10 = vpop.f32.mrb[142].mxu0 }
 0x367   : > { %v16065_v21 = vpack.c.bf16 %v3135_v49, %v3134_v30  ;;  %v6288_v8 = vmax.f32 %v6287_v31, %v3658_v10  ;;  %v13461_v56 = vpop.f32.mrb[124].mxu1  ;;  %v3660_v9 = vpop.f32.mrb[143].mxu0 }
 0x368   : > { %v3008_v32 = vadd.f32 %v15948_v59, %v13461_v56  ;;  %v6309_v0 = vmax.f32 %v6308_v38, %v3660_v9  ;;  %v2999_v35 = vpop.f32.mrb[125].mxu1 }
 0x369   : > { %v3000_v2 = vadd.f32 %v15948_v59, %v2999_v35  ;;  %v13462_v36 = vpop.f32.mrb[126].mxu1  ;;  %3923 = vmatmul.mubr.bf16.gmra.mrb[248].mxu0 %v15856_v7 }
 0x36a   : > { %v3011_v48 = vadd.f32 %v15948_v59, %v13462_v36  ;;  %v3002_v34 = vpop.f32.mrb[127].mxu1  ;;  %3932 = vmatprep.mubr.bf16.mxu0 %v18388_v6  ;;  %v3140_v29 = vmax.f32 %v3008_v32, 0.0 }
 0x36b   : > { %v3003_v39 = vadd.f32 %v15948_v59, %v3002_v34  ;;  %v3138_v49 = vmax.f32 %v3000_v2, 0.0 }
 0x36c   : > { %v3141_v24 = vmax.f32 %v3011_v48, 0.0  ;;  %v3664_v30 = vpop.f32.mrb[144].mxu0  ;;  %4556 = vmatmul.mubr.bf16.gmra.mrb[232].mxu1 %v15820_v3 }
 0x36d   : > { %v3139_v31 = vmax.f32 %v3003_v39, 0.0  ;;  %v6289_v25 = vmax.f32 %v6288_v8, %v3664_v30  ;;  %v3666_v38 = vpop.f32.mrb[145].mxu0  ;;  %4565 = vmatprep.mubr.bf16.mxu1 %v18388_v6 }
 0x36e   : > { %v16075_v10 = vpack.c.bf16 %v3141_v24, %v3140_v29  ;;  %v6310_v56 = vmax.f32 %v6309_v0, %v3666_v38  ;;  %v3668_v9 = vpop.f32.mrb[146].mxu0 }
 0x36f   : > { %v16077_v35 = vpack.c.bf16 %v3139_v31, %v3138_v49  ;;  %v6290_v36 = vmax.f32 %v6289_v25, %v3668_v9  ;;  %v3670_v47 = vpop.f32.mrb[147].mxu0  ;;  %v4297_v59 = vpop.f32.mrb[128].mxu1 }
 0x370   : > { %v6311_v32 = vmax.f32 %v6310_v56, %v3670_v47  ;;  %v4299_v48 = vpop.f32.mrb[129].mxu1 }
 0x371   : > { %3933 = vmatmul.mubr.bf16.gmra.mrb[252].mxu0 %v15854_v4  ;;  %v4301_v34 = vpop.f32.mrb[130].mxu1 }
 0x372   : > { %v6324_v2 = vmax.f32 %v4297_v59, %v4301_v34  ;;  %v4303_v39 = vpop.f32.mrb[131].mxu1  ;;  %3942 = vmatprep.mubr.bf16.mxu0 %v18388_v6 }
 0x373   : > { %v6345_v8 = vmax.f32 %v4299_v48, %v4303_v39 }
 0x374   : > { %v3674_v30 = vpop.f32.mrb[148].mxu0  ;;  %4566 = vmatmul.mubr.bf16.gmra.mrb[236].mxu1 %v15818_v1 }
 0x375   : > { %v6291_v0 = vmax.f32 %v6290_v36, %v3674_v30  ;;  %v3676_v29 = vpop.f32.mrb[149].mxu0  ;;  %4575 = vmatprep.mubr.bf16.mxu1 %v18388_v6 }
 0x376   : > { %v6312_v24 = vmax.f32 %v6311_v32, %v3676_v29  ;;  %v3678_v49 = vpop.f32.mrb[150].mxu0 }
 0x377   : > { %v6292_v31 = vmax.f32 %v6291_v0, %v3678_v49  ;;  %v3680_v47 = vpop.f32.mrb[151].mxu0  ;;  %v4307_v25 = vpop.f32.mrb[132].mxu1 }
 0x378   : > { %v6313_v38 = vmax.f32 %v6312_v24, %v3680_v47  ;;  %v6325_v56 = vmax.f32 %v6324_v2, %v4307_v25  ;;  %v4309_v9 = vpop.f32.mrb[133].mxu1 }
 0x379   : > { %v6346_v59 = vmax.f32 %v6345_v8, %v4309_v9  ;;  %3943 = vmatmul.mubr.bf16.gmra.mrb[0].mxu0 %v15868_v17  ;;  %v4311_v34 = vpop.f32.mrb[134].mxu1 }
 0x37a   : > { %v6326_v48 = vmax.f32 %v6325_v56, %v4311_v34  ;;  %v4313_v39 = vpop.f32.mrb[135].mxu1  ;;  %3952 = vmatprep.mubr.bf16.mxu0 %v18388_v6 }
 0x37b   : > { %v6347_v36 = vmax.f32 %v6346_v59, %v4313_v39 }
 0x37c   : > { %v3684_v30 = vpop.f32.mrb[152].mxu0  ;;  %4576 = vmatmul.mubr.bf16.gmra.mrb[240].mxu1 %v15844_v46 }
 0x37d   : > { %v6293_v32 = vmax.f32 %v6292_v31, %v3684_v30  ;;  %v3686_v29 = vpop.f32.mrb[153].mxu0  ;;  %4585 = vmatprep.mubr.bf16.mxu1 %v18388_v6 }
 0x37e   : > { %v6314_v0 = vmax.f32 %v6313_v38, %v3686_v29  ;;  %v3688_v24 = vpop.f32.mrb[154].mxu0 }
 0x37f   : > { %v6294_v2 = vmax.f32 %v6293_v32, %v3688_v24  ;;  %v3690_v49 = vpop.f32.mrb[155].mxu0  ;;  %v4317_v8 = vpop.f32.mrb[136].mxu1 }
 0x380   : > { %v6315_v47 = vmax.f32 %v6314_v0, %v3690_v49  ;;  %v6327_v25 = vmax.f32 %v6326_v48, %v4317_v8  ;;  %v4319_v9 = vpop.f32.mrb[137].mxu1 }
 0x381   : > { %v6348_v56 = vmax.f32 %v6347_v36, %v4319_v9  ;;  %3953 = vmatmul.mubr.bf16.gmra.mrb[4].mxu0 %v15866_v42  ;;  %v4321_v34 = vpop.f32.mrb[138].mxu1 }
 0x382   : > { %v6328_v59 = vmax.f32 %v6327_v25, %v4321_v34  ;;  %v4323_v39 = vpop.f32.mrb[139].mxu1  ;;  %3962 = vmatprep.mubr.bf16.mxu0 %v18388_v6 }
 0x383   : > { %v6349_v31 = vmax.f32 %v6348_v56, %v4323_v39 }
 0x384   : > { %v3694_v30 = vpop.f32.mrb[156].mxu0  ;;  %4586 = vmatmul.mubr.bf16.gmra.mrb[244].mxu1 %v15842_v45 }
 0x385   : > { %v6295_v38 = vmax.f32 %v6294_v2, %v3694_v30  ;;  %v3696_v29 = vpop.f32.mrb[157].mxu0  ;;  %4595 = vmatprep.mubr.bf16.mxu1 %v18388_v6 }
 0x386   : > { %v6316_v32 = vmax.f32 %v6315_v47, %v3696_v29  ;;  %v3698_v0 = vpop.f32.mrb[158].mxu0 }
 0x387   : > { %v16091_v48 = vmax.f32 %v6295_v38, %v3698_v0  ;;  %v3700_v36 = vpop.f32.mrb[159].mxu0  ;;  %v4327_v24 = vpop.f32.mrb[140].mxu1 }
 0x388   : > { %v16093_v49 = vmax.f32 %v6316_v32, %v3700_v36  ;;  %v6329_v8 = vmax.f32 %v6328_v59, %v4327_v24  ;;  %v4329_v25 = vpop.f32.mrb[141].mxu1 }
 0x389   : > { %v6350_v9 = vmax.f32 %v6349_v31, %v4329_v25  ;;  %3963 = vmatmul.mubr.bf16.gmra.mrb[8].mxu0 %v15880_v61  ;;  %v4331_v56 = vpop.f32.mrb[142].mxu1 }
 0x38a   : > { %v6330_v34 = vmax.f32 %v6329_v8, %v4331_v56  ;;  %v4333_v39 = vpop.f32.mrb[143].mxu1  ;;  %3972 = vmatprep.mubr.bf16.mxu0 %v18388_v6 }
 0x38b   : > { %v6351_v2 = vmax.f32 %v6350_v9, %v4333_v39 }
 0x38c   : > { %v3704_v30 = vpop.f32.mrb[160].mxu0  ;;  %4596 = vmatmul.mubr.bf16.gmra.mrb[248].mxu1 %v15856_v7 }
 0x38d   : > { %v3706_v47 = vpop.f32.mrb[161].mxu0  ;;  %4605 = vmatprep.mubr.bf16.mxu1 %v18388_v6 }
 0x38e   : > { %v3708_v38 = vpop.f32.mrb[162].mxu0 }
 0x38f   : > { %v6450_v29 = vmax.f32 %v3704_v30, %v3708_v38  ;;  %v3710_v32 = vpop.f32.mrb[163].mxu0  ;;  %v4337_v59 = vpop.f32.mrb[144].mxu1 }
 0x390   : > { %v6471_v0 = vmax.f32 %v3706_v47, %v3710_v32  ;;  %v6331_v31 = vmax.f32 %v6330_v34, %v4337_v59  ;;  %v4339_v36 = vpop.f32.mrb[145].mxu1 }
 0x391   : > { %v6352_v24 = vmax.f32 %v6351_v2, %v4339_v36  ;;  %3973 = vmatmul.mubr.bf16.gmra.mrb[12].mxu0 %v15878_v60  ;;  %v4341_v8 = vpop.f32.mrb[146].mxu1 }
 0x392   : > { %v6332_v25 = vmax.f32 %v6331_v31, %v4341_v8  ;;  %v4343_v56 = vpop.f32.mrb[147].mxu1  ;;  %3982 = vmatprep.mubr.bf16.mxu0 %v18388_v6 }
 0x393   : > { %v6353_v9 = vmax.f32 %v6352_v24, %v4343_v56 }
 0x394   : > { %v3714_v39 = vpop.f32.mrb[164].mxu0  ;;  %4606 = vmatmul.mubr.bf16.gmra.mrb[252].mxu1 %v15854_v4 }
 0x395   : > { %v6451_v7 = vmax.f32 %v6450_v29, %v3714_v39  ;;  %v3716_v45 = vpop.f32.mrb[165].mxu0  ;;  %4615 = vmatprep.mubr.bf16.mxu1 %v18388_v6 }
 0x396   : > { %v6472_v30 = vmax.f32 %v6471_v0, %v3716_v45  ;;  %v3718_v47 = vpop.f32.mrb[166].mxu0  ;;  %v3256_v45 = vld [vmem:[%s18352_s30 + $0x190] sm:$0xff]  ;;  %v3257_v0 = vld [vmem:[%s18352_s30 + $0x198] sm:$0xff] }
 0x397   : > { %v6452_v34 = vmax.f32 %v6451_v7, %v3718_v47  ;;  %v3720_v38 = vpop.f32.mrb[167].mxu0  ;;  %v4347_v2 = vpop.f32.mrb[148].mxu1  ;;  %v3260_v7 = vld [vmem:[%s18352_s30 + $0x1b0] sm:$0xff] }
 0x398   : > { %v6473_v32 = vmax.f32 %v6472_v30, %v3720_v38  ;;  %v6333_v59 = vmax.f32 %v6332_v25, %v4347_v2  ;;  %v4349_v36 = vpop.f32.mrb[149].mxu1  ;;  %v12473_v39 = vcombine.high %v3256_v45, %v3260_v7  ;;  %v3261_v30 = vld [vmem:[%s18352_s30 + $0x1b8] sm:$0xff] }
 0x399   : > { %v6354_v31 = vmax.f32 %v6353_v9, %v4349_v36  ;;  %3983 = vmatmul.mubr.bf16.gmra.mrb[16].mxu0 %v15892_v41  ;;  %v4351_v8 = vpop.f32.mrb[150].mxu1  ;;  %v12472_v9 = vcombine.low %v3256_v45, %v3260_v7  ;;  %v12474_v2 = vcombine.low %v3257_v0, %v3261_v30 }
 0x39a   : > { %v6334_v24 = vmax.f32 %v6333_v59, %v4351_v8  ;;  %v4353_v56 = vpop.f32.mrb[151].mxu1  ;;  %3992 = vmatprep.mubr.bf16.mxu0 %v18388_v6  ;;  %v12475_v59 = vcombine.high %v3257_v0, %v3261_v30  ;;  %4948 = vmatprep.subr.bf16.mxu0 %v12473_v39 }
 0x39b   : > { %v6355_v29 = vmax.f32 %v6354_v31, %v4353_v56  ;;  %4949 = vmatpush1.bf16.msra.mxu0 %v12472_v9 }
 0x39c   : > { %v3724_v25 = vpop.f32.mrb[168].mxu0  ;;  %4616 = vmatmul.mubr.bf16.gmra.mrb[0].mxu1 %v15868_v17  ;;  %5621 = vmatprep.subr.bf16.mxu1 %v12475_v59 }
 0x39d   : > { %v6453_v47 = vmax.f32 %v6452_v34, %v3724_v25  ;;  %v3726_v38 = vpop.f32.mrb[169].mxu0  ;;  %4625 = vmatprep.mubr.bf16.mxu1 %v18388_v6  ;;  %5622 = vmatpush1.bf16.msra.mxu1 %v12474_v2 }
 0x39e   : > { %v6474_v36 = vmax.f32 %v6473_v32, %v3726_v38  ;;  %v3728_v31 = vpop.f32.mrb[170].mxu0 }
 0x39f   : > { %v6454_v8 = vmax.f32 %v6453_v47, %v3728_v31  ;;  %v3730_v56 = vpop.f32.mrb[171].mxu0  ;;  %v4357_v4 = vpop.f32.mrb[152].mxu1 }
 0x3a0   : > { %v6475_v17 = vmax.f32 %v6474_v36, %v3730_v56  ;;  %v6335_v45 = vmax.f32 %v6334_v24, %v4357_v4  ;;  %v4359_v7 = vpop.f32.mrb[153].mxu1 }
 0x3a1   : > { %v6356_v46 = vmax.f32 %v6355_v29, %v4359_v7  ;;  %3993 = vmatmul.mubr.bf16.gmra.mrb[20].mxu0 %v15890_v40  ;;  %v4361_v34 = vpop.f32.mrb[154].mxu1 }
 0x3a2   : > { %v6336_v25 = vmax.f32 %v6335_v45, %v4361_v34  ;;  %v4363_v1 = vpop.f32.mrb[155].mxu1  ;;  %4002 = vmatprep.mubr.bf16.mxu0 %v18388_v6 }
 0x3a3   : > { %v6357_v32 = vmax.f32 %v6356_v46, %v4363_v1 }
 0x3a4   : > { %v3734_v0 = vpop.f32.mrb[172].mxu0  ;;  %4626 = vmatmul.mubr.bf16.gmra.mrb[4].mxu1 %v15866_v42 }
 0x3a5   : > { %v6455_v39 = vmax.f32 %v6454_v8, %v3734_v0  ;;  %v3736_v30 = vpop.f32.mrb[173].mxu0  ;;  %4635 = vmatprep.mubr.bf16.mxu1 %v18388_v6 }
 0x3a6   : > { %v6476_v9 = vmax.f32 %v6475_v17, %v3736_v30  ;;  %v3738_v4 = vpop.f32.mrb[174].mxu0 }
 0x3a7   : > { %v6456_v24 = vmax.f32 %v6455_v39, %v3738_v4  ;;  %v3740_v47 = vpop.f32.mrb[175].mxu0  ;;  %v4367_v29 = vpop.f32.mrb[156].mxu1 }
 0x3a8   : > { %v6477_v38 = vmax.f32 %v6476_v9, %v3740_v47  ;;  %v6337_v2 = vmax.f32 %v6336_v25, %v4367_v29  ;;  %v4369_v59 = vpop.f32.mrb[157].mxu1 }
 0x3a9   : > { %v6358_v36 = vmax.f32 %v6357_v32, %v4369_v59  ;;  %4003 = vmatmul.mubr.bf16.gmra.mrb[24].mxu0 %v15904_v5  ;;  %v4371_v31 = vpop.f32.mrb[158].mxu1 }
 0x3aa   : > { %v16124_v1 = vmax.f32 %v6337_v2, %v4371_v31  ;;  %v4373_v46 = vpop.f32.mrb[159].mxu1  ;;  %4012 = vmatprep.mubr.bf16.mxu0 %v18388_v6 }
 0x3ab   : > { %v16127_v8 = vmax.f32 %v6358_v36, %v4373_v46 }
 0x3ac   : > { %v3744_v56 = vpop.f32.mrb[176].mxu0  ;;  %4636 = vmatmul.mubr.bf16.gmra.mrb[8].mxu1 %v15880_v61 }
 0x3ad   : > { %v6457_v17 = vmax.f32 %v6456_v24, %v3744_v56  ;;  %v3746_v45 = vpop.f32.mrb[177].mxu0  ;;  %4645 = vmatprep.mubr.bf16.mxu1 %v18388_v6 }
 0x3ae   : > { %v6478_v7 = vmax.f32 %v6477_v38, %v3746_v45  ;;  %v3748_v34 = vpop.f32.mrb[178].mxu0 }
 0x3af   : > { %v6458_v25 = vmax.f32 %v6457_v17, %v3748_v34  ;;  %v3750_v32 = vpop.f32.mrb[179].mxu0  ;;  %v4377_v0 = vpop.f32.mrb[160].mxu1 }
 0x3b0   : > { %v6479_v39 = vmax.f32 %v6478_v7, %v3750_v32  ;;  %v4379_v30 = vpop.f32.mrb[161].mxu1 }
 0x3b1   : > { %4013 = vmatmul.mubr.bf16.gmra.mrb[28].mxu0 %v15902_v62  ;;  %v4381_v9 = vpop.f32.mrb[162].mxu1 }
 0x3b2   : > { %v6492_v4 = vmax.f32 %v4377_v0, %v4381_v9  ;;  %v4383_v47 = vpop.f32.mrb[163].mxu1  ;;  %4022 = vmatprep.mubr.bf16.mxu0 %v18388_v6 }
 0x3b3   : > { %v6513_v29 = vmax.f32 %v4379_v30, %v4383_v47 }
 0x3b4   : > { %v3754_v2 = vpop.f32.mrb[180].mxu0  ;;  %4646 = vmatmul.mubr.bf16.gmra.mrb[12].mxu1 %v15878_v60 }
 0x3b5   : > { %v6459_v24 = vmax.f32 %v6458_v25, %v3754_v2  ;;  %v3756_v59 = vpop.f32.mrb[181].mxu0  ;;  %4655 = vmatprep.mubr.bf16.mxu1 %v18388_v6 }
 0x3b6   : > { %v6480_v38 = vmax.f32 %v6479_v39, %v3756_v59  ;;  %v3758_v36 = vpop.f32.mrb[182].mxu0 }
 0x3b7   : > { %v6460_v31 = vmax.f32 %v6459_v24, %v3758_v36  ;;  %v3760_v46 = vpop.f32.mrb[183].mxu0  ;;  %v4387_v56 = vpop.f32.mrb[164].mxu1  ;;  %v6318_v36 = vrot.slane %v16093_v49, 4 }
 0x3b8   : > { %v6481_v17 = vmax.f32 %v6480_v38, %v3760_v46  ;;  %v6493_v45 = vmax.f32 %v6492_v4, %v4387_v56  ;;  %v4389_v7 = vpop.f32.mrb[165].mxu1  ;;  %v6297_v4 = vrot.slane %v16091_v48, 4 }
 0x3b9   : > { %v6514_v34 = vmax.f32 %v6513_v29, %v4389_v7  ;;  %4023 = vmatmul.mubr.bf16.gmra.mrb[32].mxu0 %v15916_v44  ;;  %v4391_v32 = vpop.f32.mrb[166].mxu1 }
 0x3ba   : > { %v6494_v0 = vmax.f32 %v6493_v45, %v4391_v32  ;;  %v4393_v30 = vpop.f32.mrb[167].mxu1  ;;  %4032 = vmatprep.mubr.bf16.mxu0 %v18388_v6 }
 0x3bb   : > { %v6515_v25 = vmax.f32 %v6514_v34, %v4393_v30 }
 0x3bc   : > { %v3764_v9 = vpop.f32.mrb[184].mxu0  ;;  %4656 = vmatmul.mubr.bf16.gmra.mrb[16].mxu1 %v15892_v41 }
 0x3bd   : > { %v6461_v39 = vmax.f32 %v6460_v31, %v3764_v9  ;;  %v3766_v47 = vpop.f32.mrb[185].mxu0  ;;  %4665 = vmatprep.mubr.bf16.mxu1 %v18388_v6  ;;  %v6319_v9 = vmax.f32 %v16093_v49, %v6318_v36 }
 0x3be   : > { %v6482_v2 = vmax.f32 %v6481_v17, %v3766_v47  ;;  %v3768_v24 = vpop.f32.mrb[186].mxu0  ;;  %v6298_v17 = vmax.f32 %v16091_v48, %v6297_v4 }
 0x3bf   : > { %v6462_v29 = vmax.f32 %v6461_v39, %v3768_v24  ;;  %v3770_v59 = vpop.f32.mrb[187].mxu0  ;;  %v4397_v38 = vpop.f32.mrb[168].mxu1 }
 0x3c0   : > { %v6483_v46 = vmax.f32 %v6482_v2, %v3770_v59  ;;  %v6495_v56 = vmax.f32 %v6494_v0, %v4397_v38  ;;  %v4399_v45 = vpop.f32.mrb[169].mxu1  ;;  %v6299_v24 = vrot.slane %v6298_v17, 2 }
 0x3c1   : > { %v6516_v7 = vmax.f32 %v6515_v25, %v4399_v45  ;;  %4033 = vmatmul.mubr.bf16.gmra.mrb[36].mxu0 %v15914_v43  ;;  %v4401_v34 = vpop.f32.mrb[170].mxu1  ;;  %v6320_v45 = vrot.slane %v6319_v9, 2 }
 0x3c2   : > { %v6496_v31 = vmax.f32 %v6495_v56, %v4401_v34  ;;  %v4403_v32 = vpop.f32.mrb[171].mxu1  ;;  %4042 = vmatprep.mubr.bf16.mxu0 %v18388_v6 }
 0x3c3   : > { %v6517_v30 = vmax.f32 %v6516_v7, %v4403_v32 }
 0x3c4   : > { %v3774_v39 = vpop.f32.mrb[188].mxu0  ;;  %4666 = vmatmul.mubr.bf16.gmra.mrb[20].mxu1 %v15890_v40 }
 0x3c5   : > { %v6463_v47 = vmax.f32 %v6462_v29, %v3774_v39  ;;  %v3776_v2 = vpop.f32.mrb[189].mxu0  ;;  %4675 = vmatprep.mubr.bf16.mxu1 %v18388_v6 }
 0x3c6   : > { %v6484_v0 = vmax.f32 %v6483_v46, %v3776_v2  ;;  %v3778_v25 = vpop.f32.mrb[190].mxu0  ;;  %v6300_v46 = vmax.f32 %v6298_v17, %v6299_v24 }
 0x3c7   : > { %v6464_v59 = vmax.f32 %v6463_v47, %v3778_v25  ;;  %v3780_v38 = vpop.f32.mrb[191].mxu0  ;;  %v4407_v56 = vpop.f32.mrb[172].mxu1  ;;  %v6321_v47 = vmax.f32 %v6319_v9, %v6320_v45 }
 0x3c8   : > { %v6485_v34 = vmax.f32 %v6484_v0, %v3780_v38  ;;  %v6497_v41 = vmax.f32 %v6496_v31, %v4407_v56  ;;  %v4409_v48 = vpop.f32.mrb[173].mxu1  ;;  %v6301_v56 = vrot.slane %v6300_v46, 1 }
 0x3c9   : > { %v6465_v4 = vrot.slane %v6464_v59, 4  ;;  %v6518_v7 = vmax.f32 %v6517_v30, %v4409_v48  ;;  %4043 = vmatmul.mubr.bf16.gmra.mrb[40].mxu0 %v15940_v16  ;;  %v4411_v49 = vpop.f32.mrb[174].mxu1  ;;  %v6322_v61 = vrot.slane %v6321_v47, 1 }
 0x3ca   : > { %v6486_v36 = vrot.slane %v6485_v34, 4  ;;  %v6498_v29 = vmax.f32 %v6497_v41, %v4411_v49  ;;  %v4413_v32 = vpop.f32.mrb[175].mxu1  ;;  %4052 = vmatprep.mubr.bf16.mxu0 %v18388_v6 }
 0x3cb   : > { %v6466_v39 = vmax.f32 %v6464_v59, %v6465_v4  ;;  %v6519_v2 = vmax.f32 %v6518_v7, %v4413_v32 }
 0x3cc   : > { %v6487_v25 = vmax.f32 %v6485_v34, %v6486_v36  ;;  %v3784_v40 = vpop.f32.mrb[192].mxu0  ;;  %4676 = vmatmul.mubr.bf16.gmra.mrb[24].mxu1 %v15904_v5 }
 0x3cd   : > { %v6467_v31 = vrot.slane %v6466_v39, 2  ;;  %v3786_v0 = vpop.f32.mrb[193].mxu0  ;;  %4685 = vmatprep.mubr.bf16.mxu1 %v18388_v6 }
 0x3ce   : > { %v6488_v30 = vrot.slane %v6487_v25, 2  ;;  %v3788_v38 = vpop.f32.mrb[194].mxu0 }
 0x3cf   : > { %v6468_v48 = vmax.f32 %v6466_v39, %v6467_v31  ;;  %v6618_v41 = vmax.f32 %v3784_v40, %v3788_v38  ;;  %v3790_v49 = vpop.f32.mrb[195].mxu0  ;;  %v4417_v60 = vpop.f32.mrb[176].mxu1  ;;  %v6302_v39 = vmax.f32 %v6300_v46, %v6301_v56  ;;  %v6323_v38 = vmax.f32 %v6321_v47, %v6322_v61 }
 0x3d0   : > { %v6489_v17 = vmax.f32 %v6487_v25, %v6488_v30  ;;  %v6639_v24 = vmax.f32 %v3786_v0, %v3790_v49  ;;  %v6499_v59 = vmax.f32 %v6498_v29, %v4417_v60  ;;  %v4419_v9 = vpop.f32.mrb[177].mxu1 }
 0x3d1   : > { %v6469_v45 = vrot.slane %v6468_v48, 1  ;;  %v6520_v34 = vmax.f32 %v6519_v2, %v4419_v9  ;;  %4053 = vmatmul.mubr.bf16.gmra.mrb[44].mxu0 %v15938_v52  ;;  %v4421_v4 = vpop.f32.mrb[178].mxu1 }
 0x3d2   : > { %v6490_v7 = vrot.slane %v6489_v17, 1  ;;  %v6500_v36 = vmax.f32 %v6499_v59, %v4421_v4  ;;  %v4423_v32 = vpop.f32.mrb[179].mxu1  ;;  %4062 = vmatprep.mubr.bf16.mxu0 %v18388_v6  ;;  %v3265_v4 = vld [vmem:[%s18352_s30 + $0x1d8] sm:$0xff] }
 0x3d3   : > { %v6470_v40 = vmax.f32 %v6468_v48, %v6469_v45  ;;  %v6521_v31 = vmax.f32 %v6520_v34, %v4423_v32 }
 0x3d4   : > { %v6491_v5 = vmax.f32 %v6489_v17, %v6490_v7  ;;  %v3794_v25 = vpop.f32.mrb[196].mxu0  ;;  %4686 = vmatmul.mubr.bf16.gmra.mrb[28].mxu1 %v15902_v62 }
 0x3d5   : > { %v16155_v60 = vsel %vm7698_vm4, %v6470_v40, %v6302_v39  ;;  %v6619_v29 = vmax.f32 %v6618_v41, %v3794_v25  ;;  %v3796_v2 = vpop.f32.mrb[197].mxu0  ;;  %4695 = vmatprep.mubr.bf16.mxu1 %v18388_v6  ;;  %v3269_v39 = vld [vmem:[%s18352_s30 + $0x1f8] sm:$0xff] }
 0x3d6   : > { %v16159_v0 = vsel %vm7698_vm4, %v6491_v5, %v6323_v38  ;;  %v6640_v30 = vmax.f32 %v6639_v24, %v3796_v2  ;;  %v3798_v49 = vpop.f32.mrb[198].mxu0  ;;  %v3264_v5 = vld [vmem:[%s18352_s30 + $0x1d0] sm:$0xff]  ;;  %v12482_v38 = vcombine.low %v3265_v4, %v3269_v39  ;;  %v12483_v25 = vcombine.high %v3265_v4, %v3269_v39 }
 0x3d7   : > { %v6620_v46 = vmax.f32 %v6619_v29, %v3798_v49  ;;  %v3800_v56 = vpop.f32.mrb[199].mxu0  ;;  %v4427_v48 = vpop.f32.mrb[180].mxu1  ;;  %v3268_v24 = vld [vmem:[%s18352_s30 + $0x1f0] sm:$0xff] }
 0x3d8   : > { %v6641_v61 = vmax.f32 %v6640_v30, %v3800_v56  ;;  %v6501_v47 = vmax.f32 %v6500_v36, %v4427_v48  ;;  %v4429_v17 = vpop.f32.mrb[181].mxu1  ;;  %v12480_v36 = vcombine.low %v3264_v5, %v3268_v24  ;;  %v12481_v32 = vcombine.high %v3264_v5, %v3268_v24  ;;  %5623 = vmatprep.subr.bf16.mxu1 %v12483_v25 }
 0x3d9   : > { %v6522_v59 = vmax.f32 %v6521_v31, %v4429_v17  ;;  %4063 = vmatmul.mubr.bf16.gmra.mrb[48].mxu0 %v15957_v28  ;;  %v4431_v9 = vpop.f32.mrb[182].mxu1  ;;  %5624 = vmatpush1.bf16.msra.mxu1 %v12482_v38 }
 0x3da   : > { %v6502_v45 = vmax.f32 %v6501_v47, %v4431_v9  ;;  %v4433_v41 = vpop.f32.mrb[183].mxu1  ;;  %4072 = vmatprep.mubr.bf16.mxu0 %v18388_v6  ;;  %4950 = vmatprep.subr.bf16.mxu0 %v12481_v32  ;;  %v6339_v9 = vrot.slane %v16124_v1, 4 }
 0x3db   : > { %v6523_v34 = vmax.f32 %v6522_v59, %v4433_v41  ;;  %4951 = vmatpush1.bf16.msra.mxu0 %v12480_v36 }
 0x3dc   : > { %v3804_v7 = vpop.f32.mrb[200].mxu0  ;;  %4696 = vmatmul.mubr.bf16.gmra.mrb[32].mxu1 %v15916_v44 }
 0x3dd   : > { %v6621_v40 = vmax.f32 %v6620_v46, %v3804_v7  ;;  %v3806_v31 = vpop.f32.mrb[201].mxu0  ;;  %4705 = vmatprep.mubr.bf16.mxu1 %v18388_v6 }
 0x3de   : > { %v6642_v29 = vmax.f32 %v6641_v61, %v3806_v31  ;;  %v3808_v2 = vpop.f32.mrb[202].mxu0  ;;  %v6360_v61 = vrot.slane %v16127_v8, 4 }
 0x3df   : > { %v6622_v30 = vmax.f32 %v6621_v40, %v3808_v2  ;;  %v3810_v49 = vpop.f32.mrb[203].mxu0  ;;  %v4437_v56 = vpop.f32.mrb[184].mxu1 }
 0x3e0   : > { %v6643_v48 = vmax.f32 %v6642_v29, %v3810_v49  ;;  %v6503_v47 = vmax.f32 %v6502_v45, %v4437_v56  ;;  %v4439_v17 = vpop.f32.mrb[185].mxu1  ;;  %v6361_v39 = vmax.f32 %v16127_v8, %v6360_v61 }
 0x3e1   : > { %v6524_v59 = vmax.f32 %v6523_v34, %v4439_v17  ;;  %4073 = vmatmul.mubr.bf16.gmra.mrb[52].mxu0 %v15955_v27  ;;  %v4441_v46 = vpop.f32.mrb[186].mxu1  ;;  %v6340_v34 = vmax.f32 %v16124_v1, %v6339_v9 }
 0x3e2   : > { %v6504_v41 = vmax.f32 %v6503_v47, %v4441_v46  ;;  %v4443_v5 = vpop.f32.mrb[187].mxu1  ;;  %4082 = vmatprep.mubr.bf16.mxu0 %v18388_v6  ;;  %v6362_v1 = vrot.slane %v6361_v39, 2 }
 0x3e3   : > { %v6525_v24 = vmax.f32 %v6524_v59, %v4443_v5 }
 0x3e4   : > { %v3814_v4 = vpop.f32.mrb[204].mxu0  ;;  %4706 = vmatmul.mubr.bf16.gmra.mrb[36].mxu1 %v15914_v43 }
 0x3e5   : > { %v6623_v7 = vmax.f32 %v6622_v30, %v3814_v4  ;;  %v3816_v45 = vpop.f32.mrb[205].mxu0  ;;  %4715 = vmatprep.mubr.bf16.mxu1 %v18388_v6  ;;  %v6341_v30 = vrot.slane %v6340_v34, 2 }
 0x3e6   : > { %v6644_v36 = vmax.f32 %v6643_v48, %v3816_v45  ;;  %v3818_v32 = vpop.f32.mrb[206].mxu0 }
 0x3e7   : > { %v6624_v40 = vmax.f32 %v6623_v7, %v3818_v32  ;;  %v3820_v31 = vpop.f32.mrb[207].mxu0  ;;  %v4447_v38 = vpop.f32.mrb[188].mxu1  ;;  %v6363_v7 = vmax.f32 %v6361_v39, %v6362_v1 }
 0x3e8   : > { %v6645_v25 = vmax.f32 %v6644_v36, %v3820_v31  ;;  %v6505_v29 = vmax.f32 %v6504_v41, %v4447_v38  ;;  %v4449_v2 = vpop.f32.mrb[189].mxu1  ;;  %v6342_v41 = vmax.f32 %v6340_v34, %v6341_v30 }
 0x3e9   : > { %v6526_v49 = vmax.f32 %v6525_v24, %v4449_v2  ;;  %4083 = vmatmul.mubr.bf16.gmra.mrb[56].mxu0 %v15969_v22  ;;  %v4451_v56 = vpop.f32.mrb[190].mxu1  ;;  %v6364_v34 = vrot.slane %v6363_v7, 1 }
 0x3ea   : > { %v6506_v47 = vmax.f32 %v6505_v29, %v4451_v56  ;;  %v4453_v17 = vpop.f32.mrb[191].mxu1  ;;  %4092 = vmatprep.mubr.bf16.mxu0 %v18388_v6 }
 0x3eb   : > { %v6527_v48 = vmax.f32 %v6526_v49, %v4453_v17 }
 0x3ec   : > { %v6507_v59 = vrot.slane %v6506_v47, 4  ;;  %v3824_v46 = vpop.f32.mrb[208].mxu0  ;;  %4716 = vmatmul.mubr.bf16.gmra.mrb[40].mxu1 %v15940_v16 }
 0x3ed   : > { %v6528_v8 = vrot.slane %v6527_v48, 4  ;;  %v6625_v9 = vmax.f32 %v6624_v40, %v3824_v46  ;;  %v3826_v5 = vpop.f32.mrb[209].mxu0  ;;  %4725 = vmatprep.mubr.bf16.mxu1 %v18388_v6  ;;  %v6343_v40 = vrot.slane %v6342_v41, 1 }
 0x3ee   : > { %v6508_v61 = vmax.f32 %v6506_v47, %v6507_v59  ;;  %v6646_v24 = vmax.f32 %v6645_v25, %v3826_v5  ;;  %v3828_v4 = vpop.f32.mrb[210].mxu0 }
 0x3ef   : > { %v6529_v45 = vmax.f32 %v6527_v48, %v6528_v8  ;;  %v6626_v36 = vmax.f32 %v6625_v9, %v3828_v4  ;;  %v3830_v32 = vpop.f32.mrb[211].mxu0  ;;  %v4457_v31 = vpop.f32.mrb[192].mxu1  ;;  %v6344_v8 = vmax.f32 %v6342_v41, %v6343_v40 }
 0x3f0   : > { %v6509_v38 = vrot.slane %v6508_v61, 2  ;;  %v6647_v29 = vmax.f32 %v6646_v24, %v3830_v32  ;;  %v4459_v2 = vpop.f32.mrb[193].mxu1  ;;  %v6365_v24 = vmax.f32 %v6363_v7, %v6364_v34 }
 0x3f1   : > { %v6530_v49 = vrot.slane %v6529_v45, 2  ;;  %4093 = vmatmul.mubr.bf16.gmra.mrb[60].mxu0 %v15967_v14  ;;  %v4461_v56 = vpop.f32.mrb[194].mxu1 }
 0x3f2   : > { %v6510_v17 = vmax.f32 %v6508_v61, %v6509_v38  ;;  %v6660_v46 = vmax.f32 %v4457_v31, %v4461_v56  ;;  %v4463_v16 = vpop.f32.mrb[195].mxu1  ;;  %4102 = vmatprep.mubr.bf16.mxu0 %v18388_v6 }
 0x3f3   : > { %v6531_v25 = vmax.f32 %v6529_v45, %v6530_v49  ;;  %v6681_v39 = vmax.f32 %v4459_v2, %v4463_v16 }
 0x3f4   : > { %v6511_v30 = vrot.slane %v6510_v17, 1  ;;  %v3834_v47 = vpop.f32.mrb[212].mxu0  ;;  %4726 = vmatmul.mubr.bf16.gmra.mrb[44].mxu1 %v15938_v52 }
 0x3f5   : > { %v6532_v1 = vrot.slane %v6531_v25, 1  ;;  %v6627_v48 = vmax.f32 %v6626_v36, %v3834_v47  ;;  %v3836_v59 = vpop.f32.mrb[213].mxu0  ;;  %4735 = vmatprep.mubr.bf16.mxu1 %v18388_v6 }
 0x3f6   : > { %v6512_v9 = vmax.f32 %v6510_v17, %v6511_v30  ;;  %v6648_v5 = vmax.f32 %v6647_v29, %v3836_v59  ;;  %v3838_v61 = vpop.f32.mrb[214].mxu0 }
 0x3f7   : > { %v6533_v4 = vmax.f32 %v6531_v25, %v6532_v1  ;;  %v6628_v32 = vmax.f32 %v6627_v48, %v3838_v61  ;;  %v3840_v31 = vpop.f32.mrb[215].mxu0  ;;  %v4467_v38 = vpop.f32.mrb[196].mxu1 }
 0x3f8   : > { %v16194_v16 = vsel %vm7698_vm4, %v6512_v9, %v6344_v8  ;;  %v6649_v45 = vmax.f32 %v6648_v5, %v3840_v31  ;;  %v6661_v2 = vmax.f32 %v6660_v46, %v4467_v38  ;;  %v4469_v49 = vpop.f32.mrb[197].mxu1 }
 0x3f9   : > { %v16197_v36 = vsel %vm7698_vm4, %v6533_v4, %v6365_v24  ;;  %v6682_v56 = vmax.f32 %v6681_v39, %v4469_v49  ;;  %4103 = vmatmul.mubr.bf16.gmra.mrb[64].mxu0 %v15981_v13  ;;  %v4471_v41 = vpop.f32.mrb[198].mxu1 }
 0x3fa   : > { %v6662_v29 = vmax.f32 %v6661_v2, %v4471_v41  ;;  %v4473_v40 = vpop.f32.mrb[199].mxu1  ;;  %4112 = vmatprep.mubr.bf16.mxu0 %v18388_v6 }
 0x3fb   : > { %v6683_v7 = vmax.f32 %v6682_v56, %v4473_v40 }
 0x3fc   : > { %v3844_v17 = vpop.f32.mrb[216].mxu0  ;;  %4736 = vmatmul.mubr.bf16.gmra.mrb[48].mxu1 %v15957_v28 }
 0x3fd   : > { %v6629_v34 = vmax.f32 %v6628_v32, %v3844_v17  ;;  %v3846_v25 = vpop.f32.mrb[217].mxu0  ;;  %4745 = vmatprep.mubr.bf16.mxu1 %v18388_v6 }
 0x3fe   : > { %v6650_v46 = vmax.f32 %v6649_v45, %v3846_v25  ;;  %v3848_v30 = vpop.f32.mrb[218].mxu0 }
 0x3ff   : > { %v6630_v47 = vmax.f32 %v6629_v34, %v3848_v30  ;;  %v3850_v1 = vpop.f32.mrb[219].mxu0  ;;  %v4477_v39 = vpop.f32.mrb[200].mxu1 }
 0x400   : > { %v6651_v48 = vmax.f32 %v6650_v46, %v3850_v1  ;;  %v6663_v59 = vmax.f32 %v6662_v29, %v4477_v39  ;;  %v4479_v8 = vpop.f32.mrb[201].mxu1 }
 0x401   : > { %v6684_v9 = vmax.f32 %v6683_v7, %v4479_v8  ;;  %4113 = vmatmul.mubr.bf16.gmra.mrb[68].mxu0 %v15979_v12  ;;  %v4481_v5 = vpop.f32.mrb[202].mxu1 }
 0x402   : > { %v6664_v61 = vmax.f32 %v6663_v59, %v4481_v5  ;;  %v4483_v24 = vpop.f32.mrb[203].mxu1  ;;  %4122 = vmatprep.mubr.bf16.mxu0 %v18388_v6 }
 0x403   : > { %v6685_v4 = vmax.f32 %v6684_v9, %v4483_v24 }
 0x404   : > { %v3854_v32 = vpop.f32.mrb[220].mxu0  ;;  %4746 = vmatmul.mubr.bf16.gmra.mrb[52].mxu1 %v15955_v27 }
 0x405   : > { %v6631_v31 = vmax.f32 %v6630_v47, %v3854_v32  ;;  %v3856_v38 = vpop.f32.mrb[221].mxu0  ;;  %4755 = vmatprep.mubr.bf16.mxu1 %v18388_v6 }
 0x406   : > { %v6652_v45 = vmax.f32 %v6651_v48, %v3856_v38  ;;  %v3858_v2 = vpop.f32.mrb[222].mxu0 }
 0x407   : > { %v6632_v49 = vmax.f32 %v6631_v31, %v3858_v2  ;;  %v3860_v56 = vpop.f32.mrb[223].mxu0  ;;  %v4487_v41 = vpop.f32.mrb[204].mxu1 }
 0x408   : > { %v6653_v29 = vmax.f32 %v6652_v45, %v3860_v56  ;;  %v6665_v40 = vmax.f32 %v6664_v61, %v4487_v41  ;;  %v4489_v7 = vpop.f32.mrb[205].mxu1 }
 0x409   : > { %v6633_v17 = vrot.slane %v6632_v49, 4  ;;  %v6686_v34 = vmax.f32 %v6685_v4, %v4489_v7  ;;  %4123 = vmatmul.mubr.bf16.gmra.mrb[72].mxu0 %v15993_v11  ;;  %v4491_v25 = vpop.f32.mrb[206].mxu1 }
 0x40a   : > { %v6654_v46 = vrot.slane %v6653_v29, 4  ;;  %v6666_v30 = vmax.f32 %v6665_v40, %v4491_v25  ;;  %v4493_v1 = vpop.f32.mrb[207].mxu1  ;;  %4132 = vmatprep.mubr.bf16.mxu0 %v18388_v6 }
 0x40b   : > { %v6634_v47 = vmax.f32 %v6632_v49, %v6633_v17  ;;  %v6687_v39 = vmax.f32 %v6686_v34, %v4493_v1 }
 0x40c   : > { %v6655_v48 = vmax.f32 %v6653_v29, %v6654_v46  ;;  %v3864_v59 = vpop.f32.mrb[224].mxu0  ;;  %4756 = vmatmul.mubr.bf16.gmra.mrb[56].mxu1 %v15969_v22 }
 0x40d   : > { %v6635_v8 = vrot.slane %v6634_v47, 2  ;;  %v3866_v9 = vpop.f32.mrb[225].mxu0  ;;  %4765 = vmatprep.mubr.bf16.mxu1 %v18388_v6 }
 0x40e   : > { %v6656_v5 = vrot.slane %v6655_v48, 2  ;;  %v3868_v61 = vpop.f32.mrb[226].mxu0 }
 0x40f   : > { %v6636_v24 = vmax.f32 %v6634_v47, %v6635_v8  ;;  %v6786_v4 = vmax.f32 %v3864_v59, %v3868_v61  ;;  %v3870_v32 = vpop.f32.mrb[227].mxu0  ;;  %v4497_v31 = vpop.f32.mrb[208].mxu1 }
 0x410   : > { %v6657_v38 = vmax.f32 %v6655_v48, %v6656_v5  ;;  %v6807_v45 = vmax.f32 %v3866_v9, %v3870_v32  ;;  %v6667_v2 = vmax.f32 %v6666_v30, %v4497_v31  ;;  %v4499_v56 = vpop.f32.mrb[209].mxu1 }
 0x411   : > { %v6637_v49 = vrot.slane %v6636_v24, 1  ;;  %v6688_v41 = vmax.f32 %v6687_v39, %v4499_v56  ;;  %4133 = vmatmul.mubr.bf16.gmra.mrb[76].mxu0 %v15991_v54  ;;  %v4501_v29 = vpop.f32.mrb[210].mxu1 }
 0x412   : > { %v6658_v40 = vrot.slane %v6657_v38, 1  ;;  %v6668_v7 = vmax.f32 %v6667_v2, %v4501_v29  ;;  %v4503_v17 = vpop.f32.mrb[211].mxu1  ;;  %4142 = vmatprep.mubr.bf16.mxu0 %v18388_v6 }
 0x413   : > { %v6638_v34 = vmax.f32 %v6636_v24, %v6637_v49  ;;  %v6689_v25 = vmax.f32 %v6688_v41, %v4503_v17 }
 0x414   : > { %v6659_v46 = vmax.f32 %v6657_v38, %v6658_v40  ;;  %v3874_v1 = vpop.f32.mrb[228].mxu0  ;;  %4766 = vmatmul.mubr.bf16.gmra.mrb[60].mxu1 %v15967_v14 }
 0x415   : > { %v16216_v30 = vsel %vm7700_vm5, %v6638_v34, %v16155_v60  ;;  %v6787_v47 = vmax.f32 %v6786_v4, %v3874_v1  ;;  %v3876_v39 = vpop.f32.mrb[229].mxu0  ;;  %4775 = vmatprep.mubr.bf16.mxu1 %v18388_v6 }
 0x416   : > { %v16221_v48 = vsel %vm7700_vm5, %v6659_v46, %v16159_v0  ;;  %v6808_v59 = vmax.f32 %v6807_v45, %v3876_v39  ;;  %v3878_v8 = vpop.f32.mrb[230].mxu0 }
 0x417   : > { %v6788_v9 = vmax.f32 %v6787_v47, %v3878_v8  ;;  %v3880_v5 = vpop.f32.mrb[231].mxu0  ;;  %v4507_v61 = vpop.f32.mrb[212].mxu1 }
 0x418   : > { %v6809_v24 = vmax.f32 %v6808_v59, %v3880_v5  ;;  %v6669_v32 = vmax.f32 %v6668_v7, %v4507_v61  ;;  %v4509_v31 = vpop.f32.mrb[213].mxu1 }
 0x419   : > { %v6690_v38 = vmax.f32 %v6689_v25, %v4509_v31  ;;  %4143 = vmatmul.mubr.bf16.gmra.mrb[80].mxu0 %v16005_v58  ;;  %v4511_v60 = vpop.f32.mrb[214].mxu1 }
 0x41a   : > { %v6670_v4 = vmax.f32 %v6669_v32, %v4511_v60  ;;  %v4513_v2 = vpop.f32.mrb[215].mxu1  ;;  %4152 = vmatprep.mubr.bf16.mxu0 %v18388_v6 }
 0x41b   : > { %v6691_v56 = vmax.f32 %v6690_v38, %v4513_v2 }
 0x41c   : > { %v3884_v49 = vpop.f32.mrb[232].mxu0  ;;  %4776 = vmatmul.mubr.bf16.gmra.mrb[64].mxu1 %v15981_v13 }
 0x41d   : > { %v6789_v0 = vmax.f32 %v6788_v9, %v3884_v49  ;;  %v3886_v45 = vpop.f32.mrb[233].mxu0  ;;  %4785 = vmatprep.mubr.bf16.mxu1 %v18388_v6 }
 0x41e   : > { %v6810_v41 = vmax.f32 %v6809_v24, %v3886_v45  ;;  %v3888_v29 = vpop.f32.mrb[234].mxu0 }
 0x41f   : > { %v6790_v40 = vmax.f32 %v6789_v0, %v3888_v29  ;;  %v3890_v7 = vpop.f32.mrb[235].mxu0  ;;  %v4517_v17 = vpop.f32.mrb[216].mxu1 }
 0x420   : > { %v6811_v34 = vmax.f32 %v6810_v41, %v3890_v7  ;;  %v6671_v25 = vmax.f32 %v6670_v4, %v4517_v17  ;;  %v4519_v46 = vpop.f32.mrb[217].mxu1 }
 0x421   : > { %v6692_v1 = vmax.f32 %v6691_v56, %v4519_v46  ;;  %4153 = vmatmul.mubr.bf16.gmra.mrb[84].mxu0 %v16003_v33  ;;  %v4521_v47 = vpop.f32.mrb[218].mxu1 }
 0x422   : > { %v6672_v39 = vmax.f32 %v6671_v25, %v4521_v47  ;;  %v4523_v59 = vpop.f32.mrb[219].mxu1  ;;  %4162 = vmatprep.mubr.bf16.mxu0 %v18388_v6 }
 0x423   : > { %v6693_v8 = vmax.f32 %v6692_v1, %v4523_v59 }
 0x424   : > { %v3894_v9 = vpop.f32.mrb[236].mxu0  ;;  %4786 = vmatmul.mubr.bf16.gmra.mrb[68].mxu1 %v15979_v12 }
 0x425   : > { %v6791_v5 = vmax.f32 %v6790_v40, %v3894_v9  ;;  %v3896_v61 = vpop.f32.mrb[237].mxu0  ;;  %4795 = vmatprep.mubr.bf16.mxu1 %v18388_v6 }
 0x426   : > { %v6812_v24 = vmax.f32 %v6811_v34, %v3896_v61  ;;  %v3898_v32 = vpop.f32.mrb[238].mxu0 }
 0x427   : > { %v6792_v31 = vmax.f32 %v6791_v5, %v3898_v32  ;;  %v3900_v38 = vpop.f32.mrb[239].mxu0  ;;  %v4527_v60 = vpop.f32.mrb[220].mxu1 }
 0x428   : > { %v6813_v4 = vmax.f32 %v6812_v24, %v3900_v38  ;;  %v6673_v2 = vmax.f32 %v6672_v39, %v4527_v60  ;;  %v4529_v56 = vpop.f32.mrb[221].mxu1 }
 0x429   : > { %v6694_v49 = vmax.f32 %v6693_v8, %v4529_v56  ;;  %4163 = vmatmul.mubr.bf16.gmra.mrb[88].mxu0 %v16017_v63  ;;  %v4531_v0 = vpop.f32.mrb[222].mxu1 }
 0x42a   : > { %v6674_v45 = vmax.f32 %v6673_v2, %v4531_v0  ;;  %v4533_v41 = vpop.f32.mrb[223].mxu1  ;;  %4172 = vmatprep.mubr.bf16.mxu0 %v18388_v6 }
 0x42b   : > { %v6695_v29 = vmax.f32 %v6694_v49, %v4533_v41 }
 0x42c   : > { %v6675_v40 = vrot.slane %v6674_v45, 4  ;;  %v3904_v7 = vpop.f32.mrb[240].mxu0  ;;  %4796 = vmatmul.mubr.bf16.gmra.mrb[72].mxu1 %v15993_v11 }
 0x42d   : > { %v6696_v17 = vrot.slane %v6695_v29, 4  ;;  %v6793_v34 = vmax.f32 %v6792_v31, %v3904_v7  ;;  %v3906_v25 = vpop.f32.mrb[241].mxu0  ;;  %4805 = vmatprep.mubr.bf16.mxu1 %v18388_v6 }
 0x42e   : > { %v6676_v46 = vmax.f32 %v6674_v45, %v6675_v40  ;;  %v6814_v1 = vmax.f32 %v6813_v4, %v3906_v25  ;;  %v3908_v47 = vpop.f32.mrb[242].mxu0 }
 0x42f   : > { %v6697_v39 = vmax.f32 %v6695_v29, %v6696_v17  ;;  %v6794_v59 = vmax.f32 %v6793_v34, %v3908_v47  ;;  %v3910_v8 = vpop.f32.mrb[243].mxu0  ;;  %v4537_v9 = vpop.f32.mrb[224].mxu1 }
 0x430   : > { %v6677_v5 = vrot.slane %v6676_v46, 2  ;;  %v6815_v61 = vmax.f32 %v6814_v1, %v3910_v8  ;;  %v4539_v24 = vpop.f32.mrb[225].mxu1 }
 0x431   : > { %v6698_v32 = vrot.slane %v6697_v39, 2  ;;  %4173 = vmatmul.mubr.bf16.gmra.mrb[92].mxu0 %v16015_v50  ;;  %v4541_v38 = vpop.f32.mrb[226].mxu1 }
 0x432   : > { %v6678_v60 = vmax.f32 %v6676_v46, %v6677_v5  ;;  %v6828_v2 = vmax.f32 %v4537_v9, %v4541_v38  ;;  %v4543_v31 = vpop.f32.mrb[227].mxu1  ;;  %4182 = vmatprep.mubr.bf16.mxu0 %v18388_v6 }
 0x433   : > { %v6699_v56 = vmax.f32 %v6697_v39, %v6698_v32  ;;  %v6849_v49 = vmax.f32 %v4539_v24, %v4543_v31 }
 0x434   : > { %v6679_v4 = vrot.slane %v6678_v60, 1  ;;  %v3914_v0 = vpop.f32.mrb[244].mxu0  ;;  %4806 = vmatmul.mubr.bf16.gmra.mrb[76].mxu1 %v15991_v54 }
 0x435   : > { %v6700_v45 = vrot.slane %v6699_v56, 1  ;;  %v6795_v41 = vmax.f32 %v6794_v59, %v3914_v0  ;;  %v3916_v29 = vpop.f32.mrb[245].mxu0  ;;  %4815 = vmatprep.mubr.bf16.mxu1 %v18388_v6 }
 0x436   : > { %v6680_v40 = vmax.f32 %v6678_v60, %v6679_v4  ;;  %v6816_v7 = vmax.f32 %v6815_v61, %v3916_v29  ;;  %v3918_v17 = vpop.f32.mrb[246].mxu0 }
 0x437   : > { %v6701_v34 = vmax.f32 %v6699_v56, %v6700_v45  ;;  %v6796_v25 = vmax.f32 %v6795_v41, %v3918_v17  ;;  %v3920_v46 = vpop.f32.mrb[247].mxu0  ;;  %v4547_v1 = vpop.f32.mrb[228].mxu1 }
 0x438   : > { %v16241_v47 = vsel %vm7700_vm5, %v6680_v40, %v16194_v16  ;;  %v6817_v39 = vmax.f32 %v6816_v7, %v3920_v46  ;;  %v6829_v8 = vmax.f32 %v6828_v2, %v4547_v1  ;;  %v4549_v9 = vpop.f32.mrb[229].mxu1 }
 0x439   : > { %v16245_v59 = vsel %vm7700_vm5, %v6701_v34, %v16197_v36  ;;  %v6850_v5 = vmax.f32 %v6849_v49, %v4549_v9  ;;  %4183 = vmatmul.mubr.bf16.gmra.mrb[96].mxu0 %v16029_v37  ;;  %v4551_v61 = vpop.f32.mrb[230].mxu1 }
 0x43a   : > { %v6830_v24 = vmax.f32 %v6829_v8, %v4551_v61  ;;  %v4553_v32 = vpop.f32.mrb[231].mxu1  ;;  %4192 = vmatprep.mubr.bf16.mxu0 %v18388_v6 }
 0x43b   : > { %v6851_v38 = vmax.f32 %v6850_v5, %v4553_v32 }
 0x43c   : > { %v3924_v60 = vpop.f32.mrb[248].mxu0  ;;  %4816 = vmatmul.mubr.bf16.gmra.mrb[80].mxu1 %v16005_v58 }
 0x43d   : > { %v6797_v16 = vmax.f32 %v6796_v25, %v3924_v60  ;;  %v3926_v31 = vpop.f32.mrb[249].mxu0  ;;  %4825 = vmatprep.mubr.bf16.mxu1 %v18388_v6 }
 0x43e   : > { %v6818_v2 = vmax.f32 %v6817_v39, %v3926_v31  ;;  %v3928_v56 = vpop.f32.mrb[250].mxu0 }
 0x43f   : > { %v6798_v36 = vmax.f32 %v6797_v16, %v3928_v56  ;;  %v3930_v4 = vpop.f32.mrb[251].mxu0  ;;  %v4557_v49 = vpop.f32.mrb[232].mxu1 }
 0x440   : > { %v6819_v0 = vmax.f32 %v6818_v2, %v3930_v4  ;;  %v6831_v45 = vmax.f32 %v6830_v24, %v4557_v49  ;;  %v4559_v41 = vpop.f32.mrb[233].mxu1 }
 0x441   : > { %v6852_v29 = vmax.f32 %v6851_v38, %v4559_v41  ;;  %4193 = vmatmul.mubr.bf16.gmra.mrb[100].mxu0 %v16027_v15  ;;  %v4561_v40 = vpop.f32.mrb[234].mxu1 }
 0x442   : > { %v6832_v7 = vmax.f32 %v6831_v45, %v4561_v40  ;;  %v4563_v17 = vpop.f32.mrb[235].mxu1  ;;  %4202 = vmatprep.mubr.bf16.mxu0 %v18388_v6 }
 0x443   : > { %v6853_v34 = vmax.f32 %v6852_v29, %v4563_v17 }
 0x444   : > { %v3934_v25 = vpop.f32.mrb[252].mxu0  ;;  %4826 = vmatmul.mubr.bf16.gmra.mrb[84].mxu1 %v16003_v33 }
 0x445   : > { %v6799_v46 = vmax.f32 %v6798_v36, %v3934_v25  ;;  %v3936_v1 = vpop.f32.mrb[253].mxu0  ;;  %4835 = vmatprep.mubr.bf16.mxu1 %v18388_v6 }
 0x446   : > { %v6820_v39 = vmax.f32 %v6819_v0, %v3936_v1  ;;  %v3938_v8 = vpop.f32.mrb[254].mxu0 }
 0x447   : > { %v6800_v9 = vmax.f32 %v6799_v46, %v3938_v8  ;;  %v3940_v5 = vpop.f32.mrb[255].mxu0  ;;  %v4567_v61 = vpop.f32.mrb[236].mxu1 }
 0x448   : > { %v6821_v24 = vmax.f32 %v6820_v39, %v3940_v5  ;;  %v6833_v32 = vmax.f32 %v6832_v7, %v4567_v61  ;;  %v4569_v38 = vpop.f32.mrb[237].mxu1 }
 0x449   : > { %v6801_v60 = vrot.slane %v6800_v9, 4  ;;  %v6854_v16 = vmax.f32 %v6853_v34, %v4569_v38  ;;  %4203 = vmatmul.mubr.bf16.gmra.mrb[104].mxu0 %v16053_v57  ;;  %v4571_v31 = vpop.f32.mrb[238].mxu1 }
 0x44a   : > { %v6822_v2 = vrot.slane %v6821_v24, 4  ;;  %v6834_v56 = vmax.f32 %v6833_v32, %v4571_v31  ;;  %v4573_v4 = vpop.f32.mrb[239].mxu1  ;;  %4212 = vmatprep.mubr.bf16.mxu0 %v18388_v6 }
 0x44b   : > { %v6802_v36 = vmax.f32 %v6800_v9, %v6801_v60  ;;  %v6855_v49 = vmax.f32 %v6854_v16, %v4573_v4 }
 0x44c   : > { %v6823_v0 = vmax.f32 %v6821_v24, %v6822_v2  ;;  %v3944_v45 = vpop.f32.mrb[0].mxu0  ;;  %4836 = vmatmul.mubr.bf16.gmra.mrb[88].mxu1 %v16017_v63 }
 0x44d   : > { %v6803_v41 = vrot.slane %v6802_v36, 2  ;;  %v3946_v29 = vpop.f32.mrb[1].mxu0  ;;  %4845 = vmatprep.mubr.bf16.mxu1 %v18388_v6 }
 0x44e   : > { %v6824_v40 = vrot.slane %v6823_v0, 2  ;;  %v3948_v7 = vpop.f32.mrb[2].mxu0 }
 0x44f   : > { %v6804_v17 = vmax.f32 %v6802_v36, %v6803_v41  ;;  %v6954_v34 = vmax.f32 %v3944_v45, %v3948_v7  ;;  %v3950_v25 = vpop.f32.mrb[3].mxu0  ;;  %v4577_v46 = vpop.f32.mrb[240].mxu1 }
 0x450   : > { %v6825_v1 = vmax.f32 %v6823_v0, %v6824_v40  ;;  %v6975_v39 = vmax.f32 %v3946_v29, %v3950_v25  ;;  %v6835_v8 = vmax.f32 %v6834_v56, %v4577_v46  ;;  %v4579_v5 = vpop.f32.mrb[241].mxu1 }
 0x451   : > { %v6805_v9 = vrot.slane %v6804_v17, 1  ;;  %v6856_v61 = vmax.f32 %v6855_v49, %v4579_v5  ;;  %4213 = vmatmul.mubr.bf16.gmra.mrb[108].mxu0 %v16051_v53  ;;  %v4581_v24 = vpop.f32.mrb[242].mxu1 }
 0x452   : > { %v6826_v32 = vrot.slane %v6825_v1, 1  ;;  %v6836_v38 = vmax.f32 %v6835_v8, %v4581_v24  ;;  %v4583_v60 = vpop.f32.mrb[243].mxu1  ;;  %4222 = vmatprep.mubr.bf16.mxu0 %v18388_v6 }
 0x453   : > { %v6806_v16 = vmax.f32 %v6804_v17, %v6805_v9  ;;  %v6857_v31 = vmax.f32 %v6856_v61, %v4583_v60 }
 0x454   : > { %v6827_v2 = vmax.f32 %v6825_v1, %v6826_v32  ;;  %v3954_v4 = vpop.f32.mrb[4].mxu0  ;;  %4846 = vmatmul.mubr.bf16.gmra.mrb[92].mxu1 %v16015_v50 }
 0x455   : > { %v16264_v56 = vsel %vm7702_vm6, %v6806_v16, %v16216_v30  ;;  %v6955_v36 = vmax.f32 %v6954_v34, %v3954_v4  ;;  %v3956_v49 = vpop.f32.mrb[5].mxu0  ;;  %4855 = vmatprep.mubr.bf16.mxu1 %v18388_v6 }
 0x456   : > { %v16269_v0 = vsel %vm7702_vm6, %v6827_v2, %v16221_v48  ;;  %v6976_v45 = vmax.f32 %v6975_v39, %v3956_v49  ;;  %v3958_v41 = vpop.f32.mrb[6].mxu0 }
 0x457   : > { %v6956_v29 = vmax.f32 %v6955_v36, %v3958_v41  ;;  %v3960_v40 = vpop.f32.mrb[7].mxu0  ;;  %v4587_v7 = vpop.f32.mrb[244].mxu1 }
 0x458   : > { %v6977_v17 = vmax.f32 %v6976_v45, %v3960_v40  ;;  %v6837_v25 = vmax.f32 %v6836_v38, %v4587_v7  ;;  %v4589_v46 = vpop.f32.mrb[245].mxu1 }
 0x459   : > { %v6858_v1 = vmax.f32 %v6857_v31, %v4589_v46  ;;  %4223 = vmatmul.mubr.bf16.gmra.mrb[112].mxu0 %v16065_v21  ;;  %v4591_v30 = vpop.f32.mrb[246].mxu1 }
 0x45a   : > { %v6838_v34 = vmax.f32 %v6837_v25, %v4591_v30  ;;  %v4593_v8 = vpop.f32.mrb[247].mxu1  ;;  %4232 = vmatprep.mubr.bf16.mxu0 %v18388_v6 }
 0x45b   : > { %v6859_v5 = vmax.f32 %v6858_v1, %v4593_v8 }
 0x45c   : > { %v3964_v9 = vpop.f32.mrb[8].mxu0  ;;  %4856 = vmatmul.mubr.bf16.gmra.mrb[96].mxu1 %v16029_v37 }
 0x45d   : > { %v6957_v48 = vmax.f32 %v6956_v29, %v3964_v9  ;;  %v3966_v39 = vpop.f32.mrb[9].mxu0  ;;  %4865 = vmatprep.mubr.bf16.mxu1 %v18388_v6 }
 0x45e   : > { %v6978_v61 = vmax.f32 %v6977_v17, %v3966_v39  ;;  %v3968_v24 = vpop.f32.mrb[10].mxu0 }
 0x45f   : > { %v6958_v32 = vmax.f32 %v6957_v48, %v3968_v24  ;;  %v3970_v38 = vpop.f32.mrb[11].mxu0  ;;  %v4597_v60 = vpop.f32.mrb[248].mxu1 }
 0x460   : > { %v6979_v16 = vmax.f32 %v6978_v61, %v3970_v38  ;;  %v6839_v31 = vmax.f32 %v6838_v34, %v4597_v60  ;;  %v4599_v2 = vpop.f32.mrb[249].mxu1 }
 0x461   : > { %v6860_v4 = vmax.f32 %v6859_v5, %v4599_v2  ;;  %4233 = vmatmul.mubr.bf16.gmra.mrb[116].mxu0 %v16063_v51  ;;  %v4601_v36 = vpop.f32.mrb[250].mxu1 }
 0x462   : > { %v6840_v49 = vmax.f32 %v6839_v31, %v4601_v36  ;;  %v4603_v45 = vpop.f32.mrb[251].mxu1  ;;  %4242 = vmatprep.mubr.bf16.mxu0 %v18388_v6 }
 0x463   : > { %v6861_v41 = vmax.f32 %v6860_v4, %v4603_v45 }
 0x464   : > { %v3974_v29 = vpop.f32.mrb[12].mxu0  ;;  %4866 = vmatmul.mubr.bf16.gmra.mrb[100].mxu1 %v16027_v15 }
 0x465   : > { %v6959_v40 = vmax.f32 %v6958_v32, %v3974_v29  ;;  %v3976_v7 = vpop.f32.mrb[13].mxu0  ;;  %4875 = vmatprep.mubr.bf16.mxu1 %v18388_v6 }
 0x466   : > { %v6980_v17 = vmax.f32 %v6979_v16, %v3976_v7  ;;  %v3978_v25 = vpop.f32.mrb[14].mxu0 }
 0x467   : > { %v6960_v46 = vmax.f32 %v6959_v40, %v3978_v25  ;;  %v3980_v1 = vpop.f32.mrb[15].mxu0  ;;  %v4607_v30 = vpop.f32.mrb[252].mxu1 }
 0x468   : > { %v6981_v34 = vmax.f32 %v6980_v17, %v3980_v1  ;;  %v6841_v8 = vmax.f32 %v6840_v49, %v4607_v30  ;;  %v4609_v5 = vpop.f32.mrb[253].mxu1 }
 0x469   : > { %v6862_v9 = vmax.f32 %v6861_v41, %v4609_v5  ;;  %4243 = vmatmul.mubr.bf16.gmra.mrb[120].mxu0 %v16077_v35  ;;  %v4611_v48 = vpop.f32.mrb[254].mxu1 }
 0x46a   : > { %v6842_v39 = vmax.f32 %v6841_v8, %v4611_v48  ;;  %v4613_v61 = vpop.f32.mrb[255].mxu1  ;;  %4252 = vmatprep.mubr.bf16.mxu0 %v18388_v6 }
 0x46b   : > { %v6863_v24 = vmax.f32 %v6862_v9, %v4613_v61 }
 0x46c   : > { %v6843_v32 = vrot.slane %v6842_v39, 4  ;;  %v3984_v38 = vpop.f32.mrb[16].mxu0  ;;  %4876 = vmatmul.mubr.bf16.gmra.mrb[104].mxu1 %v16053_v57 }
 0x46d   : > { %v6864_v60 = vrot.slane %v6863_v24, 4  ;;  %v6961_v16 = vmax.f32 %v6960_v46, %v3984_v38  ;;  %v3986_v31 = vpop.f32.mrb[17].mxu0  ;;  %4885 = vmatprep.mubr.bf16.mxu1 %v18388_v6 }
 0x46e   : > { %v6844_v2 = vmax.f32 %v6842_v39, %v6843_v32  ;;  %v6982_v4 = vmax.f32 %v6981_v34, %v3986_v31  ;;  %v3988_v36 = vpop.f32.mrb[18].mxu0 }
 0x46f   : > { %v6865_v49 = vmax.f32 %v6863_v24, %v6864_v60  ;;  %v6962_v45 = vmax.f32 %v6961_v16, %v3988_v36  ;;  %v3990_v41 = vpop.f32.mrb[19].mxu0  ;;  %v4617_v29 = vpop.f32.mrb[0].mxu1 }
 0x470   : > { %v6845_v40 = vrot.slane %v6844_v2, 2  ;;  %v6983_v7 = vmax.f32 %v6982_v4, %v3990_v41  ;;  %v4619_v17 = vpop.f32.mrb[1].mxu1 }
 0x471   : > { %v6866_v25 = vrot.slane %v6865_v49, 2  ;;  %4253 = vmatmul.mubr.bf16.gmra.mrb[124].mxu0 %v16075_v10  ;;  %v4621_v1 = vpop.f32.mrb[2].mxu1 }
 0x472   : > { %v6846_v30 = vmax.f32 %v6844_v2, %v6845_v40  ;;  %v6996_v8 = vmax.f32 %v4617_v29, %v4621_v1  ;;  %v4623_v46 = vpop.f32.mrb[3].mxu1  ;;  %4968 = vmatprep.mubr.bf16.mxu0 %v18388_v6 }
 0x473   : > { %v6867_v5 = vmax.f32 %v6865_v49, %v6866_v25  ;;  %v7017_v9 = vmax.f32 %v4619_v17, %v4623_v46 }
 0x474   : > { %v6847_v34 = vrot.slane %v6846_v30, 1  ;;  %v3994_v48 = vpop.f32.mrb[20].mxu0  ;;  %4886 = vmatmul.mubr.bf16.gmra.mrb[108].mxu1 %v16051_v53 }
 0x475   : > { %v6868_v39 = vrot.slane %v6867_v5, 1  ;;  %v6963_v61 = vmax.f32 %v6962_v45, %v3994_v48  ;;  %v3996_v24 = vpop.f32.mrb[21].mxu0  ;;  %4895 = vmatprep.mubr.bf16.mxu1 %v18388_v6 }
 0x476   : > { %v6848_v32 = vmax.f32 %v6846_v30, %v6847_v34  ;;  %v6984_v38 = vmax.f32 %v6983_v7, %v3996_v24  ;;  %v3998_v60 = vpop.f32.mrb[22].mxu0 }
 0x477   : > { %v6869_v16 = vmax.f32 %v6867_v5, %v6868_v39  ;;  %v6964_v31 = vmax.f32 %v6963_v61, %v3998_v60  ;;  %v4000_v2 = vpop.f32.mrb[23].mxu0  ;;  %v4627_v4 = vpop.f32.mrb[4].mxu1 }
 0x478   : > { %v16289_v36 = vsel %vm7702_vm6, %v6848_v32, %v16241_v47  ;;  %v6985_v49 = vmax.f32 %v6984_v38, %v4000_v2  ;;  %v6997_v41 = vmax.f32 %v6996_v8, %v4627_v4  ;;  %v4629_v29 = vpop.f32.mrb[5].mxu1 }
 0x479   : > { %v16293_v45 = vsel %vm7702_vm6, %v6869_v16, %v16245_v59  ;;  %v7018_v40 = vmax.f32 %v7017_v9, %v4629_v29  ;;  %v4631_v17 = vpop.f32.mrb[6].mxu1  ;;  %4969 = vmatmul.mubr.bf16.vlgmr.msra.gmra.mrb[128].mxu0 %v15627_v23 }
 0x47a   : > { %v6998_v7 = vmax.f32 %v6997_v41, %v4631_v17  ;;  %v4633_v25 = vpop.f32.mrb[7].mxu1  ;;  %4978 = vmatprep.mubr.bf16.mxu0 %v18388_v6 }
 0x47b   : > { %v7019_v1 = vmax.f32 %v7018_v40, %v4633_v25 }
 0x47c   : > { %v4004_v30 = vpop.f32.mrb[24].mxu0  ;;  %4896 = vmatmul.mubr.bf16.gmra.mrb[112].mxu1 %v16065_v21 }
 0x47d   : > { %v6965_v47 = vmax.f32 %v6964_v31, %v4004_v30  ;;  %v4006_v46 = vpop.f32.mrb[25].mxu0  ;;  %4905 = vmatprep.mubr.bf16.mxu1 %v18388_v6 }
 0x47e   : > { %v6986_v8 = vmax.f32 %v6985_v49, %v4006_v46  ;;  %v4008_v5 = vpop.f32.mrb[26].mxu0 }
 0x47f   : > { %v6966_v59 = vmax.f32 %v6965_v47, %v4008_v5  ;;  %v4010_v34 = vpop.f32.mrb[27].mxu0  ;;  %v4637_v9 = vpop.f32.mrb[8].mxu1 }
 0x480   : > { %v6987_v48 = vmax.f32 %v6986_v8, %v4010_v34  ;;  %v6999_v39 = vmax.f32 %v6998_v7, %v4637_v9  ;;  %v4639_v61 = vpop.f32.mrb[9].mxu1 }
 0x481   : > { %v7020_v24 = vmax.f32 %v7019_v1, %v4639_v61  ;;  %v4641_v32 = vpop.f32.mrb[10].mxu1  ;;  %4979 = vmatmul.mubr.bf16.gmra.mrb[132].mxu0 %v15625_v18 }
 0x482   : > { %v7000_v38 = vmax.f32 %v6999_v39, %v4641_v32  ;;  %v4643_v60 = vpop.f32.mrb[11].mxu1  ;;  %4988 = vmatprep.mubr.bf16.mxu0 %v18388_v6 }
 0x483   : > { %v7021_v16 = vmax.f32 %v7020_v24, %v4643_v60 }
 0x484   : > { %v4014_v31 = vpop.f32.mrb[28].mxu0  ;;  %4906 = vmatmul.mubr.bf16.gmra.mrb[116].mxu1 %v16063_v51 }
 0x485   : > { %v6967_v2 = vmax.f32 %v6966_v59, %v4014_v31  ;;  %v4016_v4 = vpop.f32.mrb[29].mxu0  ;;  %4915 = vmatprep.mubr.bf16.mxu1 %v18388_v6 }
 0x486   : > { %v6988_v49 = vmax.f32 %v6987_v48, %v4016_v4  ;;  %v4018_v41 = vpop.f32.mrb[30].mxu0 }
 0x487   : > { %v6968_v29 = vmax.f32 %v6967_v2, %v4018_v41  ;;  %v4020_v40 = vpop.f32.mrb[31].mxu0  ;;  %v4647_v17 = vpop.f32.mrb[12].mxu1 }
 0x488   : > { %v6989_v7 = vmax.f32 %v6988_v49, %v4020_v40  ;;  %v7001_v25 = vmax.f32 %v7000_v38, %v4647_v17  ;;  %v4649_v1 = vpop.f32.mrb[13].mxu1 }
 0x489   : > { %v6969_v30 = vrot.slane %v6968_v29, 4  ;;  %v7022_v47 = vmax.f32 %v7021_v16, %v4649_v1  ;;  %v4651_v46 = vpop.f32.mrb[14].mxu1  ;;  %4989 = vmatmul.mubr.bf16.gmra.mrb[136].mxu0 %v15646_v55 }
 0x48a   : > { %v6990_v8 = vrot.slane %v6989_v7, 4  ;;  %v7002_v5 = vmax.f32 %v7001_v25, %v4651_v46  ;;  %v4653_v34 = vpop.f32.mrb[15].mxu1  ;;  %4998 = vmatprep.mubr.bf16.mxu0 %v18388_v6 }
 0x48b   : > { %v6970_v59 = vmax.f32 %v6968_v29, %v6969_v30  ;;  %v7023_v9 = vmax.f32 %v7022_v47, %v4653_v34 }
 0x48c   : > { %v6991_v48 = vmax.f32 %v6989_v7, %v6990_v8  ;;  %v4024_v39 = vpop.f32.mrb[32].mxu0  ;;  %4916 = vmatmul.mubr.bf16.gmra.mrb[120].mxu1 %v16077_v35 }
 0x48d   : > { %v6971_v61 = vrot.slane %v6970_v59, 2  ;;  %v4026_v24 = vpop.f32.mrb[33].mxu0  ;;  %4925 = vmatprep.mubr.bf16.mxu1 %v18388_v6 }
 0x48e   : > { %v6992_v32 = vrot.slane %v6991_v48, 2  ;;  %v4028_v38 = vpop.f32.mrb[34].mxu0 }
 0x48f   : > { %v6972_v60 = vmax.f32 %v6970_v59, %v6971_v61  ;;  %v7122_v16 = vmax.f32 %v4024_v39, %v4028_v38  ;;  %v4030_v31 = vpop.f32.mrb[35].mxu0  ;;  %v4657_v2 = vpop.f32.mrb[16].mxu1 }
 0x490   : > { %v6993_v4 = vmax.f32 %v6991_v48, %v6992_v32  ;;  %v7143_v49 = vmax.f32 %v4026_v24, %v4030_v31  ;;  %v7003_v41 = vmax.f32 %v7002_v5, %v4657_v2  ;;  %v4659_v40 = vpop.f32.mrb[17].mxu1 }
 0x491   : > { %v6973_v29 = vrot.slane %v6972_v60, 1  ;;  %v7024_v17 = vmax.f32 %v7023_v9, %v4659_v40  ;;  %v4661_v7 = vpop.f32.mrb[18].mxu1  ;;  %4999 = vmatmul.mubr.bf16.gmra.mrb[140].mxu0 %v15644_v19 }
 0x492   : > { %v6994_v25 = vrot.slane %v6993_v4, 1  ;;  %v7004_v1 = vmax.f32 %v7003_v41, %v4661_v7  ;;  %v4663_v30 = vpop.f32.mrb[19].mxu1  ;;  %5008 = vmatprep.mubr.bf16.mxu0 %v18388_v6 }
 0x493   : > { %v6974_v47 = vmax.f32 %v6972_v60, %v6973_v29  ;;  %v7025_v46 = vmax.f32 %v7024_v17, %v4663_v30 }
 0x494   : > { %v6995_v8 = vmax.f32 %v6993_v4, %v6994_v25  ;;  %v4034_v34 = vpop.f32.mrb[36].mxu0  ;;  %4926 = vmatmul.mubr.bf16.gmra.mrb[124].mxu1 %v16075_v10 }
 0x495   : > { %v16312_v5 = vsel %vm7704_vm7, %v6974_v47, %v16264_v56  ;;  %v7123_v59 = vmax.f32 %v7122_v16, %v4034_v34  ;;  %v4036_v9 = vpop.f32.mrb[37].mxu0  ;;  %5641 = vmatprep.mubr.bf16.mxu1 %v18388_v6 }
 0x496   : > { %v16317_v48 = vsel %vm7704_vm7, %v6995_v8, %v16269_v0  ;;  %v7144_v39 = vmax.f32 %v7143_v49, %v4036_v9  ;;  %v4038_v61 = vpop.f32.mrb[38].mxu0 }
 0x497   : > { %v7124_v24 = vmax.f32 %v7123_v59, %v4038_v61  ;;  %v4040_v32 = vpop.f32.mrb[39].mxu0  ;;  %v4667_v38 = vpop.f32.mrb[20].mxu1 }
 0x498   : > { %v7145_v60 = vmax.f32 %v7144_v39, %v4040_v32  ;;  %v7005_v31 = vmax.f32 %v7004_v1, %v4667_v38  ;;  %v4669_v2 = vpop.f32.mrb[21].mxu1 }
 0x499   : > { %v7026_v4 = vmax.f32 %v7025_v46, %v4669_v2  ;;  %v4671_v41 = vpop.f32.mrb[22].mxu1  ;;  %5009 = vmatmul.mubr.bf16.gmra.mrb[144].mxu0 %v15662_v26 }
 0x49a   : > { %v7006_v56 = vmax.f32 %v7005_v31, %v4671_v41  ;;  %v4673_v16 = vpop.f32.mrb[23].mxu1  ;;  %5018 = vmatprep.mubr.bf16.mxu0 %v18388_v6 }
 0x49b   : > { %v7027_v40 = vmax.f32 %v7026_v4, %v4673_v16 }
 0x49c   : > { %v4044_v29 = vpop.f32.mrb[40].mxu0  ;;  %5642 = vmatmul.mubr.bf16.vlgmr.msra.gmra.mrb[128].mxu1 %v15627_v23 }
 0x49d   : > { %v7125_v0 = vmax.f32 %v7124_v24, %v4044_v29  ;;  %v4046_v49 = vpop.f32.mrb[41].mxu0  ;;  %5651 = vmatprep.mubr.bf16.mxu1 %v18388_v6 }
 0x49e   : > { %v7146_v17 = vmax.f32 %v7145_v60, %v4046_v49  ;;  %v4048_v7 = vpop.f32.mrb[42].mxu0 }
 0x49f   : > { %v7126_v25 = vmax.f32 %v7125_v0, %v4048_v7  ;;  %v4050_v1 = vpop.f32.mrb[43].mxu0  ;;  %v4677_v30 = vpop.f32.mrb[24].mxu1  ;;  %v18389_v0 = vld [vmem:[#allocation14_spill] sm:$0xff] }
 0x4a0   : > { %v7147_v47 = vmax.f32 %v7146_v17, %v4050_v1  ;;  %v7007_v46 = vmax.f32 %v7006_v56, %v4677_v30  ;;  %v4679_v8 = vpop.f32.mrb[25].mxu1 }
 0x4a1   : > { %v7028_v34 = vmax.f32 %v7027_v40, %v4679_v8  ;;  %v4681_v59 = vpop.f32.mrb[26].mxu1  ;;  %5019 = vmatmul.mubr.bf16.gmra.mrb[148].mxu0 %v15660_v20 }
 0x4a2   : > { %v7008_v9 = vmax.f32 %v7007_v46, %v4681_v59  ;;  %v4683_v39 = vpop.f32.mrb[27].mxu1  ;;  %5028 = vmatprep.mubr.bf16.mxu0 %v18388_v6 }
 0x4a3   : > { %v7029_v23 = vmax.f32 %v7028_v34, %v4683_v39 }
 0x4a4   : > { %v4054_v61 = vpop.f32.mrb[44].mxu0  ;;  %5652 = vmatmul.mubr.bf16.gmra.mrb[132].mxu1 %v15625_v18 }
 0x4a5   : > { %v7127_v24 = vmax.f32 %v7126_v25, %v4054_v61  ;;  %v4056_v32 = vpop.f32.mrb[45].mxu0  ;;  %5661 = vmatprep.mubr.bf16.mxu1 %v18388_v6 }
 0x4a6   : > { %v7148_v38 = vmax.f32 %v7147_v47, %v4056_v32  ;;  %v4058_v60 = vpop.f32.mrb[46].mxu0 }
 0x4a7   : > { %v7128_v31 = vmax.f32 %v7127_v24, %v4058_v60  ;;  %v4060_v2 = vpop.f32.mrb[47].mxu0  ;;  %v4687_v4 = vpop.f32.mrb[28].mxu1 }
 0x4a8   : > { %v7149_v41 = vmax.f32 %v7148_v38, %v4060_v2  ;;  %v7009_v56 = vmax.f32 %v7008_v9, %v4687_v4  ;;  %v4689_v16 = vpop.f32.mrb[29].mxu1  ;;  %v18390_v2 = vld [vmem:[#allocation13_spill] sm:$0xff] }
 0x4a9   : > { %v7030_v40 = vmax.f32 %v7029_v23, %v4689_v16  ;;  %v4691_v29 = vpop.f32.mrb[30].mxu1  ;;  %5029 = vmatmul.mubr.bf16.gmra.mrb[152].mxu0 %v18389_v0 }
 0x4aa   : > { %v7010_v49 = vmax.f32 %v7009_v56, %v4691_v29  ;;  %v4693_v17 = vpop.f32.mrb[31].mxu1  ;;  %5038 = vmatprep.mubr.bf16.mxu0 %v18388_v6 }
 0x4ab   : > { %v7031_v18 = vmax.f32 %v7030_v40, %v4693_v17 }
 0x4ac   : > { %v7011_v7 = vrot.slane %v7010_v49, 4  ;;  %v4064_v25 = vpop.f32.mrb[48].mxu0  ;;  %5662 = vmatmul.mubr.bf16.gmra.mrb[136].mxu1 %v15646_v55 }
 0x4ad   : > { %v7032_v1 = vrot.slane %v7031_v18, 4  ;;  %v7129_v30 = vmax.f32 %v7128_v31, %v4064_v25  ;;  %v4066_v47 = vpop.f32.mrb[49].mxu0  ;;  %5671 = vmatprep.mubr.bf16.mxu1 %v18388_v6 }
 0x4ae   : > { %v7012_v46 = vmax.f32 %v7010_v49, %v7011_v7  ;;  %v7150_v8 = vmax.f32 %v7149_v41, %v4066_v47  ;;  %v4068_v34 = vpop.f32.mrb[50].mxu0 }
 0x4af   : > { %v7033_v59 = vmax.f32 %v7031_v18, %v7032_v1  ;;  %v7130_v9 = vmax.f32 %v7129_v30, %v4068_v34  ;;  %v4070_v39 = vpop.f32.mrb[51].mxu0  ;;  %v4697_v23 = vpop.f32.mrb[32].mxu1 }
 0x4b0   : > { %v7013_v61 = vrot.slane %v7012_v46, 2  ;;  %v7151_v24 = vmax.f32 %v7150_v8, %v4070_v39  ;;  %v4699_v32 = vpop.f32.mrb[33].mxu1 }
 0x4b1   : > { %v7034_v38 = vrot.slane %v7033_v59, 2  ;;  %v4701_v60 = vpop.f32.mrb[34].mxu1  ;;  %5039 = vmatmul.mubr.bf16.gmra.mrb[156].mxu0 %v18390_v2 }
 0x4b2   : > { %v7014_v55 = vmax.f32 %v7012_v46, %v7013_v61  ;;  %v7164_v4 = vmax.f32 %v4697_v23, %v4701_v60  ;;  %v4703_v31 = vpop.f32.mrb[35].mxu1  ;;  %5048 = vmatprep.mubr.bf16.mxu0 %v18388_v6  ;;  %v18391_v61 = vld [vmem:[#allocation16_spill] sm:$0xff] }
 0x4b3   : > { %v7035_v56 = vmax.f32 %v7033_v59, %v7034_v38  ;;  %v7185_v16 = vmax.f32 %v4699_v32, %v4703_v31 }
 0x4b4   : > { %v7015_v41 = vrot.slane %v7014_v55, 1  ;;  %v4074_v40 = vpop.f32.mrb[52].mxu0  ;;  %5672 = vmatmul.mubr.bf16.gmra.mrb[140].mxu1 %v15644_v19 }
 0x4b5   : > { %v7036_v29 = vrot.slane %v7035_v56, 1  ;;  %v7131_v49 = vmax.f32 %v7130_v9, %v4074_v40  ;;  %v4076_v17 = vpop.f32.mrb[53].mxu0  ;;  %5681 = vmatprep.mubr.bf16.mxu1 %v18388_v6 }
 0x4b6   : > { %v7016_v18 = vmax.f32 %v7014_v55, %v7015_v41  ;;  %v7152_v7 = vmax.f32 %v7151_v24, %v4076_v17  ;;  %v4078_v25 = vpop.f32.mrb[54].mxu0 }
 0x4b7   : > { %v7037_v1 = vmax.f32 %v7035_v56, %v7036_v29  ;;  %v7132_v30 = vmax.f32 %v7131_v49, %v4078_v25  ;;  %v4080_v47 = vpop.f32.mrb[55].mxu0  ;;  %v4707_v46 = vpop.f32.mrb[36].mxu1 }
 0x4b8   : > { %v16337_v8 = vsel %vm7704_vm7, %v7016_v18, %v16289_v36  ;;  %v7153_v34 = vmax.f32 %v7152_v7, %v4080_v47  ;;  %v7165_v59 = vmax.f32 %v7164_v4, %v4707_v46  ;;  %v4709_v39 = vpop.f32.mrb[37].mxu1  ;;  %v18392_v18 = vld [vmem:[#allocation15_spill] sm:$0xff] }
 0x4b9   : > { %v16341_v19 = vsel %vm7704_vm7, %v7037_v1, %v16293_v45  ;;  %v7186_v9 = vmax.f32 %v7185_v16, %v4709_v39  ;;  %v4711_v23 = vpop.f32.mrb[38].mxu1  ;;  %5049 = vmatmul.mubr.bf16.gmra.mrb[160].mxu0 %v18391_v61 }
 0x4ba   : > { %v7166_v24 = vmax.f32 %v7165_v59, %v4711_v23  ;;  %v4713_v32 = vpop.f32.mrb[39].mxu1  ;;  %5058 = vmatprep.mubr.bf16.mxu0 %v18388_v6 }
 0x4bb   : > { %v7187_v38 = vmax.f32 %v7186_v9, %v4713_v32 }
 0x4bc   : > { %v4084_v60 = vpop.f32.mrb[56].mxu0  ;;  %5682 = vmatmul.mubr.bf16.gmra.mrb[144].mxu1 %v15662_v26 }
 0x4bd   : > { %v7133_v36 = vmax.f32 %v7132_v30, %v4084_v60  ;;  %v4086_v55 = vpop.f32.mrb[57].mxu0  ;;  %5691 = vmatprep.mubr.bf16.mxu1 %v18388_v6 }
 0x4be   : > { %v7154_v4 = vmax.f32 %v7153_v34, %v4086_v55  ;;  %v4088_v31 = vpop.f32.mrb[58].mxu0  ;;  %v18393_v55 = vld [vmem:[#allocation18_spill] sm:$0xff] }
 0x4bf   : > { %v7134_v45 = vmax.f32 %v7133_v36, %v4088_v31  ;;  %v4090_v56 = vpop.f32.mrb[59].mxu0  ;;  %v4717_v16 = vpop.f32.mrb[40].mxu1 }
 0x4c0   : > { %v7155_v41 = vmax.f32 %v7154_v4, %v4090_v56  ;;  %v7167_v40 = vmax.f32 %v7166_v24, %v4717_v16  ;;  %v4719_v29 = vpop.f32.mrb[41].mxu1 }
 0x4c1   : > { %v7188_v49 = vmax.f32 %v7187_v38, %v4719_v29  ;;  %v4721_v17 = vpop.f32.mrb[42].mxu1  ;;  %5059 = vmatmul.mubr.bf16.gmra.mrb[164].mxu0 %v18392_v18 }
 0x4c2   : > { %v7168_v7 = vmax.f32 %v7167_v40, %v4721_v17  ;;  %v4723_v25 = vpop.f32.mrb[43].mxu1  ;;  %5068 = vmatprep.mubr.bf16.mxu0 %v18388_v6 }
 0x4c3   : > { %v7189_v26 = vmax.f32 %v7188_v49, %v4723_v25 }
 0x4c4   : > { %v4094_v1 = vpop.f32.mrb[60].mxu0  ;;  %5692 = vmatmul.mubr.bf16.gmra.mrb[148].mxu1 %v15660_v20 }
 0x4c5   : > { %v7135_v30 = vmax.f32 %v7134_v45, %v4094_v1  ;;  %v4096_v47 = vpop.f32.mrb[61].mxu0  ;;  %5701 = vmatprep.mubr.bf16.mxu1 %v18388_v6 }
 0x4c6   : > { %v7156_v46 = vmax.f32 %v7155_v41, %v4096_v47  ;;  %v4098_v34 = vpop.f32.mrb[62].mxu0 }
 0x4c7   : > { %v7136_v59 = vmax.f32 %v7135_v30, %v4098_v34  ;;  %v4100_v39 = vpop.f32.mrb[63].mxu0  ;;  %v4727_v9 = vpop.f32.mrb[44].mxu1 }
 0x4c8   : > { %v7157_v23 = vmax.f32 %v7156_v46, %v4100_v39  ;;  %v7169_v24 = vmax.f32 %v7168_v7, %v4727_v9  ;;  %v4729_v32 = vpop.f32.mrb[45].mxu1 }
 0x4c9   : > { %v7137_v38 = vrot.slane %v7136_v59, 4  ;;  %v7190_v60 = vmax.f32 %v7189_v26, %v4729_v32  ;;  %v4731_v36 = vpop.f32.mrb[46].mxu1  ;;  %5069 = vmatmul.mubr.bf16.gmra.mrb[168].mxu0 %v18393_v55 }
 0x4ca   : > { %v7158_v4 = vrot.slane %v7157_v23, 4  ;;  %v7170_v31 = vmax.f32 %v7169_v24, %v4731_v36  ;;  %v4733_v20 = vpop.f32.mrb[47].mxu1  ;;  %5078 = vmatprep.mubr.bf16.mxu0 %v18388_v6 }
 0x4cb   : > { %v7138_v45 = vmax.f32 %v7136_v59, %v7137_v38  ;;  %v7191_v56 = vmax.f32 %v7190_v60, %v4733_v20 }
 0x4cc   : > { %v7159_v16 = vmax.f32 %v7157_v23, %v7158_v4  ;;  %v4104_v41 = vpop.f32.mrb[64].mxu0  ;;  %5702 = vmatmul.mubr.bf16.gmra.mrb[152].mxu1 %v18389_v0  ;;  %v18394_v23 = vld [vmem:[#allocation17_spill] sm:$0xff] }
 0x4cd   : > { %v7139_v40 = vrot.slane %v7138_v45, 2  ;;  %v4106_v29 = vpop.f32.mrb[65].mxu0  ;;  %5711 = vmatprep.mubr.bf16.mxu1 %v18388_v6 }
 0x4ce   : > { %v7160_v49 = vrot.slane %v7159_v16, 2  ;;  %v4108_v17 = vpop.f32.mrb[66].mxu0 }
 0x4cf   : > { %v7140_v7 = vmax.f32 %v7138_v45, %v7139_v40  ;;  %v7290_v25 = vmax.f32 %v4104_v41, %v4108_v17  ;;  %v4110_v26 = vpop.f32.mrb[67].mxu0  ;;  %v4737_v1 = vpop.f32.mrb[48].mxu1 }
 0x4d0   : > { %v7161_v30 = vmax.f32 %v7159_v16, %v7160_v49  ;;  %v7311_v47 = vmax.f32 %v4106_v29, %v4110_v26  ;;  %v7171_v46 = vmax.f32 %v7170_v31, %v4737_v1  ;;  %v4739_v34 = vpop.f32.mrb[49].mxu1 }
 0x4d1   : > { %v7141_v59 = vrot.slane %v7140_v7, 1  ;;  %v7192_v39 = vmax.f32 %v7191_v56, %v4739_v34  ;;  %v4741_v9 = vpop.f32.mrb[50].mxu1  ;;  %5079 = vmatmul.mubr.bf16.gmra.mrb[172].mxu0 %v18394_v23 }
 0x4d2   : > { %v7162_v0 = vrot.slane %v7161_v30, 1  ;;  %v7172_v24 = vmax.f32 %v7171_v46, %v4741_v9  ;;  %v4743_v32 = vpop.f32.mrb[51].mxu1  ;;  %5088 = vmatprep.mubr.bf16.mxu0 %v18388_v6 }
 0x4d3   : > { %v7142_v38 = vmax.f32 %v7140_v7, %v7141_v59  ;;  %v7193_v60 = vmax.f32 %v7192_v39, %v4743_v32 }
 0x4d4   : > { %v7163_v36 = vmax.f32 %v7161_v30, %v7162_v0  ;;  %v4114_v4 = vpop.f32.mrb[68].mxu0  ;;  %5712 = vmatmul.mubr.bf16.gmra.mrb[156].mxu1 %v18390_v2 }
 0x4d5   : > { %v16360_v31 = vsel %vm7706_vm8, %v7142_v38, %v16312_v5  ;;  %v7291_v20 = vmax.f32 %v7290_v25, %v4114_v4  ;;  %v4116_v45 = vpop.f32.mrb[69].mxu0  ;;  %5721 = vmatprep.mubr.bf16.mxu1 %v18388_v6  ;;  %v18395_v5 = vld [vmem:[#allocation20_spill] sm:$0xff] }
 0x4d6   : > { %v16365_v56 = vsel %vm7706_vm8, %v7163_v36, %v16317_v48  ;;  %v7312_v16 = vmax.f32 %v7311_v47, %v4116_v45  ;;  %v4118_v41 = vpop.f32.mrb[70].mxu0 }
 0x4d7   : > { %v7292_v40 = vmax.f32 %v7291_v20, %v4118_v41  ;;  %v4120_v29 = vpop.f32.mrb[71].mxu0  ;;  %v4747_v49 = vpop.f32.mrb[52].mxu1  ;;  %v18396_v20 = vld [vmem:[#allocation19_spill] sm:$0xff] }
 0x4d8   : > { %v7313_v17 = vmax.f32 %v7312_v16, %v4120_v29  ;;  %v7173_v7 = vmax.f32 %v7172_v24, %v4747_v49  ;;  %v4749_v2 = vpop.f32.mrb[53].mxu1 }
 0x4d9   : > { %v7194_v26 = vmax.f32 %v7193_v60, %v4749_v2  ;;  %v4751_v1 = vpop.f32.mrb[54].mxu1  ;;  %5089 = vmatmul.mubr.bf16.gmra.mrb[176].mxu0 %v18395_v5 }
 0x4da   : > { %v7174_v25 = vmax.f32 %v7173_v7, %v4751_v1  ;;  %v4753_v30 = vpop.f32.mrb[55].mxu1  ;;  %5098 = vmatprep.mubr.bf16.mxu0 %v18388_v6 }
 0x4db   : > { %v7195_v46 = vmax.f32 %v7194_v26, %v4753_v30 }
 0x4dc   : > { %v4124_v34 = vpop.f32.mrb[72].mxu0  ;;  %5722 = vmatmul.mubr.bf16.gmra.mrb[160].mxu1 %v18391_v61 }
 0x4dd   : > { %v7293_v48 = vmax.f32 %v7292_v40, %v4124_v34  ;;  %v4126_v47 = vpop.f32.mrb[73].mxu0  ;;  %5731 = vmatprep.mubr.bf16.mxu1 %v18388_v6 }
 0x4de   : > { %v7314_v59 = vmax.f32 %v7313_v17, %v4126_v47  ;;  %v4128_v39 = vpop.f32.mrb[74].mxu0 }
 0x4df   : > { %v7294_v9 = vmax.f32 %v7293_v48, %v4128_v39  ;;  %v4130_v0 = vpop.f32.mrb[75].mxu0  ;;  %v4757_v24 = vpop.f32.mrb[56].mxu1  ;;  %v18397_v48 = vld [vmem:[#allocation22_spill] sm:$0xff] }
 0x4e0   : > { %v7315_v32 = vmax.f32 %v7314_v59, %v4130_v0  ;;  %v7175_v38 = vmax.f32 %v7174_v25, %v4757_v24  ;;  %v4759_v60 = vpop.f32.mrb[57].mxu1 }
 0x4e1   : > { %v7196_v36 = vmax.f32 %v7195_v46, %v4759_v60  ;;  %v4761_v4 = vpop.f32.mrb[58].mxu1  ;;  %5099 = vmatmul.mubr.bf16.gmra.mrb[180].mxu0 %v18396_v20 }
 0x4e2   : > { %v7176_v45 = vmax.f32 %v7175_v38, %v4761_v4  ;;  %v4763_v16 = vpop.f32.mrb[59].mxu1  ;;  %5108 = vmatprep.mubr.bf16.mxu0 %v18388_v6 }
 0x4e3   : > { %v7197_v61 = vmax.f32 %v7196_v36, %v4763_v16 }
 0x4e4   : > { %v4134_v41 = vpop.f32.mrb[76].mxu0  ;;  %5732 = vmatmul.mubr.bf16.gmra.mrb[164].mxu1 %v18392_v18 }
 0x4e5   : > { %v7295_v40 = vmax.f32 %v7294_v9, %v4134_v41  ;;  %v4136_v29 = vpop.f32.mrb[77].mxu0  ;;  %5741 = vmatprep.mubr.bf16.mxu1 %v18388_v6 }
 0x4e6   : > { %v7316_v49 = vmax.f32 %v7315_v32, %v4136_v29  ;;  %v4138_v17 = vpop.f32.mrb[78].mxu0 }
 0x4e7   : > { %v7296_v7 = vmax.f32 %v7295_v40, %v4138_v17  ;;  %v4140_v2 = vpop.f32.mrb[79].mxu0  ;;  %v4767_v26 = vpop.f32.mrb[60].mxu1 }
 0x4e8   : > { %v7317_v1 = vmax.f32 %v7316_v49, %v4140_v2  ;;  %v7177_v25 = vmax.f32 %v7176_v45, %v4767_v26  ;;  %v4769_v30 = vpop.f32.mrb[61].mxu1  ;;  %v18398_v2 = vld [vmem:[#allocation21_spill] sm:$0xff] }
 0x4e9   : > { %v7198_v46 = vmax.f32 %v7197_v61, %v4769_v30  ;;  %v4771_v34 = vpop.f32.mrb[62].mxu1  ;;  %5109 = vmatmul.mubr.bf16.gmra.mrb[184].mxu0 %v18397_v48 }
 0x4ea   : > { %v7178_v47 = vmax.f32 %v7177_v25, %v4771_v34  ;;  %v4773_v59 = vpop.f32.mrb[63].mxu1  ;;  %5118 = vmatprep.mubr.bf16.mxu0 %v18388_v6 }
 0x4eb   : > { %v7199_v18 = vmax.f32 %v7198_v46, %v4773_v59 }
 0x4ec   : > { %v7179_v39 = vrot.slane %v7178_v47, 4  ;;  %v4144_v9 = vpop.f32.mrb[80].mxu0  ;;  %5742 = vmatmul.mubr.bf16.gmra.mrb[168].mxu1 %v18393_v55 }
 0x4ed   : > { %v7200_v0 = vrot.slane %v7199_v18, 4  ;;  %v7297_v24 = vmax.f32 %v7296_v7, %v4144_v9  ;;  %v4146_v32 = vpop.f32.mrb[81].mxu0  ;;  %5751 = vmatprep.mubr.bf16.mxu1 %v18388_v6 }
 0x4ee   : > { %v7180_v38 = vmax.f32 %v7178_v47, %v7179_v39  ;;  %v7318_v60 = vmax.f32 %v7317_v1, %v4146_v32  ;;  %v4148_v36 = vpop.f32.mrb[82].mxu0 }
 0x4ef   : > { %v7201_v4 = vmax.f32 %v7199_v18, %v7200_v0  ;;  %v7298_v45 = vmax.f32 %v7297_v24, %v4148_v36  ;;  %v4150_v16 = vpop.f32.mrb[83].mxu0  ;;  %v4777_v61 = vpop.f32.mrb[64].mxu1 }
 0x4f0   : > { %v7181_v41 = vrot.slane %v7180_v38, 2  ;;  %v7319_v40 = vmax.f32 %v7318_v60, %v4150_v16  ;;  %v4779_v29 = vpop.f32.mrb[65].mxu1 }
 0x4f1   : > { %v7202_v49 = vrot.slane %v7201_v4, 2  ;;  %v4781_v17 = vpop.f32.mrb[66].mxu1  ;;  %5119 = vmatmul.mubr.bf16.gmra.mrb[188].mxu0 %v18398_v2 }
 0x4f2   : > { %v7182_v55 = vmax.f32 %v7180_v38, %v7181_v41  ;;  %v7332_v26 = vmax.f32 %v4777_v61, %v4781_v17  ;;  %v4783_v7 = vpop.f32.mrb[67].mxu1  ;;  %5128 = vmatprep.mubr.bf16.mxu0 %v18388_v6  ;;  %v18399_v41 = vld [vmem:[#allocation24_spill] sm:$0xff] }
 0x4f3   : > { %v7203_v25 = vmax.f32 %v7201_v4, %v7202_v49  ;;  %v7353_v30 = vmax.f32 %v4779_v29, %v4783_v7 }
 0x4f4   : > { %v7183_v1 = vrot.slane %v7182_v55, 1  ;;  %v4154_v46 = vpop.f32.mrb[84].mxu0  ;;  %5752 = vmatmul.mubr.bf16.gmra.mrb[172].mxu1 %v18394_v23 }
 0x4f5   : > { %v7204_v34 = vrot.slane %v7203_v25, 1  ;;  %v7299_v47 = vmax.f32 %v7298_v45, %v4154_v46  ;;  %v4156_v59 = vpop.f32.mrb[85].mxu0  ;;  %5761 = vmatprep.mubr.bf16.mxu1 %v18388_v6 }
 0x4f6   : > { %v7184_v18 = vmax.f32 %v7182_v55, %v7183_v1  ;;  %v7320_v39 = vmax.f32 %v7319_v40, %v4156_v59  ;;  %v4158_v9 = vpop.f32.mrb[86].mxu0 }
 0x4f7   : > { %v7205_v0 = vmax.f32 %v7203_v25, %v7204_v34  ;;  %v7300_v24 = vmax.f32 %v7299_v47, %v4158_v9  ;;  %v4160_v32 = vpop.f32.mrb[87].mxu0  ;;  %v4787_v38 = vpop.f32.mrb[68].mxu1 }
 0x4f8   : > { %v16385_v60 = vsel %vm7706_vm8, %v7184_v18, %v16337_v8  ;;  %v7321_v36 = vmax.f32 %v7320_v39, %v4160_v32  ;;  %v7333_v4 = vmax.f32 %v7332_v26, %v4787_v38  ;;  %v4789_v16 = vpop.f32.mrb[69].mxu1  ;;  %v18400_v18 = vld [vmem:[#allocation23_spill] sm:$0xff] }
 0x4f9   : > { %v16389_v23 = vsel %vm7706_vm8, %v7205_v0, %v16341_v19  ;;  %v7354_v45 = vmax.f32 %v7353_v30, %v4789_v16  ;;  %v4791_v61 = vpop.f32.mrb[70].mxu1  ;;  %5129 = vmatmul.mubr.bf16.gmra.mrb[192].mxu0 %v18399_v41 }
 0x4fa   : > { %v7334_v40 = vmax.f32 %v7333_v4, %v4791_v61  ;;  %v4793_v29 = vpop.f32.mrb[71].mxu1  ;;  %5138 = vmatprep.mubr.bf16.mxu0 %v18388_v6 }
 0x4fb   : > { %v7355_v49 = vmax.f32 %v7354_v45, %v4793_v29 }
 0x4fc   : > { %v4164_v17 = vpop.f32.mrb[88].mxu0  ;;  %5762 = vmatmul.mubr.bf16.gmra.mrb[176].mxu1 %v18395_v5 }
 0x4fd   : > { %v7301_v8 = vmax.f32 %v7300_v24, %v4164_v17  ;;  %v4166_v55 = vpop.f32.mrb[89].mxu0  ;;  %5771 = vmatprep.mubr.bf16.mxu1 %v18388_v6 }
 0x4fe   : > { %v7322_v26 = vmax.f32 %v7321_v36, %v4166_v55  ;;  %v4168_v7 = vpop.f32.mrb[90].mxu0  ;;  %v18401_v55 = vld [vmem:[#allocation26_spill] sm:$0xff] }
 0x4ff   : > { %v7302_v19 = vmax.f32 %v7301_v8, %v4168_v7  ;;  %v4170_v25 = vpop.f32.mrb[91].mxu0  ;;  %v4797_v30 = vpop.f32.mrb[72].mxu1 }
 0x500   : > { %v7323_v1 = vmax.f32 %v7322_v26, %v4170_v25  ;;  %v7335_v46 = vmax.f32 %v7334_v40, %v4797_v30  ;;  %v4799_v34 = vpop.f32.mrb[73].mxu1 }
 0x501   : > { %v7356_v47 = vmax.f32 %v7355_v49, %v4799_v34  ;;  %v4801_v59 = vpop.f32.mrb[74].mxu1  ;;  %5139 = vmatmul.mubr.bf16.gmra.mrb[196].mxu0 %v18400_v18 }
 0x502   : > { %v7336_v39 = vmax.f32 %v7335_v46, %v4801_v59  ;;  %v4803_v9 = vpop.f32.mrb[75].mxu1  ;;  %5148 = vmatprep.mubr.bf16.mxu0 %v18388_v6 }
 0x503   : > { %v7357_v5 = vmax.f32 %v7356_v47, %v4803_v9 }
 0x504   : > { %v4174_v0 = vpop.f32.mrb[92].mxu0  ;;  %5772 = vmatmul.mubr.bf16.gmra.mrb[180].mxu1 %v18396_v20 }
 0x505   : > { %v7303_v24 = vmax.f32 %v7302_v19, %v4174_v0  ;;  %v4176_v32 = vpop.f32.mrb[93].mxu0  ;;  %5781 = vmatprep.mubr.bf16.mxu1 %v18388_v6 }
 0x506   : > { %v7324_v38 = vmax.f32 %v7323_v1, %v4176_v32  ;;  %v4178_v36 = vpop.f32.mrb[94].mxu0 }
 0x507   : > { %v7304_v4 = vmax.f32 %v7303_v24, %v4178_v36  ;;  %v4180_v16 = vpop.f32.mrb[95].mxu0  ;;  %v4807_v45 = vpop.f32.mrb[76].mxu1 }
 0x508   : > { %v7325_v61 = vmax.f32 %v7324_v38, %v4180_v16  ;;  %v7337_v40 = vmax.f32 %v7336_v39, %v4807_v45  ;;  %v4809_v29 = vpop.f32.mrb[77].mxu1 }
 0x509   : > { %v7305_v49 = vrot.slane %v7304_v4, 4  ;;  %v7358_v17 = vmax.f32 %v7357_v5, %v4809_v29  ;;  %v4811_v8 = vpop.f32.mrb[78].mxu1  ;;  %5149 = vmatmul.mubr.bf16.gmra.mrb[200].mxu0 %v18401_v55 }
 0x50a   : > { %v7326_v26 = vrot.slane %v7325_v61, 4  ;;  %v7338_v7 = vmax.f32 %v7337_v40, %v4811_v8  ;;  %v4813_v20 = vpop.f32.mrb[79].mxu1  ;;  %5158 = vmatprep.mubr.bf16.mxu0 %v18388_v6 }
 0x50b   : > { %v7306_v19 = vmax.f32 %v7304_v4, %v7305_v49  ;;  %v7359_v25 = vmax.f32 %v7358_v17, %v4813_v20 }
 0x50c   : > { %v7327_v30 = vmax.f32 %v7325_v61, %v7326_v26  ;;  %v4184_v1 = vpop.f32.mrb[96].mxu0  ;;  %5782 = vmatmul.mubr.bf16.gmra.mrb[184].mxu1 %v18397_v48  ;;  %v18402_v61 = vld [vmem:[#allocation25_spill] sm:$0xff] }
 0x50d   : > { %v7307_v46 = vrot.slane %v7306_v19, 2  ;;  %v4186_v34 = vpop.f32.mrb[97].mxu0  ;;  %5791 = vmatprep.mubr.bf16.mxu1 %v18388_v6 }
 0x50e   : > { %v7328_v47 = vrot.slane %v7327_v30, 2  ;;  %v4188_v59 = vpop.f32.mrb[98].mxu0 }
 0x50f   : > { %v7308_v39 = vmax.f32 %v7306_v19, %v7307_v46  ;;  %v7458_v9 = vmax.f32 %v4184_v1, %v4188_v59  ;;  %v4190_v5 = vpop.f32.mrb[99].mxu0  ;;  %v4817_v0 = vpop.f32.mrb[80].mxu1 }
 0x510   : > { %v7329_v24 = vmax.f32 %v7327_v30, %v7328_v47  ;;  %v7479_v32 = vmax.f32 %v4186_v34, %v4190_v5  ;;  %v7339_v38 = vmax.f32 %v7338_v7, %v4817_v0  ;;  %v4819_v36 = vpop.f32.mrb[81].mxu1 }
 0x511   : > { %v7309_v4 = vrot.slane %v7308_v39, 1  ;;  %v7360_v16 = vmax.f32 %v7359_v25, %v4819_v36  ;;  %v4821_v45 = vpop.f32.mrb[82].mxu1  ;;  %5159 = vmatmul.mubr.bf16.gmra.mrb[204].mxu0 %v18402_v61 }
 0x512   : > { %v7330_v48 = vrot.slane %v7329_v24, 1  ;;  %v7340_v40 = vmax.f32 %v7339_v38, %v4821_v45  ;;  %v4823_v29 = vpop.f32.mrb[83].mxu1  ;;  %5168 = vmatprep.mubr.bf16.mxu0 %v18388_v6 }
 0x513   : > { %v7310_v49 = vmax.f32 %v7308_v39, %v7309_v4  ;;  %v7361_v17 = vmax.f32 %v7360_v16, %v4823_v29 }
 0x514   : > { %v7331_v8 = vmax.f32 %v7329_v24, %v7330_v48  ;;  %v4194_v26 = vpop.f32.mrb[100].mxu0  ;;  %5792 = vmatmul.mubr.bf16.gmra.mrb[188].mxu1 %v18398_v2 }
 0x515   : > { %v16408_v7 = vsel %vm7708_vm9, %v7310_v49, %v16360_v31  ;;  %v7459_v20 = vmax.f32 %v7458_v9, %v4194_v26  ;;  %v4196_v19 = vpop.f32.mrb[101].mxu0  ;;  %5801 = vmatprep.mubr.bf16.mxu1 %v18388_v6  ;;  %v18403_v31 = vld [vmem:[#allocation28_spill] sm:$0xff] }
 0x516   : > { %v16413_v25 = vsel %vm7708_vm9, %v7331_v8, %v16365_v56  ;;  %v7480_v30 = vmax.f32 %v7479_v32, %v4196_v19  ;;  %v4198_v1 = vpop.f32.mrb[102].mxu0 }
 0x517   : > { %v7460_v46 = vmax.f32 %v7459_v20, %v4198_v1  ;;  %v4200_v34 = vpop.f32.mrb[103].mxu0  ;;  %v4827_v47 = vpop.f32.mrb[84].mxu1  ;;  %v18404_v20 = vld [vmem:[#allocation27_spill] sm:$0xff] }
 0x518   : > { %v7481_v59 = vmax.f32 %v7480_v30, %v4200_v34  ;;  %v7341_v39 = vmax.f32 %v7340_v40, %v4827_v47  ;;  %v4829_v2 = vpop.f32.mrb[85].mxu1 }
 0x519   : > { %v7362_v5 = vmax.f32 %v7361_v17, %v4829_v2  ;;  %v4831_v0 = vpop.f32.mrb[86].mxu1  ;;  %5169 = vmatmul.mubr.bf16.gmra.mrb[208].mxu0 %v18403_v31 }
 0x51a   : > { %v7342_v9 = vmax.f32 %v7341_v39, %v4831_v0  ;;  %v4833_v24 = vpop.f32.mrb[87].mxu1  ;;  %5178 = vmatprep.mubr.bf16.mxu0 %v18388_v6 }
 0x51b   : > { %v7363_v38 = vmax.f32 %v7362_v5, %v4833_v24 }
 0x51c   : > { %v4204_v36 = vpop.f32.mrb[104].mxu0  ;;  %5802 = vmatmul.mubr.bf16.gmra.mrb[192].mxu1 %v18399_v41 }
 0x51d   : > { %v7461_v56 = vmax.f32 %v7460_v46, %v4204_v36  ;;  %v4206_v32 = vpop.f32.mrb[105].mxu0  ;;  %5811 = vmatprep.mubr.bf16.mxu1 %v18388_v6 }
 0x51e   : > { %v7482_v4 = vmax.f32 %v7481_v59, %v4206_v32  ;;  %v4208_v16 = vpop.f32.mrb[106].mxu0 }
 0x51f   : > { %v7462_v45 = vmax.f32 %v7461_v56, %v4208_v16  ;;  %v4210_v48 = vpop.f32.mrb[107].mxu0  ;;  %v4837_v40 = vpop.f32.mrb[88].mxu1  ;;  %v18405_v56 = vld [vmem:[#allocation30_spill] sm:$0xff] }
 0x520   : > { %v7483_v29 = vmax.f32 %v7482_v4, %v4210_v48  ;;  %v7343_v49 = vmax.f32 %v7342_v9, %v4837_v40  ;;  %v4839_v17 = vpop.f32.mrb[89].mxu1 }
 0x521   : > { %v7364_v8 = vmax.f32 %v7363_v38, %v4839_v17  ;;  %v4841_v26 = vpop.f32.mrb[90].mxu1  ;;  %5179 = vmatmul.mubr.bf16.gmra.mrb[212].mxu0 %v18404_v20 }
 0x522   : > { %v7344_v19 = vmax.f32 %v7343_v49, %v4841_v26  ;;  %v4843_v30 = vpop.f32.mrb[91].mxu1  ;;  %5188 = vmatprep.mubr.bf16.mxu0 %v18388_v6 }
 0x523   : > { %v7365_v41 = vmax.f32 %v7364_v8, %v4843_v30 }
 0x524   : > { %v4214_v1 = vpop.f32.mrb[108].mxu0  ;;  %5812 = vmatmul.mubr.bf16.gmra.mrb[196].mxu1 %v18400_v18 }
 0x525   : > { %v7463_v46 = vmax.f32 %v7462_v45, %v4214_v1  ;;  %v4216_v34 = vpop.f32.mrb[109].mxu0  ;;  %5821 = vmatprep.mubr.bf16.mxu1 %v18388_v6 }
 0x526   : > { %v7484_v47 = vmax.f32 %v7483_v29, %v4216_v34  ;;  %v4218_v59 = vpop.f32.mrb[110].mxu0 }
 0x527   : > { %v7464_v39 = vmax.f32 %v7463_v46, %v4218_v59  ;;  %v4220_v2 = vpop.f32.mrb[111].mxu0  ;;  %v4847_v5 = vpop.f32.mrb[92].mxu1 }
 0x528   : > { %v7485_v0 = vmax.f32 %v7484_v47, %v4220_v2  ;;  %v7345_v9 = vmax.f32 %v7344_v19, %v4847_v5  ;;  %v4849_v24 = vpop.f32.mrb[93].mxu1  ;;  %v18406_v2 = vld [vmem:[#allocation29_spill] sm:$0xff] }
 0x529   : > { %v7366_v38 = vmax.f32 %v7365_v41, %v4849_v24  ;;  %v4851_v36 = vpop.f32.mrb[94].mxu1  ;;  %5189 = vmatmul.mubr.bf16.gmra.mrb[216].mxu0 %v18405_v56 }
 0x52a   : > { %v7346_v32 = vmax.f32 %v7345_v9, %v4851_v36  ;;  %v4853_v4 = vpop.f32.mrb[95].mxu1  ;;  %5198 = vmatprep.mubr.bf16.mxu0 %v18388_v6 }
 0x52b   : > { %v7367_v18 = vmax.f32 %v7366_v38, %v4853_v4 }
 0x52c   : > { %v7347_v16 = vrot.slane %v7346_v32, 4  ;;  %v4224_v45 = vpop.f32.mrb[112].mxu0  ;;  %5822 = vmatmul.mubr.bf16.gmra.mrb[200].mxu1 %v18401_v55 }
 0x52d   : > { %v7368_v48 = vrot.slane %v7367_v18, 4  ;;  %v7465_v40 = vmax.f32 %v7464_v39, %v4224_v45  ;;  %v4226_v29 = vpop.f32.mrb[113].mxu0  ;;  %5831 = vmatprep.mubr.bf16.mxu1 %v18388_v6 }
 0x52e   : > { %v7348_v49 = vmax.f32 %v7346_v32, %v7347_v16  ;;  %v7486_v17 = vmax.f32 %v7485_v0, %v4226_v29  ;;  %v4228_v8 = vpop.f32.mrb[114].mxu0 }
 0x52f   : > { %v7369_v26 = vmax.f32 %v7367_v18, %v7368_v48  ;;  %v7466_v19 = vmax.f32 %v7465_v40, %v4228_v8  ;;  %v4230_v30 = vpop.f32.mrb[115].mxu0  ;;  %v4857_v41 = vpop.f32.mrb[96].mxu1 }
 0x530   : > { %v7349_v1 = vrot.slane %v7348_v49, 2  ;;  %v7487_v46 = vmax.f32 %v7486_v17, %v4230_v30  ;;  %v4859_v34 = vpop.f32.mrb[97].mxu1 }
 0x531   : > { %v7370_v47 = vrot.slane %v7369_v26, 2  ;;  %v4861_v59 = vpop.f32.mrb[98].mxu1  ;;  %5199 = vmatmul.mubr.bf16.gmra.mrb[220].mxu0 %v18406_v2 }
 0x532   : > { %v7350_v55 = vmax.f32 %v7348_v49, %v7349_v1  ;;  %v7500_v5 = vmax.f32 %v4857_v41, %v4861_v59  ;;  %v4863_v39 = vpop.f32.mrb[99].mxu1  ;;  %5208 = vmatprep.mubr.bf16.mxu0 %v18388_v6  ;;  %v18407_v1 = vld [vmem:[#allocation32_spill] sm:$0xff] }
 0x533   : > { %v7371_v9 = vmax.f32 %v7369_v26, %v7370_v47  ;;  %v7521_v24 = vmax.f32 %v4859_v34, %v4863_v39 }
 0x534   : > { %v7351_v0 = vrot.slane %v7350_v55, 1  ;;  %v4234_v38 = vpop.f32.mrb[116].mxu0  ;;  %5832 = vmatmul.mubr.bf16.gmra.mrb[204].mxu1 %v18402_v61 }
 0x535   : > { %v7372_v36 = vrot.slane %v7371_v9, 1  ;;  %v7467_v32 = vmax.f32 %v7466_v19, %v4234_v38  ;;  %v4236_v4 = vpop.f32.mrb[117].mxu0  ;;  %5841 = vmatprep.mubr.bf16.mxu1 %v18388_v6 }
 0x536   : > { %v7352_v18 = vmax.f32 %v7350_v55, %v7351_v0  ;;  %v7488_v16 = vmax.f32 %v7487_v46, %v4236_v4  ;;  %v4238_v45 = vpop.f32.mrb[118].mxu0 }
 0x537   : > { %v7373_v48 = vmax.f32 %v7371_v9, %v7372_v36  ;;  %v7468_v40 = vmax.f32 %v7467_v32, %v4238_v45  ;;  %v4240_v29 = vpop.f32.mrb[119].mxu0  ;;  %v4867_v49 = vpop.f32.mrb[100].mxu1 }
 0x538   : > { %v16433_v17 = vsel %vm7708_vm9, %v7352_v18, %v16385_v60  ;;  %v7489_v8 = vmax.f32 %v7488_v16, %v4240_v29  ;;  %v7501_v26 = vmax.f32 %v7500_v5, %v4867_v49  ;;  %v4869_v30 = vpop.f32.mrb[101].mxu1  ;;  %v18408_v18 = vld [vmem:[#allocation31_spill] sm:$0xff] }
 0x539   : > { %v16437_v61 = vsel %vm7708_vm9, %v7373_v48, %v16389_v23  ;;  %v7522_v19 = vmax.f32 %v7521_v24, %v4869_v30  ;;  %v4871_v41 = vpop.f32.mrb[102].mxu1  ;;  %5209 = vmatmul.mubr.bf16.gmra.mrb[224].mxu0 %v18407_v1 }
 0x53a   : > { %v7502_v46 = vmax.f32 %v7501_v26, %v4871_v41  ;;  %v4873_v34 = vpop.f32.mrb[103].mxu1  ;;  %5218 = vmatprep.mubr.bf16.mxu0 %v18388_v6 }
 0x53b   : > { %v7523_v47 = vmax.f32 %v7522_v19, %v4873_v34 }
 0x53c   : > { %v4244_v59 = vpop.f32.mrb[120].mxu0  ;;  %5842 = vmatmul.mubr.bf16.gmra.mrb[208].mxu1 %v18403_v31 }
 0x53d   : > { %v7469_v60 = vmax.f32 %v7468_v40, %v4244_v59  ;;  %v4246_v55 = vpop.f32.mrb[121].mxu0  ;;  %5851 = vmatprep.mubr.bf16.mxu1 %v18388_v6 }
 0x53e   : > { %v7490_v5 = vmax.f32 %v7489_v8, %v4246_v55  ;;  %v4248_v39 = vpop.f32.mrb[122].mxu0 }
 0x53f   : > { %v7470_v23 = vmax.f32 %v7469_v60, %v4248_v39  ;;  %v4250_v9 = vpop.f32.mrb[123].mxu0  ;;  %v4877_v24 = vpop.f32.mrb[104].mxu1 }
 0x540   : > { %v7491_v0 = vmax.f32 %v7490_v5, %v4250_v9  ;;  %v7503_v38 = vmax.f32 %v7502_v46, %v4877_v24  ;;  %v4879_v36 = vpop.f32.mrb[105].mxu1 }
 0x541   : > { %v7524_v32 = vmax.f32 %v7523_v47, %v4879_v36  ;;  %v4881_v4 = vpop.f32.mrb[106].mxu1  ;;  %5219 = vmatmul.mubr.bf16.gmra.mrb[228].mxu0 %v18408_v18 }
 0x542   : > { %v7504_v16 = vmax.f32 %v7503_v38, %v4881_v4  ;;  %v4883_v45 = vpop.f32.mrb[107].mxu1  ;;  %5228 = vmatprep.mubr.bf16.mxu0 %v18388_v6 }
 0x543   : > { %v7525_v31 = vmax.f32 %v7524_v32, %v4883_v45 }
 0x544   : > { %v4254_v48 = vpop.f32.mrb[124].mxu0  ;;  %5852 = vmatmul.mubr.bf16.gmra.mrb[212].mxu1 %v18404_v20 }
 0x545   : > { %v7471_v40 = vmax.f32 %v7470_v23, %v4254_v48  ;;  %v4256_v29 = vpop.f32.mrb[125].mxu0  ;;  %5861 = vmatprep.mubr.bf16.mxu1 %v18388_v6 }
 0x546   : > { %v7492_v49 = vmax.f32 %v7491_v0, %v4256_v29  ;;  %v4258_v8 = vpop.f32.mrb[126].mxu0 }
 0x547   : > { %v7472_v26 = vmax.f32 %v7471_v40, %v4258_v8  ;;  %v4260_v30 = vpop.f32.mrb[127].mxu0  ;;  %v4887_v19 = vpop.f32.mrb[108].mxu1 }
 0x548   : > { %v7493_v41 = vmax.f32 %v7492_v49, %v4260_v30  ;;  %v7505_v46 = vmax.f32 %v7504_v16, %v4887_v19  ;;  %v4889_v34 = vpop.f32.mrb[109].mxu1  ;;  %v18409_v19 = vld [vmem:[#allocation33_spill] sm:$0xff] }
 0x549   : > { %v7473_v47 = vrot.slane %v7472_v26, 4  ;;  %v7526_v59 = vmax.f32 %v7525_v31, %v4889_v34  ;;  %v4891_v60 = vpop.f32.mrb[110].mxu1  ;;  %5229 = vmatmul.mubr.bf16.gmra.mrb[232].mxu0 %v15820_v3 }
 0x54a   : > { %v7494_v55 = vrot.slane %v7493_v41, 4  ;;  %v7506_v5 = vmax.f32 %v7505_v46, %v4891_v60  ;;  %v4893_v20 = vpop.f32.mrb[111].mxu1  ;;  %5238 = vmatprep.mubr.bf16.mxu0 %v18388_v6 }
 0x54b   : > { %v7474_v39 = vmax.f32 %v7472_v26, %v7473_v47  ;;  %v7527_v23 = vmax.f32 %v7526_v59, %v4893_v20  ;;  %v7626_v47 = vld [vmem:[#allocation2] sm:$0xff] }
 0x54c   : > { %v7495_v9 = vmax.f32 %v7493_v41, %v7494_v55  ;;  %v4970_v24 = vpop.f32.mrb[128].mxu0  ;;  %5862 = vmatmul.mubr.bf16.gmra.mrb[216].mxu1 %v18405_v56  ;;  %v7627_v55 = vld [vmem:[#allocation2 + $0x8] sm:$0xff] }
 0x54d   : > { %v7475_v0 = vrot.slane %v7474_v39, 2  ;;  %v4972_v38 = vpop.f32.mrb[129].mxu0  ;;  %5871 = vmatprep.mubr.bf16.mxu1 %v18388_v6 }
 0x54e   : > { %v7496_v36 = vrot.slane %v7495_v9, 2  ;;  %v4974_v32 = vpop.f32.mrb[130].mxu0 }
 0x54f   : > { %v7476_v4 = vmax.f32 %v7474_v39, %v7475_v0  ;;  %v6366_v16 = vmax.f32 %v4970_v24, %v4974_v32  ;;  %v4897_v45 = vpop.f32.mrb[112].mxu1  ;;  %v4976_v31 = vpop.f32.mrb[131].mxu0 }
 0x550   : > { %v7497_v48 = vmax.f32 %v7495_v9, %v7496_v36  ;;  %v7507_v40 = vmax.f32 %v7506_v5, %v4897_v45  ;;  %v6387_v29 = vmax.f32 %v4972_v38, %v4976_v31  ;;  %v4899_v49 = vpop.f32.mrb[113].mxu1 }
 0x551   : > { %v7477_v8 = vrot.slane %v7476_v4, 1  ;;  %v7528_v26 = vmax.f32 %v7527_v23, %v4899_v49  ;;  %v4901_v30 = vpop.f32.mrb[114].mxu1  ;;  %5239 = vmatmul.mubr.bf16.gmra.mrb[236].mxu0 %v18409_v19 }
 0x552   : > { %v7498_v56 = vrot.slane %v7497_v48, 1  ;;  %v7508_v41 = vmax.f32 %v7507_v40, %v4901_v30  ;;  %v4903_v46 = vpop.f32.mrb[115].mxu1  ;;  %5248 = vmatprep.mubr.bf16.mxu0 %v18388_v6  ;;  %v18410_v40 = vld [vmem:[#allocation35_spill] sm:$0xff] }
 0x553   : > { %v7478_v34 = vmax.f32 %v7476_v4, %v7477_v8  ;;  %v7529_v59 = vmax.f32 %v7528_v26, %v4903_v46 }
 0x554   : > { %v7499_v60 = vmax.f32 %v7497_v48, %v7498_v56  ;;  %v4980_v20 = vpop.f32.mrb[132].mxu0  ;;  %5872 = vmatmul.mubr.bf16.gmra.mrb[220].mxu1 %v18406_v2 }
 0x555   : > { %v7711_v5 = vsel %vm7710_vm10, %v7478_v34, %v16408_v7  ;;  %v6367_v39 = vmax.f32 %v6366_v16, %v4980_v20  ;;  %v4982_v23 = vpop.f32.mrb[133].mxu0  ;;  %5881 = vmatprep.mubr.bf16.mxu1 %v18388_v6 }
 0x556   : > { %v7769_v9 = vmax.f32 %v7626_v47, %v7711_v5  ;;  %v7718_v24 = vsel %vm7710_vm10, %v7499_v60, %v16413_v25  ;;  %v6388_v0 = vmax.f32 %v6387_v29, %v4982_v23  ;;  %v4984_v38 = vpop.f32.mrb[134].mxu0 }
 0x557   : > { %v7770_v36 = vmax.f32 %v7627_v55, %v7718_v24  ;;  %v6368_v32 = vmax.f32 %v6367_v39, %v4984_v38  ;;  %v4907_v4 = vpop.f32.mrb[116].mxu1  ;;  %v4986_v45 = vpop.f32.mrb[135].mxu0  ;;  %v18411_v39 = vld [vmem:[#allocation34_spill] sm:$0xff] }
 0x558   : > { %7777 = vst [vmem:[#allocation2] sm:$0xff] %v7769_v9  ;;  %v7509_v31 = vmax.f32 %v7508_v41, %v4907_v4  ;;  %v6389_v2 = vmax.f32 %v6388_v0, %v4986_v45  ;;  %v4909_v48 = vpop.f32.mrb[117].mxu1 }
 0x559   : > { %7778 = vst [vmem:[#allocation2 + $0x8] sm:$0xff] %v7770_v36  ;;  %v7530_v7 = vmax.f32 %v7529_v59, %v4909_v48  ;;  %v4911_v16 = vpop.f32.mrb[118].mxu1  ;;  %5249 = vmatmul.mubr.bf16.gmra.mrb[240].mxu0 %v18410_v40 }
 0x55a   : > { %v7510_v49 = vmax.f32 %v7509_v31, %v4911_v16  ;;  %v4913_v8 = vpop.f32.mrb[119].mxu1  ;;  %5258 = vmatprep.mubr.bf16.mxu0 %v18388_v6 }
 0x55b   : > { %v7531_v25 = vmax.f32 %v7530_v7, %v4913_v8  ;;  %v18412_v8 = vld [vmem:[#allocation37_spill] sm:$0xff] }
 0x55c   : > { %v4990_v29 = vpop.f32.mrb[136].mxu0  ;;  %5882 = vmatmul.mubr.bf16.gmra.mrb[224].mxu1 %v18407_v1 }
 0x55d   : > { %v6369_v26 = vmax.f32 %v6368_v32, %v4990_v29  ;;  %v4992_v30 = vpop.f32.mrb[137].mxu0  ;;  %5891 = vmatprep.mubr.bf16.mxu1 %v18388_v6 }
 0x55e   : > { %v6390_v56 = vmax.f32 %v6389_v2, %v4992_v30  ;;  %v4994_v41 = vpop.f32.mrb[138].mxu0 }
 0x55f   : > { %v6370_v46 = vmax.f32 %v6369_v26, %v4994_v41  ;;  %v4917_v34 = vpop.f32.mrb[120].mxu1  ;;  %v4996_v47 = vpop.f32.mrb[139].mxu0 }
 0x560   : > { %v7511_v59 = vmax.f32 %v7510_v49, %v4917_v34  ;;  %v6391_v60 = vmax.f32 %v6390_v56, %v4996_v47  ;;  %v4919_v55 = vpop.f32.mrb[121].mxu1 }
 0x561   : > { %v7532_v20 = vmax.f32 %v7531_v25, %v4919_v55  ;;  %v4921_v5 = vpop.f32.mrb[122].mxu1  ;;  %5259 = vmatmul.mubr.bf16.gmra.mrb[244].mxu0 %v18411_v39 }
 0x562   : > { %v7512_v23 = vmax.f32 %v7511_v59, %v4921_v5  ;;  %v4923_v9 = vpop.f32.mrb[123].mxu1  ;;  %5268 = vmatprep.mubr.bf16.mxu0 %v18388_v6 }
 0x563   : > { %v7533_v1 = vmax.f32 %v7532_v20, %v4923_v9 }
 0x564   : > { %v5000_v24 = vpop.f32.mrb[140].mxu0  ;;  %5892 = vmatmul.mubr.bf16.gmra.mrb[228].mxu1 %v18408_v18 }
 0x565   : > { %v6371_v0 = vmax.f32 %v6370_v46, %v5000_v24  ;;  %v5002_v38 = vpop.f32.mrb[141].mxu0  ;;  %5901 = vmatprep.mubr.bf16.mxu1 %v18388_v6 }
 0x566   : > { %v6392_v36 = vmax.f32 %v6391_v60, %v5002_v38  ;;  %v5004_v32 = vpop.f32.mrb[142].mxu0 }
 0x567   : > { %v6372_v4 = vmax.f32 %v6371_v0, %v5004_v32  ;;  %v4927_v45 = vpop.f32.mrb[124].mxu1  ;;  %v5006_v31 = vpop.f32.mrb[143].mxu0  ;;  %v18413_v0 = vld [vmem:[#allocation36_spill] sm:$0xff] }
 0x568   : > { %v7513_v2 = vmax.f32 %v7512_v23, %v4927_v45  ;;  %v6393_v48 = vmax.f32 %v6392_v36, %v5006_v31  ;;  %v4929_v7 = vpop.f32.mrb[125].mxu1 }
 0x569   : > { %v7534_v16 = vmax.f32 %v7533_v1, %v4929_v7  ;;  %v4931_v49 = vpop.f32.mrb[126].mxu1  ;;  %5269 = vmatmul.mubr.bf16.gmra.mrb[248].mxu0 %v18412_v8 }
 0x56a   : > { %v7514_v25 = vmax.f32 %v7513_v2, %v4931_v49  ;;  %v4933_v29 = vpop.f32.mrb[127].mxu1  ;;  %5278 = vmatprep.mubr.bf16.mxu0 %v18388_v6 }
 0x56b   : > { %v7535_v18 = vmax.f32 %v7534_v16, %v4933_v29 }
 0x56c   : > { %v7515_v26 = vrot.slane %v7514_v25, 4  ;;  %v5010_v30 = vpop.f32.mrb[144].mxu0  ;;  %5902 = vmatmul.mubr.bf16.gmra.mrb[232].mxu1 %v15820_v3 }
 0x56d   : > { %v7536_v56 = vrot.slane %v7535_v18, 4  ;;  %v6373_v41 = vmax.f32 %v6372_v4, %v5010_v30  ;;  %v5012_v46 = vpop.f32.mrb[145].mxu0  ;;  %5911 = vmatprep.mubr.bf16.mxu1 %v18388_v6  ;;  %v7629_v30 = vld [vmem:[#allocation2 + $0x18] sm:$0xff] }
 0x56e   : > { %v7516_v34 = vmax.f32 %v7514_v25, %v7515_v26  ;;  %v6394_v47 = vmax.f32 %v6393_v48, %v5012_v46  ;;  %v5014_v59 = vpop.f32.mrb[146].mxu0  ;;  %v7628_v25 = vld [vmem:[#allocation2 + $0x10] sm:$0xff] }
 0x56f   : > { %v7537_v60 = vmax.f32 %v7535_v18, %v7536_v56  ;;  %v6374_v55 = vmax.f32 %v6373_v41, %v5014_v59  ;;  %v5016_v20 = vpop.f32.mrb[147].mxu0  ;;  %v5643_v5 = vpop.f32.mrb[128].mxu1 }
 0x570   : > { %v7517_v23 = vrot.slane %v7516_v34, 2  ;;  %v6395_v9 = vmax.f32 %v6394_v47, %v5016_v20  ;;  %v5645_v1 = vpop.f32.mrb[129].mxu1 }
 0x571   : > { %v7538_v24 = vrot.slane %v7537_v60, 2  ;;  %5279 = vmatmul.mubr.bf16.gmra.mrb[252].mxu0 %v18413_v0  ;;  %v5647_v38 = vpop.f32.mrb[130].mxu1 }
 0x572   : > { %v7518_v3 = vmax.f32 %v7516_v34, %v7517_v23  ;;  %v6408_v36 = vmax.f32 %v5643_v5, %v5647_v38  ;;  %v5649_v32 = vpop.f32.mrb[131].mxu1  ;;  %5288 = vmatprep.mubr.bf16.mxu0 %v18388_v6  ;;  %v18414_v5 = vld [vmem:[#allocation38_spill] sm:$0xff] }
 0x573   : > { %v7539_v4 = vmax.f32 %v7537_v60, %v7538_v24  ;;  %v6429_v45 = vmax.f32 %v5645_v1, %v5649_v32 }
 0x574   : > { %v7519_v31 = vrot.slane %v7518_v3, 1  ;;  %v5020_v2 = vpop.f32.mrb[148].mxu0  ;;  %5912 = vmatmul.mubr.bf16.gmra.mrb[236].mxu1 %v18409_v19 }
 0x575   : > { %v7540_v48 = vrot.slane %v7539_v4, 1  ;;  %v6375_v7 = vmax.f32 %v6374_v55, %v5020_v2  ;;  %v5022_v16 = vpop.f32.mrb[149].mxu0  ;;  %5921 = vmatprep.mubr.bf16.mxu1 %v18388_v6 }
 0x576   : > { %v7520_v49 = vmax.f32 %v7518_v3, %v7519_v31  ;;  %v6396_v29 = vmax.f32 %v6395_v9, %v5022_v16  ;;  %v5024_v18 = vpop.f32.mrb[150].mxu0 }
 0x577   : > { %v7541_v26 = vmax.f32 %v7539_v4, %v7540_v48  ;;  %v6376_v56 = vmax.f32 %v6375_v7, %v5024_v18  ;;  %v5026_v41 = vpop.f32.mrb[151].mxu0  ;;  %v5653_v46 = vpop.f32.mrb[132].mxu1 }
 0x578   : > { %v7725_v34 = vsel %vm7710_vm10, %v7520_v49, %v16433_v17  ;;  %v6397_v47 = vmax.f32 %v6396_v29, %v5026_v41  ;;  %v6409_v59 = vmax.f32 %v6408_v36, %v5653_v46  ;;  %v5655_v19 = vpop.f32.mrb[133].mxu1 }
 0x579   : > { %v7771_v60 = vmax.f32 %v7628_v25, %v7725_v34  ;;  %v7732_v55 = vsel %vm7710_vm10, %v7541_v26, %v16437_v61  ;;  %v6430_v20 = vmax.f32 %v6429_v45, %v5655_v19  ;;  %5289 = vmatmul.mubr.bf16.gmra.mrb[0].mxu0 %v18414_v5  ;;  %v5657_v23 = vpop.f32.mrb[134].mxu1 }
 0x57a   : > { %v7772_v9 = vmax.f32 %v7629_v30, %v7732_v55  ;;  %v6410_v1 = vmax.f32 %v6409_v59, %v5657_v23  ;;  %v5659_v24 = vpop.f32.mrb[135].mxu1  ;;  %5298 = vmatprep.mubr.bf16.mxu0 %v18388_v6 }
 0x57b   : > { %7779 = vst [vmem:[#allocation2 + $0x10] sm:$0xff] %v7771_v60  ;;  %v6431_v38 = vmax.f32 %v6430_v20, %v5659_v24  ;;  %v18415_v20 = vld [vmem:[#allocation40_spill] sm:$0xff] }
 0x57c   : > { %7780 = vst [vmem:[#allocation2 + $0x18] sm:$0xff] %v7772_v9  ;;  %v5030_v17 = vpop.f32.mrb[152].mxu0  ;;  %5922 = vmatmul.mubr.bf16.gmra.mrb[240].mxu1 %v18410_v40 }
 0x57d   : > { %v6377_v3 = vmax.f32 %v6376_v56, %v5030_v17  ;;  %v5032_v36 = vpop.f32.mrb[153].mxu0  ;;  %5931 = vmatprep.mubr.bf16.mxu1 %v18388_v6 }
 0x57e   : > { %v6398_v61 = vmax.f32 %v6397_v47, %v5032_v36  ;;  %v5034_v32 = vpop.f32.mrb[154].mxu0 }
 0x57f   : > { %v6378_v4 = vmax.f32 %v6377_v3, %v5034_v32  ;;  %v5036_v45 = vpop.f32.mrb[155].mxu0  ;;  %v5663_v31 = vpop.f32.mrb[136].mxu1 }
 0x580   : > { %v6399_v2 = vmax.f32 %v6398_v61, %v5036_v45  ;;  %v6411_v48 = vmax.f32 %v6410_v1, %v5663_v31  ;;  %v5665_v7 = vpop.f32.mrb[137].mxu1 }
 0x581   : > { %v6432_v16 = vmax.f32 %v6431_v38, %v5665_v7  ;;  %5299 = vmatmul.mubr.bf16.gmra.mrb[4].mxu0 %v15866_v42  ;;  %v5667_v49 = vpop.f32.mrb[138].mxu1 }
 0x582   : > { %v6412_v25 = vmax.f32 %v6411_v48, %v5667_v49  ;;  %v5669_v29 = vpop.f32.mrb[139].mxu1  ;;  %5308 = vmatprep.mubr.bf16.mxu0 %v18388_v6 }
 0x583   : > { %v6433_v40 = vmax.f32 %v6432_v16, %v5669_v29 }
 0x584   : > { %v5040_v18 = vpop.f32.mrb[156].mxu0  ;;  %5932 = vmatmul.mubr.bf16.gmra.mrb[244].mxu1 %v18411_v39 }
 0x585   : > { %v6379_v26 = vmax.f32 %v6378_v4, %v5040_v18  ;;  %v5042_v30 = vpop.f32.mrb[157].mxu0  ;;  %5941 = vmatprep.mubr.bf16.mxu1 %v18388_v6 }
 0x586   : > { %v6400_v56 = vmax.f32 %v6399_v2, %v5042_v30  ;;  %v5044_v41 = vpop.f32.mrb[158].mxu0  ;;  %v18416_v2 = vld [vmem:[#allocation39_spill] sm:$0xff] }
 0x587   : > { %v16487_v46 = vmax.f32 %v6379_v26, %v5044_v41  ;;  %v5046_v34 = vpop.f32.mrb[159].mxu0  ;;  %v5673_v47 = vpop.f32.mrb[140].mxu1 }
 0x588   : > { %v16489_v59 = vmax.f32 %v6400_v56, %v5046_v34  ;;  %v6413_v19 = vmax.f32 %v6412_v25, %v5673_v47  ;;  %v5675_v60 = vpop.f32.mrb[141].mxu1 }
 0x589   : > { %v6434_v55 = vmax.f32 %v6433_v40, %v5675_v60  ;;  %5309 = vmatmul.mubr.bf16.gmra.mrb[8].mxu0 %v18415_v20  ;;  %v5677_v23 = vpop.f32.mrb[142].mxu1  ;;  %v18417_v60 = vld [vmem:[#allocation42_spill] sm:$0xff] }
 0x58a   : > { %v6414_v9 = vmax.f32 %v6413_v19, %v5677_v23  ;;  %v5679_v39 = vpop.f32.mrb[143].mxu1  ;;  %5318 = vmatprep.mubr.bf16.mxu0 %v18388_v6 }
 0x58b   : > { %v6435_v1 = vmax.f32 %v6434_v55, %v5679_v39 }
 0x58c   : > { %v5050_v24 = vpop.f32.mrb[160].mxu0  ;;  %5942 = vmatmul.mubr.bf16.gmra.mrb[248].mxu1 %v18412_v8 }
 0x58d   : > { %v5052_v38 = vpop.f32.mrb[161].mxu0  ;;  %5951 = vmatprep.mubr.bf16.mxu1 %v18388_v6 }
 0x58e   : > { %v5054_v17 = vpop.f32.mrb[162].mxu0 }
 0x58f   : > { %v6534_v3 = vmax.f32 %v5050_v24, %v5054_v17  ;;  %v5056_v36 = vpop.f32.mrb[163].mxu0  ;;  %v5683_v61 = vpop.f32.mrb[144].mxu1 }
 0x590   : > { %v6555_v32 = vmax.f32 %v5052_v38, %v5056_v36  ;;  %v6415_v4 = vmax.f32 %v6414_v9, %v5683_v61  ;;  %v5685_v45 = vpop.f32.mrb[145].mxu1 }
 0x591   : > { %v6436_v31 = vmax.f32 %v6435_v1, %v5685_v45  ;;  %5319 = vmatmul.mubr.bf16.gmra.mrb[12].mxu0 %v18416_v2  ;;  %v5687_v48 = vpop.f32.mrb[146].mxu1 }
 0x592   : > { %v6416_v7 = vmax.f32 %v6415_v4, %v5687_v48  ;;  %v5689_v16 = vpop.f32.mrb[147].mxu1  ;;  %5328 = vmatprep.mubr.bf16.mxu0 %v18388_v6  ;;  %v18418_v48 = vld [vmem:[#allocation41_spill] sm:$0xff] }
 0x593   : > { %v6437_v49 = vmax.f32 %v6436_v31, %v5689_v16 }
 0x594   : > { %v5060_v8 = vpop.f32.mrb[164].mxu0  ;;  %5952 = vmatmul.mubr.bf16.gmra.mrb[252].mxu1 %v18413_v0 }
 0x595   : > { %v6535_v25 = vmax.f32 %v6534_v3, %v5060_v8  ;;  %v5062_v29 = vpop.f32.mrb[165].mxu0  ;;  %5961 = vmatprep.mubr.bf16.mxu1 %v18388_v6 }
 0x596   : > { %v6556_v40 = vmax.f32 %v6555_v32, %v5062_v29  ;;  %v5064_v18 = vpop.f32.mrb[166].mxu0 }
 0x597   : > { %v6536_v26 = vmax.f32 %v6535_v25, %v5064_v18  ;;  %v5066_v30 = vpop.f32.mrb[167].mxu0  ;;  %v5693_v56 = vpop.f32.mrb[148].mxu1 }
 0x598   : > { %v6557_v41 = vmax.f32 %v6556_v40, %v5066_v30  ;;  %v6417_v34 = vmax.f32 %v6416_v7, %v5693_v56  ;;  %v5695_v47 = vpop.f32.mrb[149].mxu1 }
 0x599   : > { %v6438_v19 = vmax.f32 %v6437_v49, %v5695_v47  ;;  %5329 = vmatmul.mubr.bf16.gmra.mrb[16].mxu0 %v18417_v60  ;;  %v5697_v55 = vpop.f32.mrb[150].mxu1 }
 0x59a   : > { %v6418_v23 = vmax.f32 %v6417_v34, %v5697_v55  ;;  %v5699_v9 = vpop.f32.mrb[151].mxu1  ;;  %5338 = vmatprep.mubr.bf16.mxu0 %v18388_v6  ;;  %v18419_v55 = vld [vmem:[#allocation43_spill] sm:$0xff] }
 0x59b   : > { %v6439_v0 = vmax.f32 %v6438_v19, %v5699_v9 }
 0x59c   : > { %v5070_v39 = vpop.f32.mrb[168].mxu0  ;;  %5962 = vmatmul.mubr.bf16.gmra.mrb[0].mxu1 %v18414_v5 }
 0x59d   : > { %v6537_v1 = vmax.f32 %v6536_v26, %v5070_v39  ;;  %v5072_v24 = vpop.f32.mrb[169].mxu0  ;;  %5971 = vmatprep.mubr.bf16.mxu1 %v18388_v6 }
 0x59e   : > { %v6558_v38 = vmax.f32 %v6557_v41, %v5072_v24  ;;  %v5074_v17 = vpop.f32.mrb[170].mxu0 }
 0x59f   : > { %v6538_v3 = vmax.f32 %v6537_v1, %v5074_v17  ;;  %v5076_v36 = vpop.f32.mrb[171].mxu0  ;;  %v5703_v61 = vpop.f32.mrb[152].mxu1 }
 0x5a0   : > { %v6559_v32 = vmax.f32 %v6558_v38, %v5076_v36  ;;  %v6419_v4 = vmax.f32 %v6418_v23, %v5703_v61  ;;  %v5705_v45 = vpop.f32.mrb[153].mxu1 }
 0x5a1   : > { %v6440_v31 = vmax.f32 %v6439_v0, %v5705_v45  ;;  %5339 = vmatmul.mubr.bf16.gmra.mrb[20].mxu0 %v18418_v48  ;;  %v5707_v7 = vpop.f32.mrb[154].mxu1 }
 0x5a2   : > { %v6420_v16 = vmax.f32 %v6419_v4, %v5707_v7  ;;  %v5709_v49 = vpop.f32.mrb[155].mxu1  ;;  %5348 = vmatprep.mubr.bf16.mxu0 %v18388_v6 }
 0x5a3   : > { %v6441_v5 = vmax.f32 %v6440_v31, %v5709_v49 }
 0x5a4   : > { %v5080_v8 = vpop.f32.mrb[172].mxu0  ;;  %5972 = vmatmul.mubr.bf16.gmra.mrb[4].mxu1 %v15866_v42 }
 0x5a5   : > { %v6539_v25 = vmax.f32 %v6538_v3, %v5080_v8  ;;  %v5082_v29 = vpop.f32.mrb[173].mxu0  ;;  %5981 = vmatprep.mubr.bf16.mxu1 %v18388_v6 }
 0x5a6   : > { %v6560_v40 = vmax.f32 %v6559_v32, %v5082_v29  ;;  %v5084_v18 = vpop.f32.mrb[174].mxu0 }
 0x5a7   : > { %v6540_v26 = vmax.f32 %v6539_v25, %v5084_v18  ;;  %v5086_v30 = vpop.f32.mrb[175].mxu0  ;;  %v5713_v56 = vpop.f32.mrb[156].mxu1 }
 0x5a8   : > { %v6561_v41 = vmax.f32 %v6560_v40, %v5086_v30  ;;  %v6421_v34 = vmax.f32 %v6420_v16, %v5713_v56  ;;  %v5715_v47 = vpop.f32.mrb[157].mxu1 }
 0x5a9   : > { %v6442_v19 = vmax.f32 %v6441_v5, %v5715_v47  ;;  %5349 = vmatmul.mubr.bf16.gmra.mrb[24].mxu0 %v18419_v55  ;;  %v5717_v23 = vpop.f32.mrb[158].mxu1 }
 0x5aa   : > { %v16508_v9 = vmax.f32 %v6421_v34, %v5717_v23  ;;  %v5719_v0 = vpop.f32.mrb[159].mxu1  ;;  %5358 = vmatprep.mubr.bf16.mxu0 %v18388_v6 }
 0x5ab   : > { %v16511_v42 = vmax.f32 %v6442_v19, %v5719_v0 }
 0x5ac   : > { %v5090_v39 = vpop.f32.mrb[176].mxu0  ;;  %5982 = vmatmul.mubr.bf16.gmra.mrb[8].mxu1 %v18415_v20 }
 0x5ad   : > { %v6541_v1 = vmax.f32 %v6540_v26, %v5090_v39  ;;  %v5092_v24 = vpop.f32.mrb[177].mxu0  ;;  %5991 = vmatprep.mubr.bf16.mxu1 %v18388_v6 }
 0x5ae   : > { %v6562_v38 = vmax.f32 %v6561_v41, %v5092_v24  ;;  %v5094_v17 = vpop.f32.mrb[178].mxu0 }
 0x5af   : > { %v6542_v3 = vmax.f32 %v6541_v1, %v5094_v17  ;;  %v5096_v36 = vpop.f32.mrb[179].mxu0  ;;  %v5723_v61 = vpop.f32.mrb[160].mxu1 }
 0x5b0   : > { %v6563_v32 = vmax.f32 %v6562_v38, %v5096_v36  ;;  %v5725_v4 = vpop.f32.mrb[161].mxu1  ;;  %v6381_v38 = vrot.slane %v16487_v46, 4 }
 0x5b1   : > { %5359 = vmatmul.mubr.bf16.gmra.mrb[28].mxu0 %v15902_v62  ;;  %v5727_v45 = vpop.f32.mrb[162].mxu1 }
 0x5b2   : > { %v6576_v31 = vmax.f32 %v5723_v61, %v5727_v45  ;;  %v5729_v7 = vpop.f32.mrb[163].mxu1  ;;  %5368 = vmatprep.mubr.bf16.mxu0 %v18388_v6  ;;  %v6402_v61 = vrot.slane %v16489_v59, 4 }
 0x5b3   : > { %v6597_v16 = vmax.f32 %v5725_v4, %v5729_v7 }
 0x5b4   : > { %v5100_v20 = vpop.f32.mrb[180].mxu0  ;;  %5992 = vmatmul.mubr.bf16.gmra.mrb[12].mxu1 %v18416_v2 }
 0x5b5   : > { %v6543_v49 = vmax.f32 %v6542_v3, %v5100_v20  ;;  %v5102_v5 = vpop.f32.mrb[181].mxu0  ;;  %6001 = vmatprep.mubr.bf16.mxu1 %v18388_v6  ;;  %v6382_v20 = vmax.f32 %v16487_v46, %v6381_v38 }
 0x5b6   : > { %v6564_v8 = vmax.f32 %v6563_v32, %v5102_v5  ;;  %v5104_v25 = vpop.f32.mrb[182].mxu0  ;;  %v6403_v5 = vmax.f32 %v16489_v59, %v6402_v61  ;;  %v18420_v59 = vld [vmem:[#allocation44_spill] sm:$0xff] }
 0x5b7   : > { %v6544_v29 = vmax.f32 %v6543_v49, %v5104_v25  ;;  %v5106_v40 = vpop.f32.mrb[183].mxu0  ;;  %v5733_v18 = vpop.f32.mrb[164].mxu1 }
 0x5b8   : > { %v6565_v26 = vmax.f32 %v6564_v8, %v5106_v40  ;;  %v6577_v30 = vmax.f32 %v6576_v31, %v5733_v18  ;;  %v5735_v56 = vpop.f32.mrb[165].mxu1 }
 0x5b9   : > { %v6598_v41 = vmax.f32 %v6597_v16, %v5735_v56  ;;  %5369 = vmatmul.mubr.bf16.gmra.mrb[32].mxu0 %v15916_v44  ;;  %v5737_v34 = vpop.f32.mrb[166].mxu1 }
 0x5ba   : > { %v6578_v47 = vmax.f32 %v6577_v30, %v5737_v34  ;;  %v5739_v19 = vpop.f32.mrb[167].mxu1  ;;  %5378 = vmatprep.mubr.bf16.mxu0 %v18388_v6  ;;  %v6404_v34 = vrot.slane %v6403_v5, 2 }
 0x5bb   : > { %v6599_v2 = vmax.f32 %v6598_v41, %v5739_v19 }
 0x5bc   : > { %v5110_v23 = vpop.f32.mrb[184].mxu0  ;;  %6002 = vmatmul.mubr.bf16.gmra.mrb[16].mxu1 %v18417_v60 }
 0x5bd   : > { %v6545_v0 = vmax.f32 %v6544_v29, %v5110_v23  ;;  %v5112_v39 = vpop.f32.mrb[185].mxu0  ;;  %6011 = vmatprep.mubr.bf16.mxu1 %v18388_v6 }
 0x5be   : > { %v6566_v1 = vmax.f32 %v6565_v26, %v5112_v39  ;;  %v5114_v24 = vpop.f32.mrb[186].mxu0  ;;  %v6383_v26 = vrot.slane %v6382_v20, 2 }
 0x5bf   : > { %v6546_v17 = vmax.f32 %v6545_v0, %v5114_v24  ;;  %v5116_v3 = vpop.f32.mrb[187].mxu0  ;;  %v5743_v36 = vpop.f32.mrb[168].mxu1 }
 0x5c0   : > { %v6567_v32 = vmax.f32 %v6566_v1, %v5116_v3  ;;  %v6579_v4 = vmax.f32 %v6578_v47, %v5743_v36  ;;  %v5745_v45 = vpop.f32.mrb[169].mxu1  ;;  %v6384_v24 = vmax.f32 %v6382_v20, %v6383_v26  ;;  %v6405_v3 = vmax.f32 %v6403_v5, %v6404_v34 }
 0x5c1   : > { %v6600_v31 = vmax.f32 %v6599_v2, %v5745_v45  ;;  %5379 = vmatmul.mubr.bf16.gmra.mrb[36].mxu0 %v15914_v43  ;;  %v5747_v60 = vpop.f32.mrb[170].mxu1 }
 0x5c2   : > { %v6580_v7 = vmax.f32 %v6579_v4, %v5747_v60  ;;  %v5749_v16 = vpop.f32.mrb[171].mxu1  ;;  %5388 = vmatprep.mubr.bf16.mxu0 %v18388_v6  ;;  %v6385_v60 = vrot.slane %v6384_v24, 1 }
 0x5c3   : > { %v6601_v49 = vmax.f32 %v6600_v31, %v5749_v16 }
 0x5c4   : > { %v5120_v8 = vpop.f32.mrb[188].mxu0  ;;  %6012 = vmatmul.mubr.bf16.gmra.mrb[20].mxu1 %v18418_v48  ;;  %v6386_v34 = vmax.f32 %v6384_v24, %v6385_v60 }
 0x5c5   : > { %v6547_v25 = vmax.f32 %v6546_v17, %v5120_v8  ;;  %v5122_v29 = vpop.f32.mrb[189].mxu0  ;;  %6021 = vmatprep.mubr.bf16.mxu1 %v18388_v6 }
 0x5c6   : > { %v6568_v40 = vmax.f32 %v6567_v32, %v5122_v29  ;;  %v5124_v18 = vpop.f32.mrb[190].mxu0 }
 0x5c7   : > { %v6548_v30 = vmax.f32 %v6547_v25, %v5124_v18  ;;  %v5126_v56 = vpop.f32.mrb[191].mxu0  ;;  %v5753_v41 = vpop.f32.mrb[172].mxu1  ;;  %v6406_v25 = vrot.slane %v6405_v3, 1 }
 0x5c8   : > { %v6569_v47 = vmax.f32 %v6568_v40, %v5126_v56  ;;  %v6581_v19 = vmax.f32 %v6580_v7, %v5753_v41  ;;  %v5755_v46 = vpop.f32.mrb[173].mxu1 }
 0x5c9   : > { %v6549_v2 = vrot.slane %v6548_v30, 4  ;;  %v6602_v23 = vmax.f32 %v6601_v49, %v5755_v46  ;;  %5389 = vmatmul.mubr.bf16.gmra.mrb[40].mxu0 %v18420_v59  ;;  %v5757_v0 = vpop.f32.mrb[174].mxu1  ;;  %v6407_v46 = vmax.f32 %v6405_v3, %v6406_v25 }
 0x5ca   : > { %v6570_v48 = vrot.slane %v6569_v47, 4  ;;  %v6582_v39 = vmax.f32 %v6581_v19, %v5757_v0  ;;  %v5759_v1 = vpop.f32.mrb[175].mxu1  ;;  %5398 = vmatprep.mubr.bf16.mxu0 %v18388_v6 }
 0x5cb   : > { %v6550_v38 = vmax.f32 %v6548_v30, %v6549_v2  ;;  %v6603_v17 = vmax.f32 %v6602_v23, %v5759_v1 }
 0x5cc   : > { %v6571_v36 = vmax.f32 %v6569_v47, %v6570_v48  ;;  %v5130_v61 = vpop.f32.mrb[192].mxu0  ;;  %6022 = vmatmul.mubr.bf16.gmra.mrb[24].mxu1 %v18419_v55 }
 0x5cd   : > { %v6551_v32 = vrot.slane %v6550_v38, 2  ;;  %v5132_v4 = vpop.f32.mrb[193].mxu0  ;;  %6031 = vmatprep.mubr.bf16.mxu1 %v18388_v6 }
 0x5ce   : > { %v6572_v45 = vrot.slane %v6571_v36, 2  ;;  %v5134_v31 = vpop.f32.mrb[194].mxu0 }
 0x5cf   : > { %v6552_v7 = vmax.f32 %v6550_v38, %v6551_v32  ;;  %v6702_v16 = vmax.f32 %v5130_v61, %v5134_v31  ;;  %v5136_v49 = vpop.f32.mrb[195].mxu0  ;;  %v5763_v8 = vpop.f32.mrb[176].mxu1 }
 0x5d0   : > { %v6573_v20 = vmax.f32 %v6571_v36, %v6572_v45  ;;  %v6723_v29 = vmax.f32 %v5132_v4, %v5136_v49  ;;  %v6583_v40 = vmax.f32 %v6582_v39, %v5763_v8  ;;  %v5765_v5 = vpop.f32.mrb[177].mxu1 }
 0x5d1   : > { %v6553_v18 = vrot.slane %v6552_v7, 1  ;;  %v6604_v26 = vmax.f32 %v6603_v17, %v5765_v5  ;;  %5399 = vmatmul.mubr.bf16.gmra.mrb[44].mxu0 %v15938_v52  ;;  %v5767_v55 = vpop.f32.mrb[178].mxu1 }
 0x5d2   : > { %v6574_v30 = vrot.slane %v6573_v20, 1  ;;  %v6584_v56 = vmax.f32 %v6583_v40, %v5767_v55  ;;  %v5769_v41 = vpop.f32.mrb[179].mxu1  ;;  %5408 = vmatprep.mubr.bf16.mxu0 %v18388_v6 }
 0x5d3   : > { %v6554_v47 = vmax.f32 %v6552_v7, %v6553_v18  ;;  %v6605_v19 = vmax.f32 %v6604_v26, %v5769_v41  ;;  %v6423_v41 = vrot.slane %v16508_v9, 4 }
 0x5d4   : > { %v6575_v2 = vmax.f32 %v6573_v20, %v6574_v30  ;;  %v5140_v23 = vpop.f32.mrb[196].mxu0  ;;  %6032 = vmatmul.mubr.bf16.gmra.mrb[28].mxu1 %v15902_v62 }
 0x5d5   : > { %v16539_v0 = vsel %vm7698_vm4, %v6554_v47, %v6386_v34  ;;  %v6703_v48 = vmax.f32 %v6702_v16, %v5140_v23  ;;  %v5142_v39 = vpop.f32.mrb[197].mxu0  ;;  %6041 = vmatprep.mubr.bf16.mxu1 %v18388_v6  ;;  %v6444_v47 = vrot.slane %v16511_v42, 4 }
 0x5d6   : > { %v16543_v1 = vsel %vm7698_vm4, %v6575_v2, %v6407_v46  ;;  %v6724_v38 = vmax.f32 %v6723_v29, %v5142_v39  ;;  %v5144_v17 = vpop.f32.mrb[198].mxu0 }
 0x5d7   : > { %v6704_v24 = vmax.f32 %v6703_v48, %v5144_v17  ;;  %v5146_v36 = vpop.f32.mrb[199].mxu0  ;;  %v5773_v61 = vpop.f32.mrb[180].mxu1  ;;  %v6424_v48 = vmax.f32 %v16508_v9, %v6423_v41  ;;  %v6445_v17 = vmax.f32 %v16511_v42, %v6444_v47 }
 0x5d8   : > { %v6725_v3 = vmax.f32 %v6724_v38, %v5146_v36  ;;  %v6585_v32 = vmax.f32 %v6584_v56, %v5773_v61  ;;  %v5775_v4 = vpop.f32.mrb[181].mxu1 }
 0x5d9   : > { %v6606_v45 = vmax.f32 %v6605_v19, %v5775_v4  ;;  %5409 = vmatmul.mubr.bf16.gmra.mrb[48].mxu0 %v15957_v28  ;;  %v5777_v62 = vpop.f32.mrb[182].mxu1  ;;  %v6446_v9 = vrot.slane %v6445_v17, 2 }
 0x5da   : > { %v6586_v31 = vmax.f32 %v6585_v32, %v5777_v62  ;;  %v5779_v60 = vpop.f32.mrb[183].mxu1  ;;  %5418 = vmatprep.mubr.bf16.mxu0 %v18388_v6  ;;  %v6425_v62 = vrot.slane %v6424_v48, 2 }
 0x5db   : > { %v6607_v7 = vmax.f32 %v6606_v45, %v5779_v60 }
 0x5dc   : > { %v5150_v16 = vpop.f32.mrb[200].mxu0  ;;  %6042 = vmatmul.mubr.bf16.gmra.mrb[32].mxu1 %v15916_v44 }
 0x5dd   : > { %v6705_v49 = vmax.f32 %v6704_v24, %v5150_v16  ;;  %v5152_v8 = vpop.f32.mrb[201].mxu0  ;;  %6051 = vmatprep.mubr.bf16.mxu1 %v18388_v6 }
 0x5de   : > { %v6726_v25 = vmax.f32 %v6725_v3, %v5152_v8  ;;  %v5154_v20 = vpop.f32.mrb[202].mxu0 }
 0x5df   : > { %v6706_v29 = vmax.f32 %v6705_v49, %v5154_v20  ;;  %v5156_v40 = vpop.f32.mrb[203].mxu0  ;;  %v5783_v5 = vpop.f32.mrb[184].mxu1  ;;  %v6426_v20 = vmax.f32 %v6424_v48, %v6425_v62 }
 0x5e0   : > { %v6727_v18 = vmax.f32 %v6726_v25, %v5156_v40  ;;  %v6587_v26 = vmax.f32 %v6586_v31, %v5783_v5  ;;  %v5785_v55 = vpop.f32.mrb[185].mxu1 }
 0x5e1   : > { %v6608_v30 = vmax.f32 %v6607_v7, %v5785_v55  ;;  %5419 = vmatmul.mubr.bf16.gmra.mrb[52].mxu0 %v15955_v27  ;;  %v5787_v56 = vpop.f32.mrb[186].mxu1 }
 0x5e2   : > { %v6588_v34 = vmax.f32 %v6587_v26, %v5787_v56  ;;  %v5789_v44 = vpop.f32.mrb[187].mxu1  ;;  %5428 = vmatprep.mubr.bf16.mxu0 %v18388_v6 }
 0x5e3   : > { %v6609_v19 = vmax.f32 %v6608_v30, %v5789_v44 }
 0x5e4   : > { %v5160_v46 = vpop.f32.mrb[204].mxu0  ;;  %6052 = vmatmul.mubr.bf16.gmra.mrb[36].mxu1 %v15914_v43 }
 0x5e5   : > { %v6707_v2 = vmax.f32 %v6706_v29, %v5160_v46  ;;  %v5162_v23 = vpop.f32.mrb[205].mxu0  ;;  %6061 = vmatprep.mubr.bf16.mxu1 %v18388_v6 }
 0x5e6   : > { %v6728_v39 = vmax.f32 %v6727_v18, %v5162_v23  ;;  %v5164_v38 = vpop.f32.mrb[206].mxu0  ;;  %v6447_v18 = vmax.f32 %v6445_v17, %v6446_v9 }
 0x5e7   : > { %v6708_v24 = vmax.f32 %v6707_v2, %v5164_v38  ;;  %v5166_v36 = vpop.f32.mrb[207].mxu0  ;;  %v5793_v61 = vpop.f32.mrb[188].mxu1 }
 0x5e8   : > { %v6729_v3 = vmax.f32 %v6728_v39, %v5166_v36  ;;  %v6589_v32 = vmax.f32 %v6588_v34, %v5793_v61  ;;  %v5795_v4 = vpop.f32.mrb[189].mxu1  ;;  %v6448_v48 = vrot.slane %v6447_v18, 1 }
 0x5e9   : > { %v6610_v45 = vmax.f32 %v6609_v19, %v5795_v4  ;;  %5429 = vmatmul.mubr.bf16.gmra.mrb[56].mxu0 %v15969_v22  ;;  %v5797_v43 = vpop.f32.mrb[190].mxu1  ;;  %v6427_v19 = vrot.slane %v6426_v20, 1 }
 0x5ea   : > { %v6590_v31 = vmax.f32 %v6589_v32, %v5797_v43  ;;  %v5799_v60 = vpop.f32.mrb[191].mxu1  ;;  %5438 = vmatprep.mubr.bf16.mxu0 %v18388_v6  ;;  %v6449_v62 = vmax.f32 %v6447_v18, %v6448_v48 }
 0x5eb   : > { %v6611_v7 = vmax.f32 %v6610_v45, %v5799_v60  ;;  %v6428_v32 = vmax.f32 %v6426_v20, %v6427_v19 }
 0x5ec   : > { %v6591_v16 = vrot.slane %v6590_v31, 4  ;;  %v5170_v49 = vpop.f32.mrb[208].mxu0  ;;  %6062 = vmatmul.mubr.bf16.gmra.mrb[40].mxu1 %v18420_v59 }
 0x5ed   : > { %v6612_v42 = vrot.slane %v6611_v7, 4  ;;  %v6709_v8 = vmax.f32 %v6708_v24, %v5170_v49  ;;  %v5172_v25 = vpop.f32.mrb[209].mxu0  ;;  %6071 = vmatprep.mubr.bf16.mxu1 %v18388_v6 }
 0x5ee   : > { %v6592_v29 = vmax.f32 %v6590_v31, %v6591_v16  ;;  %v6730_v40 = vmax.f32 %v6729_v3, %v5172_v25  ;;  %v5174_v5 = vpop.f32.mrb[210].mxu0 }
 0x5ef   : > { %v6613_v26 = vmax.f32 %v6611_v7, %v6612_v42  ;;  %v6710_v55 = vmax.f32 %v6709_v8, %v5174_v5  ;;  %v5176_v30 = vpop.f32.mrb[211].mxu0  ;;  %v5803_v56 = vpop.f32.mrb[192].mxu1 }
 0x5f0   : > { %v6593_v41 = vrot.slane %v6592_v29, 2  ;;  %v6731_v34 = vmax.f32 %v6730_v40, %v5176_v30  ;;  %v5805_v44 = vpop.f32.mrb[193].mxu1 }
 0x5f1   : > { %v6614_v47 = vrot.slane %v6613_v26, 2  ;;  %5439 = vmatmul.mubr.bf16.gmra.mrb[60].mxu0 %v15967_v14  ;;  %v5807_v59 = vpop.f32.mrb[194].mxu1 }
 0x5f2   : > { %v6594_v46 = vmax.f32 %v6592_v29, %v6593_v41  ;;  %v6744_v2 = vmax.f32 %v5803_v56, %v5807_v59  ;;  %v5809_v23 = vpop.f32.mrb[195].mxu1  ;;  %5448 = vmatprep.mubr.bf16.mxu0 %v18388_v6 }
 0x5f3   : > { %v6615_v39 = vmax.f32 %v6613_v26, %v6614_v47  ;;  %v6765_v38 = vmax.f32 %v5805_v44, %v5809_v23 }
 0x5f4   : > { %v6595_v17 = vrot.slane %v6594_v46, 1  ;;  %v5180_v24 = vpop.f32.mrb[212].mxu0  ;;  %6072 = vmatmul.mubr.bf16.gmra.mrb[44].mxu1 %v15938_v52 }
 0x5f5   : > { %v6616_v36 = vrot.slane %v6615_v39, 1  ;;  %v6711_v61 = vmax.f32 %v6710_v55, %v5180_v24  ;;  %v5182_v3 = vpop.f32.mrb[213].mxu0  ;;  %6081 = vmatprep.mubr.bf16.mxu1 %v18388_v6 }
 0x5f6   : > { %v6596_v4 = vmax.f32 %v6594_v46, %v6595_v17  ;;  %v6732_v45 = vmax.f32 %v6731_v34, %v5182_v3  ;;  %v5184_v43 = vpop.f32.mrb[214].mxu0 }
 0x5f7   : > { %v6617_v31 = vmax.f32 %v6615_v39, %v6616_v36  ;;  %v6712_v60 = vmax.f32 %v6711_v61, %v5184_v43  ;;  %v5186_v9 = vpop.f32.mrb[215].mxu0  ;;  %v5813_v7 = vpop.f32.mrb[196].mxu1 }
 0x5f8   : > { %v16566_v16 = vsel %vm7698_vm4, %v6596_v4, %v6428_v32  ;;  %v6733_v49 = vmax.f32 %v6732_v45, %v5186_v9  ;;  %v6745_v42 = vmax.f32 %v6744_v2, %v5813_v7  ;;  %v5815_v52 = vpop.f32.mrb[197].mxu1 }
 0x5f9   : > { %v16569_v8 = vsel %vm7698_vm4, %v6617_v31, %v6449_v62  ;;  %v6766_v25 = vmax.f32 %v6765_v38, %v5815_v52  ;;  %5449 = vmatmul.mubr.bf16.gmra.mrb[64].mxu0 %v15981_v13  ;;  %v5817_v20 = vpop.f32.mrb[198].mxu1 }
 0x5fa   : > { %v6746_v29 = vmax.f32 %v6745_v42, %v5817_v20  ;;  %v5819_v40 = vpop.f32.mrb[199].mxu1  ;;  %5458 = vmatprep.mubr.bf16.mxu0 %v18388_v6 }
 0x5fb   : > { %v6767_v5 = vmax.f32 %v6766_v25, %v5819_v40 }
 0x5fc   : > { %v5190_v18 = vpop.f32.mrb[216].mxu0  ;;  %6082 = vmatmul.mubr.bf16.gmra.mrb[48].mxu1 %v15957_v28 }
 0x5fd   : > { %v6713_v26 = vmax.f32 %v6712_v60, %v5190_v18  ;;  %v5192_v55 = vpop.f32.mrb[217].mxu0  ;;  %6091 = vmatprep.mubr.bf16.mxu1 %v18388_v6 }
 0x5fe   : > { %v6734_v30 = vmax.f32 %v6733_v49, %v5192_v55  ;;  %v5194_v56 = vpop.f32.mrb[218].mxu0 }
 0x5ff   : > { %v6714_v41 = vmax.f32 %v6713_v26, %v5194_v56  ;;  %v5196_v34 = vpop.f32.mrb[219].mxu0  ;;  %v5823_v44 = vpop.f32.mrb[200].mxu1 }
 0x600   : > { %v6735_v47 = vmax.f32 %v6734_v30, %v5196_v34  ;;  %v6747_v59 = vmax.f32 %v6746_v29, %v5823_v44  ;;  %v5825_v19 = vpop.f32.mrb[201].mxu1 }
 0x601   : > { %v6768_v46 = vmax.f32 %v6767_v5, %v5825_v19  ;;  %5459 = vmatmul.mubr.bf16.gmra.mrb[68].mxu0 %v15979_v12  ;;  %v5827_v2 = vpop.f32.mrb[202].mxu1 }
 0x602   : > { %v6748_v23 = vmax.f32 %v6747_v59, %v5827_v2  ;;  %v5829_v48 = vpop.f32.mrb[203].mxu1  ;;  %5468 = vmatprep.mubr.bf16.mxu0 %v18388_v6 }
 0x603   : > { %v6769_v28 = vmax.f32 %v6768_v46, %v5829_v48 }
 0x604   : > { %v5200_v39 = vpop.f32.mrb[220].mxu0  ;;  %6092 = vmatmul.mubr.bf16.gmra.mrb[52].mxu1 %v15955_v27 }
 0x605   : > { %v6715_v38 = vmax.f32 %v6714_v41, %v5200_v39  ;;  %v5202_v17 = vpop.f32.mrb[221].mxu0  ;;  %6101 = vmatprep.mubr.bf16.mxu1 %v18388_v6 }
 0x606   : > { %v6736_v24 = vmax.f32 %v6735_v47, %v5202_v17  ;;  %v5204_v36 = vpop.f32.mrb[222].mxu0 }
 0x607   : > { %v6716_v61 = vmax.f32 %v6715_v38, %v5204_v36  ;;  %v5206_v3 = vpop.f32.mrb[223].mxu0  ;;  %v5833_v32 = vpop.f32.mrb[204].mxu1 }
 0x608   : > { %v6737_v4 = vmax.f32 %v6736_v24, %v5206_v3  ;;  %v6749_v45 = vmax.f32 %v6748_v23, %v5833_v32  ;;  %v5835_v43 = vpop.f32.mrb[205].mxu1 }
 0x609   : > { %v6717_v62 = vrot.slane %v6716_v61, 4  ;;  %v6770_v31 = vmax.f32 %v6769_v28, %v5835_v43  ;;  %5469 = vmatmul.mubr.bf16.gmra.mrb[72].mxu0 %v15993_v11  ;;  %v5837_v60 = vpop.f32.mrb[206].mxu1 }
 0x60a   : > { %v6738_v9 = vrot.slane %v6737_v4, 4  ;;  %v6750_v7 = vmax.f32 %v6749_v45, %v5837_v60  ;;  %v5839_v27 = vpop.f32.mrb[207].mxu1  ;;  %5478 = vmatprep.mubr.bf16.mxu0 %v18388_v6 }
 0x60b   : > { %v6718_v49 = vmax.f32 %v6716_v61, %v6717_v62  ;;  %v6771_v42 = vmax.f32 %v6770_v31, %v5839_v27 }
 0x60c   : > { %v6739_v52 = vmax.f32 %v6737_v4, %v6738_v9  ;;  %v5210_v25 = vpop.f32.mrb[224].mxu0  ;;  %6102 = vmatmul.mubr.bf16.gmra.mrb[56].mxu1 %v15969_v22 }
 0x60d   : > { %v6719_v20 = vrot.slane %v6718_v49, 2  ;;  %v5212_v29 = vpop.f32.mrb[225].mxu0  ;;  %6111 = vmatprep.mubr.bf16.mxu1 %v18388_v6 }
 0x60e   : > { %v6740_v40 = vrot.slane %v6739_v52, 2  ;;  %v5214_v5 = vpop.f32.mrb[226].mxu0 }
 0x60f   : > { %v6720_v18 = vmax.f32 %v6718_v49, %v6719_v20  ;;  %v6870_v26 = vmax.f32 %v5210_v25, %v5214_v5  ;;  %v5216_v55 = vpop.f32.mrb[227].mxu0  ;;  %v5843_v30 = vpop.f32.mrb[208].mxu1 }
 0x610   : > { %v6741_v56 = vmax.f32 %v6739_v52, %v6740_v40  ;;  %v6891_v41 = vmax.f32 %v5212_v29, %v5216_v55  ;;  %v6751_v34 = vmax.f32 %v6750_v7, %v5843_v30  ;;  %v5845_v44 = vpop.f32.mrb[209].mxu1 }
 0x611   : > { %v6721_v47 = vrot.slane %v6720_v18, 1  ;;  %v6772_v59 = vmax.f32 %v6771_v42, %v5845_v44  ;;  %5479 = vmatmul.mubr.bf16.gmra.mrb[76].mxu0 %v15991_v54  ;;  %v5847_v19 = vpop.f32.mrb[210].mxu1 }
 0x612   : > { %v6742_v22 = vrot.slane %v6741_v56, 1  ;;  %v6752_v46 = vmax.f32 %v6751_v34, %v5847_v19  ;;  %v5849_v2 = vpop.f32.mrb[211].mxu1  ;;  %5488 = vmatprep.mubr.bf16.mxu0 %v18388_v6 }
 0x613   : > { %v6722_v23 = vmax.f32 %v6720_v18, %v6721_v47  ;;  %v6773_v48 = vmax.f32 %v6772_v59, %v5849_v2 }
 0x614   : > { %v6743_v28 = vmax.f32 %v6741_v56, %v6742_v22  ;;  %v5220_v39 = vpop.f32.mrb[228].mxu0  ;;  %6112 = vmatmul.mubr.bf16.gmra.mrb[60].mxu1 %v15967_v14 }
 0x615   : > { %v16588_v38 = vsel %vm7700_vm5, %v6722_v23, %v16539_v0  ;;  %v6871_v17 = vmax.f32 %v6870_v26, %v5220_v39  ;;  %v5222_v24 = vpop.f32.mrb[229].mxu0  ;;  %6121 = vmatprep.mubr.bf16.mxu1 %v18388_v6 }
 0x616   : > { %v16593_v36 = vsel %vm7700_vm5, %v6743_v28, %v16543_v1  ;;  %v6892_v61 = vmax.f32 %v6891_v41, %v5222_v24  ;;  %v5224_v3 = vpop.f32.mrb[230].mxu0 }
 0x617   : > { %v6872_v32 = vmax.f32 %v6871_v17, %v5224_v3  ;;  %v5226_v4 = vpop.f32.mrb[231].mxu0  ;;  %v5853_v45 = vpop.f32.mrb[212].mxu1 }
 0x618   : > { %v6893_v43 = vmax.f32 %v6892_v61, %v5226_v4  ;;  %v6753_v62 = vmax.f32 %v6752_v46, %v5853_v45  ;;  %v5855_v14 = vpop.f32.mrb[213].mxu1 }
 0x619   : > { %v6774_v31 = vmax.f32 %v6773_v48, %v5855_v14  ;;  %5489 = vmatmul.mubr.bf16.gmra.mrb[80].mxu0 %v16005_v58  ;;  %v5857_v0 = vpop.f32.mrb[214].mxu1 }
 0x61a   : > { %v6754_v60 = vmax.f32 %v6753_v62, %v5857_v0  ;;  %v5859_v9 = vpop.f32.mrb[215].mxu1  ;;  %5498 = vmatprep.mubr.bf16.mxu0 %v18388_v6 }
 0x61b   : > { %v6775_v7 = vmax.f32 %v6774_v31, %v5859_v9 }
 0x61c   : > { %v5230_v27 = vpop.f32.mrb[232].mxu0  ;;  %6122 = vmatmul.mubr.bf16.gmra.mrb[64].mxu1 %v15981_v13 }
 0x61d   : > { %v6873_v1 = vmax.f32 %v6872_v32, %v5230_v27  ;;  %v5232_v49 = vpop.f32.mrb[233].mxu0  ;;  %6131 = vmatprep.mubr.bf16.mxu1 %v18388_v6 }
 0x61e   : > { %v6894_v42 = vmax.f32 %v6893_v43, %v5232_v49  ;;  %v5234_v52 = vpop.f32.mrb[234].mxu0 }
 0x61f   : > { %v6874_v25 = vmax.f32 %v6873_v1, %v5234_v52  ;;  %v5236_v20 = vpop.f32.mrb[235].mxu0  ;;  %v5863_v29 = vpop.f32.mrb[216].mxu1 }
 0x620   : > { %v6895_v40 = vmax.f32 %v6894_v42, %v5236_v20  ;;  %v6755_v5 = vmax.f32 %v6754_v60, %v5863_v29  ;;  %v5865_v18 = vpop.f32.mrb[217].mxu1 }
 0x621   : > { %v6776_v26 = vmax.f32 %v6775_v7, %v5865_v18  ;;  %5499 = vmatmul.mubr.bf16.gmra.mrb[84].mxu0 %v16003_v33  ;;  %v5867_v55 = vpop.f32.mrb[218].mxu1 }
 0x622   : > { %v6756_v30 = vmax.f32 %v6755_v5, %v5867_v55  ;;  %v5869_v56 = vpop.f32.mrb[219].mxu1  ;;  %5508 = vmatprep.mubr.bf16.mxu0 %v18388_v6 }
 0x623   : > { %v6777_v13 = vmax.f32 %v6776_v26, %v5869_v56 }
 0x624   : > { %v5240_v41 = vpop.f32.mrb[236].mxu0  ;;  %6132 = vmatmul.mubr.bf16.gmra.mrb[68].mxu1 %v15979_v12 }
 0x625   : > { %v6875_v34 = vmax.f32 %v6874_v25, %v5240_v41  ;;  %v5242_v44 = vpop.f32.mrb[237].mxu0  ;;  %6141 = vmatprep.mubr.bf16.mxu1 %v18388_v6 }
 0x626   : > { %v6896_v47 = vmax.f32 %v6895_v40, %v5242_v44  ;;  %v5244_v59 = vpop.f32.mrb[238].mxu0 }
 0x627   : > { %v6876_v19 = vmax.f32 %v6875_v34, %v5244_v59  ;;  %v5246_v22 = vpop.f32.mrb[239].mxu0  ;;  %v5873_v46 = vpop.f32.mrb[220].mxu1 }
 0x628   : > { %v6897_v2 = vmax.f32 %v6896_v47, %v5246_v22  ;;  %v6757_v23 = vmax.f32 %v6756_v30, %v5873_v46  ;;  %v5875_v48 = vpop.f32.mrb[221].mxu1 }
 0x629   : > { %v6778_v28 = vmax.f32 %v6777_v13, %v5875_v48  ;;  %5509 = vmatmul.mubr.bf16.gmra.mrb[88].mxu0 %v16017_v63  ;;  %v5877_v39 = vpop.f32.mrb[222].mxu1 }
 0x62a   : > { %v6758_v17 = vmax.f32 %v6757_v23, %v5877_v39  ;;  %v5879_v24 = vpop.f32.mrb[223].mxu1  ;;  %5518 = vmatprep.mubr.bf16.mxu0 %v18388_v6 }
 0x62b   : > { %v6779_v12 = vmax.f32 %v6778_v28, %v5879_v24 }
 0x62c   : > { %v6759_v61 = vrot.slane %v6758_v17, 4  ;;  %v5250_v3 = vpop.f32.mrb[240].mxu0  ;;  %6142 = vmatmul.mubr.bf16.gmra.mrb[72].mxu1 %v15993_v11 }
 0x62d   : > { %v6780_v32 = vrot.slane %v6779_v12, 4  ;;  %v6877_v4 = vmax.f32 %v6876_v19, %v5250_v3  ;;  %v5252_v45 = vpop.f32.mrb[241].mxu0  ;;  %6151 = vmatprep.mubr.bf16.mxu1 %v18388_v6 }
 0x62e   : > { %v6760_v43 = vmax.f32 %v6758_v17, %v6759_v61  ;;  %v6898_v62 = vmax.f32 %v6897_v2, %v5252_v45  ;;  %v5254_v14 = vpop.f32.mrb[242].mxu0 }
 0x62f   : > { %v6781_v31 = vmax.f32 %v6779_v12, %v6780_v32  ;;  %v6878_v0 = vmax.f32 %v6877_v4, %v5254_v14  ;;  %v5256_v60 = vpop.f32.mrb[243].mxu0  ;;  %v5883_v9 = vpop.f32.mrb[224].mxu1 }
 0x630   : > { %v6761_v7 = vrot.slane %v6760_v43, 2  ;;  %v6899_v27 = vmax.f32 %v6898_v62, %v5256_v60  ;;  %v5885_v1 = vpop.f32.mrb[225].mxu1 }
 0x631   : > { %v6782_v49 = vrot.slane %v6781_v31, 2  ;;  %5519 = vmatmul.mubr.bf16.gmra.mrb[92].mxu0 %v16015_v50  ;;  %v5887_v42 = vpop.f32.mrb[226].mxu1 }
 0x632   : > { %v6762_v11 = vmax.f32 %v6760_v43, %v6761_v7  ;;  %v6912_v52 = vmax.f32 %v5883_v9, %v5887_v42  ;;  %v5889_v25 = vpop.f32.mrb[227].mxu1  ;;  %5528 = vmatprep.mubr.bf16.mxu0 %v18388_v6 }
 0x633   : > { %v6783_v20 = vmax.f32 %v6781_v31, %v6782_v49  ;;  %v6933_v29 = vmax.f32 %v5885_v1, %v5889_v25 }
 0x634   : > { %v6763_v40 = vrot.slane %v6762_v11, 1  ;;  %v5260_v5 = vpop.f32.mrb[244].mxu0  ;;  %6152 = vmatmul.mubr.bf16.gmra.mrb[76].mxu1 %v15991_v54 }
 0x635   : > { %v6784_v18 = vrot.slane %v6783_v20, 1  ;;  %v6879_v26 = vmax.f32 %v6878_v0, %v5260_v5  ;;  %v5262_v55 = vpop.f32.mrb[245].mxu0  ;;  %6161 = vmatprep.mubr.bf16.mxu1 %v18388_v6 }
 0x636   : > { %v6764_v30 = vmax.f32 %v6762_v11, %v6763_v40  ;;  %v6900_v56 = vmax.f32 %v6899_v27, %v5262_v55  ;;  %v5264_v13 = vpop.f32.mrb[246].mxu0 }
 0x637   : > { %v6785_v41 = vmax.f32 %v6783_v20, %v6784_v18  ;;  %v6880_v34 = vmax.f32 %v6879_v26, %v5264_v13  ;;  %v5266_v44 = vpop.f32.mrb[247].mxu0  ;;  %v5893_v47 = vpop.f32.mrb[228].mxu1 }
 0x638   : > { %v16613_v59 = vsel %vm7700_vm5, %v6764_v30, %v16566_v16  ;;  %v6901_v19 = vmax.f32 %v6900_v56, %v5266_v44  ;;  %v6913_v22 = vmax.f32 %v6912_v52, %v5893_v47  ;;  %v5895_v46 = vpop.f32.mrb[229].mxu1 }
 0x639   : > { %v16617_v54 = vsel %vm7700_vm5, %v6785_v41, %v16569_v8  ;;  %v6934_v2 = vmax.f32 %v6933_v29, %v5895_v46  ;;  %5529 = vmatmul.mubr.bf16.gmra.mrb[96].mxu0 %v16029_v37  ;;  %v5897_v23 = vpop.f32.mrb[230].mxu1 }
 0x63a   : > { %v6914_v48 = vmax.f32 %v6913_v22, %v5897_v23  ;;  %v5899_v28 = vpop.f32.mrb[231].mxu1  ;;  %5538 = vmatprep.mubr.bf16.mxu0 %v18388_v6 }
 0x63b   : > { %v6935_v39 = vmax.f32 %v6934_v2, %v5899_v28 }
 0x63c   : > { %v5270_v17 = vpop.f32.mrb[248].mxu0  ;;  %6162 = vmatmul.mubr.bf16.gmra.mrb[80].mxu1 %v16005_v58 }
 0x63d   : > { %v6881_v16 = vmax.f32 %v6880_v34, %v5270_v17  ;;  %v5272_v24 = vpop.f32.mrb[249].mxu0  ;;  %6171 = vmatprep.mubr.bf16.mxu1 %v18388_v6 }
 0x63e   : > { %v6902_v12 = vmax.f32 %v6901_v19, %v5272_v24  ;;  %v5274_v61 = vpop.f32.mrb[250].mxu0 }
 0x63f   : > { %v6882_v8 = vmax.f32 %v6881_v16, %v5274_v61  ;;  %v5276_v3 = vpop.f32.mrb[251].mxu0  ;;  %v5903_v32 = vpop.f32.mrb[232].mxu1 }
 0x640   : > { %v6903_v4 = vmax.f32 %v6902_v12, %v5276_v3  ;;  %v6915_v45 = vmax.f32 %v6914_v48, %v5903_v32  ;;  %v5905_v43 = vpop.f32.mrb[233].mxu1 }
 0x641   : > { %v6936_v62 = vmax.f32 %v6935_v39, %v5905_v43  ;;  %5539 = vmatmul.mubr.bf16.gmra.mrb[100].mxu0 %v16027_v15  ;;  %v5907_v14 = vpop.f32.mrb[234].mxu1 }
 0x642   : > { %v6916_v31 = vmax.f32 %v6915_v45, %v5907_v14  ;;  %v5909_v0 = vpop.f32.mrb[235].mxu1  ;;  %5548 = vmatprep.mubr.bf16.mxu0 %v18388_v6 }
 0x643   : > { %v6937_v58 = vmax.f32 %v6936_v62, %v5909_v0 }
 0x644   : > { %v5280_v60 = vpop.f32.mrb[252].mxu0  ;;  %6172 = vmatmul.mubr.bf16.gmra.mrb[84].mxu1 %v16003_v33 }
 0x645   : > { %v6883_v9 = vmax.f32 %v6882_v8, %v5280_v60  ;;  %v5282_v7 = vpop.f32.mrb[253].mxu0  ;;  %6181 = vmatprep.mubr.bf16.mxu1 %v18388_v6 }
 0x646   : > { %v6904_v27 = vmax.f32 %v6903_v4, %v5282_v7  ;;  %v5284_v1 = vpop.f32.mrb[254].mxu0 }
 0x647   : > { %v6884_v49 = vmax.f32 %v6883_v9, %v5284_v1  ;;  %v5286_v42 = vpop.f32.mrb[255].mxu0  ;;  %v5913_v11 = vpop.f32.mrb[236].mxu1 }
 0x648   : > { %v6905_v52 = vmax.f32 %v6904_v27, %v5286_v42  ;;  %v6917_v25 = vmax.f32 %v6916_v31, %v5913_v11  ;;  %v5915_v20 = vpop.f32.mrb[237].mxu1 }
 0x649   : > { %v6885_v29 = vrot.slane %v6884_v49, 4  ;;  %v6938_v40 = vmax.f32 %v6937_v58, %v5915_v20  ;;  %5549 = vmatmul.mubr.bf16.gmra.mrb[104].mxu0 %v16053_v57  ;;  %v5917_v5 = vpop.f32.mrb[238].mxu1 }
 0x64a   : > { %v6906_v18 = vrot.slane %v6905_v52, 4  ;;  %v6918_v26 = vmax.f32 %v6917_v25, %v5917_v5  ;;  %v5919_v33 = vpop.f32.mrb[239].mxu1  ;;  %5558 = vmatprep.mubr.bf16.mxu0 %v18388_v6 }
 0x64b   : > { %v6886_v55 = vmax.f32 %v6884_v49, %v6885_v29  ;;  %v6939_v30 = vmax.f32 %v6938_v40, %v5919_v33 }
 0x64c   : > { %v6907_v56 = vmax.f32 %v6905_v52, %v6906_v18  ;;  %v5290_v13 = vpop.f32.mrb[0].mxu0  ;;  %6182 = vmatmul.mubr.bf16.gmra.mrb[88].mxu1 %v16017_v63 }
 0x64d   : > { %v6887_v41 = vrot.slane %v6886_v55, 2  ;;  %v5292_v34 = vpop.f32.mrb[1].mxu0  ;;  %6191 = vmatprep.mubr.bf16.mxu1 %v18388_v6 }
 0x64e   : > { %v6908_v44 = vrot.slane %v6907_v56, 2  ;;  %v5294_v47 = vpop.f32.mrb[2].mxu0 }
 0x64f   : > { %v6888_v19 = vmax.f32 %v6886_v55, %v6887_v41  ;;  %v7038_v22 = vmax.f32 %v5290_v13, %v5294_v47  ;;  %v5296_v46 = vpop.f32.mrb[3].mxu0  ;;  %v5923_v2 = vpop.f32.mrb[240].mxu1 }
 0x650   : > { %v6909_v23 = vmax.f32 %v6907_v56, %v6908_v44  ;;  %v7059_v48 = vmax.f32 %v5292_v34, %v5296_v46  ;;  %v6919_v28 = vmax.f32 %v6918_v26, %v5923_v2  ;;  %v5925_v39 = vpop.f32.mrb[241].mxu1 }
 0x651   : > { %v6889_v17 = vrot.slane %v6888_v19, 1  ;;  %v6940_v16 = vmax.f32 %v6939_v30, %v5925_v39  ;;  %5559 = vmatmul.mubr.bf16.gmra.mrb[108].mxu0 %v16051_v53  ;;  %v5927_v24 = vpop.f32.mrb[242].mxu1 }
 0x652   : > { %v6910_v63 = vrot.slane %v6909_v23, 1  ;;  %v6920_v12 = vmax.f32 %v6919_v28, %v5927_v24  ;;  %v5929_v61 = vpop.f32.mrb[243].mxu1  ;;  %5568 = vmatprep.mubr.bf16.mxu0 %v18388_v6 }
 0x653   : > { %v6890_v8 = vmax.f32 %v6888_v19, %v6889_v17  ;;  %v6941_v3 = vmax.f32 %v6940_v16, %v5929_v61 }
 0x654   : > { %v6911_v32 = vmax.f32 %v6909_v23, %v6910_v63  ;;  %v5300_v4 = vpop.f32.mrb[4].mxu0  ;;  %6192 = vmatmul.mubr.bf16.gmra.mrb[92].mxu1 %v16015_v50 }
 0x655   : > { %v16636_v45 = vsel %vm7702_vm6, %v6890_v8, %v16588_v38  ;;  %v7039_v43 = vmax.f32 %v7038_v22, %v5300_v4  ;;  %v5302_v62 = vpop.f32.mrb[5].mxu0  ;;  %6201 = vmatprep.mubr.bf16.mxu1 %v18388_v6 }
 0x656   : > { %v16641_v14 = vsel %vm7702_vm6, %v6911_v32, %v16593_v36  ;;  %v7060_v31 = vmax.f32 %v7059_v48, %v5302_v62  ;;  %v5304_v0 = vpop.f32.mrb[6].mxu0 }
 0x657   : > { %v7040_v58 = vmax.f32 %v7039_v43, %v5304_v0  ;;  %v5306_v60 = vpop.f32.mrb[7].mxu0  ;;  %v5933_v9 = vpop.f32.mrb[244].mxu1 }
 0x658   : > { %v7061_v7 = vmax.f32 %v7060_v31, %v5306_v60  ;;  %v6921_v27 = vmax.f32 %v6920_v12, %v5933_v9  ;;  %v5935_v50 = vpop.f32.mrb[245].mxu1 }
 0x659   : > { %v6942_v1 = vmax.f32 %v6941_v3, %v5935_v50  ;;  %5569 = vmatmul.mubr.bf16.gmra.mrb[112].mxu0 %v16065_v21  ;;  %v5937_v38 = vpop.f32.mrb[246].mxu1 }
 0x65a   : > { %v6922_v49 = vmax.f32 %v6921_v27, %v5937_v38  ;;  %v5939_v42 = vpop.f32.mrb[247].mxu1  ;;  %5578 = vmatprep.mubr.bf16.mxu0 %v18388_v6 }
 0x65b   : > { %v6943_v11 = vmax.f32 %v6942_v1, %v5939_v42 }
 0x65c   : > { %v5310_v52 = vpop.f32.mrb[8].mxu0  ;;  %6202 = vmatmul.mubr.bf16.gmra.mrb[96].mxu1 %v16029_v37 }
 0x65d   : > { %v7041_v36 = vmax.f32 %v7040_v58, %v5310_v52  ;;  %v5312_v25 = vpop.f32.mrb[9].mxu0  ;;  %6211 = vmatprep.mubr.bf16.mxu1 %v18388_v6 }
 0x65e   : > { %v7062_v20 = vmax.f32 %v7061_v7, %v5312_v25  ;;  %v5314_v29 = vpop.f32.mrb[10].mxu0 }
 0x65f   : > { %v7042_v40 = vmax.f32 %v7041_v36, %v5314_v29  ;;  %v5316_v5 = vpop.f32.mrb[11].mxu0  ;;  %v5943_v18 = vpop.f32.mrb[248].mxu1 }
 0x660   : > { %v7063_v26 = vmax.f32 %v7062_v20, %v5316_v5  ;;  %v6923_v33 = vmax.f32 %v6922_v49, %v5943_v18  ;;  %v5945_v55 = vpop.f32.mrb[249].mxu1 }
 0x661   : > { %v6944_v30 = vmax.f32 %v6943_v11, %v5945_v55  ;;  %5579 = vmatmul.mubr.bf16.gmra.mrb[116].mxu0 %v16063_v51  ;;  %v5947_v56 = vpop.f32.mrb[250].mxu1 }
 0x662   : > { %v6924_v13 = vmax.f32 %v6923_v33, %v5947_v56  ;;  %v5949_v41 = vpop.f32.mrb[251].mxu1  ;;  %5588 = vmatprep.mubr.bf16.mxu0 %v18388_v6 }
 0x663   : > { %v6945_v37 = vmax.f32 %v6944_v30, %v5949_v41 }
 0x664   : > { %v5320_v34 = vpop.f32.mrb[12].mxu0  ;;  %6212 = vmatmul.mubr.bf16.gmra.mrb[100].mxu1 %v16027_v15 }
 0x665   : > { %v7043_v44 = vmax.f32 %v7042_v40, %v5320_v34  ;;  %v5322_v47 = vpop.f32.mrb[13].mxu0  ;;  %6221 = vmatprep.mubr.bf16.mxu1 %v18388_v6 }
 0x666   : > { %v7064_v19 = vmax.f32 %v7063_v26, %v5322_v47  ;;  %v5324_v22 = vpop.f32.mrb[14].mxu0 }
 0x667   : > { %v7044_v46 = vmax.f32 %v7043_v44, %v5324_v22  ;;  %v5326_v2 = vpop.f32.mrb[15].mxu0  ;;  %v5953_v23 = vpop.f32.mrb[252].mxu1 }
 0x668   : > { %v7065_v48 = vmax.f32 %v7064_v19, %v5326_v2  ;;  %v6925_v28 = vmax.f32 %v6924_v13, %v5953_v23  ;;  %v5955_v39 = vpop.f32.mrb[253].mxu1 }
 0x669   : > { %v6946_v17 = vmax.f32 %v6945_v37, %v5955_v39  ;;  %5589 = vmatmul.mubr.bf16.gmra.mrb[120].mxu0 %v16077_v35  ;;  %v5957_v16 = vpop.f32.mrb[254].mxu1 }
 0x66a   : > { %v6926_v24 = vmax.f32 %v6925_v28, %v5957_v16  ;;  %v5959_v63 = vpop.f32.mrb[255].mxu1  ;;  %5598 = vmatprep.mubr.bf16.mxu0 %v18388_v6 }
 0x66b   : > { %v6947_v15 = vmax.f32 %v6946_v17, %v5959_v63 }
 0x66c   : > { %v6927_v12 = vrot.slane %v6926_v24, 4  ;;  %v5330_v61 = vpop.f32.mrb[16].mxu0  ;;  %6222 = vmatmul.mubr.bf16.gmra.mrb[104].mxu1 %v16053_v57 }
 0x66d   : > { %v6948_v8 = vrot.slane %v6947_v15, 4  ;;  %v7045_v3 = vmax.f32 %v7044_v46, %v5330_v61  ;;  %v5332_v32 = vpop.f32.mrb[17].mxu0  ;;  %6231 = vmatprep.mubr.bf16.mxu1 %v18388_v6 }
 0x66e   : > { %v6928_v4 = vmax.f32 %v6926_v24, %v6927_v12  ;;  %v7066_v43 = vmax.f32 %v7065_v48, %v5332_v32  ;;  %v5334_v62 = vpop.f32.mrb[18].mxu0 }
 0x66f   : > { %v6949_v31 = vmax.f32 %v6947_v15, %v6948_v8  ;;  %v7046_v0 = vmax.f32 %v7045_v3, %v5334_v62  ;;  %v5336_v58 = vpop.f32.mrb[19].mxu0  ;;  %v5963_v60 = vpop.f32.mrb[0].mxu1 }
 0x670   : > { %v6929_v9 = vrot.slane %v6928_v4, 2  ;;  %v7067_v7 = vmax.f32 %v7066_v43, %v5336_v58  ;;  %v5965_v27 = vpop.f32.mrb[1].mxu1 }
 0x671   : > { %v6950_v50 = vrot.slane %v6949_v31, 2  ;;  %5599 = vmatmul.mubr.bf16.gmra.mrb[124].mxu0 %v16075_v10  ;;  %v5967_v1 = vpop.f32.mrb[2].mxu1 }
 0x672   : > { %v6930_v57 = vmax.f32 %v6928_v4, %v6929_v9  ;;  %v7080_v38 = vmax.f32 %v5963_v60, %v5967_v1  ;;  %v5969_v49 = vpop.f32.mrb[3].mxu1 }
 0x673   : > { %v6951_v42 = vmax.f32 %v6949_v31, %v6950_v50  ;;  %v7101_v11 = vmax.f32 %v5965_v27, %v5969_v49 }
 0x674   : > { %v6931_v52 = vrot.slane %v6930_v57, 1  ;;  %v5340_v36 = vpop.f32.mrb[20].mxu0  ;;  %6232 = vmatmul.mubr.bf16.gmra.mrb[108].mxu1 %v16051_v53 }
 0x675   : > { %v6952_v25 = vrot.slane %v6951_v42, 1  ;;  %v7047_v20 = vmax.f32 %v7046_v0, %v5340_v36  ;;  %v5342_v29 = vpop.f32.mrb[21].mxu0  ;;  %6241 = vmatprep.mubr.bf16.mxu1 %v18388_v6 }
 0x676   : > { %v6932_v40 = vmax.f32 %v6930_v57, %v6931_v52  ;;  %v7068_v5 = vmax.f32 %v7067_v7, %v5342_v29  ;;  %v5344_v18 = vpop.f32.mrb[22].mxu0 }
 0x677   : > { %v6953_v26 = vmax.f32 %v6951_v42, %v6952_v25  ;;  %v7048_v33 = vmax.f32 %v7047_v20, %v5344_v18  ;;  %v5346_v55 = vpop.f32.mrb[23].mxu0  ;;  %v5973_v30 = vpop.f32.mrb[4].mxu1 }
 0x678   : > { %v16660_v56 = vsel %vm7702_vm6, %v6932_v40, %v16613_v59  ;;  %v7069_v13 = vmax.f32 %v7068_v5, %v5346_v55  ;;  %v7081_v41 = vmax.f32 %v7080_v38, %v5973_v30  ;;  %v5975_v37 = vpop.f32.mrb[5].mxu1 }
 0x679   : > { %v16664_v53 = vsel %vm7702_vm6, %v6953_v26, %v16617_v54  ;;  %v7102_v34 = vmax.f32 %v7101_v11, %v5975_v37  ;;  %v5977_v44 = vpop.f32.mrb[6].mxu1 }
 0x67a   : > { %v7082_v47 = vmax.f32 %v7081_v41, %v5977_v44  ;;  %v5979_v19 = vpop.f32.mrb[7].mxu1 }
 0x67b   : > { %v7103_v22 = vmax.f32 %v7102_v34, %v5979_v19 }
 0x67c   : > { %v5350_v46 = vpop.f32.mrb[24].mxu0  ;;  %6242 = vmatmul.mubr.bf16.gmra.mrb[112].mxu1 %v16065_v21 }
 0x67d   : > { %v7049_v2 = vmax.f32 %v7048_v33, %v5350_v46  ;;  %v5352_v23 = vpop.f32.mrb[25].mxu0  ;;  %6251 = vmatprep.mubr.bf16.mxu1 %v18388_v6 }
 0x67e   : > { %v7070_v59 = vmax.f32 %v7069_v13, %v5352_v23  ;;  %v5354_v48 = vpop.f32.mrb[26].mxu0 }
 0x67f   : > { %v7050_v28 = vmax.f32 %v7049_v2, %v5354_v48  ;;  %v5356_v39 = vpop.f32.mrb[27].mxu0  ;;  %v5983_v17 = vpop.f32.mrb[8].mxu1 }
 0x680   : > { %v7071_v16 = vmax.f32 %v7070_v59, %v5356_v39  ;;  %v7083_v54 = vmax.f32 %v7082_v47, %v5983_v17  ;;  %v5985_v24 = vpop.f32.mrb[9].mxu1 }
 0x681   : > { %v7104_v63 = vmax.f32 %v7103_v22, %v5985_v24  ;;  %v5987_v15 = vpop.f32.mrb[10].mxu1 }
 0x682   : > { %v7084_v12 = vmax.f32 %v7083_v54, %v5987_v15  ;;  %v5989_v61 = vpop.f32.mrb[11].mxu1 }
 0x683   : > { %v7105_v8 = vmax.f32 %v7104_v63, %v5989_v61 }
 0x684   : > { %v5360_v3 = vpop.f32.mrb[28].mxu0  ;;  %6252 = vmatmul.mubr.bf16.gmra.mrb[116].mxu1 %v16063_v51 }
 0x685   : > { %v7051_v21 = vmax.f32 %v7050_v28, %v5360_v3  ;;  %v5362_v32 = vpop.f32.mrb[29].mxu0  ;;  %6261 = vmatprep.mubr.bf16.mxu1 %v18388_v6 }
 0x686   : > { %v7072_v4 = vmax.f32 %v7071_v16, %v5362_v32  ;;  %v5364_v43 = vpop.f32.mrb[30].mxu0 }
 0x687   : > { %v7052_v62 = vmax.f32 %v7051_v21, %v5364_v43  ;;  %v5366_v31 = vpop.f32.mrb[31].mxu0  ;;  %v5993_v0 = vpop.f32.mrb[12].mxu1 }
 0x688   : > { %v7073_v58 = vmax.f32 %v7072_v4, %v5366_v31  ;;  %v7085_v60 = vmax.f32 %v7084_v12, %v5993_v0  ;;  %v5995_v9 = vpop.f32.mrb[13].mxu1 }
 0x689   : > { %v7053_v7 = vrot.slane %v7052_v62, 4  ;;  %v7106_v27 = vmax.f32 %v7105_v8, %v5995_v9  ;;  %v5997_v50 = vpop.f32.mrb[14].mxu1 }
 0x68a   : > { %v7074_v1 = vrot.slane %v7073_v58, 4  ;;  %v7086_v57 = vmax.f32 %v7085_v60, %v5997_v50  ;;  %v5999_v38 = vpop.f32.mrb[15].mxu1 }
 0x68b   : > { %v7054_v49 = vmax.f32 %v7052_v62, %v7053_v7  ;;  %v7107_v51 = vmax.f32 %v7106_v27, %v5999_v38 }
 0x68c   : > { %v7075_v42 = vmax.f32 %v7073_v58, %v7074_v1  ;;  %v5370_v11 = vpop.f32.mrb[32].mxu0  ;;  %6262 = vmatmul.mubr.bf16.gmra.mrb[120].mxu1 %v16077_v35 }
 0x68d   : > { %v7055_v52 = vrot.slane %v7054_v49, 2  ;;  %v5372_v36 = vpop.f32.mrb[33].mxu0  ;;  %6271 = vmatprep.mubr.bf16.mxu1 %v18388_v6 }
 0x68e   : > { %v7076_v25 = vrot.slane %v7075_v42, 2  ;;  %v5374_v20 = vpop.f32.mrb[34].mxu0 }
 0x68f   : > { %v7056_v29 = vmax.f32 %v7054_v49, %v7055_v52  ;;  %v7206_v40 = vmax.f32 %v5370_v11, %v5374_v20  ;;  %v5376_v5 = vpop.f32.mrb[35].mxu0  ;;  %v6003_v18 = vpop.f32.mrb[16].mxu1 }
 0x690   : > { %v7077_v26 = vmax.f32 %v7075_v42, %v7076_v25  ;;  %v7227_v33 = vmax.f32 %v5372_v36, %v5376_v5  ;;  %v7087_v55 = vmax.f32 %v7086_v57, %v6003_v18  ;;  %v6005_v30 = vpop.f32.mrb[17].mxu1 }
 0x691   : > { %v7057_v13 = vrot.slane %v7056_v29, 1  ;;  %v7108_v41 = vmax.f32 %v7107_v51, %v6005_v30  ;;  %v6007_v37 = vpop.f32.mrb[18].mxu1 }
 0x692   : > { %v7078_v34 = vrot.slane %v7077_v26, 1  ;;  %v7088_v44 = vmax.f32 %v7087_v55, %v6007_v37  ;;  %v6009_v35 = vpop.f32.mrb[19].mxu1 }
 0x693   : > { %v7058_v47 = vmax.f32 %v7056_v29, %v7057_v13  ;;  %v7109_v19 = vmax.f32 %v7108_v41, %v6009_v35 }
 0x694   : > { %v7079_v22 = vmax.f32 %v7077_v26, %v7078_v34  ;;  %v5380_v6 = vpop.f32.mrb[36].mxu0  ;;  %6272 = vmatmul.mubr.bf16.gmra.mrb[124].mxu1 %v16075_v10 }
 0x695   : > { %v16675_v46 = vsel %vm7704_vm7, %v7058_v47, %v16636_v45  ;;  %v7207_v2 = vmax.f32 %v7206_v40, %v5380_v6  ;;  %v5382_v23 = vpop.f32.mrb[37].mxu0 }
 0x696   : > { %v16679_v59 = vsel %vm7704_vm7, %v7079_v22, %v16641_v14  ;;  %v7228_v48 = vmax.f32 %v7227_v33, %v5382_v23  ;;  %v5384_v28 = vpop.f32.mrb[38].mxu0 }
 0x697   : > { %v7208_v39 = vmax.f32 %v7207_v2, %v5384_v28  ;;  %v5386_v17 = vpop.f32.mrb[39].mxu0  ;;  %v6013_v16 = vpop.f32.mrb[20].mxu1 }
 0x698   : > { %v7229_v54 = vmax.f32 %v7228_v48, %v5386_v17  ;;  %v7089_v24 = vmax.f32 %v7088_v44, %v6013_v16  ;;  %v6015_v63 = vpop.f32.mrb[21].mxu1 }
 0x699   : > { %v7110_v15 = vmax.f32 %v7109_v19, %v6015_v63  ;;  %v6017_v10 = vpop.f32.mrb[22].mxu1 }
 0x69a   : > { %v7090_v12 = vmax.f32 %v7089_v24, %v6017_v10  ;;  %v6019_v61 = vpop.f32.mrb[23].mxu1 }
 0x69b   : > { %v7111_v45 = vmax.f32 %v7110_v15, %v6019_v61 }
 0x69c   : > { %v5390_v8 = vpop.f32.mrb[40].mxu0 }
 0x69d   : > { %v7209_v3 = vmax.f32 %v7208_v39, %v5390_v8  ;;  %v5392_v21 = vpop.f32.mrb[41].mxu0 }
 0x69e   : > { %v7230_v32 = vmax.f32 %v7229_v54, %v5392_v21  ;;  %v5394_v4 = vpop.f32.mrb[42].mxu0 }
 0x69f   : > { %v7210_v14 = vmax.f32 %v7209_v3, %v5394_v4  ;;  %v5396_v43 = vpop.f32.mrb[43].mxu0  ;;  %v6023_v62 = vpop.f32.mrb[24].mxu1 }
 0x6a0   : > { %v7231_v31 = vmax.f32 %v7230_v32, %v5396_v43  ;;  %v7091_v0 = vmax.f32 %v7090_v12, %v6023_v62  ;;  %v6025_v58 = vpop.f32.mrb[25].mxu1 }
 0x6a1   : > { %v7112_v60 = vmax.f32 %v7111_v45, %v6025_v58  ;;  %v6027_v9 = vpop.f32.mrb[26].mxu1 }
 0x6a2   : > { %v7092_v7 = vmax.f32 %v7091_v0, %v6027_v9  ;;  %v6029_v27 = vpop.f32.mrb[27].mxu1 }
 0x6a3   : > { %v7113_v50 = vmax.f32 %v7112_v60, %v6029_v27 }
 0x6a4   : > { %v5400_v1 = vpop.f32.mrb[44].mxu0 }
 0x6a5   : > { %v7211_v57 = vmax.f32 %v7210_v14, %v5400_v1  ;;  %v5402_v38 = vpop.f32.mrb[45].mxu0 }
 0x6a6   : > { %v7232_v49 = vmax.f32 %v7231_v31, %v5402_v38  ;;  %v5404_v51 = vpop.f32.mrb[46].mxu0 }
 0x6a7   : > { %v7212_v42 = vmax.f32 %v7211_v57, %v5404_v51  ;;  %v5406_v11 = vpop.f32.mrb[47].mxu0  ;;  %v6033_v52 = vpop.f32.mrb[28].mxu1 }
 0x6a8   : > { %v7233_v36 = vmax.f32 %v7232_v49, %v5406_v11  ;;  %v7093_v25 = vmax.f32 %v7092_v7, %v6033_v52  ;;  %v6035_v20 = vpop.f32.mrb[29].mxu1 }
 0x6a9   : > { %v7114_v29 = vmax.f32 %v7113_v50, %v6035_v20  ;;  %v6037_v40 = vpop.f32.mrb[30].mxu1 }
 0x6aa   : > { %v7094_v5 = vmax.f32 %v7093_v25, %v6037_v40  ;;  %v6039_v18 = vpop.f32.mrb[31].mxu1 }
 0x6ab   : > { %v7115_v26 = vmax.f32 %v7114_v29, %v6039_v18 }
 0x6ac   : > { %v7095_v33 = vrot.slane %v7094_v5, 4  ;;  %v5410_v55 = vpop.f32.mrb[48].mxu0 }
 0x6ad   : > { %v7116_v30 = vrot.slane %v7115_v26, 4  ;;  %v7213_v13 = vmax.f32 %v7212_v42, %v5410_v55  ;;  %v5412_v41 = vpop.f32.mrb[49].mxu0 }
 0x6ae   : > { %v7096_v37 = vmax.f32 %v7094_v5, %v7095_v33  ;;  %v7234_v34 = vmax.f32 %v7233_v36, %v5412_v41  ;;  %v5414_v44 = vpop.f32.mrb[50].mxu0 }
 0x6af   : > { %v7117_v35 = vmax.f32 %v7115_v26, %v7116_v30  ;;  %v7214_v47 = vmax.f32 %v7213_v13, %v5414_v44  ;;  %v5416_v19 = vpop.f32.mrb[51].mxu0  ;;  %v6043_v22 = vpop.f32.mrb[32].mxu1 }
 0x6b0   : > { %v7097_v6 = vrot.slane %v7096_v37, 2  ;;  %v7235_v2 = vmax.f32 %v7234_v34, %v5416_v19  ;;  %v6045_v23 = vpop.f32.mrb[33].mxu1 }
 0x6b1   : > { %v7118_v48 = vrot.slane %v7117_v35, 2  ;;  %v6047_v28 = vpop.f32.mrb[34].mxu1 }
 0x6b2   : > { %v7098_v39 = vmax.f32 %v7096_v37, %v7097_v6  ;;  %v7248_v17 = vmax.f32 %v6043_v22, %v6047_v28  ;;  %v6049_v16 = vpop.f32.mrb[35].mxu1 }
 0x6b3   : > { %v7119_v54 = vmax.f32 %v7117_v35, %v7118_v48  ;;  %v7269_v24 = vmax.f32 %v6045_v23, %v6049_v16 }
 0x6b4   : > { %v7099_v63 = vrot.slane %v7098_v39, 1  ;;  %v5420_v15 = vpop.f32.mrb[52].mxu0 }
 0x6b5   : > { %v7120_v10 = vrot.slane %v7119_v54, 1  ;;  %v7215_v12 = vmax.f32 %v7214_v47, %v5420_v15  ;;  %v5422_v61 = vpop.f32.mrb[53].mxu0 }
 0x6b6   : > { %v7100_v45 = vmax.f32 %v7098_v39, %v7099_v63  ;;  %v7236_v8 = vmax.f32 %v7235_v2, %v5422_v61  ;;  %v5424_v3 = vpop.f32.mrb[54].mxu0 }
 0x6b7   : > { %v7121_v21 = vmax.f32 %v7119_v54, %v7120_v10  ;;  %v7216_v32 = vmax.f32 %v7215_v12, %v5424_v3  ;;  %v5426_v4 = vpop.f32.mrb[55].mxu0  ;;  %v6053_v14 = vpop.f32.mrb[36].mxu1 }
 0x6b8   : > { %v16683_v43 = vsel %vm7704_vm7, %v7100_v45, %v16660_v56  ;;  %v7237_v62 = vmax.f32 %v7236_v8, %v5426_v4  ;;  %v7249_v31 = vmax.f32 %v7248_v17, %v6053_v14  ;;  %v6055_v0 = vpop.f32.mrb[37].mxu1 }
 0x6b9   : > { %v16687_v58 = vsel %vm7704_vm7, %v7121_v21, %v16664_v53  ;;  %v7270_v60 = vmax.f32 %v7269_v24, %v6055_v0  ;;  %v6057_v9 = vpop.f32.mrb[38].mxu1 }
 0x6ba   : > { %v7250_v7 = vmax.f32 %v7249_v31, %v6057_v9  ;;  %v6059_v27 = vpop.f32.mrb[39].mxu1 }
 0x6bb   : > { %v7271_v50 = vmax.f32 %v7270_v60, %v6059_v27 }
 0x6bc   : > { %v5430_v1 = vpop.f32.mrb[56].mxu0 }
 0x6bd   : > { %v7217_v57 = vmax.f32 %v7216_v32, %v5430_v1  ;;  %v5432_v38 = vpop.f32.mrb[57].mxu0 }
 0x6be   : > { %v7238_v49 = vmax.f32 %v7237_v62, %v5432_v38  ;;  %v5434_v51 = vpop.f32.mrb[58].mxu0 }
 0x6bf   : > { %v7218_v42 = vmax.f32 %v7217_v57, %v5434_v51  ;;  %v5436_v56 = vpop.f32.mrb[59].mxu0  ;;  %v6063_v11 = vpop.f32.mrb[40].mxu1 }
 0x6c0   : > { %v7239_v52 = vmax.f32 %v7238_v49, %v5436_v56  ;;  %v7251_v36 = vmax.f32 %v7250_v7, %v6063_v11  ;;  %v6065_v25 = vpop.f32.mrb[41].mxu1 }
 0x6c1   : > { %v7272_v20 = vmax.f32 %v7271_v50, %v6065_v25  ;;  %v6067_v29 = vpop.f32.mrb[42].mxu1 }
 0x6c2   : > { %v7252_v53 = vmax.f32 %v7251_v36, %v6067_v29  ;;  %v6069_v40 = vpop.f32.mrb[43].mxu1 }
 0x6c3   : > { %v7273_v5 = vmax.f32 %v7272_v20, %v6069_v40 }
 0x6c4   : > { %v5440_v18 = vpop.f32.mrb[60].mxu0 }
 0x6c5   : > { %v7219_v26 = vmax.f32 %v7218_v42, %v5440_v18  ;;  %v5442_v33 = vpop.f32.mrb[61].mxu0 }
 0x6c6   : > { %v7240_v55 = vmax.f32 %v7239_v52, %v5442_v33  ;;  %v5444_v30 = vpop.f32.mrb[62].mxu0 }
 0x6c7   : > { %v7220_v13 = vmax.f32 %v7219_v26, %v5444_v30  ;;  %v5446_v41 = vpop.f32.mrb[63].mxu0  ;;  %v6073_v37 = vpop.f32.mrb[44].mxu1 }
 0x6c8   : > { %v7241_v34 = vmax.f32 %v7240_v55, %v5446_v41  ;;  %v7253_v44 = vmax.f32 %v7252_v53, %v6073_v37  ;;  %v6075_v35 = vpop.f32.mrb[45].mxu1 }
 0x6c9   : > { %v7221_v47 = vrot.slane %v7220_v13, 4  ;;  %v7274_v19 = vmax.f32 %v7273_v5, %v6075_v35  ;;  %v6077_v22 = vpop.f32.mrb[46].mxu1 }
 0x6ca   : > { %v7242_v6 = vrot.slane %v7241_v34, 4  ;;  %v7254_v2 = vmax.f32 %v7253_v44, %v6077_v22  ;;  %v6079_v23 = vpop.f32.mrb[47].mxu1 }
 0x6cb   : > { %v7222_v48 = vmax.f32 %v7220_v13, %v7221_v47  ;;  %v7275_v28 = vmax.f32 %v7274_v19, %v6079_v23 }
 0x6cc   : > { %v7243_v39 = vmax.f32 %v7241_v34, %v7242_v6  ;;  %v5450_v17 = vpop.f32.mrb[64].mxu0 }
 0x6cd   : > { %v7223_v16 = vrot.slane %v7222_v48, 2  ;;  %v5452_v54 = vpop.f32.mrb[65].mxu0 }
 0x6ce   : > { %v7244_v24 = vrot.slane %v7243_v39, 2  ;;  %v5454_v63 = vpop.f32.mrb[66].mxu0 }
 0x6cf   : > { %v7224_v15 = vmax.f32 %v7222_v48, %v7223_v16  ;;  %v7374_v10 = vmax.f32 %v5450_v17, %v5454_v63  ;;  %v5456_v12 = vpop.f32.mrb[67].mxu0  ;;  %v6083_v61 = vpop.f32.mrb[48].mxu1 }
 0x6d0   : > { %v7245_v45 = vmax.f32 %v7243_v39, %v7244_v24  ;;  %v7395_v8 = vmax.f32 %v5452_v54, %v5456_v12  ;;  %v7255_v3 = vmax.f32 %v7254_v2, %v6083_v61  ;;  %v6085_v21 = vpop.f32.mrb[49].mxu1 }
 0x6d1   : > { %v7225_v32 = vrot.slane %v7224_v15, 1  ;;  %v7276_v4 = vmax.f32 %v7275_v28, %v6085_v21  ;;  %v6087_v14 = vpop.f32.mrb[50].mxu1 }
 0x6d2   : > { %v7246_v62 = vrot.slane %v7245_v45, 1  ;;  %v7256_v31 = vmax.f32 %v7255_v3, %v6087_v14  ;;  %v6089_v0 = vpop.f32.mrb[51].mxu1 }
 0x6d3   : > { %v7226_v60 = vmax.f32 %v7224_v15, %v7225_v32  ;;  %v7277_v9 = vmax.f32 %v7276_v4, %v6089_v0 }
 0x6d4   : > { %v7247_v7 = vmax.f32 %v7245_v45, %v7246_v62  ;;  %v5460_v27 = vpop.f32.mrb[68].mxu0 }
 0x6d5   : > { %v16691_v50 = vsel %vm7706_vm8, %v7226_v60, %v16675_v46  ;;  %v7375_v1 = vmax.f32 %v7374_v10, %v5460_v27  ;;  %v5462_v57 = vpop.f32.mrb[69].mxu0 }
 0x6d6   : > { %v16695_v38 = vsel %vm7706_vm8, %v7247_v7, %v16679_v59  ;;  %v7396_v49 = vmax.f32 %v7395_v8, %v5462_v57  ;;  %v5464_v51 = vpop.f32.mrb[70].mxu0 }
 0x6d7   : > { %v7376_v42 = vmax.f32 %v7375_v1, %v5464_v51  ;;  %v5466_v56 = vpop.f32.mrb[71].mxu0  ;;  %v6093_v11 = vpop.f32.mrb[52].mxu1 }
 0x6d8   : > { %v7397_v52 = vmax.f32 %v7396_v49, %v5466_v56  ;;  %v7257_v36 = vmax.f32 %v7256_v31, %v6093_v11  ;;  %v6095_v25 = vpop.f32.mrb[53].mxu1 }
 0x6d9   : > { %v7278_v20 = vmax.f32 %v7277_v9, %v6095_v25  ;;  %v6097_v29 = vpop.f32.mrb[54].mxu1 }
 0x6da   : > { %v7258_v53 = vmax.f32 %v7257_v36, %v6097_v29  ;;  %v6099_v40 = vpop.f32.mrb[55].mxu1 }
 0x6db   : > { %v7279_v46 = vmax.f32 %v7278_v20, %v6099_v40 }
 0x6dc   : > { %v5470_v5 = vpop.f32.mrb[72].mxu0 }
 0x6dd   : > { %v7377_v18 = vmax.f32 %v7376_v42, %v5470_v5  ;;  %v5472_v26 = vpop.f32.mrb[73].mxu0 }
 0x6de   : > { %v7398_v33 = vmax.f32 %v7397_v52, %v5472_v26  ;;  %v5474_v55 = vpop.f32.mrb[74].mxu0 }
 0x6df   : > { %v7378_v59 = vmax.f32 %v7377_v18, %v5474_v55  ;;  %v5476_v30 = vpop.f32.mrb[75].mxu0  ;;  %v6103_v13 = vpop.f32.mrb[56].mxu1 }
 0x6e0   : > { %v7399_v41 = vmax.f32 %v7398_v33, %v5476_v30  ;;  %v7259_v37 = vmax.f32 %v7258_v53, %v6103_v13  ;;  %v6105_v34 = vpop.f32.mrb[57].mxu1 }
 0x6e1   : > { %v7280_v44 = vmax.f32 %v7279_v46, %v6105_v34  ;;  %v6107_v35 = vpop.f32.mrb[58].mxu1 }
 0x6e2   : > { %v7260_v47 = vmax.f32 %v7259_v37, %v6107_v35  ;;  %v6109_v19 = vpop.f32.mrb[59].mxu1 }
 0x6e3   : > { %v7281_v22 = vmax.f32 %v7280_v44, %v6109_v19 }
 0x6e4   : > { %v5480_v6 = vpop.f32.mrb[76].mxu0 }
 0x6e5   : > { %v7379_v2 = vmax.f32 %v7378_v59, %v5480_v6  ;;  %v5482_v23 = vpop.f32.mrb[77].mxu0 }
 0x6e6   : > { %v7400_v48 = vmax.f32 %v7399_v41, %v5482_v23  ;;  %v5484_v28 = vpop.f32.mrb[78].mxu0 }
 0x6e7   : > { %v7380_v39 = vmax.f32 %v7379_v2, %v5484_v28  ;;  %v5486_v17 = vpop.f32.mrb[79].mxu0  ;;  %v6113_v16 = vpop.f32.mrb[60].mxu1 }
 0x6e8   : > { %v7401_v54 = vmax.f32 %v7400_v48, %v5486_v17  ;;  %v7261_v24 = vmax.f32 %v7260_v47, %v6113_v16  ;;  %v6115_v63 = vpop.f32.mrb[61].mxu1 }
 0x6e9   : > { %v7282_v15 = vmax.f32 %v7281_v22, %v6115_v63  ;;  %v6117_v10 = vpop.f32.mrb[62].mxu1 }
 0x6ea   : > { %v7262_v12 = vmax.f32 %v7261_v24, %v6117_v10  ;;  %v6119_v61 = vpop.f32.mrb[63].mxu1 }
 0x6eb   : > { %v7283_v45 = vmax.f32 %v7282_v15, %v6119_v61 }
 0x6ec   : > { %v7263_v8 = vrot.slane %v7262_v12, 4  ;;  %v5490_v3 = vpop.f32.mrb[80].mxu0 }
 0x6ed   : > { %v7284_v21 = vrot.slane %v7283_v45, 4  ;;  %v7381_v32 = vmax.f32 %v7380_v39, %v5490_v3  ;;  %v5492_v4 = vpop.f32.mrb[81].mxu0 }
 0x6ee   : > { %v7264_v14 = vmax.f32 %v7262_v12, %v7263_v8  ;;  %v7402_v62 = vmax.f32 %v7401_v54, %v5492_v4  ;;  %v5494_v31 = vpop.f32.mrb[82].mxu0 }
 0x6ef   : > { %v7285_v0 = vmax.f32 %v7283_v45, %v7284_v21  ;;  %v7382_v60 = vmax.f32 %v7381_v32, %v5494_v31  ;;  %v5496_v9 = vpop.f32.mrb[83].mxu0  ;;  %v6123_v7 = vpop.f32.mrb[64].mxu1 }
 0x6f0   : > { %v7265_v27 = vrot.slane %v7264_v14, 2  ;;  %v7403_v1 = vmax.f32 %v7402_v62, %v5496_v9  ;;  %v6125_v57 = vpop.f32.mrb[65].mxu1 }
 0x6f1   : > { %v7286_v49 = vrot.slane %v7285_v0, 2  ;;  %v6127_v51 = vpop.f32.mrb[66].mxu1 }
 0x6f2   : > { %v7266_v42 = vmax.f32 %v7264_v14, %v7265_v27  ;;  %v7416_v56 = vmax.f32 %v6123_v7, %v6127_v51  ;;  %v6129_v11 = vpop.f32.mrb[67].mxu1 }
 0x6f3   : > { %v7287_v52 = vmax.f32 %v7285_v0, %v7286_v49  ;;  %v7437_v36 = vmax.f32 %v6125_v57, %v6129_v11 }
 0x6f4   : > { %v7267_v25 = vrot.slane %v7266_v42, 1  ;;  %v5500_v20 = vpop.f32.mrb[84].mxu0 }
 0x6f5   : > { %v7288_v29 = vrot.slane %v7287_v52, 1  ;;  %v7383_v53 = vmax.f32 %v7382_v60, %v5500_v20  ;;  %v5502_v40 = vpop.f32.mrb[85].mxu0 }
 0x6f6   : > { %v7268_v46 = vmax.f32 %v7266_v42, %v7267_v25  ;;  %v7404_v5 = vmax.f32 %v7403_v1, %v5502_v40  ;;  %v5504_v18 = vpop.f32.mrb[86].mxu0 }
 0x6f7   : > { %v7289_v26 = vmax.f32 %v7287_v52, %v7288_v29  ;;  %v7384_v33 = vmax.f32 %v7383_v53, %v5504_v18  ;;  %v5506_v55 = vpop.f32.mrb[87].mxu0  ;;  %v6133_v59 = vpop.f32.mrb[68].mxu1 }
 0x6f8   : > { %v16699_v30 = vsel %vm7706_vm8, %v7268_v46, %v16683_v43  ;;  %v7405_v13 = vmax.f32 %v7404_v5, %v5506_v55  ;;  %v7417_v41 = vmax.f32 %v7416_v56, %v6133_v59  ;;  %v6135_v37 = vpop.f32.mrb[69].mxu1 }
 0x6f9   : > { %v16703_v34 = vsel %vm7706_vm8, %v7289_v26, %v16687_v58  ;;  %v7438_v44 = vmax.f32 %v7437_v36, %v6135_v37  ;;  %v6137_v35 = vpop.f32.mrb[70].mxu1 }
 0x6fa   : > { %v7418_v47 = vmax.f32 %v7417_v41, %v6137_v35  ;;  %v6139_v19 = vpop.f32.mrb[71].mxu1 }
 0x6fb   : > { %v7439_v22 = vmax.f32 %v7438_v44, %v6139_v19 }
 0x6fc   : > { %v5510_v6 = vpop.f32.mrb[88].mxu0 }
 0x6fd   : > { %v7385_v2 = vmax.f32 %v7384_v33, %v5510_v6  ;;  %v5512_v23 = vpop.f32.mrb[89].mxu0 }
 0x6fe   : > { %v7406_v48 = vmax.f32 %v7405_v13, %v5512_v23  ;;  %v5514_v28 = vpop.f32.mrb[90].mxu0 }
 0x6ff   : > { %v7386_v39 = vmax.f32 %v7385_v2, %v5514_v28  ;;  %v5516_v43 = vpop.f32.mrb[91].mxu0  ;;  %v6143_v17 = vpop.f32.mrb[72].mxu1 }
 0x700   : > { %v7407_v16 = vmax.f32 %v7406_v48, %v5516_v43  ;;  %v7419_v54 = vmax.f32 %v7418_v47, %v6143_v17  ;;  %v6145_v24 = vpop.f32.mrb[73].mxu1 }
 0x701   : > { %v7440_v63 = vmax.f32 %v7439_v22, %v6145_v24  ;;  %v6147_v15 = vpop.f32.mrb[74].mxu1 }
 0x702   : > { %v7420_v58 = vmax.f32 %v7419_v54, %v6147_v15  ;;  %v6149_v10 = vpop.f32.mrb[75].mxu1 }
 0x703   : > { %v7441_v12 = vmax.f32 %v7440_v63, %v6149_v10 }
 0x704   : > { %v5520_v61 = vpop.f32.mrb[92].mxu0 }
 0x705   : > { %v7387_v45 = vmax.f32 %v7386_v39, %v5520_v61  ;;  %v5522_v8 = vpop.f32.mrb[93].mxu0 }
 0x706   : > { %v7408_v3 = vmax.f32 %v7407_v16, %v5522_v8  ;;  %v5524_v21 = vpop.f32.mrb[94].mxu0 }
 0x707   : > { %v7388_v32 = vmax.f32 %v7387_v45, %v5524_v21  ;;  %v5526_v4 = vpop.f32.mrb[95].mxu0  ;;  %v6153_v14 = vpop.f32.mrb[76].mxu1 }
 0x708   : > { %v7409_v62 = vmax.f32 %v7408_v3, %v5526_v4  ;;  %v7421_v31 = vmax.f32 %v7420_v58, %v6153_v14  ;;  %v6155_v0 = vpop.f32.mrb[77].mxu1 }
 0x709   : > { %v7389_v60 = vrot.slane %v7388_v32, 4  ;;  %v7442_v9 = vmax.f32 %v7441_v12, %v6155_v0  ;;  %v6157_v7 = vpop.f32.mrb[78].mxu1 }
 0x70a   : > { %v7410_v27 = vrot.slane %v7409_v62, 4  ;;  %v7422_v1 = vmax.f32 %v7421_v31, %v6157_v7  ;;  %v6159_v57 = vpop.f32.mrb[79].mxu1 }
 0x70b   : > { %v7390_v49 = vmax.f32 %v7388_v32, %v7389_v60  ;;  %v7443_v51 = vmax.f32 %v7442_v9, %v6159_v57 }
 0x70c   : > { %v7411_v42 = vmax.f32 %v7409_v62, %v7410_v27  ;;  %v5530_v56 = vpop.f32.mrb[96].mxu0 }
 0x70d   : > { %v7391_v11 = vrot.slane %v7390_v49, 2  ;;  %v5532_v52 = vpop.f32.mrb[97].mxu0 }
 0x70e   : > { %v7412_v36 = vrot.slane %v7411_v42, 2  ;;  %v5534_v25 = vpop.f32.mrb[98].mxu0 }
 0x70f   : > { %v7392_v20 = vmax.f32 %v7390_v49, %v7391_v11  ;;  %v7542_v29 = vmax.f32 %v5530_v56, %v5534_v25  ;;  %v5536_v53 = vpop.f32.mrb[99].mxu0  ;;  %v6163_v40 = vpop.f32.mrb[80].mxu1 }
 0x710   : > { %v7413_v46 = vmax.f32 %v7411_v42, %v7412_v36  ;;  %v7563_v5 = vmax.f32 %v5532_v52, %v5536_v53  ;;  %v7423_v18 = vmax.f32 %v7422_v1, %v6163_v40  ;;  %v6165_v26 = vpop.f32.mrb[81].mxu1 }
 0x711   : > { %v7393_v33 = vrot.slane %v7392_v20, 1  ;;  %v7444_v55 = vmax.f32 %v7443_v51, %v6165_v26  ;;  %v6167_v59 = vpop.f32.mrb[82].mxu1 }
 0x712   : > { %v7414_v13 = vrot.slane %v7413_v46, 1  ;;  %v7424_v41 = vmax.f32 %v7423_v18, %v6167_v59  ;;  %v6169_v37 = vpop.f32.mrb[83].mxu1 }
 0x713   : > { %v7394_v44 = vmax.f32 %v7392_v20, %v7393_v33  ;;  %v7445_v35 = vmax.f32 %v7444_v55, %v6169_v37 }
 0x714   : > { %v7415_v47 = vmax.f32 %v7413_v46, %v7414_v13  ;;  %v5540_v19 = vpop.f32.mrb[100].mxu0 }
 0x715   : > { %v16707_v22 = vsel %vm7708_vm9, %v7394_v44, %v16691_v50  ;;  %v7543_v6 = vmax.f32 %v7542_v29, %v5540_v19  ;;  %v5542_v2 = vpop.f32.mrb[101].mxu0 }
 0x716   : > { %v16711_v23 = vsel %vm7708_vm9, %v7415_v47, %v16695_v38  ;;  %v7564_v48 = vmax.f32 %v7563_v5, %v5542_v2  ;;  %v5544_v28 = vpop.f32.mrb[102].mxu0 }
 0x717   : > { %v7544_v39 = vmax.f32 %v7543_v6, %v5544_v28  ;;  %v5546_v43 = vpop.f32.mrb[103].mxu0  ;;  %v6173_v17 = vpop.f32.mrb[84].mxu1 }
 0x718   : > { %v7565_v16 = vmax.f32 %v7564_v48, %v5546_v43  ;;  %v7425_v54 = vmax.f32 %v7424_v41, %v6173_v17  ;;  %v6175_v24 = vpop.f32.mrb[85].mxu1 }
 0x719   : > { %v7446_v63 = vmax.f32 %v7445_v35, %v6175_v24  ;;  %v6177_v15 = vpop.f32.mrb[86].mxu1 }
 0x71a   : > { %v7426_v58 = vmax.f32 %v7425_v54, %v6177_v15  ;;  %v6179_v10 = vpop.f32.mrb[87].mxu1 }
 0x71b   : > { %v7447_v50 = vmax.f32 %v7446_v63, %v6179_v10 }
 0x71c   : > { %v5550_v12 = vpop.f32.mrb[104].mxu0 }
 0x71d   : > { %v7545_v61 = vmax.f32 %v7544_v39, %v5550_v12  ;;  %v5552_v45 = vpop.f32.mrb[105].mxu0 }
 0x71e   : > { %v7566_v8 = vmax.f32 %v7565_v16, %v5552_v45  ;;  %v5554_v3 = vpop.f32.mrb[106].mxu0 }
 0x71f   : > { %v7546_v38 = vmax.f32 %v7545_v61, %v5554_v3  ;;  %v5556_v21 = vpop.f32.mrb[107].mxu0  ;;  %v6183_v32 = vpop.f32.mrb[88].mxu1 }
 0x720   : > { %v7567_v4 = vmax.f32 %v7566_v8, %v5556_v21  ;;  %v7427_v14 = vmax.f32 %v7426_v58, %v6183_v32  ;;  %v6185_v62 = vpop.f32.mrb[89].mxu1 }
 0x721   : > { %v7448_v31 = vmax.f32 %v7447_v50, %v6185_v62  ;;  %v6187_v0 = vpop.f32.mrb[90].mxu1 }
 0x722   : > { %v7428_v60 = vmax.f32 %v7427_v14, %v6187_v0  ;;  %v6189_v9 = vpop.f32.mrb[91].mxu1 }
 0x723   : > { %v7449_v7 = vmax.f32 %v7448_v31, %v6189_v9 }
 0x724   : > { %v5560_v27 = vpop.f32.mrb[108].mxu0 }
 0x725   : > { %v7547_v1 = vmax.f32 %v7546_v38, %v5560_v27  ;;  %v5562_v57 = vpop.f32.mrb[109].mxu0 }
 0x726   : > { %v7568_v49 = vmax.f32 %v7567_v4, %v5562_v57  ;;  %v5564_v51 = vpop.f32.mrb[110].mxu0 }
 0x727   : > { %v7548_v42 = vmax.f32 %v7547_v1, %v5564_v51  ;;  %v5566_v56 = vpop.f32.mrb[111].mxu0  ;;  %v6193_v11 = vpop.f32.mrb[92].mxu1 }
 0x728   : > { %v7569_v52 = vmax.f32 %v7568_v49, %v5566_v56  ;;  %v7429_v36 = vmax.f32 %v7428_v60, %v6193_v11  ;;  %v6195_v25 = vpop.f32.mrb[93].mxu1 }
 0x729   : > { %v7450_v20 = vmax.f32 %v7449_v7, %v6195_v25  ;;  %v6197_v29 = vpop.f32.mrb[94].mxu1 }
 0x72a   : > { %v7430_v53 = vmax.f32 %v7429_v36, %v6197_v29  ;;  %v6199_v40 = vpop.f32.mrb[95].mxu1 }
 0x72b   : > { %v7451_v46 = vmax.f32 %v7450_v20, %v6199_v40 }
 0x72c   : > { %v7431_v5 = vrot.slane %v7430_v53, 4  ;;  %v5570_v18 = vpop.f32.mrb[112].mxu0 }
 0x72d   : > { %v7452_v26 = vrot.slane %v7451_v46, 4  ;;  %v7549_v33 = vmax.f32 %v7548_v42, %v5570_v18  ;;  %v5572_v55 = vpop.f32.mrb[113].mxu0 }
 0x72e   : > { %v7432_v59 = vmax.f32 %v7430_v53, %v7431_v5  ;;  %v7570_v13 = vmax.f32 %v7569_v52, %v5572_v55  ;;  %v5574_v41 = vpop.f32.mrb[114].mxu0 }
 0x72f   : > { %v7453_v37 = vmax.f32 %v7451_v46, %v7452_v26  ;;  %v7550_v44 = vmax.f32 %v7549_v33, %v5574_v41  ;;  %v5576_v35 = vpop.f32.mrb[115].mxu0  ;;  %v6203_v47 = vpop.f32.mrb[96].mxu1 }
 0x730   : > { %v7433_v19 = vrot.slane %v7432_v59, 2  ;;  %v7571_v6 = vmax.f32 %v7570_v13, %v5576_v35  ;;  %v6205_v2 = vpop.f32.mrb[97].mxu1 }
 0x731   : > { %v7454_v48 = vrot.slane %v7453_v37, 2  ;;  %v6207_v28 = vpop.f32.mrb[98].mxu1 }
 0x732   : > { %v7434_v39 = vmax.f32 %v7432_v59, %v7433_v19  ;;  %v7584_v43 = vmax.f32 %v6203_v47, %v6207_v28  ;;  %v6209_v17 = vpop.f32.mrb[99].mxu1 }
 0x733   : > { %v7455_v16 = vmax.f32 %v7453_v37, %v7454_v48  ;;  %v7605_v54 = vmax.f32 %v6205_v2, %v6209_v17 }
 0x734   : > { %v7435_v24 = vrot.slane %v7434_v39, 1  ;;  %v5580_v63 = vpop.f32.mrb[116].mxu0 }
 0x735   : > { %v7456_v15 = vrot.slane %v7455_v16, 1  ;;  %v7551_v58 = vmax.f32 %v7550_v44, %v5580_v63  ;;  %v5582_v10 = vpop.f32.mrb[117].mxu0 }
 0x736   : > { %v7436_v50 = vmax.f32 %v7434_v39, %v7435_v24  ;;  %v7572_v12 = vmax.f32 %v7571_v6, %v5582_v10  ;;  %v5584_v61 = vpop.f32.mrb[118].mxu0 }
 0x737   : > { %v7457_v45 = vmax.f32 %v7455_v16, %v7456_v15  ;;  %v7552_v8 = vmax.f32 %v7551_v58, %v5584_v61  ;;  %v5586_v3 = vpop.f32.mrb[119].mxu0  ;;  %v6213_v38 = vpop.f32.mrb[100].mxu1 }
 0x738   : > { %v16715_v21 = vsel %vm7708_vm9, %v7436_v50, %v16699_v30  ;;  %v7573_v32 = vmax.f32 %v7572_v12, %v5586_v3  ;;  %v7585_v4 = vmax.f32 %v7584_v43, %v6213_v38  ;;  %v6215_v14 = vpop.f32.mrb[101].mxu1  ;;  %v7630_v3 = vld [vmem:[#allocation2 + $0x20] sm:$0xff] }
 0x739   : > { %v16719_v62 = vsel %vm7708_vm9, %v7457_v45, %v16703_v34  ;;  %v7606_v31 = vmax.f32 %v7605_v54, %v6215_v14  ;;  %v6217_v0 = vpop.f32.mrb[102].mxu1 }
 0x73a   : > { %v7586_v60 = vmax.f32 %v7585_v4, %v6217_v0  ;;  %v6219_v9 = vpop.f32.mrb[103].mxu1  ;;  %v7631_v4 = vld [vmem:[#allocation2 + $0x28] sm:$0xff] }
 0x73b   : > { %v7607_v7 = vmax.f32 %v7606_v31, %v6219_v9 }
 0x73c   : > { %v5590_v27 = vpop.f32.mrb[120].mxu0 }
 0x73d   : > { %v7553_v1 = vmax.f32 %v7552_v8, %v5590_v27  ;;  %v5592_v57 = vpop.f32.mrb[121].mxu0 }
 0x73e   : > { %v7574_v49 = vmax.f32 %v7573_v32, %v5592_v57  ;;  %v5594_v51 = vpop.f32.mrb[122].mxu0 }
 0x73f   : > { %v7554_v42 = vmax.f32 %v7553_v1, %v5594_v51  ;;  %v5596_v30 = vpop.f32.mrb[123].mxu0  ;;  %v6223_v56 = vpop.f32.mrb[104].mxu1 }
 0x740   : > { %v7575_v11 = vmax.f32 %v7574_v49, %v5596_v30  ;;  %v7587_v52 = vmax.f32 %v7586_v60, %v6223_v56  ;;  %v6225_v36 = vpop.f32.mrb[105].mxu1 }
 0x741   : > { %v7608_v25 = vmax.f32 %v7607_v7, %v6225_v36  ;;  %v6227_v20 = vpop.f32.mrb[106].mxu1 }
 0x742   : > { %v7588_v34 = vmax.f32 %v7587_v52, %v6227_v20  ;;  %v6229_v29 = vpop.f32.mrb[107].mxu1 }
 0x743   : > { %v7609_v53 = vmax.f32 %v7608_v25, %v6229_v29 }
 0x744   : > { %v5600_v40 = vpop.f32.mrb[124].mxu0 }
 0x745   : > { %v7555_v46 = vmax.f32 %v7554_v42, %v5600_v40  ;;  %v5602_v5 = vpop.f32.mrb[125].mxu0 }
 0x746   : > { %v7576_v18 = vmax.f32 %v7575_v11, %v5602_v5  ;;  %v5604_v26 = vpop.f32.mrb[126].mxu0 }
 0x747   : > { %v7556_v33 = vmax.f32 %v7555_v46, %v5604_v26  ;;  %v5606_v55 = vpop.f32.mrb[127].mxu0  ;;  %v6233_v59 = vpop.f32.mrb[108].mxu1 }
 0x748   : > { %v7577_v13 = vmax.f32 %v7576_v18, %v5606_v55  ;;  %v7589_v41 = vmax.f32 %v7588_v34, %v6233_v59  ;;  %v6235_v37 = vpop.f32.mrb[109].mxu1 }
 0x749   : > { %v7557_v44 = vrot.slane %v7556_v33, 4  ;;  %v7610_v35 = vmax.f32 %v7609_v53, %v6235_v37  ;;  %v6237_v47 = vpop.f32.mrb[110].mxu1 }
 0x74a   : > { %v7578_v19 = vrot.slane %v7577_v13, 4  ;;  %v7590_v6 = vmax.f32 %v7589_v41, %v6237_v47  ;;  %v6239_v2 = vpop.f32.mrb[111].mxu1 }
 0x74b   : > { %v7558_v48 = vmax.f32 %v7556_v33, %v7557_v44  ;;  %v7611_v28 = vmax.f32 %v7610_v35, %v6239_v2 }
 0x74c   : > { %v7579_v39 = vmax.f32 %v7577_v13, %v7578_v19 }
 0x74d   : > { %v7559_v43 = vrot.slane %v7558_v48, 2 }
 0x74e   : > { %v7580_v17 = vrot.slane %v7579_v39, 2 }
 0x74f   : > { %v7560_v16 = vmax.f32 %v7558_v48, %v7559_v43  ;;  %v6243_v54 = vpop.f32.mrb[112].mxu1  ;;  %v7633_v48 = vld [vmem:[#allocation2 + $0x38] sm:$0xff] }
 0x750   : > { %v7581_v24 = vmax.f32 %v7579_v39, %v7580_v17  ;;  %v7591_v63 = vmax.f32 %v7590_v6, %v6243_v54  ;;  %v6245_v15 = vpop.f32.mrb[113].mxu1  ;;  %v7632_v6 = vld [vmem:[#allocation2 + $0x30] sm:$0xff] }
 0x751   : > { %v7561_v58 = vrot.slane %v7560_v16, 1  ;;  %v7612_v10 = vmax.f32 %v7611_v28, %v6245_v15  ;;  %v6247_v50 = vpop.f32.mrb[114].mxu1  ;;  %v13606_v54 = vld [vmem:[%s18421_s5 + $0x204] ss:$16 sps:$4 sm:$0xff] (!%p12484_p0)   ;;  %v13614_v15 = vld [vmem:[%s18421_s5 + $0x20] ss:$16 sps:$4 sm:$0xff] (!%p12484_p0)  }
 0x752   : > { %v7582_v12 = vrot.slane %v7581_v24, 1  ;;  %v7592_v61 = vmax.f32 %v7591_v63, %v6247_v50  ;;  %v6249_v45 = vpop.f32.mrb[115].mxu1  ;;  %9462 = vmatprep.subr.bf16.mxu0 (!%p12484_p0), %v13606_v54  ;;  %v13612_v63 = vld [vmem:[%s18421_s5 + $0x224] ss:$16 sps:$4 sm:$0xff] (!%p12484_p0)  }
 0x753   : > { %v7562_v8 = vmax.f32 %v7560_v16, %v7561_v58  ;;  %v7613_v38 = vmax.f32 %v7612_v10, %v6249_v45  ;;  %v13604_v16 = vld [vmem:[%s18421_s5 + $0x4] ss:$16 sps:$4 sm:$0xff] (!%p12484_p0)   ;;  %v13615_v58 = vld [vmem:[%s18421_s5 + $0x220] ss:$16 sps:$4 sm:$0xff] (!%p12484_p0)  }
 0x754   : > { %v7583_v32 = vmax.f32 %v7581_v24, %v7582_v12  ;;  %9421 = vmatprep.subr.bf16.mxu1 (!%p12484_p0), %v13604_v16  ;;  %v13610_v24 = vld [vmem:[%s18421_s5 + $0x24] ss:$16 sps:$4 sm:$0xff] (!%p12484_p0)   ;;  %v13620_v12 = vld [vmem:[%s18421_s5 + $0x40] ss:$16 sps:$4 sm:$0xff] (!%p12484_p0)  }
 0x755   : > { %v7739_v14 = vsel %vm7710_vm10, %v7562_v8, %v16707_v22  ;;  %v13616_v10 = vld [vmem:[%s18421_s5 + $0x44] ss:$16 sps:$4 sm:$0xff] (!%p12484_p0)   ;;  %v13681_v16 = vld [vmem:[%s18421_s5 + $0x380] ss:$16 sps:$4 sm:$0xff] (!%p12484_p0)  }
 0x756   : > { %v7773_v31 = vmax.f32 %v7630_v3, %v7739_v14  ;;  %v7746_v0 = vsel %vm7710_vm10, %v7583_v32, %v16711_v23  ;;  %v13618_v50 = vld [vmem:[%s18421_s5 + $0x244] ss:$16 sps:$4 sm:$0xff] (!%p12484_p0)   ;;  %v13626_v3 = vld [vmem:[%s18421_s5 + $0x60] ss:$16 sps:$4 sm:$0xff] (!%p12484_p0)  }
 0x757   : > { %v7774_v60 = vmax.f32 %v7631_v4, %v7746_v0  ;;  %v6253_v9 = vpop.f32.mrb[116].mxu1  ;;  %v13622_v45 = vld [vmem:[%s18421_s5 + $0x64] ss:$16 sps:$4 sm:$0xff] (!%p12484_p0)   ;;  %v13632_v14 = vld [vmem:[%s18421_s5 + $0x80] ss:$16 sps:$4 sm:$0xff] (!%p12484_p0)  }
 0x758   : > { %7781 = vst [vmem:[#allocation2 + $0x20] sm:$0xff] %v7773_v31  ;;  %v7593_v7 = vmax.f32 %v7592_v61, %v6253_v9  ;;  %v6255_v27 = vpop.f32.mrb[117].mxu1  ;;  %v13621_v61 = vld [vmem:[%s18421_s5 + $0x240] ss:$16 sps:$4 sm:$0xff] (!%p12484_p0)   ;;  %v13624_v8 = vld [vmem:[%s18421_s5 + $0x264] ss:$16 sps:$4 sm:$0xff] (!%p12484_p0)  }
 0x759   : > { %7782 = vst [vmem:[#allocation2 + $0x28] sm:$0xff] %v7774_v60  ;;  %v7614_v1 = vmax.f32 %v7613_v38, %v6255_v27  ;;  %v6257_v57 = vpop.f32.mrb[118].mxu1  ;;  %v13627_v38 = vld [vmem:[%s18421_s5 + $0x260] ss:$16 sps:$4 sm:$0xff] (!%p12484_p0)   ;;  %v13628_v32 = vld [vmem:[%s18421_s5 + $0x84] ss:$16 sps:$4 sm:$0xff] (!%p12484_p0)  }
 0x75a   : > { %v7594_v49 = vmax.f32 %v7593_v7, %v6257_v57  ;;  %v6259_v51 = vpop.f32.mrb[119].mxu1  ;;  %v13630_v4 = vld [vmem:[%s18421_s5 + $0x284] ss:$16 sps:$4 sm:$0xff] (!%p12484_p0)   ;;  %v13633_v31 = vld [vmem:[%s18421_s5 + $0x280] ss:$16 sps:$4 sm:$0xff] (!%p12484_p0)  }
 0x75b   : > { %v7615_v42 = vmax.f32 %v7614_v1, %v6259_v51  ;;  %v13634_v0 = vld [vmem:[%s18421_s5 + $0xa4] ss:$16 sps:$4 sm:$0xff] (!%p12484_p0)   ;;  %v13638_v9 = vld [vmem:[%s18421_s5 + $0xa0] ss:$16 sps:$4 sm:$0xff] (!%p12484_p0)  }
 0x75c   : > { %v13636_v60 = vld [vmem:[%s18421_s5 + $0x2a4] ss:$16 sps:$4 sm:$0xff] (!%p12484_p0)   ;;  %v13639_v7 = vld [vmem:[%s18421_s5 + $0x2a0] ss:$16 sps:$4 sm:$0xff] (!%p12484_p0)  }
 0x75d   : > { %v13640_v27 = vld [vmem:[%s18421_s5 + $0xc4] ss:$16 sps:$4 sm:$0xff] (!%p12484_p0)   ;;  %v13644_v57 = vld [vmem:[%s18421_s5 + $0xc0] ss:$16 sps:$4 sm:$0xff] (!%p12484_p0)  }
 0x75e   : > { %v13642_v1 = vld [vmem:[%s18421_s5 + $0x2c4] ss:$16 sps:$4 sm:$0xff] (!%p12484_p0)  }
 0x75f   : > { %v6263_v30 = vpop.f32.mrb[120].mxu1  ;;  %v13646_v51 = vld [vmem:[%s18421_s5 + $0xe4] ss:$16 sps:$4 sm:$0xff] (!%p12484_p0)  }
 0x760   : > { %v7595_v56 = vmax.f32 %v7594_v49, %v6263_v30  ;;  %v6265_v11 = vpop.f32.mrb[121].mxu1  ;;  %v13645_v49 = vld [vmem:[%s18421_s5 + $0x2c0] ss:$16 sps:$4 sm:$0xff] (!%p12484_p0)  }
 0x761   : > { %v7616_v52 = vmax.f32 %v7615_v42, %v6265_v11  ;;  %v6267_v22 = vpop.f32.mrb[122].mxu1  ;;  %v13648_v42 = vld [vmem:[%s18421_s5 + $0x2e4] ss:$16 sps:$4 sm:$0xff] (!%p12484_p0)   ;;  %v13650_v30 = vld [vmem:[%s18421_s5 + $0xe0] ss:$16 sps:$4 sm:$0xff] (!%p12484_p0)  }
 0x762   : > { %v7596_v36 = vmax.f32 %v7595_v56, %v6267_v22  ;;  %v6269_v25 = vpop.f32.mrb[123].mxu1  ;;  %v13651_v56 = vld [vmem:[%s18421_s5 + $0x2e0] ss:$16 sps:$4 sm:$0xff] (!%p12484_p0)   ;;  %v13652_v11 = vld [vmem:[%s18421_s5 + $0x104] ss:$16 sps:$4 sm:$0xff] (!%p12484_p0)  }
 0x763   : > { %v7617_v20 = vmax.f32 %v7616_v52, %v6269_v25  ;;  %v13654_v52 = vld [vmem:[%s18421_s5 + $0x304] ss:$16 sps:$4 sm:$0xff] (!%p12484_p0)   ;;  %v13656_v22 = vld [vmem:[%s18421_s5 + $0x100] ss:$16 sps:$4 sm:$0xff] (!%p12484_p0)  }
 0x764   : > { %v13658_v25 = vld [vmem:[%s18421_s5 + $0x124] ss:$16 sps:$4 sm:$0xff] (!%p12484_p0)  }
 0x767   : > { %v6273_v23 = vpop.f32.mrb[124].mxu1 }
 0x768   : > { %v7597_v34 = vmax.f32 %v7596_v36, %v6273_v23  ;;  %v6275_v29 = vpop.f32.mrb[125].mxu1  ;;  %v13657_v36 = vld [vmem:[%s18421_s5 + $0x300] ss:$16 sps:$4 sm:$0xff] (!%p12484_p0)   ;;  %v13660_v23 = vld [vmem:[%s18421_s5 + $0x324] ss:$16 sps:$4 sm:$0xff] (!%p12484_p0)  }
 0x769   : > { %v7618_v53 = vmax.f32 %v7617_v20, %v6275_v29  ;;  %v6277_v40 = vpop.f32.mrb[126].mxu1  ;;  %v7799_v20 = vlaneseq (!%p12484_p0)  ;;  %v13663_v29 = vld [vmem:[%s18421_s5 + $0x320] ss:$16 sps:$4 sm:$0xff] (!%p12484_p0)  }
 0x76a   : > { %v7598_v46 = vmax.f32 %v7597_v34, %v6277_v40  ;;  %v6279_v5 = vpop.f32.mrb[127].mxu1  ;;  %v13662_v34 = vld [vmem:[%s18421_s5 + $0x120] ss:$16 sps:$4 sm:$0xff] (!%p12484_p0)  }
 0x76b   : > { %v7619_v18 = vmax.f32 %v7618_v53, %v6279_v5  ;;  %v13664_v53 = vld [vmem:[%s18421_s5 + $0x144] ss:$16 sps:$4 sm:$0xff] (!%p12484_p0)   ;;  %v16853_v40 = vshrl.u32 (!%p12484_p0), %v7799_v20, 7  ;;  %v13668_v5 = vld [vmem:[%s18421_s5 + $0x140] ss:$16 sps:$4 sm:$0xff] (!%p12484_p0)  }
 0x76c   : > { %v7599_v26 = vrot.slane %v7598_v46, 4  ;;  %v13706_v20 = vld [vmem:[%s18421_s5 + $0x420] ss:$16 sps:$4 sm:$0xff] (!%p12484_p0)  }
 0x76d   : > { %v7620_v33 = vrot.slane %v7619_v18, 4 }
 0x76e   : > { %v7600_v55 = vmax.f32 %v7598_v46, %v7599_v26  ;;  %v13666_v46 = vld [vmem:[%s18421_s5 + $0x344] ss:$16 sps:$4 sm:$0xff] (!%p12484_p0)  }
 0x76f   : > { %v7621_v59 = vmax.f32 %v7619_v18, %v7620_v33  ;;  %v13669_v18 = vld [vmem:[%s18421_s5 + $0x340] ss:$16 sps:$4 sm:$0xff] (!%p12484_p0)   ;;  %v13670_v26 = vld [vmem:[%s18421_s5 + $0x164] ss:$16 sps:$4 sm:$0xff] (!%p12484_p0)   ;;  %v16868_v33 = vsub.s32 (!%p12484_p0), 1, %v16853_v40 }
 0x770   : > { %v7601_v13 = vrot.slane %v7600_v55, 2 }
 0x771   : > { %v7622_v41 = vrot.slane %v7621_v59, 2 }
 0x772   : > { %v7602_v37 = vmax.f32 %v7600_v55, %v7601_v13  ;;  %v16871_v55 = vsub.s32 (!%p12484_p0), 3, %v16853_v40  ;;  %v13674_v13 = vld [vmem:[%s18421_s5 + $0x160] ss:$16 sps:$4 sm:$0xff] (!%p12484_p0)  }
 0x773   : > { %v7623_v44 = vmax.f32 %v7621_v59, %v7622_v41  ;;  %v13672_v59 = vld [vmem:[%s18421_s5 + $0x364] ss:$16 sps:$4 sm:$0xff] (!%p12484_p0)   ;;  %v13675_v41 = vld [vmem:[%s18421_s5 + $0x360] ss:$16 sps:$4 sm:$0xff] (!%p12484_p0)  }
 0x774   : > { %v7603_v35 = vrot.slane %v7602_v37, 1 }
 0x775   : > { %v7624_v47 = vrot.slane %v7623_v44, 1 }
 0x776   : > { %v7604_v19 = vmax.f32 %v7602_v37, %v7603_v35  ;;  %7788 = sbr.rel (%p12484_p0) target bundleno = 3300 (0xce4), region = 134  ;;  %v7790_v37 = vld [vmem:[#allocation2 + $0x8] sm:$0xff] (!%p12484_p0)  ;;  %v7792_v35 = vld [vmem:[#allocation2 + $0x18] sm:$0xff] (!%p12484_p0) }
 0x777   : > { %v7625_v2 = vmax.f32 %v7623_v44, %v7624_v47  ;;  %v16885_v44 = vld [vmem:[%s18422_s7] sm:$0xff] (!%p12484_p0) }
 0x778   : > { %v7753_v28 = vsel %vm7710_vm10, %v7604_v19, %v16715_v21  ;;  %v13608_v21 = vld [vmem:[%s18421_s5] ss:$16 sps:$4 sm:$0xff] (!%p12484_p0)   ;;  %v13676_v47 = vld [vmem:[%s18421_s5 + $0x184] ss:$16 sps:$4 sm:$0xff] (!%p12484_p0)   ;;  %v7806_v19 = vrot.slane (!%p12484_p0), %v16885_v44, %v16868_v33 }
 0x779   : > { %v7775_v39 = vmax.f32 %v7632_v6, %v7753_v28  ;;  %v7760_v43 = vsel %vm7710_vm10, %v7625_v2, %v16719_v62  ;;  %v13609_v62 = vld [vmem:[%s18421_s5 + $0x200] ss:$16 sps:$4 sm:$0xff] (!%p12484_p0)   ;;  %9422 = vmatpush1.bf16.msra.mxu1 (!%p12484_p0), %v13608_v21  ;;  %v7814_v6 = vrot.slane (!%p12484_p0), %v16885_v44, %v16871_v55  ;;  %v13678_v2 = vld [vmem:[%s18421_s5 + $0x384] ss:$16 sps:$4 sm:$0xff] (!%p12484_p0)  }
 0x77a   : > { %v7776_v17 = vmax.f32 %v7633_v48, %v7760_v43  ;;  %9463 = vmatpush1.bf16.msra.mxu0 (!%p12484_p0), %v13609_v62  ;;  %9423 = vmatprep.subr.bf16.mxu1 (!%p12484_p0), %v13610_v24  ;;  %v7840_v48 = vadd.f32 (!%p12484_p0), %v7806_v19, %v7790_v37  ;;  %v16901_v43 = vsub.s32 (!%p12484_p0), 0, %v16853_v40  ;;  %v13682_v62 = vld [vmem:[%s18421_s5 + $0x1a4] ss:$16 sps:$4 sm:$0xff] (!%p12484_p0)   ;;  %v13724_v37 = vld [vmem:[%s18421_s5 + $0x480] ss:$16 sps:$4 sm:$0xff] (!%p12484_p0)  }
 0x77b   : > { %7783 = vst [vmem:[#allocation2 + $0x30] sm:$0xff] %v7775_v39  ;;  %9464 = vmatprep.subr.bf16.mxu0 (!%p12484_p0), %v13612_v63  ;;  %v7842_v28 = vadd.f32 (!%p12484_p0), %v7814_v6, %v7792_v35  ;;  %v13680_v39 = vld [vmem:[%s18421_s5 + $0x180] ss:$16 sps:$4 sm:$0xff] (!%p12484_p0)   ;;  %v13684_v24 = vld [vmem:[%s18421_s5 + $0x3a4] ss:$16 sps:$4 sm:$0xff] (!%p12484_p0)  }
 0x77c   : > { %7784 = vst [vmem:[#allocation2 + $0x38] sm:$0xff] %v7776_v17  ;;  %v16904_v17 = vsub.s32 (!%p12484_p0), 2, %v16853_v40  ;;  %v7848_v54 = vmax.f32 (!%p12484_p0), %v7840_v48, 0.0  ;;  %v13686_v63 = vld [vmem:[%s18421_s5 + $0x1a0] ss:$16 sps:$4 sm:$0xff] (!%p12484_p0)  }
 0x77d   : > { %9424 = vmatpush1.bf16.msra.mxu1 %v13614_v15  ;;  %v7850_v21 = vmax.f32 %v7842_v28, 0.0  ;;  %v13727_v35 = vld [vmem:[%s18421_s5 + $0x88] ss:$16 sps:$4 sm:$0xff]   ;;  %v13732_v19 = vld [vmem:[%s18421_s5 + $0x4a4] ss:$16 sps:$4 sm:$0xff]  }
 0x77e   : > { %9465 = vmatpush1.bf16.msra.mxu0 %v13615_v58  ;;  %9425 = vmatprep.subr.bf16.mxu1 %v13616_v10  ;;  %v7856_v15 = vpack.c.bf16 %v7848_v54, %v7848_v54  ;;  %v13687_v10 = vld [vmem:[%s18421_s5 + $0x3a0] ss:$16 sps:$4 sm:$0xff]   ;;  %v13735_v6 = vld [vmem:[%s18421_s5 + $0xac] ss:$16 sps:$4 sm:$0xff]   ;;  %v13733_v48 = vld [vmem:[%s18421_s5 + $0xa8] ss:$16 sps:$4 sm:$0xff]  }
 0x77f   : > { %9466 = vmatprep.subr.bf16.mxu0 %v13618_v50  ;;  %v16918_v58 = vpack.c.bf16 %v7850_v21, %v7850_v21  ;;  %v7802_v50 = vrot.slane %v16885_v44, %v16901_v43  ;;  %v13736_v54 = vld [vmem:[%s18421_s5 + $0x4c0] ss:$16 sps:$4 sm:$0xff]   ;;  %v7794_v21 = vld [vmem:[#allocation2 + $0x28] sm:$0xff] }
 0x780   : > { %9453 = vmatprep.mubr.bf16.mxu1 %v7856_v15 }
 0x781   : > { %9426 = vmatpush1.bf16.msra.mxu1 %v13620_v12  ;;  %v7810_v12 = vrot.slane %v16885_v44, %v16904_v17  ;;  %9494 = vmatprep.mubr.bf16.mxu0 %v16918_v58 }
 0x782   : > { %9467 = vmatpush1.bf16.msra.mxu0 %v13621_v61  ;;  %9427 = vmatprep.subr.bf16.mxu1 %v13622_v45  ;;  %v7789_v61 = vld [vmem:[#allocation2] sm:$0xff]  ;;  %v7791_v45 = vld [vmem:[#allocation2 + $0x10] sm:$0xff] }
 0x783   : > { %9468 = vmatprep.subr.bf16.mxu0 %v13624_v8  ;;  %v13688_v8 = vld [vmem:[%s18421_s5 + $0x1c4] ss:$16 sps:$4 sm:$0xff]  }
 0x785   : > { %9428 = vmatpush1.bf16.msra.mxu1 %v13626_v3  ;;  %v13690_v3 = vld [vmem:[%s18421_s5 + $0x3c4] ss:$16 sps:$4 sm:$0xff]  }
 0x786   : > { %9469 = vmatpush1.bf16.msra.mxu0 %v13627_v38  ;;  %9429 = vmatprep.subr.bf16.mxu1 %v13628_v32  ;;  %v7839_v38 = vadd.f32 %v7802_v50, %v7789_v61  ;;  %v7841_v32 = vadd.f32 %v7810_v12, %v7791_v45  ;;  %v13742_v50 = vld [vmem:[%s18421_s5 + $0x4e0] ss:$16 sps:$4 sm:$0xff]   ;;  %v13745_v12 = vld [vmem:[%s18421_s5 + $0xe8] ss:$16 sps:$4 sm:$0xff]   ;;  %v13750_v61 = vld [vmem:[%s18421_s5 + $0x504] ss:$16 sps:$4 sm:$0xff]  }
 0x787   : > { %9470 = vmatprep.subr.bf16.mxu0 %v13630_v4  ;;  %v13692_v4 = vld [vmem:[%s18421_s5 + $0x1c0] ss:$16 sps:$4 sm:$0xff]  }
 0x789   : > { %9430 = vmatpush1.bf16.msra.mxu1 %v13632_v14  ;;  %v13693_v14 = vld [vmem:[%s18421_s5 + $0x3c0] ss:$16 sps:$4 sm:$0xff]  }
 0x78a   : > { %9471 = vmatpush1.bf16.msra.mxu0 %v13633_v31  ;;  %9431 = vmatprep.subr.bf16.mxu1 %v13634_v0  ;;  %v7829_v31 = vsub.s32 7, %v16853_v40  ;;  %v13694_v0 = vld [vmem:[%s18421_s5 + $0x1e4] ss:$16 sps:$4 sm:$0xff]  }
 0x78b   : > { %9472 = vmatprep.subr.bf16.mxu0 %v13636_v60  ;;  %v13696_v60 = vld [vmem:[%s18421_s5 + $0x3e4] ss:$16 sps:$4 sm:$0xff]  }
 0x78d   : > { %9432 = vmatpush1.bf16.msra.mxu1 %v13638_v9  ;;  %v7825_v9 = vsub.s32 6, %v16853_v40 }
 0x78e   : > { %9473 = vmatpush1.bf16.msra.mxu0 %v13639_v7  ;;  %9433 = vmatprep.subr.bf16.mxu1 %v13640_v27  ;;  %v16949_v7 = vrot.slane %v16885_v44, %v7829_v31  ;;  %v7847_v27 = vmax.f32 %v7839_v38, 0.0  ;;  %v13751_v38 = vld [vmem:[%s18421_s5 + $0x108] ss:$16 sps:$4 sm:$0xff]  }
 0x78f   : > { %9474 = vmatprep.subr.bf16.mxu0 %v13642_v1  ;;  %v7849_v1 = vmax.f32 %v7841_v32, 0.0  ;;  %v13756_v32 = vld [vmem:[%s18421_s5 + $0x524] ss:$16 sps:$4 sm:$0xff]   ;;  %v13757_v31 = vld [vmem:[%s18421_s5 + $0x128] ss:$16 sps:$4 sm:$0xff]  }
 0x791   : > { %9434 = vmatpush1.bf16.msra.mxu1 %v13644_v57  ;;  %v16952_v57 = vrot.slane %v16885_v44, %v7825_v9  ;;  %v13760_v9 = vld [vmem:[%s18421_s5 + $0x540] ss:$16 sps:$4 sm:$0xff]  }
 0x792   : > { %9475 = vmatpush1.bf16.msra.mxu0 %v13645_v49  ;;  %9435 = vmatprep.subr.bf16.mxu1 %v13646_v51  ;;  %v13698_v49 = vld [vmem:[%s18421_s5 + $0x1e0] ss:$16 sps:$4 sm:$0xff]  }
 0x793   : > { %9476 = vmatprep.subr.bf16.mxu0 %v13648_v42  ;;  %v13699_v51 = vld [vmem:[%s18421_s5 + $0x3e0] ss:$16 sps:$4 sm:$0xff]   ;;  %v13702_v42 = vld [vmem:[%s18421_s5 + $0x404] ss:$16 sps:$4 sm:$0xff]  }
 0x795   : > { %9436 = vmatpush1.bf16.msra.mxu1 %v13650_v30  ;;  %v13705_v30 = vld [vmem:[%s18421_s5 + $0xc] ss:$16 sps:$4 sm:$0xff]  }
 0x796   : > { %9477 = vmatpush1.bf16.msra.mxu0 %v13651_v56  ;;  %9437 = vmatprep.subr.bf16.mxu1 %v13652_v11  ;;  %v16966_v56 = vpack.c.bf16 %v7847_v27, %v7847_v27  ;;  %v16968_v11 = vpack.c.bf16 %v7849_v1, %v7849_v1  ;;  %v13763_v27 = vld [vmem:[%s18421_s5 + $0x148] ss:$16 sps:$4 sm:$0xff]   ;;  %v13768_v1 = vld [vmem:[%s18421_s5 + $0x564] ss:$16 sps:$4 sm:$0xff]  }
 0x797   : > { %9478 = vmatprep.subr.bf16.mxu0 %v13654_v52  ;;  %v13700_v52 = vld [vmem:[%s18421_s5 + $0x400] ss:$16 sps:$4 sm:$0xff]  }
 0x799   : > { %9438 = vmatpush1.bf16.msra.mxu1 %v13656_v22  ;;  %v13703_v22 = vld [vmem:[%s18421_s5 + $0x8] ss:$16 sps:$4 sm:$0xff]  }
 0x79a   : > { %9479 = vmatpush1.bf16.msra.mxu0 %v13657_v36  ;;  %9439 = vmatprep.subr.bf16.mxu1 %v13658_v25  ;;  %v13708_v36 = vld [vmem:[%s18421_s5 + $0x424] ss:$16 sps:$4 sm:$0xff]   ;;  %v13711_v25 = vld [vmem:[%s18421_s5 + $0x2c] ss:$16 sps:$4 sm:$0xff]  }
 0x79b   : > { %9480 = vmatprep.subr.bf16.mxu0 %v13660_v23  ;;  %v13709_v23 = vld [vmem:[%s18421_s5 + $0x28] ss:$16 sps:$4 sm:$0xff]  }
 0x79d   : > { %9440 = vmatpush1.bf16.msra.mxu1 %v13662_v34  ;;  %v13714_v34 = vld [vmem:[%s18421_s5 + $0x444] ss:$16 sps:$4 sm:$0xff]  }
 0x79e   : > { %9481 = vmatpush1.bf16.msra.mxu0 %v13663_v29  ;;  %9441 = vmatprep.subr.bf16.mxu1 %v13664_v53  ;;  %v13717_v29 = vld [vmem:[%s18421_s5 + $0x4c] ss:$16 sps:$4 sm:$0xff]   ;;  %v13712_v53 = vld [vmem:[%s18421_s5 + $0x440] ss:$16 sps:$4 sm:$0xff]  }
 0x79f   : > { %9482 = vmatprep.subr.bf16.mxu0 %v13666_v46  ;;  %v13715_v46 = vld [vmem:[%s18421_s5 + $0x48] ss:$16 sps:$4 sm:$0xff]  }
 0x7a1   : > { %9442 = vmatpush1.bf16.msra.mxu1 %v13668_v5  ;;  %v13720_v5 = vld [vmem:[%s18421_s5 + $0x464] ss:$16 sps:$4 sm:$0xff]  }
 0x7a2   : > { %9483 = vmatpush1.bf16.msra.mxu0 %v13669_v18  ;;  %9443 = vmatprep.subr.bf16.mxu1 %v13670_v26  ;;  %v13723_v18 = vld [vmem:[%s18421_s5 + $0x6c] ss:$16 sps:$4 sm:$0xff]   ;;  %v13718_v26 = vld [vmem:[%s18421_s5 + $0x460] ss:$16 sps:$4 sm:$0xff]  }
 0x7a3   : > { %9484 = vmatprep.subr.bf16.mxu0 %v13672_v59  ;;  %v13721_v59 = vld [vmem:[%s18421_s5 + $0x68] ss:$16 sps:$4 sm:$0xff]  }
 0x7a5   : > { %9444 = vmatpush1.bf16.msra.mxu1 %v13674_v13  ;;  %v13726_v13 = vld [vmem:[%s18421_s5 + $0x484] ss:$16 sps:$4 sm:$0xff]  }
 0x7a6   : > { %9485 = vmatpush1.bf16.msra.mxu0 %v13675_v41  ;;  %9445 = vmatprep.subr.bf16.mxu1 %v13676_v47  ;;  %v13729_v41 = vld [vmem:[%s18421_s5 + $0x8c] ss:$16 sps:$4 sm:$0xff]   ;;  %v7821_v47 = vsub.s32 5, %v16853_v40 }
 0x7a7   : > { %9486 = vmatprep.subr.bf16.mxu0 %v13678_v2  ;;  %v13730_v2 = vld [vmem:[%s18421_s5 + $0x4a0] ss:$16 sps:$4 sm:$0xff]  }
 0x7a8   : > { %v7822_v28 = vrot.slane %v16885_v44, %v7821_v47 }
 0x7a9   : > { %9446 = vmatpush1.bf16.msra.mxu1 %v13680_v39  ;;  %v13738_v39 = vld [vmem:[%s18421_s5 + $0x4c4] ss:$16 sps:$4 sm:$0xff]  }
 0x7aa   : > { %9487 = vmatpush1.bf16.msra.mxu0 %v13681_v16  ;;  %9447 = vmatprep.subr.bf16.mxu1 %v13682_v62  ;;  %v13741_v16 = vld [vmem:[%s18421_s5 + $0xcc] ss:$16 sps:$4 sm:$0xff]   ;;  %v13739_v62 = vld [vmem:[%s18421_s5 + $0xc8] ss:$16 sps:$4 sm:$0xff]  }
 0x7ab   : > { %9488 = vmatprep.subr.bf16.mxu0 %v13684_v24  ;;  %v13744_v24 = vld [vmem:[%s18421_s5 + $0x4e4] ss:$16 sps:$4 sm:$0xff]  }
 0x7ad   : > { %9448 = vmatpush1.bf16.msra.mxu1 %v13686_v63  ;;  %v7844_v63 = vadd.f32 %v7822_v28, %v7794_v21  ;;  %v13799_v28 = vld [vmem:[%s18421_s5 + $0x208] ss:$16 sps:$4 sm:$0xff]  }
 0x7ae   : > { %9489 = vmatpush1.bf16.msra.mxu0 %v13687_v10  ;;  %9449 = vmatprep.subr.bf16.mxu1 %v13688_v8  ;;  %v13753_v8 = vld [vmem:[%s18421_s5 + $0x10c] ss:$16 sps:$4 sm:$0xff]  }
 0x7af   : > { %9490 = vmatprep.subr.bf16.mxu0 %v13690_v3  ;;  %v7852_v10 = vmax.f32 %v7844_v63, 0.0  ;;  %v13748_v3 = vld [vmem:[%s18421_s5 + $0x500] ss:$16 sps:$4 sm:$0xff]   ;;  %v7796_v21 = vld [vmem:[#allocation2 + $0x38] sm:$0xff] }
 0x7b0   : > { %v13805_v63 = vld [vmem:[%s18421_s5 + $0x228] ss:$16 sps:$4 sm:$0xff]  }
 0x7b1   : > { %9450 = vmatpush1.bf16.msra.mxu1 %v13692_v4  ;;  %v17069_v45 = vpack.c.bf16 %v7852_v10, %v7852_v10  ;;  %v13759_v4 = vld [vmem:[%s18421_s5 + $0x12c] ss:$16 sps:$4 sm:$0xff]  }
 0x7b2   : > { %9491 = vmatpush1.bf16.msra.mxu0 %v13693_v14  ;;  %9451 = vmatprep.subr.bf16.mxu1 %v13694_v0  ;;  %v13754_v14 = vld [vmem:[%s18421_s5 + $0x520] ss:$16 sps:$4 sm:$0xff]   ;;  %v13762_v0 = vld [vmem:[%s18421_s5 + $0x544] ss:$16 sps:$4 sm:$0xff]  }
 0x7b3   : > { %9492 = vmatprep.subr.bf16.mxu0 %v13696_v60  ;;  %v13765_v60 = vld [vmem:[%s18421_s5 + $0x14c] ss:$16 sps:$4 sm:$0xff]  }
 0x7b5   : > { %9452 = vmatpush1.bf16.msra.mxu1 %v13698_v49  ;;  %v13771_v49 = vld [vmem:[%s18421_s5 + $0x16c] ss:$16 sps:$4 sm:$0xff]  }
 0x7b6   : > { %9493 = vmatpush1.bf16.msra.mxu0 %v13699_v51  ;;  %9585 = vmatprep.subr.bf16.mxu1 %v13705_v30  ;;  %v13766_v51 = vld [vmem:[%s18421_s5 + $0x560] ss:$16 sps:$4 sm:$0xff]   ;;  %v13774_v30 = vld [vmem:[%s18421_s5 + $0x584] ss:$16 sps:$4 sm:$0xff]  }
 0x7b7   : > { %9503 = vmatprep.subr.bf16.mxu0 %v13702_v42  ;;  %v13769_v42 = vld [vmem:[%s18421_s5 + $0x168] ss:$16 sps:$4 sm:$0xff]  }
 0x7b8   : > { %9454 = vmatmul.mubr.bf16.vlgmr.msra.gmra.mrb[0].mxu1 %v16966_v56 }
 0x7b9   : > { %9495 = vmatmul.mubr.bf16.vlgmr.msra.gmra.mrb[0].mxu0 %v16968_v11  ;;  %9586 = vmatpush1.bf16.msra.mxu1 %v13703_v22  ;;  %v13772_v22 = vld [vmem:[%s18421_s5 + $0x580] ss:$16 sps:$4 sm:$0xff]  }
 0x7ba   : > { %9504 = vmatpush1.bf16.msra.mxu0 %v13700_v52  ;;  %9587 = vmatprep.subr.bf16.mxu1 %v13711_v25  ;;  %v13777_v52 = vld [vmem:[%s18421_s5 + $0x18c] ss:$16 sps:$4 sm:$0xff]   ;;  %v7817_v25 = vsub.s32 4, %v16853_v40 }
 0x7bb   : > { %9505 = vmatprep.subr.bf16.mxu0 %v13708_v36  ;;  %9617 = vmatprep.mubr.bf16.mxu1 %v7856_v15  ;;  %v13747_v15 = vld [vmem:[%s18421_s5 + $0xec] ss:$16 sps:$4 sm:$0xff]   ;;  %v13775_v36 = vld [vmem:[%s18421_s5 + $0x188] ss:$16 sps:$4 sm:$0xff]  }
 0x7bc   : > { %9535 = vmatprep.mubr.bf16.mxu0 %v17069_v45 }
 0x7bd   : > { %9588 = vmatpush1.bf16.msra.mxu1 %v13709_v23  ;;  %v13783_v23 = vld [vmem:[%s18421_s5 + $0x1ac] ss:$16 sps:$4 sm:$0xff]  }
 0x7be   : > { %9506 = vmatpush1.bf16.msra.mxu0 %v13706_v20  ;;  %9589 = vmatprep.subr.bf16.mxu1 %v13717_v29  ;;  %v13780_v20 = vld [vmem:[%s18421_s5 + $0x5a4] ss:$16 sps:$4 sm:$0xff]   ;;  %v13781_v29 = vld [vmem:[%s18421_s5 + $0x1a8] ss:$16 sps:$4 sm:$0xff]  }
 0x7bf   : > { %9507 = vmatprep.subr.bf16.mxu0 %v13714_v34  ;;  %v13778_v34 = vld [vmem:[%s18421_s5 + $0x5a0] ss:$16 sps:$4 sm:$0xff]  }
 0x7c1   : > { %9590 = vmatpush1.bf16.msra.mxu1 %v13715_v46  ;;  %v7818_v46 = vrot.slane %v16885_v44, %v7817_v25  ;;  %v13792_v44 = vld [vmem:[%s18421_s5 + $0x5e4] ss:$16 sps:$4 sm:$0xff]  }
 0x7c2   : > { %9508 = vmatpush1.bf16.msra.mxu0 %v13712_v53  ;;  %9591 = vmatprep.subr.bf16.mxu1 %v13723_v18  ;;  %v13786_v53 = vld [vmem:[%s18421_s5 + $0x5c4] ss:$16 sps:$4 sm:$0xff]   ;;  %v13789_v18 = vld [vmem:[%s18421_s5 + $0x1cc] ss:$16 sps:$4 sm:$0xff]  }
 0x7c3   : > { %9509 = vmatprep.subr.bf16.mxu0 %v13720_v5  ;;  %v7793_v5 = vld [vmem:[#allocation2 + $0x20] sm:$0xff] }
 0x7c5   : > { %9592 = vmatpush1.bf16.msra.mxu1 %v13721_v59  ;;  %v13787_v59 = vld [vmem:[%s18421_s5 + $0x1c8] ss:$16 sps:$4 sm:$0xff]  }
 0x7c6   : > { %9510 = vmatpush1.bf16.msra.mxu0 %v13718_v26  ;;  %9593 = vmatprep.subr.bf16.mxu1 %v13729_v41  ;;  %v13784_v26 = vld [vmem:[%s18421_s5 + $0x5c0] ss:$16 sps:$4 sm:$0xff]   ;;  %v13795_v41 = vld [vmem:[%s18421_s5 + $0x1ec] ss:$16 sps:$4 sm:$0xff]  }
 0x7c7   : > { %9511 = vmatprep.subr.bf16.mxu0 %v13726_v13  ;;  %v7843_v13 = vadd.f32 %v7818_v46, %v7793_v5  ;;  %v13850_v46 = vld [vmem:[%s18421_s5 + $0x720] ss:$16 sps:$4 sm:$0xff]   ;;  %v13853_v5 = vld [vmem:[%s18421_s5 + $0x328] ss:$16 sps:$4 sm:$0xff]  }
 0x7c9   : > { %9594 = vmatpush1.bf16.msra.mxu1 %v13727_v35  ;;  %v13793_v35 = vld [vmem:[%s18421_s5 + $0x1e8] ss:$16 sps:$4 sm:$0xff]  }
 0x7ca   : > { %9512 = vmatpush1.bf16.msra.mxu0 %v13724_v37  ;;  %9595 = vmatprep.subr.bf16.mxu1 %v13735_v6  ;;  %v13790_v37 = vld [vmem:[%s18421_s5 + $0x5e0] ss:$16 sps:$4 sm:$0xff]   ;;  %v13798_v6 = vld [vmem:[%s18421_s5 + $0x604] ss:$16 sps:$4 sm:$0xff]  }
 0x7cb   : > { %9513 = vmatprep.subr.bf16.mxu0 %v13732_v19  ;;  %v7851_v19 = vmax.f32 %v7843_v13, 0.0  ;;  %v13859_v13 = vld [vmem:[%s18421_s5 + $0x348] ss:$16 sps:$4 sm:$0xff]  }
 0x7cd   : > { %9596 = vmatpush1.bf16.msra.mxu1 %v13733_v48  ;;  %v13796_v48 = vld [vmem:[%s18421_s5 + $0x600] ss:$16 sps:$4 sm:$0xff]  }
 0x7ce   : > { %9514 = vmatpush1.bf16.msra.mxu0 %v13730_v2  ;;  %9597 = vmatprep.subr.bf16.mxu1 %v13741_v16  ;;  %v13801_v2 = vld [vmem:[%s18421_s5 + $0x20c] ss:$16 sps:$4 sm:$0xff]   ;;  %v13804_v16 = vld [vmem:[%s18421_s5 + $0x624] ss:$16 sps:$4 sm:$0xff]  }
 0x7cf   : > { %9515 = vmatprep.subr.bf16.mxu0 %v13738_v39  ;;  %v17181_v39 = vpack.c.bf16 %v7851_v19, %v7851_v19  ;;  %v13870_v19 = vld [vmem:[%s18421_s5 + $0x784] ss:$16 sps:$4 sm:$0xff]  }
 0x7d1   : > { %9598 = vmatpush1.bf16.msra.mxu1 %v13739_v62  ;;  %v7846_v62 = vadd.f32 %v16949_v7, %v7796_v21  ;;  %v13813_v7 = vld [vmem:[%s18421_s5 + $0x24c] ss:$16 sps:$4 sm:$0xff]   ;;  %v13877_v21 = vld [vmem:[%s18421_s5 + $0x3a8] ss:$16 sps:$4 sm:$0xff]  }
 0x7d2   : > { %9516 = vmatpush1.bf16.msra.mxu0 %v13736_v54  ;;  %9599 = vmatprep.subr.bf16.mxu1 %v13747_v15  ;;  %v13807_v54 = vld [vmem:[%s18421_s5 + $0x22c] ss:$16 sps:$4 sm:$0xff]   ;;  %v13810_v15 = vld [vmem:[%s18421_s5 + $0x644] ss:$16 sps:$4 sm:$0xff]  }
 0x7d3   : > { %9517 = vmatprep.subr.bf16.mxu0 %v13744_v24  ;;  %v13802_v24 = vld [vmem:[%s18421_s5 + $0x620] ss:$16 sps:$4 sm:$0xff]  }
 0x7d5   : > { %9600 = vmatpush1.bf16.msra.mxu1 %v13745_v12  ;;  %v13811_v12 = vld [vmem:[%s18421_s5 + $0x248] ss:$16 sps:$4 sm:$0xff]  }
 0x7d6   : > { %9518 = vmatpush1.bf16.msra.mxu0 %v13742_v50  ;;  %9601 = vmatprep.subr.bf16.mxu1 %v13753_v8  ;;  %v13808_v50 = vld [vmem:[%s18421_s5 + $0x640] ss:$16 sps:$4 sm:$0xff]  }
 0x7d7   : > { %9519 = vmatprep.subr.bf16.mxu0 %v13750_v61  ;;  %v13816_v61 = vld [vmem:[%s18421_s5 + $0x664] ss:$16 sps:$4 sm:$0xff]   ;;  %v13814_v8 = vld [vmem:[%s18421_s5 + $0x660] ss:$16 sps:$4 sm:$0xff]  }
 0x7d9   : > { %9602 = vmatpush1.bf16.msra.mxu1 %v13751_v38  ;;  %v13822_v38 = vld [vmem:[%s18421_s5 + $0x684] ss:$16 sps:$4 sm:$0xff]  }
 0x7da   : > { %9520 = vmatpush1.bf16.msra.mxu0 %v13748_v3  ;;  %9603 = vmatprep.subr.bf16.mxu1 %v13759_v4  ;;  %v13817_v3 = vld [vmem:[%s18421_s5 + $0x268] ss:$16 sps:$4 sm:$0xff]   ;;  %v13820_v4 = vld [vmem:[%s18421_s5 + $0x680] ss:$16 sps:$4 sm:$0xff]  }
 0x7db   : > { %9521 = vmatprep.subr.bf16.mxu0 %v13756_v32  ;;  %v13825_v32 = vld [vmem:[%s18421_s5 + $0x28c] ss:$16 sps:$4 sm:$0xff]  }
 0x7dd   : > { %9604 = vmatpush1.bf16.msra.mxu1 %v13757_v31  ;;  %v13828_v31 = vld [vmem:[%s18421_s5 + $0x6a4] ss:$16 sps:$4 sm:$0xff]  }
 0x7de   : > { %9522 = vmatpush1.bf16.msra.mxu0 %v13754_v14  ;;  %9605 = vmatprep.subr.bf16.mxu1 %v13765_v60  ;;  %v13823_v14 = vld [vmem:[%s18421_s5 + $0x288] ss:$16 sps:$4 sm:$0xff]   ;;  %v13826_v60 = vld [vmem:[%s18421_s5 + $0x6a0] ss:$16 sps:$4 sm:$0xff]  }
 0x7df   : > { %9523 = vmatprep.subr.bf16.mxu0 %v13762_v0  ;;  %v13831_v0 = vld [vmem:[%s18421_s5 + $0x2ac] ss:$16 sps:$4 sm:$0xff]  }
 0x7e1   : > { %9606 = vmatpush1.bf16.msra.mxu1 %v13763_v27  ;;  %v13834_v27 = vld [vmem:[%s18421_s5 + $0x6c4] ss:$16 sps:$4 sm:$0xff]  }
 0x7e2   : > { %9524 = vmatpush1.bf16.msra.mxu0 %v13760_v9  ;;  %9607 = vmatprep.subr.bf16.mxu1 %v13771_v49  ;;  %v13829_v9 = vld [vmem:[%s18421_s5 + $0x2a8] ss:$16 sps:$4 sm:$0xff]   ;;  %v13832_v49 = vld [vmem:[%s18421_s5 + $0x6c0] ss:$16 sps:$4 sm:$0xff]  }
 0x7e3   : > { %9525 = vmatprep.subr.bf16.mxu0 %v13768_v1  ;;  %v13837_v1 = vld [vmem:[%s18421_s5 + $0x2cc] ss:$16 sps:$4 sm:$0xff]  }
 0x7e5   : > { %9608 = vmatpush1.bf16.msra.mxu1 %v13769_v42  ;;  %v13840_v42 = vld [vmem:[%s18421_s5 + $0x6e4] ss:$16 sps:$4 sm:$0xff]  }
 0x7e6   : > { %9526 = vmatpush1.bf16.msra.mxu0 %v13766_v51  ;;  %9609 = vmatprep.subr.bf16.mxu1 %v13777_v52  ;;  %v13835_v51 = vld [vmem:[%s18421_s5 + $0x2c8] ss:$16 sps:$4 sm:$0xff]   ;;  %v13838_v52 = vld [vmem:[%s18421_s5 + $0x6e0] ss:$16 sps:$4 sm:$0xff]  }
 0x7e7   : > { %9527 = vmatprep.subr.bf16.mxu0 %v13774_v30  ;;  %v13843_v30 = vld [vmem:[%s18421_s5 + $0x2ec] ss:$16 sps:$4 sm:$0xff]  }
 0x7e9   : > { %9610 = vmatpush1.bf16.msra.mxu1 %v13775_v36  ;;  %v13846_v36 = vld [vmem:[%s18421_s5 + $0x704] ss:$16 sps:$4 sm:$0xff]  }
 0x7ea   : > { %9528 = vmatpush1.bf16.msra.mxu0 %v13772_v22  ;;  %9611 = vmatprep.subr.bf16.mxu1 %v13783_v23  ;;  %v13841_v22 = vld [vmem:[%s18421_s5 + $0x2e8] ss:$16 sps:$4 sm:$0xff]   ;;  %v13844_v23 = vld [vmem:[%s18421_s5 + $0x700] ss:$16 sps:$4 sm:$0xff]  }
 0x7eb   : > { %9529 = vmatprep.subr.bf16.mxu0 %v13780_v20  ;;  %v13849_v20 = vld [vmem:[%s18421_s5 + $0x30c] ss:$16 sps:$4 sm:$0xff]  }
 0x7ed   : > { %9612 = vmatpush1.bf16.msra.mxu1 %v13781_v29  ;;  %v13852_v29 = vld [vmem:[%s18421_s5 + $0x724] ss:$16 sps:$4 sm:$0xff]  }
 0x7ee   : > { %9530 = vmatpush1.bf16.msra.mxu0 %v13778_v34  ;;  %9613 = vmatprep.subr.bf16.mxu1 %v13789_v18  ;;  %v13847_v34 = vld [vmem:[%s18421_s5 + $0x308] ss:$16 sps:$4 sm:$0xff]   ;;  %v13858_v18 = vld [vmem:[%s18421_s5 + $0x744] ss:$16 sps:$4 sm:$0xff]  }
 0x7ef   : > { %9531 = vmatprep.subr.bf16.mxu0 %v13786_v53  ;;  %v13855_v53 = vld [vmem:[%s18421_s5 + $0x32c] ss:$16 sps:$4 sm:$0xff]  }
 0x7f1   : > { %9614 = vmatpush1.bf16.msra.mxu1 %v13787_v59  ;;  %v13856_v59 = vld [vmem:[%s18421_s5 + $0x740] ss:$16 sps:$4 sm:$0xff]  }
 0x7f2   : > { %9532 = vmatpush1.bf16.msra.mxu0 %v13784_v26  ;;  %9615 = vmatprep.subr.bf16.mxu1 %v13795_v41  ;;  %v13861_v26 = vld [vmem:[%s18421_s5 + $0x34c] ss:$16 sps:$4 sm:$0xff]  }
 0x7f3   : > { %9533 = vmatprep.subr.bf16.mxu0 %v13792_v44  ;;  %v13864_v44 = vld [vmem:[%s18421_s5 + $0x764] ss:$16 sps:$4 sm:$0xff]   ;;  %v13867_v41 = vld [vmem:[%s18421_s5 + $0x36c] ss:$16 sps:$4 sm:$0xff]  }
 0x7f5   : > { %9616 = vmatpush1.bf16.msra.mxu1 %v13793_v35  ;;  %v13865_v35 = vld [vmem:[%s18421_s5 + $0x368] ss:$16 sps:$4 sm:$0xff]  }
 0x7f6   : > { %9534 = vmatpush1.bf16.msra.mxu0 %v13790_v37  ;;  %9626 = vmatprep.subr.bf16.mxu1 %v13801_v2  ;;  %v13862_v37 = vld [vmem:[%s18421_s5 + $0x760] ss:$16 sps:$4 sm:$0xff]  }
 0x7f7   : > { %9544 = vmatprep.subr.bf16.mxu0 %v13798_v6  ;;  %v13873_v6 = vld [vmem:[%s18421_s5 + $0x38c] ss:$16 sps:$4 sm:$0xff]   ;;  %v13868_v2 = vld [vmem:[%s18421_s5 + $0x780] ss:$16 sps:$4 sm:$0xff]  }
 0x7f8   : > { %9618 = vmatmul.mubr.bf16.vlgmr.msra.gmra.mrb[4].mxu1 %v16966_v56  ;;  %v7854_v56 = vmax.f32 %v7846_v62, 0.0  ;;  %v13882_v62 = vld [vmem:[%s18421_s5 + $0x7c4] ss:$16 sps:$4 sm:$0xff]  }
 0x7f9   : > { %9536 = vmatmul.mubr.bf16.vlgmr.msra.gmra.mrb[0].mxu0 %v17181_v39  ;;  %9627 = vmatpush1.bf16.msra.mxu1 %v13799_v28  ;;  %v13876_v28 = vld [vmem:[%s18421_s5 + $0x7a4] ss:$16 sps:$4 sm:$0xff]  }
 0x7fa   : > { %9545 = vmatpush1.bf16.msra.mxu0 %v13796_v48  ;;  %9628 = vmatprep.subr.bf16.mxu1 %v13807_v54  ;;  %v17205_v10 = vpack.c.bf16 %v7854_v56, %v7854_v56  ;;  %v13871_v48 = vld [vmem:[%s18421_s5 + $0x388] ss:$16 sps:$4 sm:$0xff]   ;;  %v13874_v54 = vld [vmem:[%s18421_s5 + $0x7a0] ss:$16 sps:$4 sm:$0xff]  }
 0x7fb   : > { %9546 = vmatprep.subr.bf16.mxu0 %v13804_v16  ;;  %9658 = vmatprep.mubr.bf16.mxu1 %v16918_v58  ;;  %v13819_v58 = vld [vmem:[%s18421_s5 + $0x26c] ss:$16 sps:$4 sm:$0xff]  }
 0x7fc   : > { %9576 = vmatprep.mubr.bf16.mxu0 %v17205_v10  ;;  %v13879_v16 = vld [vmem:[%s18421_s5 + $0x3ac] ss:$16 sps:$4 sm:$0xff]  }
 0x7fd   : > { %9629 = vmatpush1.bf16.msra.mxu1 %v13805_v63  ;;  %v7795_v63 = vld [vmem:[#allocation2 + $0x30] sm:$0xff] }
 0x7fe   : > { %9547 = vmatpush1.bf16.msra.mxu0 %v13802_v24  ;;  %9630 = vmatprep.subr.bf16.mxu1 %v13813_v7  ;;  %v13885_v24 = vld [vmem:[%s18421_s5 + $0x3cc] ss:$16 sps:$4 sm:$0xff]   ;;  %v13883_v7 = vld [vmem:[%s18421_s5 + $0x3c8] ss:$16 sps:$4 sm:$0xff]   ;;  %v7845_v56 = vadd.f32 %v16952_v57, %v7795_v63 }
 0x7ff   : > { %9548 = vmatprep.subr.bf16.mxu0 %v13810_v15  ;;  %v13880_v15 = vld [vmem:[%s18421_s5 + $0x7c0] ss:$16 sps:$4 sm:$0xff]   ;;  %v13889_v57 = vld [vmem:[%s18421_s5 + $0x3e8] ss:$16 sps:$4 sm:$0xff]   ;;  %v14023_v63 = vld [vmem:[#allocation4 + $0xb4] ss:$8 sps:$4 sm:$0xff]  }
 0x801   : > { %9631 = vmatpush1.bf16.msra.mxu1 %v13811_v12  ;;  %v13891_v12 = vld [vmem:[%s18421_s5 + $0x3ec] ss:$16 sps:$4 sm:$0xff]  }
 0x802   : > { %9549 = vmatpush1.bf16.msra.mxu0 %v13808_v50  ;;  %9632 = vmatprep.subr.bf16.mxu1 %v13819_v58  ;;  %v13888_v50 = vld [vmem:[%s18421_s5 + $0x7e4] ss:$16 sps:$4 sm:$0xff]   ;;  %v7853_v58 = vmax.f32 %v7845_v56, 0.0  ;;  %v14021_v56 = vld [vmem:[#allocation4 + $0xb0] ss:$8 sps:$4 sm:$0xff]  }
 0x803   : > { %9550 = vmatprep.subr.bf16.mxu0 %v13816_v61  ;;  %v13886_v61 = vld [vmem:[%s18421_s5 + $0x7e0] ss:$16 sps:$4 sm:$0xff]  }
 0x805   : > { %9633 = vmatpush1.bf16.msra.mxu1 %v13817_v3  ;;  %v13892_v3 = vld [vmem:[%s18421_s5 + $0x408] ss:$16 sps:$4 sm:$0xff]  }
 0x806   : > { %9551 = vmatpush1.bf16.msra.mxu0 %v13814_v8  ;;  %9634 = vmatprep.subr.bf16.mxu1 %v13825_v32  ;;  %v13894_v8 = vld [vmem:[%s18421_s5 + $0x40c] ss:$16 sps:$4 sm:$0xff]  }
 0x807   : > { %9552 = vmatprep.subr.bf16.mxu0 %v13822_v38  ;;  %v17377_v38 = vpack.c.bf16 %v7853_v58, %v7853_v58  ;;  %v13897_v32 = vld [vmem:[%s18421_s5 + $0x42c] ss:$16 sps:$4 sm:$0xff]   ;;  %v14024_v58 = vld [vmem:[#allocation4 + $0xc0] ss:$8 sps:$4 sm:$0xff]  }
 0x809   : > { %9635 = vmatpush1.bf16.msra.mxu1 %v13823_v14  ;;  %v13990_v14 = vld [vmem:[#allocation4 + $0x4] ss:$8 sps:$4 sm:$0xff]  }
 0x80a   : > { %9553 = vmatpush1.bf16.msra.mxu0 %v13820_v4  ;;  %9636 = vmatprep.subr.bf16.mxu1 %v13831_v0  ;;  %v13988_v4 = vld [vmem:[#allocation4] ss:$8 sps:$4 sm:$0xff]   ;;  %v13993_v0 = vld [vmem:[#allocation4 + $0x14] ss:$8 sps:$4 sm:$0xff]  }
 0x80b   : > { %9554 = vmatprep.subr.bf16.mxu0 %v13828_v31  ;;  %v13895_v31 = vld [vmem:[%s18421_s5 + $0x428] ss:$16 sps:$4 sm:$0xff]  }
 0x80d   : > { %9637 = vmatpush1.bf16.msra.mxu1 %v13829_v9  ;;  %v13991_v9 = vld [vmem:[#allocation4 + $0x10] ss:$8 sps:$4 sm:$0xff]  }
 0x80e   : > { %9555 = vmatpush1.bf16.msra.mxu0 %v13826_v60  ;;  %9638 = vmatprep.subr.bf16.mxu1 %v13837_v1  ;;  %v13900_v60 = vld [vmem:[%s18421_s5 + $0x44c] ss:$16 sps:$4 sm:$0xff]   ;;  %v13994_v1 = vld [vmem:[#allocation4 + $0x20] ss:$8 sps:$4 sm:$0xff]  }
 0x80f   : > { %9556 = vmatprep.subr.bf16.mxu0 %v13834_v27  ;;  %v13898_v27 = vld [vmem:[%s18421_s5 + $0x448] ss:$16 sps:$4 sm:$0xff]  }
 0x811   : > { %9639 = vmatpush1.bf16.msra.mxu1 %v13835_v51  ;;  %v13906_v51 = vld [vmem:[%s18421_s5 + $0x48c] ss:$16 sps:$4 sm:$0xff]  }
 0x812   : > { %9557 = vmatpush1.bf16.msra.mxu0 %v13832_v49  ;;  %9640 = vmatprep.subr.bf16.mxu1 %v13843_v30  ;;  %v13901_v49 = vld [vmem:[%s18421_s5 + $0x468] ss:$16 sps:$4 sm:$0xff]  }
 0x813   : > { %9558 = vmatprep.subr.bf16.mxu0 %v13840_v42  ;;  %v13999_v42 = vld [vmem:[#allocation4 + $0x34] ss:$8 sps:$4 sm:$0xff]   ;;  %v13997_v30 = vld [vmem:[#allocation4 + $0x30] ss:$8 sps:$4 sm:$0xff]  }
 0x815   : > { %9641 = vmatpush1.bf16.msra.mxu1 %v13841_v22  ;;  %v13904_v22 = vld [vmem:[%s18421_s5 + $0x488] ss:$16 sps:$4 sm:$0xff]  }
 0x816   : > { %9559 = vmatpush1.bf16.msra.mxu0 %v13838_v52  ;;  %9642 = vmatprep.subr.bf16.mxu1 %v13849_v20  ;;  %v14002_v52 = vld [vmem:[#allocation4 + $0x44] ss:$8 sps:$4 sm:$0xff]   ;;  %v14000_v20 = vld [vmem:[#allocation4 + $0x40] ss:$8 sps:$4 sm:$0xff]  }
 0x817   : > { %9560 = vmatprep.subr.bf16.mxu0 %v13846_v36  ;;  %v13909_v36 = vld [vmem:[%s18421_s5 + $0x4ac] ss:$16 sps:$4 sm:$0xff]  }
 0x819   : > { %9643 = vmatpush1.bf16.msra.mxu1 %v13847_v34  ;;  %v13907_v34 = vld [vmem:[%s18421_s5 + $0x4a8] ss:$16 sps:$4 sm:$0xff]  }
 0x81a   : > { %9561 = vmatpush1.bf16.msra.mxu0 %v13844_v23  ;;  %9644 = vmatprep.subr.bf16.mxu1 %v13855_v53  ;;  %v14005_v23 = vld [vmem:[#allocation4 + $0x54] ss:$8 sps:$4 sm:$0xff]   ;;  %v14003_v53 = vld [vmem:[#allocation4 + $0x50] ss:$8 sps:$4 sm:$0xff]  }
 0x81b   : > { %9562 = vmatprep.subr.bf16.mxu0 %v13852_v29  ;;  %v13912_v29 = vld [vmem:[%s18421_s5 + $0x4cc] ss:$16 sps:$4 sm:$0xff]  }
 0x81d   : > { %9645 = vmatpush1.bf16.msra.mxu1 %v13853_v5  ;;  %v13910_v5 = vld [vmem:[%s18421_s5 + $0x4c8] ss:$16 sps:$4 sm:$0xff]  }
 0x81e   : > { %9563 = vmatpush1.bf16.msra.mxu0 %v13850_v46  ;;  %9646 = vmatprep.subr.bf16.mxu1 %v13861_v26  ;;  %v14008_v46 = vld [vmem:[#allocation4 + $0x64] ss:$8 sps:$4 sm:$0xff]   ;;  %v14006_v26 = vld [vmem:[#allocation4 + $0x60] ss:$8 sps:$4 sm:$0xff]  }
 0x81f   : > { %9564 = vmatprep.subr.bf16.mxu0 %v13858_v18  ;;  %v13915_v18 = vld [vmem:[%s18421_s5 + $0x4ec] ss:$16 sps:$4 sm:$0xff]  }
 0x821   : > { %9647 = vmatpush1.bf16.msra.mxu1 %v13859_v13  ;;  %v13913_v13 = vld [vmem:[%s18421_s5 + $0x4e8] ss:$16 sps:$4 sm:$0xff]  }
 0x822   : > { %9565 = vmatpush1.bf16.msra.mxu0 %v13856_v59  ;;  %9648 = vmatprep.subr.bf16.mxu1 %v13867_v41  ;;  %v14011_v59 = vld [vmem:[#allocation4 + $0x74] ss:$8 sps:$4 sm:$0xff]   ;;  %v14009_v41 = vld [vmem:[#allocation4 + $0x70] ss:$8 sps:$4 sm:$0xff]  }
 0x823   : > { %9566 = vmatprep.subr.bf16.mxu0 %v13864_v44  ;;  %v13918_v44 = vld [vmem:[%s18421_s5 + $0x50c] ss:$16 sps:$4 sm:$0xff]  }
 0x825   : > { %9649 = vmatpush1.bf16.msra.mxu1 %v13865_v35  ;;  %v13916_v35 = vld [vmem:[%s18421_s5 + $0x508] ss:$16 sps:$4 sm:$0xff]  }
 0x826   : > { %9567 = vmatpush1.bf16.msra.mxu0 %v13862_v37  ;;  %9650 = vmatprep.subr.bf16.mxu1 %v13873_v6  ;;  %v14014_v37 = vld [vmem:[#allocation4 + $0x84] ss:$8 sps:$4 sm:$0xff]   ;;  %v14012_v6 = vld [vmem:[#allocation4 + $0x80] ss:$8 sps:$4 sm:$0xff]  }
 0x827   : > { %9568 = vmatprep.subr.bf16.mxu0 %v13870_v19  ;;  %v13921_v19 = vld [vmem:[%s18421_s5 + $0x52c] ss:$16 sps:$4 sm:$0xff]  }
 0x829   : > { %9651 = vmatpush1.bf16.msra.mxu1 %v13871_v48  ;;  %v13919_v48 = vld [vmem:[%s18421_s5 + $0x528] ss:$16 sps:$4 sm:$0xff]  }
 0x82a   : > { %9569 = vmatpush1.bf16.msra.mxu0 %v13868_v2  ;;  %9652 = vmatprep.subr.bf16.mxu1 %v13879_v16  ;;  %v14017_v2 = vld [vmem:[#allocation4 + $0x94] ss:$8 sps:$4 sm:$0xff]   ;;  %v14015_v16 = vld [vmem:[#allocation4 + $0x90] ss:$8 sps:$4 sm:$0xff]  }
 0x82b   : > { %9570 = vmatprep.subr.bf16.mxu0 %v13876_v28  ;;  %v13924_v28 = vld [vmem:[%s18421_s5 + $0x54c] ss:$16 sps:$4 sm:$0xff]  }
 0x82d   : > { %9653 = vmatpush1.bf16.msra.mxu1 %v13877_v21  ;;  %v13922_v21 = vld [vmem:[%s18421_s5 + $0x548] ss:$16 sps:$4 sm:$0xff]  }
 0x82e   : > { %9571 = vmatpush1.bf16.msra.mxu0 %v13874_v54  ;;  %9654 = vmatprep.subr.bf16.mxu1 %v13885_v24  ;;  %v14020_v54 = vld [vmem:[#allocation4 + $0xa4] ss:$8 sps:$4 sm:$0xff]   ;;  %v14018_v24 = vld [vmem:[#allocation4 + $0xa0] ss:$8 sps:$4 sm:$0xff]  }
 0x82f   : > { %9572 = vmatprep.subr.bf16.mxu0 %v13882_v62  ;;  %v13927_v62 = vld [vmem:[%s18421_s5 + $0x56c] ss:$16 sps:$4 sm:$0xff]  }
 0x831   : > { %9655 = vmatpush1.bf16.msra.mxu1 %v13883_v7  ;;  %v13930_v7 = vld [vmem:[%s18421_s5 + $0x58c] ss:$16 sps:$4 sm:$0xff]  }
 0x832   : > { %9573 = vmatpush1.bf16.msra.mxu0 %v13880_v15  ;;  %9656 = vmatprep.subr.bf16.mxu1 %v13891_v12  ;;  %v13925_v15 = vld [vmem:[%s18421_s5 + $0x568] ss:$16 sps:$4 sm:$0xff]  }
 0x833   : > { %9574 = vmatprep.subr.bf16.mxu0 %v13888_v50  ;;  %v14026_v50 = vld [vmem:[#allocation4 + $0xc4] ss:$8 sps:$4 sm:$0xff]   ;;  %v13928_v12 = vld [vmem:[%s18421_s5 + $0x588] ss:$16 sps:$4 sm:$0xff]  }
 0x835   : > { %9657 = vmatpush1.bf16.msra.mxu1 %v13889_v57  ;;  %v14029_v57 = vld [vmem:[#allocation4 + $0xd4] ss:$8 sps:$4 sm:$0xff]  }
 0x836   : > { %9575 = vmatpush1.bf16.msra.mxu0 %v13886_v61  ;;  %9667 = vmatprep.subr.bf16.mxu1 %v13894_v8  ;;  %v13933_v61 = vld [vmem:[%s18421_s5 + $0x5ac] ss:$16 sps:$4 sm:$0xff]   ;;  %v13931_v8 = vld [vmem:[%s18421_s5 + $0x5a8] ss:$16 sps:$4 sm:$0xff]  }
 0x837   : > { %10153 = vmatprep.subr.bf16.mxu0 %v13990_v14  ;;  %v13939_v14 = vld [vmem:[%s18421_s5 + $0x5ec] ss:$16 sps:$4 sm:$0xff]  }
 0x838   : > { %9659 = vmatmul.mubr.bf16.vlgmr.msra.gmra.mrb[4].mxu1 %v16968_v11  ;;  %v13996_v11 = vld [vmem:[#allocation4 + $0x24] ss:$8 sps:$4 sm:$0xff]  }
 0x839   : > { %9577 = vmatmul.mubr.bf16.vlgmr.msra.gmra.mrb[0].mxu0 %v17377_v38  ;;  %9668 = vmatpush1.bf16.msra.mxu1 %v13892_v3  ;;  %v13936_v3 = vld [vmem:[%s18421_s5 + $0x5cc] ss:$16 sps:$4 sm:$0xff]  }
 0x83a   : > { %9699 = vmatprep.mubr.bf16.mxu1 %v17069_v45  ;;  %9669 = vmatprep.subr.bf16.mxu1 %v13897_v32  ;;  %v13903_v45 = vld [vmem:[%s18421_s5 + $0x46c] ss:$16 sps:$4 sm:$0xff]   ;;  %v14027_v32 = vld [vmem:[#allocation4 + $0xd0] ss:$8 sps:$4 sm:$0xff]  }
 0x83b   : > { %10154 = vmatpush1.bf16.msra.mxu0 %v13988_v4  ;;  %v13934_v4 = vld [vmem:[%s18421_s5 + $0x5c8] ss:$16 sps:$4 sm:$0xff]  }
 0x83c   : > { %10155 = vmatprep.subr.bf16.mxu0 %v13993_v0  ;;  %v13942_v0 = vld [vmem:[%s18421_s5 + $0x60c] ss:$16 sps:$4 sm:$0xff]  }
 0x83d   : > { %9670 = vmatpush1.bf16.msra.mxu1 %v13895_v31  ;;  %v13937_v31 = vld [vmem:[%s18421_s5 + $0x5e8] ss:$16 sps:$4 sm:$0xff]  }
 0x83e   : > { %9671 = vmatprep.subr.bf16.mxu1 %v13900_v60  ;;  %v13940_v60 = vld [vmem:[%s18421_s5 + $0x608] ss:$16 sps:$4 sm:$0xff]  }
 0x83f   : > { %10156 = vmatpush1.bf16.msra.mxu0 %v13991_v9  ;;  %v13945_v9 = vld [vmem:[%s18421_s5 + $0x62c] ss:$16 sps:$4 sm:$0xff]  }
 0x840   : > { %10157 = vmatprep.subr.bf16.mxu0 %v13996_v11  ;;  %v13943_v11 = vld [vmem:[%s18421_s5 + $0x628] ss:$16 sps:$4 sm:$0xff]  }
 0x841   : > { %9672 = vmatpush1.bf16.msra.mxu1 %v13898_v27  ;;  %v13948_v27 = vld [vmem:[%s18421_s5 + $0x64c] ss:$16 sps:$4 sm:$0xff]  }
 0x842   : > { %9673 = vmatprep.subr.bf16.mxu1 %v13903_v45  ;;  %v13946_v45 = vld [vmem:[%s18421_s5 + $0x648] ss:$16 sps:$4 sm:$0xff]  }
 0x843   : > { %10158 = vmatpush1.bf16.msra.mxu0 %v13994_v1  ;;  %v13951_v1 = vld [vmem:[%s18421_s5 + $0x66c] ss:$16 sps:$4 sm:$0xff]  }
 0x844   : > { %10159 = vmatprep.subr.bf16.mxu0 %v13999_v42  ;;  %v13955_v42 = vld [vmem:[%s18421_s5 + $0x6a8] ss:$16 sps:$4 sm:$0xff]  }
 0x845   : > { %9674 = vmatpush1.bf16.msra.mxu1 %v13901_v49  ;;  %v13954_v49 = vld [vmem:[%s18421_s5 + $0x68c] ss:$16 sps:$4 sm:$0xff]  }
 0x846   : > { %9675 = vmatprep.subr.bf16.mxu1 %v13906_v51  ;;  %v13957_v51 = vld [vmem:[%s18421_s5 + $0x6ac] ss:$16 sps:$4 sm:$0xff]  }
 0x847   : > { %10160 = vmatpush1.bf16.msra.mxu0 %v13997_v30  ;;  %v13960_v30 = vld [vmem:[%s18421_s5 + $0x6cc] ss:$16 sps:$4 sm:$0xff]  }
 0x848   : > { %10161 = vmatprep.subr.bf16.mxu0 %v14002_v52  ;;  %v14032_v52 = vld [vmem:[#allocation4 + $0xe4] ss:$8 sps:$4 sm:$0xff]  }
 0x849   : > { %9676 = vmatpush1.bf16.msra.mxu1 %v13904_v22 }
 0x84a   : > { %9677 = vmatprep.subr.bf16.mxu1 %v13909_v36  ;;  %v13958_v36 = vld [vmem:[%s18421_s5 + $0x6c8] ss:$16 sps:$4 sm:$0xff]  }
 0x84b   : > { %10162 = vmatpush1.bf16.msra.mxu0 %v14000_v20  ;;  %v14030_v20 = vld [vmem:[#allocation4 + $0xe0] ss:$8 sps:$4 sm:$0xff]  }
 0x84c   : > { %10163 = vmatprep.subr.bf16.mxu0 %v14005_v23 }
 0x84d   : > { %9678 = vmatpush1.bf16.msra.mxu1 %v13907_v34  ;;  %v13963_v34 = vld [vmem:[%s18421_s5 + $0x6ec] ss:$16 sps:$4 sm:$0xff]  }
 0x84e   : > { %9679 = vmatprep.subr.bf16.mxu1 %v13912_v29 }
 0x84f   : > { %10164 = vmatpush1.bf16.msra.mxu0 %v14003_v53 }
 0x850   : > { %10165 = vmatprep.subr.bf16.mxu0 %v14008_v46  ;;  %v14035_v46 = vld [vmem:[#allocation4 + $0xf4] ss:$8 sps:$4 sm:$0xff]  }
 0x851   : > { %9680 = vmatpush1.bf16.msra.mxu1 %v13910_v5  ;;  %v13961_v5 = vld [vmem:[%s18421_s5 + $0x6e8] ss:$16 sps:$4 sm:$0xff]  }
 0x852   : > { %9681 = vmatprep.subr.bf16.mxu1 %v13915_v18  ;;  %v14033_v18 = vld [vmem:[#allocation4 + $0xf0] ss:$8 sps:$4 sm:$0xff]  }
 0x853   : > { %10166 = vmatpush1.bf16.msra.mxu0 %v14006_v26  ;;  %v13966_v26 = vld [vmem:[%s18421_s5 + $0x70c] ss:$16 sps:$4 sm:$0xff]  }
 0x854   : > { %10167 = vmatprep.subr.bf16.mxu0 %v14011_v59  ;;  %v14038_v59 = vld [vmem:[#allocation4 + $0x104] ss:$8 sps:$4 sm:$0xff]  }
 0x855   : > { %9682 = vmatpush1.bf16.msra.mxu1 %v13913_v13  ;;  %v13964_v13 = vld [vmem:[%s18421_s5 + $0x708] ss:$16 sps:$4 sm:$0xff]  }
 0x856   : > { %9683 = vmatprep.subr.bf16.mxu1 %v13918_v44  ;;  %v13969_v44 = vld [vmem:[%s18421_s5 + $0x72c] ss:$16 sps:$4 sm:$0xff]  }
 0x857   : > { %10168 = vmatpush1.bf16.msra.mxu0 %v14009_v41  ;;  %v13967_v41 = vld [vmem:[%s18421_s5 + $0x728] ss:$16 sps:$4 sm:$0xff]  }
 0x858   : > { %10169 = vmatprep.subr.bf16.mxu0 %v14014_v37  ;;  %v13972_v37 = vld [vmem:[%s18421_s5 + $0x74c] ss:$16 sps:$4 sm:$0xff]  }
 0x859   : > { %9684 = vmatpush1.bf16.msra.mxu1 %v13916_v35  ;;  %v13970_v35 = vld [vmem:[%s18421_s5 + $0x748] ss:$16 sps:$4 sm:$0xff]  }
 0x85a   : > { %9685 = vmatprep.subr.bf16.mxu1 %v13921_v19  ;;  %v13975_v19 = vld [vmem:[%s18421_s5 + $0x76c] ss:$16 sps:$4 sm:$0xff]  }
 0x85b   : > { %10170 = vmatpush1.bf16.msra.mxu0 %v14012_v6  ;;  %v13973_v6 = vld [vmem:[%s18421_s5 + $0x768] ss:$16 sps:$4 sm:$0xff]  }
 0x85c   : > { %10171 = vmatprep.subr.bf16.mxu0 %v14017_v2  ;;  %v13978_v2 = vld [vmem:[%s18421_s5 + $0x78c] ss:$16 sps:$4 sm:$0xff]  }
 0x85d   : > { %9686 = vmatpush1.bf16.msra.mxu1 %v13919_v48  ;;  %v13976_v48 = vld [vmem:[%s18421_s5 + $0x788] ss:$16 sps:$4 sm:$0xff]  }
 0x85e   : > { %9687 = vmatprep.subr.bf16.mxu1 %v13924_v28  ;;  %v13981_v28 = vld [vmem:[%s18421_s5 + $0x7ac] ss:$16 sps:$4 sm:$0xff]  }
 0x85f   : > { %10172 = vmatpush1.bf16.msra.mxu0 %v14015_v16  ;;  %v13979_v16 = vld [vmem:[%s18421_s5 + $0x7a8] ss:$16 sps:$4 sm:$0xff]  }
 0x860   : > { %10173 = vmatprep.subr.bf16.mxu0 %v14020_v54  ;;  %v13984_v54 = vld [vmem:[%s18421_s5 + $0x7cc] ss:$16 sps:$4 sm:$0xff]  }
 0x861   : > { %9688 = vmatpush1.bf16.msra.mxu1 %v13922_v21  ;;  %v13982_v21 = vld [vmem:[%s18421_s5 + $0x7c8] ss:$16 sps:$4 sm:$0xff]  }
 0x862   : > { %9689 = vmatprep.subr.bf16.mxu1 %v13927_v62  ;;  %v13987_v62 = vld [vmem:[%s18421_s5 + $0x7ec] ss:$16 sps:$4 sm:$0xff]  }
 0x863   : > { %10174 = vmatpush1.bf16.msra.mxu0 %v14018_v24  ;;  %v13985_v24 = vld [vmem:[%s18421_s5 + $0x7e8] ss:$16 sps:$4 sm:$0xff]  }
 0x864   : > { %10175 = vmatprep.subr.bf16.mxu0 %v14023_v63  ;;  %v17574_v63 = vld [vmem:[%s18423_s6] sm:$0xf] }
 0x865   : > { %9690 = vmatpush1.bf16.msra.mxu1 %v13925_v15  ;;  %v8124_v15 = vrot.slane %v17574_v63, %v16901_v43 }
 0x866   : > { %9691 = vmatprep.subr.bf16.mxu1 %v13930_v7  ;;  %v8128_v7 = vrot.slane %v17574_v63, %v16868_v33 }
 0x867   : > { %10176 = vmatpush1.bf16.msra.mxu0 %v14021_v56 }
 0x868   : > { %10177 = vmatprep.subr.bf16.mxu0 %v14026_v50 }
 0x869   : > { %9692 = vmatpush1.bf16.msra.mxu1 %v13928_v12 }
 0x86a   : > { %9693 = vmatprep.subr.bf16.mxu1 %v13933_v61 }
 0x86b   : > { %10178 = vmatpush1.bf16.msra.mxu0 %v14024_v58 }
 0x86c   : > { %10179 = vmatprep.subr.bf16.mxu0 %v14029_v57 }
 0x86d   : > { %9694 = vmatpush1.bf16.msra.mxu1 %v13931_v8 }
 0x86e   : > { %9695 = vmatprep.subr.bf16.mxu1 %v13936_v3 }
 0x86f   : > { %10180 = vmatpush1.bf16.msra.mxu0 %v14027_v32 }
 0x870   : > { %10181 = vmatprep.subr.bf16.mxu0 %v14032_v52  ;;  %v14050_v52 = vld [vmem:[#allocation4 + $0x144] ss:$8 sps:$4 sm:$0xff]  }
 0x871   : > { %9696 = vmatpush1.bf16.msra.mxu1 %v13934_v4 }
 0x872   : > { %9697 = vmatprep.subr.bf16.mxu1 %v13939_v14  ;;  %v14036_v14 = vld [vmem:[#allocation4 + $0x100] ss:$8 sps:$4 sm:$0xff]  }
 0x873   : > { %10182 = vmatpush1.bf16.msra.mxu0 %v14030_v20  ;;  %v14048_v20 = vld [vmem:[#allocation4 + $0x140] ss:$8 sps:$4 sm:$0xff]  }
 0x874   : > { %10183 = vmatprep.subr.bf16.mxu0 %v14035_v46  ;;  %v14056_v46 = vld [vmem:[#allocation4 + $0x164] ss:$8 sps:$4 sm:$0xff]  }
 0x875   : > { %9698 = vmatpush1.bf16.msra.mxu1 %v13937_v31 }
 0x876   : > { %9708 = vmatprep.subr.bf16.mxu1 %v13942_v0  ;;  %v14041_v0 = vld [vmem:[#allocation4 + $0x114] ss:$8 sps:$4 sm:$0xff]  }
 0x877   : > { %10184 = vmatpush1.bf16.msra.mxu0 %v14033_v18  ;;  %v14104_v18 = vld [vmem:[#allocation6 + $0xc4] ss:$16 sps:$4 sm:$0xff]  }
 0x878   : > { %9700 = vmatmul.mubr.bf16.vlgmr.msra.gmra.mrb[4].mxu1 %v17181_v39  ;;  %v13949_v39 = vld [vmem:[%s18421_s5 + $0x668] ss:$16 sps:$4 sm:$0xff]   ;;  %10194 = vmatprep.subr.bf16.mxu0 %v14038_v59  ;;  %v14059_v59 = vld [vmem:[#allocation4 + $0x174] ss:$8 sps:$4 sm:$0xff]  }
 0x879   : > { %9709 = vmatpush1.bf16.msra.mxu1 %v13940_v60  ;;  %9740 = vmatprep.mubr.bf16.mxu1 %v17205_v10  ;;  %v13952_v10 = vld [vmem:[%s18421_s5 + $0x688] ss:$16 sps:$4 sm:$0xff]   ;;  %v14084_v60 = vld [vmem:[#allocation6] ss:$16 sps:$4 sm:$0xff]  }
 0x87a   : > { %9710 = vmatprep.subr.bf16.mxu1 %v13945_v9  ;;  %v14086_v9 = vld [vmem:[#allocation6 + $0x4] ss:$16 sps:$4 sm:$0xff]  }
 0x87d   : > { %9711 = vmatpush1.bf16.msra.mxu1 %v13943_v11  ;;  %v14039_v11 = vld [vmem:[#allocation4 + $0x110] ss:$8 sps:$4 sm:$0xff]  }
 0x87e   : > { %9712 = vmatprep.subr.bf16.mxu1 %v13948_v27  ;;  %v14089_v27 = vld [vmem:[#allocation6 + $0x24] ss:$16 sps:$4 sm:$0xff]  }
 0x881   : > { %9713 = vmatpush1.bf16.msra.mxu1 %v13946_v45  ;;  %v14044_v45 = vld [vmem:[#allocation4 + $0x124] ss:$8 sps:$4 sm:$0xff]  }
 0x882   : > { %9714 = vmatprep.subr.bf16.mxu1 %v13951_v1  ;;  %v14087_v1 = vld [vmem:[#allocation6 + $0x20] ss:$16 sps:$4 sm:$0xff]  }
 0x885   : > { %9715 = vmatpush1.bf16.msra.mxu1 %v13949_v39  ;;  %v14092_v39 = vld [vmem:[#allocation6 + $0x44] ss:$16 sps:$4 sm:$0xff]  }
 0x886   : > { %9716 = vmatprep.subr.bf16.mxu1 %v13954_v49  ;;  %v14042_v49 = vld [vmem:[#allocation4 + $0x120] ss:$8 sps:$4 sm:$0xff]  }
 0x889   : > { %9717 = vmatpush1.bf16.msra.mxu1 %v13952_v10  ;;  %v14047_v10 = vld [vmem:[#allocation4 + $0x134] ss:$8 sps:$4 sm:$0xff]  }
 0x88a   : > { %9718 = vmatprep.subr.bf16.mxu1 %v13957_v51  ;;  %v14090_v51 = vld [vmem:[#allocation6 + $0x40] ss:$16 sps:$4 sm:$0xff]  }
 0x88b   : > { %v9455_v22 = vpop.f32.mrb[0].mxu1 }
 0x88c   : > { %v9457_v23 = vpop.f32.mrb[1].mxu1  ;;  %v9456_v56 = vadd.f32 %v9455_v22, %v8124_v15  ;;  %v14093_v22 = vld [vmem:[#allocation6 + $0x60] ss:$16 sps:$4 sm:$0xff]   ;;  %v14071_v15 = vld [vmem:[#allocation4 + $0x1b4] ss:$8 sps:$4 sm:$0xff]  }
 0x88d   : > { %v9459_v29 = vpop.f32.mrb[2].mxu1  ;;  %9719 = vmatpush1.bf16.msra.mxu1 %v13955_v42  ;;  %v9458_v50 = vadd.f32 %v9457_v23, %v8128_v7  ;;  %v14095_v42 = vld [vmem:[#allocation6 + $0x64] ss:$16 sps:$4 sm:$0xff]   ;;  %v14114_v7 = vld [vmem:[#allocation6 + $0x140] ss:$16 sps:$4 sm:$0xff]  }
 0x88e   : > { %v9460_v53 = vpop.f32.mrb[3].mxu1  ;;  %9720 = vmatprep.subr.bf16.mxu1 %v13960_v30  ;;  %v14045_v30 = vld [vmem:[#allocation4 + $0x130] ss:$8 sps:$4 sm:$0xff]   ;;  %v14053_v23 = vld [vmem:[#allocation4 + $0x154] ss:$8 sps:$4 sm:$0xff]  }
 0x88f   : > { %v14101_v29 = vld [vmem:[#allocation6 + $0xa4] ss:$16 sps:$4 sm:$0xff]   ;;  %v14051_v53 = vld [vmem:[#allocation4 + $0x150] ss:$8 sps:$4 sm:$0xff]  }
 0x891   : > { %9721 = vmatpush1.bf16.msra.mxu1 %v13958_v36  ;;  %v14098_v36 = vld [vmem:[#allocation6 + $0x84] ss:$16 sps:$4 sm:$0xff]  }
 0x892   : > { %9722 = vmatprep.subr.bf16.mxu1 %v13963_v34  ;;  %v14096_v34 = vld [vmem:[#allocation6 + $0x80] ss:$16 sps:$4 sm:$0xff]  }
 0x895   : > { %9723 = vmatpush1.bf16.msra.mxu1 %v13961_v5  ;;  %v14099_v5 = vld [vmem:[#allocation6 + $0xa0] ss:$16 sps:$4 sm:$0xff]  }
 0x896   : > { %9724 = vmatprep.subr.bf16.mxu1 %v13966_v26  ;;  %v14054_v26 = vld [vmem:[#allocation4 + $0x160] ss:$8 sps:$4 sm:$0xff]  }
 0x899   : > { %9725 = vmatpush1.bf16.msra.mxu1 %v13964_v13  ;;  %v14102_v13 = vld [vmem:[#allocation6 + $0xc0] ss:$16 sps:$4 sm:$0xff]  }
 0x89a   : > { %9726 = vmatprep.subr.bf16.mxu1 %v13969_v44  ;;  %v14107_v44 = vld [vmem:[#allocation6 + $0xe4] ss:$16 sps:$4 sm:$0xff]  }
 0x89d   : > { %9727 = vmatpush1.bf16.msra.mxu1 %v13967_v41  ;;  %v14057_v41 = vld [vmem:[#allocation4 + $0x170] ss:$8 sps:$4 sm:$0xff]  }
 0x89e   : > { %9728 = vmatprep.subr.bf16.mxu1 %v13972_v37  ;;  %v14062_v37 = vld [vmem:[#allocation4 + $0x184] ss:$8 sps:$4 sm:$0xff]  }
 0x8a1   : > { %9729 = vmatpush1.bf16.msra.mxu1 %v13970_v35  ;;  %v14105_v35 = vld [vmem:[#allocation6 + $0xe0] ss:$16 sps:$4 sm:$0xff]  }
 0x8a2   : > { %9730 = vmatprep.subr.bf16.mxu1 %v13975_v19  ;;  %v14110_v19 = vld [vmem:[#allocation6 + $0x104] ss:$16 sps:$4 sm:$0xff]  }
 0x8a5   : > { %9731 = vmatpush1.bf16.msra.mxu1 %v13973_v6  ;;  %v14060_v6 = vld [vmem:[#allocation4 + $0x180] ss:$8 sps:$4 sm:$0xff]  }
 0x8a6   : > { %9732 = vmatprep.subr.bf16.mxu1 %v13978_v2  ;;  %v14065_v2 = vld [vmem:[#allocation4 + $0x194] ss:$8 sps:$4 sm:$0xff]  }
 0x8a9   : > { %9733 = vmatpush1.bf16.msra.mxu1 %v13976_v48  ;;  %v14108_v48 = vld [vmem:[#allocation6 + $0x100] ss:$16 sps:$4 sm:$0xff]  }
 0x8aa   : > { %9734 = vmatprep.subr.bf16.mxu1 %v13981_v28  ;;  %v14113_v28 = vld [vmem:[#allocation6 + $0x124] ss:$16 sps:$4 sm:$0xff]  }
 0x8ad   : > { %9735 = vmatpush1.bf16.msra.mxu1 %v13979_v16  ;;  %v14063_v16 = vld [vmem:[#allocation4 + $0x190] ss:$8 sps:$4 sm:$0xff]  }
 0x8ae   : > { %9736 = vmatprep.subr.bf16.mxu1 %v13984_v54  ;;  %v14068_v54 = vld [vmem:[#allocation4 + $0x1a4] ss:$8 sps:$4 sm:$0xff]  }
 0x8b1   : > { %9737 = vmatpush1.bf16.msra.mxu1 %v13982_v21  ;;  %v14111_v21 = vld [vmem:[#allocation6 + $0x120] ss:$16 sps:$4 sm:$0xff]  }
 0x8b2   : > { %9738 = vmatprep.subr.bf16.mxu1 %v13987_v62  ;;  %v14116_v62 = vld [vmem:[#allocation6 + $0x144] ss:$16 sps:$4 sm:$0xff]  }
 0x8b5   : > { %9739 = vmatpush1.bf16.msra.mxu1 %v13985_v24  ;;  %v14066_v24 = vld [vmem:[#allocation4 + $0x1a0] ss:$8 sps:$4 sm:$0xff]  }
 0x8b6   : > { %10645 = vmatprep.subr.bf16.mxu1 %v14086_v9  ;;  %v8132_v9 = vrot.slane %v17574_v63, %v16904_v17 }
 0x8b8   : > { %9741 = vmatmul.mubr.bf16.vlgmr.msra.gmra.mrb[4].mxu1 %v17377_v38 }
 0x8b9   : > { %10646 = vmatpush1.bf16.msra.mxu1 %v14084_v60  ;;  %v14081_v60 = vld [vmem:[#allocation4 + $0x1f0] ss:$8 sps:$4 sm:$0xff]  }
 0x8ba   : > { %10647 = vmatprep.subr.bf16.mxu1 %v14089_v27 }
 0x8bd   : > { %10648 = vmatpush1.bf16.msra.mxu1 %v14087_v1 }
 0x8be   : > { %10649 = vmatprep.subr.bf16.mxu1 %v14092_v39 }
 0x8c1   : > { %10650 = vmatpush1.bf16.msra.mxu1 %v14090_v51 }
 0x8c2   : > { %10651 = vmatprep.subr.bf16.mxu1 %v14095_v42 }
 0x8c5   : > { %10652 = vmatpush1.bf16.msra.mxu1 %v14093_v22  ;;  %v14128_v22 = vld [vmem:[#allocation6 + $0x1c4] ss:$16 sps:$4 sm:$0xff]  }
 0x8c6   : > { %10653 = vmatprep.subr.bf16.mxu1 %v14098_v36  ;;  %v14126_v36 = vld [vmem:[#allocation6 + $0x1c0] ss:$16 sps:$4 sm:$0xff]  }
 0x8c9   : > { %10654 = vmatpush1.bf16.msra.mxu1 %v14096_v34  ;;  %v14180_v34 = vld [vmem:[%s18424_s20] ss:$24 sps:$4 sm:$0xff]  }
 0x8ca   : > { %10655 = vmatprep.subr.bf16.mxu1 %v14101_v29  ;;  %v14182_v29 = vld [vmem:[%s18425_s13 + $0x4] ss:$24 sps:$4 sm:$0xff]  }
 0x8cd   : > { %10656 = vmatpush1.bf16.msra.mxu1 %v14099_v5  ;;  %v14194_v5 = vld [vmem:[%s18425_s13 + $0x64] ss:$24 sps:$4 sm:$0xff]  }
 0x8ce   : > { %10657 = vmatprep.subr.bf16.mxu1 %v14104_v18  ;;  %v14192_v18 = vld [vmem:[%s18425_s13 + $0x60] ss:$24 sps:$4 sm:$0xff]  }
 0x8d1   : > { %10658 = vmatpush1.bf16.msra.mxu1 %v14102_v13  ;;  %v14206_v13 = vld [vmem:[%s18425_s13 + $0xc4] ss:$24 sps:$4 sm:$0xff]  }
 0x8d2   : > { %10659 = vmatprep.subr.bf16.mxu1 %v14107_v44  ;;  %v14204_v44 = vld [vmem:[%s18425_s13 + $0xc0] ss:$24 sps:$4 sm:$0xff]  }
 0x8d5   : > { %10660 = vmatpush1.bf16.msra.mxu1 %v14105_v35  ;;  %v14218_v35 = vld [vmem:[%s18425_s13 + $0x124] ss:$24 sps:$4 sm:$0xff]  }
 0x8d6   : > { %10661 = vmatprep.subr.bf16.mxu1 %v14110_v19  ;;  %v14216_v19 = vld [vmem:[%s18425_s13 + $0x120] ss:$24 sps:$4 sm:$0xff]  }
 0x8d9   : > { %10662 = vmatpush1.bf16.msra.mxu1 %v14108_v48  ;;  %v14230_v48 = vld [vmem:[%s18425_s13 + $0x184] ss:$24 sps:$4 sm:$0xff]  }
 0x8da   : > { %10663 = vmatprep.subr.bf16.mxu1 %v14113_v28  ;;  %v14228_v28 = vld [vmem:[%s18425_s13 + $0x180] ss:$24 sps:$4 sm:$0xff]  }
 0x8dd   : > { %10664 = vmatpush1.bf16.msra.mxu1 %v14111_v21  ;;  %v14242_v21 = vld [vmem:[%s18425_s13 + $0x1e4] ss:$24 sps:$4 sm:$0xff]  }
 0x8de   : > { %10665 = vmatprep.subr.bf16.mxu1 %v14116_v62  ;;  %v14240_v62 = vld [vmem:[%s18425_s13 + $0x1e0] ss:$24 sps:$4 sm:$0xff]  }
 0x8e1   : > { %10666 = vmatpush1.bf16.msra.mxu1 %v14114_v7  ;;  %v14254_v7 = vld [vmem:[%s18425_s13 + $0x244] ss:$24 sps:$4 sm:$0xff]  }
 0x90c   : > { %v9578_v12 = vpop.f32.mrb[0].mxu0 }
 0x90d   : > { %v13464_v61 = vadd.f32 %v9578_v12, %v9456_v56  ;;  %v9580_v58 = vpop.f32.mrb[1].mxu0  ;;  %v14119_v56 = vld [vmem:[#allocation6 + $0x164] ss:$16 sps:$4 sm:$0xff]  }
 0x90e   : > { %v13466_v57 = vadd.f32 %v9580_v58, %v9458_v50  ;;  %v9582_v8 = vpop.f32.mrb[2].mxu0  ;;  %v14069_v50 = vld [vmem:[#allocation4 + $0x1b0] ss:$8 sps:$4 sm:$0xff]   ;;  %v14074_v12 = vld [vmem:[#allocation4 + $0x1c4] ss:$8 sps:$4 sm:$0xff]   ;;  %10667 = vmatprep.subr.bf16.mxu1 %v14119_v56 }
 0x90f   : > { %v9749_v3 = vmax.f32 %v13464_v61, 0.0  ;;  %v9583_v38 = vpop.f32.mrb[3].mxu0  ;;  %v14117_v61 = vld [vmem:[#allocation6 + $0x160] ss:$16 sps:$4 sm:$0xff]   ;;  %v14122_v58 = vld [vmem:[#allocation6 + $0x184] ss:$16 sps:$4 sm:$0xff]  }
 0x910   : > { %v9750_v32 = vmax.f32 %v13466_v57, 0.0  ;;  %v14072_v57 = vld [vmem:[#allocation4 + $0x1c0] ss:$8 sps:$4 sm:$0xff]   ;;  %v14077_v8 = vld [vmem:[#allocation4 + $0x1d4] ss:$8 sps:$4 sm:$0xff]   ;;  %10668 = vmatpush1.bf16.msra.mxu1 %v14117_v61 }
 0x911   : > { %v9753_v31 = vpack.c.bf16 %v9749_v3, %v9749_v3  ;;  %v14120_v3 = vld [vmem:[#allocation6 + $0x180] ss:$16 sps:$4 sm:$0xff]   ;;  %10669 = vmatprep.subr.bf16.mxu1 %v14122_v58  ;;  %v14125_v38 = vld [vmem:[#allocation6 + $0x1a4] ss:$16 sps:$4 sm:$0xff]  }
 0x912   : > { %v9754_v4 = vpack.c.bf16 %v9750_v32, %v9750_v32  ;;  %v14075_v32 = vld [vmem:[#allocation4 + $0x1d0] ss:$8 sps:$4 sm:$0xff]  }
 0x913   : > { %v14252_v56 = vld [vmem:[%s18425_s13 + $0x240] ss:$24 sps:$4 sm:$0xff]   ;;  %v14258_v61 = vld [vmem:[%s18425_s13 + $0x270] ss:$24 sps:$4 sm:$0xff]  }
 0x914   : > { %10185 = vmatprep.mubr.bf16.mxu0 %v9754_v4  ;;  %v14080_v4 = vld [vmem:[#allocation4 + $0x1e4] ss:$8 sps:$4 sm:$0xff]   ;;  %10670 = vmatpush1.bf16.msra.mxu1 %v14120_v3 }
 0x915   : > { %10186 = vmatmul.mubr.bf16.vlgmr.msra.gmra.mrb[4].mxu0 %v9753_v31  ;;  %10671 = vmatprep.subr.bf16.mxu1 %v14125_v38  ;;  %v14078_v31 = vld [vmem:[#allocation4 + $0x1e0] ss:$8 sps:$4 sm:$0xff]  }
 0x916   : > { %10195 = vmatpush1.bf16.msra.mxu0 %v14036_v14  ;;  %v14123_v14 = vld [vmem:[#allocation6 + $0x1a0] ss:$16 sps:$4 sm:$0xff]  }
 0x917   : > { %10196 = vmatprep.subr.bf16.mxu0 %v14041_v0  ;;  %v14083_v0 = vld [vmem:[#allocation4 + $0x1f4] ss:$8 sps:$4 sm:$0xff]  }
 0x918   : > { %10672 = vmatpush1.bf16.msra.mxu1 %v14123_v14 }
 0x919   : > { %10673 = vmatprep.subr.bf16.mxu1 %v14128_v22  ;;  %v14152_v22 = vld [vmem:[#allocation6 + $0xcc] ss:$16 sps:$4 sm:$0xff]  }
 0x91a   : > { %10197 = vmatpush1.bf16.msra.mxu0 %v14039_v11  ;;  %v8136_v11 = vrot.slane %v17574_v63, %v16871_v55  ;;  %v14134_v63 = vld [vmem:[#allocation6 + $0xc] ss:$16 sps:$4 sm:$0xff]  }
 0x91b   : > { %10198 = vmatprep.subr.bf16.mxu0 %v14044_v45 }
 0x91c   : > { %10674 = vmatpush1.bf16.msra.mxu1 %v14126_v36  ;;  %v14150_v36 = vld [vmem:[#allocation6 + $0xc8] ss:$16 sps:$4 sm:$0xff]  }
 0x91e   : > { %10199 = vmatpush1.bf16.msra.mxu0 %v14042_v49 }
 0x91f   : > { %10200 = vmatprep.subr.bf16.mxu0 %v14047_v10 }
 0x922   : > { %10201 = vmatpush1.bf16.msra.mxu0 %v14045_v30 }
 0x923   : > { %10202 = vmatprep.subr.bf16.mxu0 %v14050_v52 }
 0x926   : > { %10203 = vmatpush1.bf16.msra.mxu0 %v14048_v20  ;;  %v14131_v20 = vld [vmem:[#allocation6 + $0x1e4] ss:$16 sps:$4 sm:$0xff]  }
 0x927   : > { %10204 = vmatprep.subr.bf16.mxu0 %v14053_v23  ;;  %v14129_v23 = vld [vmem:[#allocation6 + $0x1e0] ss:$16 sps:$4 sm:$0xff]   ;;  %10675 = vmatprep.subr.bf16.mxu1 %v14131_v20  ;;  %v14155_v20 = vld [vmem:[#allocation6 + $0xec] ss:$16 sps:$4 sm:$0xff]  }
 0x928   : > { %10676 = vmatpush1.bf16.msra.mxu1 %v14129_v23  ;;  %v14153_v23 = vld [vmem:[#allocation6 + $0xe8] ss:$16 sps:$4 sm:$0xff]  }
 0x929   : > { %10686 = vmatprep.subr.bf16.mxu1 %v14134_v63  ;;  %v14158_v63 = vld [vmem:[#allocation6 + $0x10c] ss:$16 sps:$4 sm:$0xff]  }
 0x92a   : > { %10205 = vmatpush1.bf16.msra.mxu0 %v14051_v53  ;;  %v14188_v53 = vld [vmem:[%s18425_s13 + $0x34] ss:$24 sps:$4 sm:$0xff]  }
 0x92b   : > { %10206 = vmatprep.subr.bf16.mxu0 %v14056_v46  ;;  %v14186_v46 = vld [vmem:[%s18425_s13 + $0x30] ss:$24 sps:$4 sm:$0xff]  }
 0x92e   : > { %10207 = vmatpush1.bf16.msra.mxu0 %v14054_v26  ;;  %v14200_v26 = vld [vmem:[%s18425_s13 + $0x94] ss:$24 sps:$4 sm:$0xff]  }
 0x92f   : > { %10208 = vmatprep.subr.bf16.mxu0 %v14059_v59  ;;  %v14198_v59 = vld [vmem:[%s18425_s13 + $0x90] ss:$24 sps:$4 sm:$0xff]  }
 0x932   : > { %10209 = vmatpush1.bf16.msra.mxu0 %v14057_v41  ;;  %v14212_v41 = vld [vmem:[%s18425_s13 + $0xf4] ss:$24 sps:$4 sm:$0xff]  }
 0x933   : > { %10210 = vmatprep.subr.bf16.mxu0 %v14062_v37  ;;  %v14210_v37 = vld [vmem:[%s18425_s13 + $0xf0] ss:$24 sps:$4 sm:$0xff]  }
 0x936   : > { %10211 = vmatpush1.bf16.msra.mxu0 %v14060_v6  ;;  %v14224_v6 = vld [vmem:[%s18425_s13 + $0x154] ss:$24 sps:$4 sm:$0xff]  }
 0x937   : > { %10212 = vmatprep.subr.bf16.mxu0 %v14065_v2  ;;  %v14222_v2 = vld [vmem:[%s18425_s13 + $0x150] ss:$24 sps:$4 sm:$0xff]  }
 0x93a   : > { %10213 = vmatpush1.bf16.msra.mxu0 %v14063_v16  ;;  %v14236_v16 = vld [vmem:[%s18425_s13 + $0x1b4] ss:$24 sps:$4 sm:$0xff]  }
 0x93b   : > { %10214 = vmatprep.subr.bf16.mxu0 %v14068_v54  ;;  %v14234_v54 = vld [vmem:[%s18425_s13 + $0x1b0] ss:$24 sps:$4 sm:$0xff]  }
 0x93e   : > { %10215 = vmatpush1.bf16.msra.mxu0 %v14066_v24  ;;  %v14248_v24 = vld [vmem:[%s18425_s13 + $0x214] ss:$24 sps:$4 sm:$0xff]  }
 0x93f   : > { %10216 = vmatprep.subr.bf16.mxu0 %v14071_v15  ;;  %v14246_v15 = vld [vmem:[%s18425_s13 + $0x210] ss:$24 sps:$4 sm:$0xff]  }
 0x942   : > { %10217 = vmatpush1.bf16.msra.mxu0 %v14069_v50  ;;  %v9821_v50 = vld [vmem:[%s18426_s21] sm:$0x3] }
 0x943   : > { %10218 = vmatprep.subr.bf16.mxu0 %v14074_v12  ;;  %v14260_v12 = vld [vmem:[%s18425_s13 + $0x274] ss:$24 sps:$4 sm:$0xff]   ;;  %v9826_v58 = vrot.slane %v9821_v50, %v16901_v43 }
 0x946   : > { %10219 = vmatpush1.bf16.msra.mxu0 %v14072_v57  ;;  %v9830_v57 = vrot.slane %v9821_v50, %v16868_v33  ;;  %v14213_v50 = vld [vmem:[%s18425_s13 + $0xf8] ss:$24 sps:$4 sm:$0xff]  }
 0x947   : > { %10220 = vmatprep.subr.bf16.mxu0 %v14077_v8 }
 0x94a   : > { %10221 = vmatpush1.bf16.msra.mxu0 %v14075_v32 }
 0x94b   : > { %10222 = vmatprep.subr.bf16.mxu0 %v14080_v4 }
 0x94e   : > { %10223 = vmatpush1.bf16.msra.mxu0 %v14078_v31 }
 0x94f   : > { %10224 = vmatprep.subr.bf16.mxu0 %v14083_v0 }
 0x952   : > { %10225 = vmatpush1.bf16.msra.mxu0 %v14081_v60 }
 0x953   : > { %11919 = vmatprep.subr.bf16.mxu0 %v14182_v29  ;;  %v14161_v29 = vld [vmem:[#allocation6 + $0x12c] ss:$16 sps:$4 sm:$0xff]  }
 0x98b   : > { %v9742_v27 = vpop.f32.mrb[4].mxu1 }
 0x98c   : > { %v13467_v45 = vadd.f32 %v9742_v27, %v8132_v9  ;;  %v9744_v1 = vpop.f32.mrb[5].mxu1  ;;  %v14132_v9 = vld [vmem:[#allocation6 + $0x8] ss:$16 sps:$4 sm:$0xff]   ;;  %v14137_v27 = vld [vmem:[#allocation6 + $0x2c] ss:$16 sps:$4 sm:$0xff]  }
 0x98d   : > { %v13468_v39 = vadd.f32 %v9744_v1, %v8136_v11  ;;  %v9746_v49 = vpop.f32.mrb[6].mxu1  ;;  %v14140_v1 = vld [vmem:[#allocation6 + $0x4c] ss:$16 sps:$4 sm:$0xff]  }
 0x98e   : > { %v9751_v10 = vmax.f32 %v13467_v45, 0.0  ;;  %v9747_v51 = vpop.f32.mrb[7].mxu1  ;;  %v14135_v45 = vld [vmem:[#allocation6 + $0x28] ss:$16 sps:$4 sm:$0xff]   ;;  %v14143_v49 = vld [vmem:[#allocation6 + $0x6c] ss:$16 sps:$4 sm:$0xff]  }
 0x98f   : > { %v9752_v42 = vmax.f32 %v13468_v39, 0.0  ;;  %v14138_v39 = vld [vmem:[#allocation6 + $0x48] ss:$16 sps:$4 sm:$0xff]   ;;  %v14146_v51 = vld [vmem:[#allocation6 + $0x8c] ss:$16 sps:$4 sm:$0xff]  }
 0x990   : > { %v9755_v52 = vpack.c.bf16 %v9751_v10, %v9751_v10  ;;  %v14141_v10 = vld [vmem:[#allocation6 + $0x68] ss:$16 sps:$4 sm:$0xff]  }
 0x991   : > { %v9756_v30 = vpack.c.bf16 %v9752_v42, %v9752_v42  ;;  %v14144_v42 = vld [vmem:[#allocation6 + $0x88] ss:$16 sps:$4 sm:$0xff]  }
 0x993   : > { %10226 = vmatprep.mubr.bf16.mxu0 %v9756_v30  ;;  %v14149_v30 = vld [vmem:[#allocation6 + $0xac] ss:$16 sps:$4 sm:$0xff]  }
 0x994   : > { %10227 = vmatmul.mubr.bf16.vlgmr.msra.gmra.mrb[4].mxu0 %v9755_v52  ;;  %v14147_v52 = vld [vmem:[#allocation6 + $0xa8] ss:$16 sps:$4 sm:$0xff]  }
 0x995   : > { %11920 = vmatpush1.bf16.msra.mxu0 %v14180_v34  ;;  %v14156_v34 = vld [vmem:[#allocation6 + $0x108] ss:$16 sps:$4 sm:$0xff]  }
 0x996   : > { %11921 = vmatprep.subr.bf16.mxu0 %v14188_v53  ;;  %v14159_v53 = vld [vmem:[#allocation6 + $0x128] ss:$16 sps:$4 sm:$0xff]  }
 0x999   : > { %11922 = vmatpush1.bf16.msra.mxu0 %v14186_v46  ;;  %v14164_v46 = vld [vmem:[#allocation6 + $0x14c] ss:$16 sps:$4 sm:$0xff]  }
 0x99a   : > { %11923 = vmatprep.subr.bf16.mxu0 %v14194_v5  ;;  %v14162_v5 = vld [vmem:[#allocation6 + $0x148] ss:$16 sps:$4 sm:$0xff]  }
 0x99d   : > { %11924 = vmatpush1.bf16.msra.mxu0 %v14192_v18  ;;  %v14167_v18 = vld [vmem:[#allocation6 + $0x16c] ss:$16 sps:$4 sm:$0xff]  }
 0x99e   : > { %11925 = vmatprep.subr.bf16.mxu0 %v14200_v26  ;;  %v14165_v26 = vld [vmem:[#allocation6 + $0x168] ss:$16 sps:$4 sm:$0xff]  }
 0x9a1   : > { %11926 = vmatpush1.bf16.msra.mxu0 %v14198_v59  ;;  %v14170_v59 = vld [vmem:[#allocation6 + $0x18c] ss:$16 sps:$4 sm:$0xff]  }
 0x9a2   : > { %11927 = vmatprep.subr.bf16.mxu0 %v14206_v13  ;;  %v14168_v13 = vld [vmem:[#allocation6 + $0x188] ss:$16 sps:$4 sm:$0xff]  }
 0x9a5   : > { %11928 = vmatpush1.bf16.msra.mxu0 %v14204_v44  ;;  %v14173_v44 = vld [vmem:[#allocation6 + $0x1ac] ss:$16 sps:$4 sm:$0xff]  }
 0x9a6   : > { %11929 = vmatprep.subr.bf16.mxu0 %v14212_v41  ;;  %v14171_v41 = vld [vmem:[#allocation6 + $0x1a8] ss:$16 sps:$4 sm:$0xff]  }
 0x9a9   : > { %11930 = vmatpush1.bf16.msra.mxu0 %v14210_v37  ;;  %v14176_v37 = vld [vmem:[#allocation6 + $0x1cc] ss:$16 sps:$4 sm:$0xff]  }
 0x9aa   : > { %11931 = vmatprep.subr.bf16.mxu0 %v14218_v35  ;;  %v14174_v35 = vld [vmem:[#allocation6 + $0x1c8] ss:$16 sps:$4 sm:$0xff]  }
 0x9ad   : > { %11932 = vmatpush1.bf16.msra.mxu0 %v14216_v19  ;;  %v14179_v19 = vld [vmem:[#allocation6 + $0x1ec] ss:$16 sps:$4 sm:$0xff]  }
 0x9ae   : > { %11933 = vmatprep.subr.bf16.mxu0 %v14224_v6  ;;  %v14177_v6 = vld [vmem:[#allocation6 + $0x1e8] ss:$16 sps:$4 sm:$0xff]  }
 0x9b1   : > { %11934 = vmatpush1.bf16.msra.mxu0 %v14222_v2  ;;  %v14185_v2 = vld [vmem:[%s18425_s13 + $0xc] ss:$24 sps:$4 sm:$0xff]  }
 0x9b2   : > { %11935 = vmatprep.subr.bf16.mxu0 %v14230_v48  ;;  %v14183_v48 = vld [vmem:[%s18425_s13 + $0x8] ss:$24 sps:$4 sm:$0xff]  }
 0x9b5   : > { %11936 = vmatpush1.bf16.msra.mxu0 %v14228_v28  ;;  %v14191_v28 = vld [vmem:[%s18425_s13 + $0x3c] ss:$24 sps:$4 sm:$0xff]  }
 0x9b6   : > { %11937 = vmatprep.subr.bf16.mxu0 %v14236_v16  ;;  %v14189_v16 = vld [vmem:[%s18425_s13 + $0x38] ss:$24 sps:$4 sm:$0xff]  }
 0x9b9   : > { %11938 = vmatpush1.bf16.msra.mxu0 %v14234_v54  ;;  %v14197_v54 = vld [vmem:[%s18425_s13 + $0x6c] ss:$24 sps:$4 sm:$0xff]  }
 0x9ba   : > { %11939 = vmatprep.subr.bf16.mxu0 %v14242_v21  ;;  %v14195_v21 = vld [vmem:[%s18425_s13 + $0x68] ss:$24 sps:$4 sm:$0xff]  }
 0x9bd   : > { %11940 = vmatpush1.bf16.msra.mxu0 %v14240_v62  ;;  %v14203_v62 = vld [vmem:[%s18425_s13 + $0x9c] ss:$24 sps:$4 sm:$0xff]  }
 0x9be   : > { %11941 = vmatprep.subr.bf16.mxu0 %v14248_v24  ;;  %v14201_v24 = vld [vmem:[%s18425_s13 + $0x98] ss:$24 sps:$4 sm:$0xff]  }
 0x9c1   : > { %11942 = vmatpush1.bf16.msra.mxu0 %v14246_v15  ;;  %v14209_v15 = vld [vmem:[%s18425_s13 + $0xcc] ss:$24 sps:$4 sm:$0xff]  }
 0x9c2   : > { %11943 = vmatprep.subr.bf16.mxu0 %v14254_v7  ;;  %v14207_v7 = vld [vmem:[%s18425_s13 + $0xc8] ss:$24 sps:$4 sm:$0xff]  }
 0x9c5   : > { %11944 = vmatpush1.bf16.msra.mxu0 %v14252_v56  ;;  %v14215_v56 = vld [vmem:[%s18425_s13 + $0xfc] ss:$24 sps:$4 sm:$0xff]  }
 0x9c6   : > { %11945 = vmatprep.subr.bf16.mxu0 %v14260_v12  ;;  %v14221_v12 = vld [vmem:[%s18425_s13 + $0x12c] ss:$24 sps:$4 sm:$0xff]  }
 0x9c9   : > { %11946 = vmatpush1.bf16.msra.mxu0 %v14258_v61  ;;  %v14266_v61 = vld [vmem:[%s18425_s13 + $0x2a4] ss:$24 sps:$4 sm:$0xff]  }
 0x9ca   : > { %11947 = vmatprep.subr.bf16.mxu0 %v14266_v61  ;;  %v14311_v61 = vld [vmem:[%s18425_s13 + $0x3fc] ss:$24 sps:$4 sm:$0xff]  }
 0xa67   : > { %v10228_v8 = vpop.f32.mrb[4].mxu0 }
 0xa68   : > { %v13469_v3 = vadd.f32 %v10228_v8, %v9826_v58  ;;  %v10230_v38 = vpop.f32.mrb[5].mxu0  ;;  %v14264_v58 = vld [vmem:[%s18425_s13 + $0x2a0] ss:$24 sps:$4 sm:$0xff]   ;;  %v14227_v8 = vld [vmem:[%s18425_s13 + $0x15c] ss:$24 sps:$4 sm:$0xff]  }
 0xa69   : > { %v13470_v32 = vadd.f32 %v10230_v38, %v9830_v57  ;;  %v10232_v4 = vpop.f32.mrb[6].mxu0  ;;  %v14219_v57 = vld [vmem:[%s18425_s13 + $0x128] ss:$24 sps:$4 sm:$0xff]   ;;  %11948 = vmatpush1.bf16.msra.mxu0 %v14264_v58 }
 0xa6a   : > { %v10235_v14 = vmax.f32 %v13469_v3, 0.0  ;;  %v10233_v31 = vpop.f32.mrb[7].mxu0  ;;  %v14272_v3 = vld [vmem:[%s18425_s13 + $0x2d4] ss:$24 sps:$4 sm:$0xff]   ;;  %v14270_v38 = vld [vmem:[%s18425_s13 + $0x2d0] ss:$24 sps:$4 sm:$0xff]  }
 0xa6b   : > { %v10236_v0 = vmax.f32 %v13470_v32, 0.0  ;;  %11949 = vmatprep.subr.bf16.mxu0 %v14272_v3  ;;  %v14225_v32 = vld [vmem:[%s18425_s13 + $0x158] ss:$24 sps:$4 sm:$0xff]   ;;  %v14233_v4 = vld [vmem:[%s18425_s13 + $0x18c] ss:$24 sps:$4 sm:$0xff]  }
 0xa6c   : > { %v17673_v11 = vpack.c.bf16 %v10235_v14, %v10235_v14  ;;  %v14278_v14 = vld [vmem:[%s18425_s13 + $0x304] ss:$24 sps:$4 sm:$0xff]   ;;  %v14231_v31 = vld [vmem:[%s18425_s13 + $0x188] ss:$24 sps:$4 sm:$0xff]  }
 0xa6d   : > { %v10238_v60 = vpack.c.bf16 %v10236_v0, %v10236_v0  ;;  %11950 = vmatpush1.bf16.msra.mxu0 %v14270_v38  ;;  %v14239_v0 = vld [vmem:[%s18425_s13 + $0x1bc] ss:$24 sps:$4 sm:$0xff]   ;;  %v14306_v58 = vld [vmem:[%s18425_s13 + $0x3f0] ss:$24 sps:$4 sm:$0xff]   ;;  %v14317_v3 = vld [vmem:[%s18425_s13 + $0x42c] ss:$24 sps:$4 sm:$0xff]  }
 0xa6e   : > { %11960 = vmatprep.subr.bf16.mxu0 %v14278_v14  ;;  %v14312_v38 = vld [vmem:[%s18425_s13 + $0x420] ss:$24 sps:$4 sm:$0xff]   ;;  %v14323_v14 = vld [vmem:[%s18425_s13 + $0x45c] ss:$24 sps:$4 sm:$0xff]  }
 0xa6f   : > { %10677 = vmatprep.mubr.bf16.mxu1 %v10238_v60 }
 0xa70   : > { %10678 = vmatmul.mubr.bf16.vlgmr.msra.gmra.mrb[8].mxu1 %v17673_v11 }
 0xa71   : > { %10687 = vmatpush1.bf16.msra.mxu1 %v14132_v9  ;;  %10718 = vmatprep.mubr.bf16.mxu1 %v10238_v60  ;;  %v14237_v60 = vld [vmem:[%s18425_s13 + $0x1b8] ss:$24 sps:$4 sm:$0xff]   ;;  %v14245_v9 = vld [vmem:[%s18425_s13 + $0x1ec] ss:$24 sps:$4 sm:$0xff]  }
 0xa72   : > { %10688 = vmatprep.subr.bf16.mxu1 %v14137_v27  ;;  %v14251_v27 = vld [vmem:[%s18425_s13 + $0x21c] ss:$24 sps:$4 sm:$0xff]  }
 0xa75   : > { %10689 = vmatpush1.bf16.msra.mxu1 %v14135_v45  ;;  %v14249_v45 = vld [vmem:[%s18425_s13 + $0x218] ss:$24 sps:$4 sm:$0xff]  }
 0xa76   : > { %10690 = vmatprep.subr.bf16.mxu1 %v14140_v1  ;;  %v14257_v1 = vld [vmem:[%s18425_s13 + $0x24c] ss:$24 sps:$4 sm:$0xff]  }
 0xa79   : > { %10691 = vmatpush1.bf16.msra.mxu1 %v14138_v39  ;;  %v14255_v39 = vld [vmem:[%s18425_s13 + $0x248] ss:$24 sps:$4 sm:$0xff]  }
 0xa7a   : > { %10692 = vmatprep.subr.bf16.mxu1 %v14143_v49  ;;  %v14263_v49 = vld [vmem:[%s18425_s13 + $0x27c] ss:$24 sps:$4 sm:$0xff]  }
 0xa7d   : > { %10693 = vmatpush1.bf16.msra.mxu1 %v14141_v10  ;;  %v14261_v10 = vld [vmem:[%s18425_s13 + $0x278] ss:$24 sps:$4 sm:$0xff]  }
 0xa7e   : > { %10694 = vmatprep.subr.bf16.mxu1 %v14146_v51  ;;  %v14269_v51 = vld [vmem:[%s18425_s13 + $0x2ac] ss:$24 sps:$4 sm:$0xff]  }
 0xa81   : > { %10695 = vmatpush1.bf16.msra.mxu1 %v14144_v42  ;;  %v14267_v42 = vld [vmem:[%s18425_s13 + $0x2a8] ss:$24 sps:$4 sm:$0xff]  }
 0xa82   : > { %10696 = vmatprep.subr.bf16.mxu1 %v14149_v30  ;;  %v14275_v30 = vld [vmem:[%s18425_s13 + $0x2dc] ss:$24 sps:$4 sm:$0xff]  }
 0xa85   : > { %10697 = vmatpush1.bf16.msra.mxu1 %v14147_v52  ;;  %v14273_v52 = vld [vmem:[%s18425_s13 + $0x2d8] ss:$24 sps:$4 sm:$0xff]  }
 0xa86   : > { %10698 = vmatprep.subr.bf16.mxu1 %v14152_v22  ;;  %v14281_v22 = vld [vmem:[%s18425_s13 + $0x30c] ss:$24 sps:$4 sm:$0xff]  }
 0xa89   : > { %10699 = vmatpush1.bf16.msra.mxu1 %v14150_v36  ;;  %v17794_v36 = vld [vmem:[%s18427_s14] sm:$0xf]  ;;  %s18428_s14 = sld [smem:[#allocation54_spill]] }
 0xa8a   : > { %10700 = vmatprep.subr.bf16.mxu1 %v14155_v20  ;;  %v10308_v20 = vrot.slane %v17794_v36, %v16901_v43 }
 0xa8d   : > { %10701 = vmatpush1.bf16.msra.mxu1 %v14153_v23  ;;  %v10312_v23 = vrot.slane %v17794_v36, %v16868_v33 }
 0xa8e   : > { %10702 = vmatprep.subr.bf16.mxu1 %v14158_v63 }
 0xa91   : > { %10703 = vmatpush1.bf16.msra.mxu1 %v14156_v34 }
 0xa92   : > { %10704 = vmatprep.subr.bf16.mxu1 %v14161_v29 }
 0xa95   : > { %10705 = vmatpush1.bf16.msra.mxu1 %v14159_v53 }
 0xa96   : > { %10706 = vmatprep.subr.bf16.mxu1 %v14164_v46 }
 0xa99   : > { %10707 = vmatpush1.bf16.msra.mxu1 %v14162_v5 }
 0xa9a   : > { %10708 = vmatprep.subr.bf16.mxu1 %v14167_v18 }
 0xa9d   : > { %10709 = vmatpush1.bf16.msra.mxu1 %v14165_v26 }
 0xa9e   : > { %10710 = vmatprep.subr.bf16.mxu1 %v14170_v59 }
 0xaa1   : > { %10711 = vmatpush1.bf16.msra.mxu1 %v14168_v13  ;;  %v14276_v13 = vld [vmem:[%s18425_s13 + $0x300] ss:$24 sps:$4 sm:$0xff]  }
 0xaa2   : > { %10712 = vmatprep.subr.bf16.mxu1 %v14173_v44  ;;  %v14279_v44 = vld [vmem:[%s18425_s13 + $0x308] ss:$24 sps:$4 sm:$0xff]  }
 0xaa5   : > { %10713 = vmatpush1.bf16.msra.mxu1 %v14171_v41 }
 0xaa6   : > { %10714 = vmatprep.subr.bf16.mxu1 %v14176_v37  ;;  %v14284_v37 = vld [vmem:[%s18425_s13 + $0x334] ss:$24 sps:$4 sm:$0xff]  }
 0xaa9   : > { %10715 = vmatpush1.bf16.msra.mxu1 %v14174_v35  ;;  %v14287_v35 = vld [vmem:[%s18425_s13 + $0x33c] ss:$24 sps:$4 sm:$0xff]  }
 0xaaa   : > { %10716 = vmatprep.subr.bf16.mxu1 %v14179_v19  ;;  %v14282_v19 = vld [vmem:[%s18425_s13 + $0x330] ss:$24 sps:$4 sm:$0xff]  }
 0xaad   : > { %10717 = vmatpush1.bf16.msra.mxu1 %v14177_v6  ;;  %v14285_v6 = vld [vmem:[%s18425_s13 + $0x338] ss:$24 sps:$4 sm:$0xff]  }
 0xaae   : > { %12001 = vmatprep.subr.bf16.mxu1 %v14185_v2  ;;  %v14290_v2 = vld [vmem:[%s18425_s13 + $0x364] ss:$24 sps:$4 sm:$0xff]  }
 0xab0   : > { %10719 = vmatmul.mubr.bf16.vlgmr.msra.gmra.mrb[12].mxu1 %v17673_v11  ;;  %v14243_v11 = vld [vmem:[%s18425_s13 + $0x1e8] ss:$24 sps:$4 sm:$0xff]  }
 0xab1   : > { %12002 = vmatpush1.bf16.msra.mxu1 %v14183_v48  ;;  %v14293_v48 = vld [vmem:[%s18425_s13 + $0x36c] ss:$24 sps:$4 sm:$0xff]  }
 0xab2   : > { %12003 = vmatprep.subr.bf16.mxu1 %v14191_v28  ;;  %v14288_v28 = vld [vmem:[%s18425_s13 + $0x360] ss:$24 sps:$4 sm:$0xff]  }
 0xab5   : > { %12004 = vmatpush1.bf16.msra.mxu1 %v14189_v16  ;;  %v14291_v16 = vld [vmem:[%s18425_s13 + $0x368] ss:$24 sps:$4 sm:$0xff]  }
 0xab6   : > { %12005 = vmatprep.subr.bf16.mxu1 %v14197_v54  ;;  %v14296_v54 = vld [vmem:[%s18425_s13 + $0x394] ss:$24 sps:$4 sm:$0xff]  }
 0xab9   : > { %12006 = vmatpush1.bf16.msra.mxu1 %v14195_v21  ;;  %v14299_v21 = vld [vmem:[%s18425_s13 + $0x39c] ss:$24 sps:$4 sm:$0xff]  }
 0xaba   : > { %12007 = vmatprep.subr.bf16.mxu1 %v14203_v62  ;;  %v14294_v62 = vld [vmem:[%s18425_s13 + $0x390] ss:$24 sps:$4 sm:$0xff]  }
 0xabd   : > { %12008 = vmatpush1.bf16.msra.mxu1 %v14201_v24  ;;  %v14297_v24 = vld [vmem:[%s18425_s13 + $0x398] ss:$24 sps:$4 sm:$0xff]  }
 0xabe   : > { %12009 = vmatprep.subr.bf16.mxu1 %v14209_v15  ;;  %v14302_v15 = vld [vmem:[%s18425_s13 + $0x3c4] ss:$24 sps:$4 sm:$0xff]  }
 0xac1   : > { %12010 = vmatpush1.bf16.msra.mxu1 %v14207_v7  ;;  %v14305_v7 = vld [vmem:[%s18425_s13 + $0x3cc] ss:$24 sps:$4 sm:$0xff]  }
 0xac2   : > { %12011 = vmatprep.subr.bf16.mxu1 %v14215_v56  ;;  %v14300_v56 = vld [vmem:[%s18425_s13 + $0x3c0] ss:$24 sps:$4 sm:$0xff]  }
 0xac5   : > { %12012 = vmatpush1.bf16.msra.mxu1 %v14213_v50  ;;  %v14303_v50 = vld [vmem:[%s18425_s13 + $0x3c8] ss:$24 sps:$4 sm:$0xff]  }
 0xac6   : > { %12013 = vmatprep.subr.bf16.mxu1 %v14221_v12  ;;  %v14308_v12 = vld [vmem:[%s18425_s13 + $0x3f4] ss:$24 sps:$4 sm:$0xff]  }
 0xac9   : > { %12014 = vmatpush1.bf16.msra.mxu1 %v14219_v57  ;;  %v14309_v57 = vld [vmem:[%s18425_s13 + $0x3f8] ss:$24 sps:$4 sm:$0xff]  }
 0xaca   : > { %12015 = vmatprep.subr.bf16.mxu1 %v14227_v8  ;;  %v14314_v8 = vld [vmem:[%s18425_s13 + $0x424] ss:$24 sps:$4 sm:$0xff]  }
 0xacd   : > { %12016 = vmatpush1.bf16.msra.mxu1 %v14225_v32  ;;  %v14315_v32 = vld [vmem:[%s18425_s13 + $0x428] ss:$24 sps:$4 sm:$0xff]  }
 0xace   : > { %12017 = vmatprep.subr.bf16.mxu1 %v14233_v4  ;;  %v14320_v4 = vld [vmem:[%s18425_s13 + $0x454] ss:$24 sps:$4 sm:$0xff]  }
 0xad1   : > { %12018 = vmatpush1.bf16.msra.mxu1 %v14231_v31  ;;  %v14318_v31 = vld [vmem:[%s18425_s13 + $0x450] ss:$24 sps:$4 sm:$0xff]  }
 0xad2   : > { %12019 = vmatprep.subr.bf16.mxu1 %v14239_v0  ;;  %v14321_v0 = vld [vmem:[%s18425_s13 + $0x458] ss:$24 sps:$4 sm:$0xff]  }
 0xad5   : > { %12020 = vmatpush1.bf16.msra.mxu1 %v14237_v60  ;;  %v14326_v60 = vld [vmem:[%s18425_s13 + $0x484] ss:$24 sps:$4 sm:$0xff]  }
 0xad6   : > { %12021 = vmatprep.subr.bf16.mxu1 %v14245_v9  ;;  %v14329_v9 = vld [vmem:[%s18425_s13 + $0x48c] ss:$24 sps:$4 sm:$0xff]  }
 0xad9   : > { %12022 = vmatpush1.bf16.msra.mxu1 %v14243_v11  ;;  %v14324_v11 = vld [vmem:[%s18425_s13 + $0x480] ss:$24 sps:$4 sm:$0xff]  }
 0xada   : > { %12023 = vmatprep.subr.bf16.mxu1 %v14251_v27  ;;  %v14327_v27 = vld [vmem:[%s18425_s13 + $0x488] ss:$24 sps:$4 sm:$0xff]  }
 0xadd   : > { %12024 = vmatpush1.bf16.msra.mxu1 %v14249_v45  ;;  %v14332_v45 = vld [vmem:[%s18425_s13 + $0x4b4] ss:$24 sps:$4 sm:$0xff]  }
 0xade   : > { %12025 = vmatprep.subr.bf16.mxu1 %v14257_v1  ;;  %v14335_v1 = vld [vmem:[%s18425_s13 + $0x4bc] ss:$24 sps:$4 sm:$0xff]  }
 0xae1   : > { %12026 = vmatpush1.bf16.msra.mxu1 %v14255_v39  ;;  %v14330_v39 = vld [vmem:[%s18425_s13 + $0x4b0] ss:$24 sps:$4 sm:$0xff]  }
 0xae2   : > { %12027 = vmatprep.subr.bf16.mxu1 %v14263_v49  ;;  %v14333_v49 = vld [vmem:[%s18425_s13 + $0x4b8] ss:$24 sps:$4 sm:$0xff]  }
 0xae5   : > { %12028 = vmatpush1.bf16.msra.mxu1 %v14261_v10  ;;  %v14338_v10 = vld [vmem:[%s18425_s13 + $0x4e4] ss:$24 sps:$4 sm:$0xff]  }
 0xae6   : > { %12029 = vmatprep.subr.bf16.mxu1 %v14269_v51  ;;  %v14341_v51 = vld [vmem:[%s18425_s13 + $0x4ec] ss:$24 sps:$4 sm:$0xff]  }
 0xae9   : > { %12030 = vmatpush1.bf16.msra.mxu1 %v14267_v42  ;;  %v14336_v42 = vld [vmem:[%s18425_s13 + $0x4e0] ss:$24 sps:$4 sm:$0xff]  }
 0xaea   : > { %12031 = vmatprep.subr.bf16.mxu1 %v14275_v30  ;;  %v14339_v30 = vld [vmem:[%s18425_s13 + $0x4e8] ss:$24 sps:$4 sm:$0xff]  }
 0xaed   : > { %12032 = vmatpush1.bf16.msra.mxu1 %v14273_v52  ;;  %v14344_v52 = vld [vmem:[%s18425_s13 + $0x514] ss:$24 sps:$4 sm:$0xff]  }
 0xaee   : > { %12042 = vmatprep.subr.bf16.mxu1 %v14281_v22  ;;  %v14347_v22 = vld [vmem:[%s18425_s13 + $0x51c] ss:$24 sps:$4 sm:$0xff]  }
 0xb43   : > { %v10679_v63 = vpop.f32.mrb[8].mxu1 }
 0xb44   : > { %v10680_v34 = vadd.f32 %v10679_v63, %v10308_v20  ;;  %v10681_v29 = vpop.f32.mrb[9].mxu1  ;;  %v14342_v20 = vld [vmem:[%s18425_s13 + $0x510] ss:$24 sps:$4 sm:$0xff]   ;;  %v14350_v63 = vld [vmem:[%s18425_s13 + $0x544] ss:$24 sps:$4 sm:$0xff]  }
 0xb45   : > { %v10682_v53 = vadd.f32 %v10681_v29, %v10312_v23  ;;  %v10683_v46 = vpop.f32.mrb[10].mxu1  ;;  %v14345_v23 = vld [vmem:[%s18425_s13 + $0x518] ss:$24 sps:$4 sm:$0xff]  }
 0xb46   : > { %v10727_v5 = vmax.f32 %v10680_v34, 0.0  ;;  %v10684_v18 = vpop.f32.mrb[11].mxu1  ;;  %v14353_v34 = vld [vmem:[%s18425_s13 + $0x54c] ss:$24 sps:$4 sm:$0xff]   ;;  %v14348_v29 = vld [vmem:[%s18425_s13 + $0x540] ss:$24 sps:$4 sm:$0xff]  }
 0xb47   : > { %v10728_v26 = vmax.f32 %v10682_v53, 0.0  ;;  %v14351_v53 = vld [vmem:[%s18425_s13 + $0x548] ss:$24 sps:$4 sm:$0xff]   ;;  %v14356_v46 = vld [vmem:[%s18425_s13 + $0x574] ss:$24 sps:$4 sm:$0xff]  }
 0xb48   : > { %v17808_v41 = vpack.c.bf16 %v10727_v5, %v10727_v5  ;;  %v14359_v5 = vld [vmem:[%s18425_s13 + $0x57c] ss:$24 sps:$4 sm:$0xff]   ;;  %v14354_v18 = vld [vmem:[%s18425_s13 + $0x570] ss:$24 sps:$4 sm:$0xff]  }
 0xb49   : > { %v17800_v59 = vpack.c.bf16 %v10728_v26, %v10728_v26  ;;  %v14357_v26 = vld [vmem:[%s18425_s13 + $0x578] ss:$24 sps:$4 sm:$0xff]  }
 0xb4b   : > { %11951 = vmatprep.mubr.bf16.mxu0 %v17800_v59  ;;  %12033 = vmatprep.mubr.bf16.mxu1 %v17800_v59 }
 0xb4c   : > { %11952 = vmatmul.mubr.bf16.vlgmr.msra.gmra.mrb[8].mxu0 %v17808_v41  ;;  %12034 = vmatmul.mubr.bf16.vlgmr.msra.gmra.mrb[16].mxu1 %v17808_v41 }
 0xb4d   : > { %11961 = vmatpush1.bf16.msra.mxu0 %v14276_v13  ;;  %12043 = vmatpush1.bf16.msra.mxu1 %v14279_v44  ;;  %v14362_v13 = vld [vmem:[%s18425_s13 + $0x5a4] ss:$24 sps:$4 sm:$0xff]  }
 0xb4e   : > { %11962 = vmatprep.subr.bf16.mxu0 %v14284_v37  ;;  %12044 = vmatprep.subr.bf16.mxu1 %v14287_v35  ;;  %v14365_v44 = vld [vmem:[%s18425_s13 + $0x5ac] ss:$24 sps:$4 sm:$0xff]   ;;  %v10316_v37 = vrot.slane %v17794_v36, %v16904_v17  ;;  %v10320_v35 = vrot.slane %v17794_v36, %v16871_v55 }
 0xb51   : > { %11963 = vmatpush1.bf16.msra.mxu0 %v14282_v19  ;;  %12045 = vmatpush1.bf16.msra.mxu1 %v14285_v6  ;;  %v14360_v19 = vld [vmem:[%s18425_s13 + $0x5a0] ss:$24 sps:$4 sm:$0xff]  }
 0xb52   : > { %11964 = vmatprep.subr.bf16.mxu0 %v14290_v2  ;;  %12046 = vmatprep.subr.bf16.mxu1 %v14293_v48  ;;  %v14363_v6 = vld [vmem:[%s18425_s13 + $0x5a8] ss:$24 sps:$4 sm:$0xff]   ;;  %v14368_v2 = vld [vmem:[%s18425_s13 + $0x5d4] ss:$24 sps:$4 sm:$0xff]  }
 0xb53   : > { %v14371_v48 = vld [vmem:[%s18425_s13 + $0x5dc] ss:$24 sps:$4 sm:$0xff]  }
 0xb55   : > { %11965 = vmatpush1.bf16.msra.mxu0 %v14288_v28  ;;  %12047 = vmatpush1.bf16.msra.mxu1 %v14291_v16 }
 0xb56   : > { %11966 = vmatprep.subr.bf16.mxu0 %v14296_v54  ;;  %12048 = vmatprep.subr.bf16.mxu1 %v14299_v21 }
 0xb59   : > { %11967 = vmatpush1.bf16.msra.mxu0 %v14294_v62  ;;  %12049 = vmatpush1.bf16.msra.mxu1 %v14297_v24  ;;  %v14366_v62 = vld [vmem:[%s18425_s13 + $0x5d0] ss:$24 sps:$4 sm:$0xff]  }
 0xb5a   : > { %11968 = vmatprep.subr.bf16.mxu0 %v14302_v15  ;;  %12050 = vmatprep.subr.bf16.mxu1 %v14305_v7  ;;  %v14369_v24 = vld [vmem:[%s18425_s13 + $0x5d8] ss:$24 sps:$4 sm:$0xff]  }
 0xb5d   : > { %11969 = vmatpush1.bf16.msra.mxu0 %v14300_v56  ;;  %12051 = vmatpush1.bf16.msra.mxu1 %v14303_v50  ;;  %v14374_v56 = vld [vmem:[%s18425_s13 + $0x14] ss:$24 sps:$4 sm:$0xff]  }
 0xb5e   : > { %11970 = vmatprep.subr.bf16.mxu0 %v14308_v12  ;;  %12052 = vmatprep.subr.bf16.mxu1 %v14311_v61  ;;  %v14372_v61 = vld [vmem:[%s18425_s13 + $0x10] ss:$24 sps:$4 sm:$0xff]  }
 0xb61   : > { %11971 = vmatpush1.bf16.msra.mxu0 %v14306_v58  ;;  %12053 = vmatpush1.bf16.msra.mxu1 %v14309_v57  ;;  %v14377_v57 = vld [vmem:[%s18425_s13 + $0x44] ss:$24 sps:$4 sm:$0xff]  }
 0xb62   : > { %11972 = vmatprep.subr.bf16.mxu0 %v14314_v8  ;;  %12054 = vmatprep.subr.bf16.mxu1 %v14317_v3  ;;  %v14375_v8 = vld [vmem:[%s18425_s13 + $0x40] ss:$24 sps:$4 sm:$0xff]   ;;  %v14380_v3 = vld [vmem:[%s18425_s13 + $0x74] ss:$24 sps:$4 sm:$0xff]  }
 0xb65   : > { %11973 = vmatpush1.bf16.msra.mxu0 %v14312_v38  ;;  %12055 = vmatpush1.bf16.msra.mxu1 %v14315_v32  ;;  %v14378_v38 = vld [vmem:[%s18425_s13 + $0x70] ss:$24 sps:$4 sm:$0xff]   ;;  %v14383_v32 = vld [vmem:[%s18425_s13 + $0xa4] ss:$24 sps:$4 sm:$0xff]  }
 0xb66   : > { %11974 = vmatprep.subr.bf16.mxu0 %v14320_v4  ;;  %12056 = vmatprep.subr.bf16.mxu1 %v14323_v14  ;;  %v14386_v4 = vld [vmem:[%s18425_s13 + $0xd4] ss:$24 sps:$4 sm:$0xff]   ;;  %v14384_v14 = vld [vmem:[%s18425_s13 + $0xd0] ss:$24 sps:$4 sm:$0xff]  }
 0xb69   : > { %11975 = vmatpush1.bf16.msra.mxu0 %v14318_v31  ;;  %12057 = vmatpush1.bf16.msra.mxu1 %v14321_v0  ;;  %v14389_v31 = vld [vmem:[%s18425_s13 + $0x104] ss:$24 sps:$4 sm:$0xff]   ;;  %v14387_v0 = vld [vmem:[%s18425_s13 + $0x100] ss:$24 sps:$4 sm:$0xff]  }
 0xb6a   : > { %11976 = vmatprep.subr.bf16.mxu0 %v14326_v60  ;;  %12058 = vmatprep.subr.bf16.mxu1 %v14329_v9  ;;  %v14392_v60 = vld [vmem:[%s18425_s13 + $0x134] ss:$24 sps:$4 sm:$0xff]   ;;  %v14390_v9 = vld [vmem:[%s18425_s13 + $0x130] ss:$24 sps:$4 sm:$0xff]  }
 0xb6d   : > { %11977 = vmatpush1.bf16.msra.mxu0 %v14324_v11  ;;  %12059 = vmatpush1.bf16.msra.mxu1 %v14327_v27  ;;  %v14395_v11 = vld [vmem:[%s18425_s13 + $0x164] ss:$24 sps:$4 sm:$0xff]   ;;  %v14393_v27 = vld [vmem:[%s18425_s13 + $0x160] ss:$24 sps:$4 sm:$0xff]  }
 0xb6e   : > { %11978 = vmatprep.subr.bf16.mxu0 %v14332_v45  ;;  %12060 = vmatprep.subr.bf16.mxu1 %v14335_v1  ;;  %v14398_v45 = vld [vmem:[%s18425_s13 + $0x194] ss:$24 sps:$4 sm:$0xff]   ;;  %v14396_v1 = vld [vmem:[%s18425_s13 + $0x190] ss:$24 sps:$4 sm:$0xff]  }
 0xb71   : > { %11979 = vmatpush1.bf16.msra.mxu0 %v14330_v39  ;;  %12061 = vmatpush1.bf16.msra.mxu1 %v14333_v49  ;;  %v14401_v39 = vld [vmem:[%s18425_s13 + $0x1c4] ss:$24 sps:$4 sm:$0xff]   ;;  %v14399_v49 = vld [vmem:[%s18425_s13 + $0x1c0] ss:$24 sps:$4 sm:$0xff]  }
 0xb72   : > { %11980 = vmatprep.subr.bf16.mxu0 %v14338_v10  ;;  %12062 = vmatprep.subr.bf16.mxu1 %v14341_v51  ;;  %v14404_v10 = vld [vmem:[%s18425_s13 + $0x1f4] ss:$24 sps:$4 sm:$0xff]   ;;  %v14402_v51 = vld [vmem:[%s18425_s13 + $0x1f0] ss:$24 sps:$4 sm:$0xff]  }
 0xb75   : > { %11981 = vmatpush1.bf16.msra.mxu0 %v14336_v42  ;;  %12063 = vmatpush1.bf16.msra.mxu1 %v14339_v30  ;;  %v14407_v42 = vld [vmem:[%s18425_s13 + $0x224] ss:$24 sps:$4 sm:$0xff]   ;;  %v14405_v30 = vld [vmem:[%s18425_s13 + $0x220] ss:$24 sps:$4 sm:$0xff]  }
 0xb76   : > { %11982 = vmatprep.subr.bf16.mxu0 %v14344_v52  ;;  %12064 = vmatprep.subr.bf16.mxu1 %v14347_v22  ;;  %v14410_v52 = vld [vmem:[%s18425_s13 + $0x254] ss:$24 sps:$4 sm:$0xff]   ;;  %v14408_v22 = vld [vmem:[%s18425_s13 + $0x250] ss:$24 sps:$4 sm:$0xff]  }
 0xb79   : > { %11983 = vmatpush1.bf16.msra.mxu0 %v14342_v20  ;;  %12065 = vmatpush1.bf16.msra.mxu1 %v14345_v23  ;;  %v14413_v20 = vld [vmem:[%s18425_s13 + $0x284] ss:$24 sps:$4 sm:$0xff]   ;;  %v14411_v23 = vld [vmem:[%s18425_s13 + $0x280] ss:$24 sps:$4 sm:$0xff]  }
 0xb7a   : > { %11984 = vmatprep.subr.bf16.mxu0 %v14350_v63  ;;  %12066 = vmatprep.subr.bf16.mxu1 %v14353_v34  ;;  %v14416_v63 = vld [vmem:[%s18425_s13 + $0x2b4] ss:$24 sps:$4 sm:$0xff]   ;;  %v14414_v34 = vld [vmem:[%s18425_s13 + $0x2b0] ss:$24 sps:$4 sm:$0xff]  }
 0xb7d   : > { %11985 = vmatpush1.bf16.msra.mxu0 %v14348_v29  ;;  %12067 = vmatpush1.bf16.msra.mxu1 %v14351_v53  ;;  %v14419_v29 = vld [vmem:[%s18425_s13 + $0x2e4] ss:$24 sps:$4 sm:$0xff]   ;;  %v14417_v53 = vld [vmem:[%s18425_s13 + $0x2e0] ss:$24 sps:$4 sm:$0xff]  }
 0xb7e   : > { %11986 = vmatprep.subr.bf16.mxu0 %v14356_v46  ;;  %12068 = vmatprep.subr.bf16.mxu1 %v14359_v5  ;;  %v14422_v46 = vld [vmem:[%s18425_s13 + $0x314] ss:$24 sps:$4 sm:$0xff]   ;;  %v14420_v5 = vld [vmem:[%s18425_s13 + $0x310] ss:$24 sps:$4 sm:$0xff]  }
 0xb81   : > { %11987 = vmatpush1.bf16.msra.mxu0 %v14354_v18  ;;  %12069 = vmatpush1.bf16.msra.mxu1 %v14357_v26  ;;  %v14425_v18 = vld [vmem:[%s18425_s13 + $0x344] ss:$24 sps:$4 sm:$0xff]   ;;  %v14423_v26 = vld [vmem:[%s18425_s13 + $0x340] ss:$24 sps:$4 sm:$0xff]  }
 0xb82   : > { %11988 = vmatprep.subr.bf16.mxu0 %v14362_v13  ;;  %12070 = vmatprep.subr.bf16.mxu1 %v14365_v44  ;;  %v14428_v13 = vld [vmem:[%s18425_s13 + $0x374] ss:$24 sps:$4 sm:$0xff]   ;;  %v14426_v44 = vld [vmem:[%s18425_s13 + $0x370] ss:$24 sps:$4 sm:$0xff]  }
 0xb83   : > { %v10720_v28 = vpop.f32.mrb[12].mxu1 }
 0xb84   : > { %v10721_v36 = vadd.f32 %v10720_v28, %v10316_v37  ;;  %v10722_v16 = vpop.f32.mrb[13].mxu1  ;;  %v14429_v37 = vld [vmem:[%s18425_s13 + $0x3a0] ss:$24 sps:$4 sm:$0xff]   ;;  %v14438_v28 = vld [vmem:[%s18425_s13 + $0x430] ss:$24 sps:$4 sm:$0xff]  }
 0xb85   : > { %v10723_v54 = vadd.f32 %v10722_v16, %v10320_v35  ;;  %v10724_v21 = vpop.f32.mrb[14].mxu1  ;;  %11989 = vmatpush1.bf16.msra.mxu0 %v14360_v19  ;;  %12071 = vmatpush1.bf16.msra.mxu1 %v14363_v6  ;;  %v14434_v35 = vld [vmem:[%s18425_s13 + $0x3d4] ss:$24 sps:$4 sm:$0xff]   ;;  %v14432_v19 = vld [vmem:[%s18425_s13 + $0x3d0] ss:$24 sps:$4 sm:$0xff]  }
 0xb86   : > { %v10729_v15 = vmax.f32 %v10721_v36, 0.0  ;;  %v10725_v7 = vpop.f32.mrb[15].mxu1  ;;  %11990 = vmatprep.subr.bf16.mxu0 %v14368_v2  ;;  %12072 = vmatprep.subr.bf16.mxu1 %v14371_v48  ;;  %v14437_v6 = vld [vmem:[%s18425_s13 + $0x404] ss:$24 sps:$4 sm:$0xff]   ;;  %v14435_v2 = vld [vmem:[%s18425_s13 + $0x400] ss:$24 sps:$4 sm:$0xff]  }
 0xb87   : > { %v10730_v50 = vmax.f32 %v10723_v54, 0.0  ;;  %v14440_v48 = vld [vmem:[%s18425_s13 + $0x434] ss:$24 sps:$4 sm:$0xff]   ;;  %v14443_v36 = vld [vmem:[%s18425_s13 + $0x464] ss:$24 sps:$4 sm:$0xff]  }
 0xb88   : > { %v18006_v58 = vpack.c.bf16 %v10729_v15, %v10729_v15  ;;  %v14441_v16 = vld [vmem:[%s18425_s13 + $0x460] ss:$24 sps:$4 sm:$0xff]   ;;  %v14446_v54 = vld [vmem:[%s18425_s13 + $0x494] ss:$24 sps:$4 sm:$0xff]   ;;  %v14444_v21 = vld [vmem:[%s18425_s13 + $0x490] ss:$24 sps:$4 sm:$0xff]  }
 0xb89   : > { %v18001_v12 = vpack.c.bf16 %v10730_v50, %v10730_v50  ;;  %11991 = vmatpush1.bf16.msra.mxu0 %v14366_v62  ;;  %12073 = vmatpush1.bf16.msra.mxu1 %v14369_v24  ;;  %v14449_v62 = vld [vmem:[%s18425_s13 + $0x4c4] ss:$24 sps:$4 sm:$0xff]   ;;  %v14447_v24 = vld [vmem:[%s18425_s13 + $0x4c0] ss:$24 sps:$4 sm:$0xff]   ;;  %v14452_v15 = vld [vmem:[%s18425_s13 + $0x4f4] ss:$24 sps:$4 sm:$0xff]  }
 0xb8a   : > { %12083 = vmatprep.subr.bf16.mxu0 %v14374_v56  ;;  %v14450_v7 = vld [vmem:[%s18425_s13 + $0x4f0] ss:$24 sps:$4 sm:$0xff]   ;;  %v14455_v56 = vld [vmem:[%s18425_s13 + $0x524] ss:$24 sps:$4 sm:$0xff]   ;;  %v14453_v50 = vld [vmem:[%s18425_s13 + $0x520] ss:$24 sps:$4 sm:$0xff]  }
 0xb8b   : > { %11992 = vmatprep.mubr.bf16.mxu0 %v18001_v12  ;;  %12074 = vmatprep.mubr.bf16.mxu1 %v18001_v12 }
 0xb8c   : > { %11993 = vmatmul.mubr.bf16.vlgmr.msra.gmra.mrb[8].mxu0 %v18006_v58  ;;  %12075 = vmatmul.mubr.bf16.vlgmr.msra.gmra.mrb[16].mxu1 %v18006_v58 }
 0xb8d   : > { %12084 = vmatpush1.bf16.msra.mxu0 %v14372_v61  ;;  %12115 = vmatprep.mubr.bf16.mxu0 %v17800_v59  ;;  %v14381_v59 = vld [vmem:[%s18425_s13 + $0xa0] ss:$24 sps:$4 sm:$0xff]   ;;  %v14456_v61 = vld [vmem:[%s18425_s13 + $0x550] ss:$24 sps:$4 sm:$0xff]  }
 0xb8e   : > { %12085 = vmatprep.subr.bf16.mxu0 %v14377_v57  ;;  %v14461_v57 = vld [vmem:[%s18425_s13 + $0x584] ss:$24 sps:$4 sm:$0xff]  }
 0xb91   : > { %12086 = vmatpush1.bf16.msra.mxu0 %v14375_v8  ;;  %v14459_v8 = vld [vmem:[%s18425_s13 + $0x580] ss:$24 sps:$4 sm:$0xff]  }
 0xb92   : > { %12087 = vmatprep.subr.bf16.mxu0 %v14380_v3  ;;  %v14464_v3 = vld [vmem:[%s18425_s13 + $0x5b4] ss:$24 sps:$4 sm:$0xff]  }
 0xb95   : > { %12088 = vmatpush1.bf16.msra.mxu0 %v14378_v38  ;;  %v14462_v38 = vld [vmem:[%s18425_s13 + $0x5b0] ss:$24 sps:$4 sm:$0xff]  }
 0xb96   : > { %12089 = vmatprep.subr.bf16.mxu0 %v14383_v32  ;;  %v14467_v32 = vld [vmem:[%s18425_s13 + $0x5e4] ss:$24 sps:$4 sm:$0xff]  }
 0xb99   : > { %12090 = vmatpush1.bf16.msra.mxu0 %v14381_v59  ;;  %v14465_v59 = vld [vmem:[%s18425_s13 + $0x5e0] ss:$24 sps:$4 sm:$0xff]  }
 0xb9a   : > { %12091 = vmatprep.subr.bf16.mxu0 %v14386_v4  ;;  %v10927_v4 = vld [vmem:[%s18428_s14] sm:$0x3f] }
 0xb9d   : > { %12092 = vmatpush1.bf16.msra.mxu0 %v14384_v14  ;;  %v10932_v14 = vrot.slane %v10927_v4, %v16901_v43 }
 0xb9e   : > { %12093 = vmatprep.subr.bf16.mxu0 %v14389_v31  ;;  %v10940_v31 = vrot.slane %v10927_v4, %v16904_v17  ;;  %v10952_v17 = vrot.slane %v10927_v4, %v7821_v47 }
 0xba1   : > { %12094 = vmatpush1.bf16.msra.mxu0 %v14387_v0  ;;  %v10936_v0 = vrot.slane %v10927_v4, %v16868_v33 }
 0xba2   : > { %12095 = vmatprep.subr.bf16.mxu0 %v14392_v60  ;;  %v10944_v60 = vrot.slane %v10927_v4, %v16871_v55  ;;  %v10948_v55 = vrot.slane %v10927_v4, %v7817_v25 }
 0xba5   : > { %12096 = vmatpush1.bf16.msra.mxu0 %v14390_v9 }
 0xba6   : > { %12097 = vmatprep.subr.bf16.mxu0 %v14395_v11 }
 0xba9   : > { %12098 = vmatpush1.bf16.msra.mxu0 %v14393_v27 }
 0xbaa   : > { %12099 = vmatprep.subr.bf16.mxu0 %v14398_v45 }
 0xbad   : > { %12100 = vmatpush1.bf16.msra.mxu0 %v14396_v1 }
 0xbae   : > { %12101 = vmatprep.subr.bf16.mxu0 %v14401_v39 }
 0xbb1   : > { %12102 = vmatpush1.bf16.msra.mxu0 %v14399_v49 }
 0xbb2   : > { %12103 = vmatprep.subr.bf16.mxu0 %v14404_v10 }
 0xbb5   : > { %12104 = vmatpush1.bf16.msra.mxu0 %v14402_v51 }
 0xbb6   : > { %12105 = vmatprep.subr.bf16.mxu0 %v14407_v42 }
 0xbb9   : > { %12106 = vmatpush1.bf16.msra.mxu0 %v14405_v30 }
 0xbba   : > { %12107 = vmatprep.subr.bf16.mxu0 %v14410_v52 }
 0xbbd   : > { %12108 = vmatpush1.bf16.msra.mxu0 %v14408_v22 }
 0xbbe   : > { %12109 = vmatprep.subr.bf16.mxu0 %v14413_v20 }
 0xbc1   : > { %12110 = vmatpush1.bf16.msra.mxu0 %v14411_v23 }
 0xbc2   : > { %12111 = vmatprep.subr.bf16.mxu0 %v14416_v63 }
 0xbc5   : > { %12112 = vmatpush1.bf16.msra.mxu0 %v14414_v34 }
 0xbc6   : > { %12113 = vmatprep.subr.bf16.mxu0 %v14419_v29 }
 0xbc9   : > { %12114 = vmatpush1.bf16.msra.mxu0 %v14417_v53 }
 0xbca   : > { %12124 = vmatprep.subr.bf16.mxu0 %v14422_v46 }
 0xbcc   : > { %12116 = vmatmul.mubr.bf16.vlgmr.msra.gmra.mrb[12].mxu0 %v17808_v41  ;;  %v14431_v41 = vld [vmem:[%s18425_s13 + $0x3a4] ss:$24 sps:$4 sm:$0xff]  }
 0xbcd   : > { %12125 = vmatpush1.bf16.msra.mxu0 %v14420_v5  ;;  %12156 = vmatprep.mubr.bf16.mxu0 %v18001_v12  ;;  %v14458_v12 = vld [vmem:[%s18425_s13 + $0x554] ss:$24 sps:$4 sm:$0xff]  }
 0xbce   : > { %12126 = vmatprep.subr.bf16.mxu0 %v14425_v18 }
 0xbd1   : > { %12127 = vmatpush1.bf16.msra.mxu0 %v14423_v26 }
 0xbd2   : > { %12128 = vmatprep.subr.bf16.mxu0 %v14428_v13 }
 0xbd5   : > { %12129 = vmatpush1.bf16.msra.mxu0 %v14426_v44 }
 0xbd6   : > { %12130 = vmatprep.subr.bf16.mxu0 %v14431_v41 }
 0xbd9   : > { %12131 = vmatpush1.bf16.msra.mxu0 %v14429_v37 }
 0xbda   : > { %12132 = vmatprep.subr.bf16.mxu0 %v14434_v35 }
 0xbdd   : > { %12133 = vmatpush1.bf16.msra.mxu0 %v14432_v19 }
 0xbde   : > { %12134 = vmatprep.subr.bf16.mxu0 %v14437_v6 }
 0xbe1   : > { %12135 = vmatpush1.bf16.msra.mxu0 %v14435_v2 }
 0xbe2   : > { %12136 = vmatprep.subr.bf16.mxu0 %v14440_v48 }
 0xbe5   : > { %12137 = vmatpush1.bf16.msra.mxu0 %v14438_v28 }
 0xbe6   : > { %12138 = vmatprep.subr.bf16.mxu0 %v14443_v36 }
 0xbe9   : > { %12139 = vmatpush1.bf16.msra.mxu0 %v14441_v16 }
 0xbea   : > { %12140 = vmatprep.subr.bf16.mxu0 %v14446_v54 }
 0xbed   : > { %12141 = vmatpush1.bf16.msra.mxu0 %v14444_v21 }
 0xbee   : > { %12142 = vmatprep.subr.bf16.mxu0 %v14449_v62 }
 0xbf1   : > { %12143 = vmatpush1.bf16.msra.mxu0 %v14447_v24 }
 0xbf2   : > { %12144 = vmatprep.subr.bf16.mxu0 %v14452_v15 }
 0xbf5   : > { %12145 = vmatpush1.bf16.msra.mxu0 %v14450_v7 }
 0xbf6   : > { %12146 = vmatprep.subr.bf16.mxu0 %v14455_v56 }
 0xbf9   : > { %12147 = vmatpush1.bf16.msra.mxu0 %v14453_v50 }
 0xbfa   : > { %12148 = vmatprep.subr.bf16.mxu0 %v14458_v12 }
 0xbfd   : > { %12149 = vmatpush1.bf16.msra.mxu0 %v14456_v61 }
 0xbfe   : > { %12150 = vmatprep.subr.bf16.mxu0 %v14461_v57 }
 0xc01   : > { %12151 = vmatpush1.bf16.msra.mxu0 %v14459_v8 }
 0xc02   : > { %12152 = vmatprep.subr.bf16.mxu0 %v14464_v3 }
 0xc05   : > { %12153 = vmatpush1.bf16.msra.mxu0 %v14462_v38 }
 0xc06   : > { %12154 = vmatprep.subr.bf16.mxu0 %v14467_v32 }
 0xc09   : > { %12155 = vmatpush1.bf16.msra.mxu0 %v14465_v59 }
 0xc0c   : > { %12157 = vmatmul.mubr.bf16.vlgmr.msra.gmra.mrb[12].mxu0 %v18006_v58 }
 0xc5f   : > { %v11994_v9 = vpop.f32.mrb[8].mxu0  ;;  %v12076_v11 = vpop.f32.mrb[16].mxu1 }
 0xc60   : > { %v13471_v27 = vadd.f32 %v11994_v9, %v10932_v14  ;;  %v13473_v58 = vadd.f32 %v12076_v11, %v10940_v31  ;;  %v11996_v45 = vpop.f32.mrb[9].mxu0  ;;  %v12078_v1 = vpop.f32.mrb[17].mxu1 }
 0xc61   : > { %v13472_v39 = vadd.f32 %v11996_v45, %v10936_v0  ;;  %v13474_v49 = vadd.f32 %v12078_v1, %v10944_v60  ;;  %v11998_v10 = vpop.f32.mrb[10].mxu0  ;;  %v12080_v51 = vpop.f32.mrb[18].mxu1 }
 0xc62   : > { %12165 = vst [vmem:[%s15082_s2] sm:$0xff] %v13471_v27  ;;  %12167 = vst [vmem:[%s15082_s2 + $0x10] sm:$0xff] %v13473_v58  ;;  %v11999_v43 = vpop.f32.mrb[11].mxu0  ;;  %v12081_v33 = vpop.f32.mrb[19].mxu1 }
 0xc63   : > { %12166 = vst [vmem:[%s15082_s2 + $0x8] sm:$0xff] %v13472_v39  ;;  %12168 = vst [vmem:[%s15082_s2 + $0x18] sm:$0xff] %v13474_v49 }
 0xcdf   : > { %v12158_v42 = vpop.f32.mrb[12].mxu0 }
 0xce0   : > { %v13475_v30 = vadd.f32 %v12158_v42, %v10948_v55  ;;  %v12160_v52 = vpop.f32.mrb[13].mxu0 }
 0xce1   : > { %v13476_v22 = vadd.f32 %v12160_v52, %v10952_v17  ;;  %v12162_v20 = vpop.f32.mrb[14].mxu0 }
 0xce2   : > { %12169 = vst [vmem:[%s15082_s2 + $0x20] sm:$0xff] %v13475_v30  ;;  %v12163_v23 = vpop.f32.mrb[15].mxu0 }
 0xce3   : > { %12170 = vst [vmem:[%s15082_s2 + $0x28] sm:$0xff] %v13476_v22 }
 0xce4 PF: > { %s27_s24 = sadd.s32 1, %s14586_s24   ;;  %s18429_s28 = sld [smem:[#allocation12_spill]] }
 0xce5   : > { %p24_p1 = scmp.ge.s32.totalorder %s27_s24, 6   ;;  %s18430_s12 = sld [smem:[#allocation10_spill]] }
 0xce6   : > { %s18431_s10 = sld [smem:[#allocation11_spill]]  ;;  %s18432_s18 = smov %s14566_s19 }
 0xce7   : > { %s18434_s20 = smov %s14578_s22  ;;  %s18435_s21 = smov %s14582_s23 }
 0xce8   :  { %26 = sbr.rel (!%p24_p1) target bundleno = 16 (0x10), region = 170 }
 0xcea   : > { %s18433_s19 = smov %s18429_s28 }
 0xceb   : > { %s18436_s22 = smov %s18430_s12 }
 0xcec   : > { %s18437_s23 = smov %s18431_s10 }
 0xcef   :  { %12192 = vsyncpa [#allocation5], 1 }
 0xcf0   :  { %12194 = vsyncpa [#allocation5 + $0x1], 1 }
 0xcf1   :  { %12195 = vsyncpa [#allocation7], 1 }

</bundles_post_ra>
